<compile_context>
chip_gen: v6e
topology: v6e:2x2x1
jax: 0.10.0
libtpu: 0.0.40
codegen_flags: <defaults>
</compile_context>

<pallas_src>
import jax
import jax.numpy as jnp
import numpy as np
from jax.experimental import pallas as pl
from jax.experimental.pallas import tpu as pltpu

C1, C2 = 16, 32            # conv1 / conv2 output channels (fixed by SmallCNN)
HID_PAD, OUT_PAD = 128, 128  # fc hidden (64) and logits (10) padded to 128 lanes


# ---------------------------------------------------------------------------
# Fused kernel: one batch block per grid step, everything in VMEM.
# ---------------------------------------------------------------------------
def fused_smallcnn_kernel(x_ref, w1e_ref, b1_ref, w2e_ref, b2_ref,
                          wf1e_ref, bf1_ref, wf2_ref, bf2_ref,
                          o_ref, xp1_ref, xp2_ref):
    """Lane-dense layouts (rows x lanes):
      x_ref   : (B, H, W*3)        input (NHWC with W,C merged into lanes)
      xp1_ref : (B, H+2, W*3)      H-zero-padded conv1 input (scratch)
      conv1   : rows (b,y),  lanes x*16+c            (f32 accumulation)
      pool1   : valid data at lanes (2*x2)*16+c      (odd-x blocks are junk,
                                                      zeroed out by w2e rows)
      xp2_ref : (B, H/2+2, W*16)   H-zero-padded conv2 input (scratch)
      conv2   : rows (b,y2), lanes x2*32+c
      pool2   : valid data at lanes (2*x4)*32+c
      fc1/fc2 : rows b, 128 lanes
    """
    B, H, L0 = x_ref.shape
    L1 = w1e_ref.shape[-1]          # W   * 16
    L2 = w2e_ref.shape[-1]          # W/2 * 32
    H4 = wf1e_ref.shape[0]          # H/4
    Hh = H // 2
    f32 = jnp.float32

    # ---- conv1: in-kernel H padding, 3 structured matmuls (one per ky) ----
    xp1_ref[...] = jnp.zeros_like(xp1_ref)
    xp1_ref[:, 1:H + 1, :] = x_ref[...]
    acc1 = jnp.dot(xp1_ref[:, 0:H, :].reshape(B * H, L0), w1e_ref[0],
                   preferred_element_type=f32)
    for ky in (1, 2):
        acc1 += jnp.dot(xp1_ref[:, ky:ky + H, :].reshape(B * H, L0),
                        w1e_ref[ky], preferred_element_type=f32)
    a1 = jnp.maximum(acc1 + b1_ref[...], 0.0)                  # (B*H, L1)

    # ---- pool1: H via row pair-max, W via lane roll + max ----
    p1 = jnp.max(a1.reshape(B * Hh, 2, L1), axis=1)
    p1 = jnp.maximum(p1, pltpu.roll(p1, shift=L1 - C1, axis=1))

    # ---- conv2 (reads pool1's un-compacted lane layout directly) ----
    xp2_ref[...] = jnp.zeros_like(xp2_ref)
    xp2_ref[:, 1:Hh + 1, :] = p1.reshape(B, Hh, L1).astype(xp2_ref.dtype)
    acc2 = jnp.dot(xp2_ref[:, 0:Hh, :].reshape(B * Hh, L1), w2e_ref[0],
                   preferred_element_type=f32)
    for ky in (1, 2):
        acc2 += jnp.dot(xp2_ref[:, ky:ky + Hh, :].reshape(B * Hh, L1),
                        w2e_ref[ky], preferred_element_type=f32)
    a2 = jnp.maximum(acc2 + b2_ref[...], 0.0)                  # (B*Hh, L2)

    # ---- pool2 ----
    p2 = jnp.max(a2.reshape(B * H4, 2, L2), axis=1)
    p2 = jnp.maximum(p2, pltpu.roll(p2, shift=L2 - C2, axis=1))
    p2 = p2.reshape(B, H4, L2).astype(jnp.bfloat16)

    # ---- fc1 + ReLU (torch NCHW flatten folded into wf1e's row layout) ----
    accf = jnp.dot(p2[:, 0, :], wf1e_ref[0], preferred_element_type=f32)
    for y4 in range(1, H4):
        accf += jnp.dot(p2[:, y4, :], wf1e_ref[y4], preferred_element_type=f32)
    hid = jnp.maximum(accf + bf1_ref[...], 0.0).astype(jnp.bfloat16)

    # ---- fc2 (logits padded to 128 lanes; sliced to 10 outside) ----
    o_ref[...] = (jnp.dot(hid, wf2_ref[...], preferred_element_type=f32)
                  + bf2_ref[...])


# ---------------------------------------------------------------------------
# One-time weight repacking (done at init, NOT per forward call).
# ---------------------------------------------------------------------------
def prepare_params(params, h, w):
    assert h % 4 == 0 and w % 4 == 0, "two 2x2 pools need H, W % 4 == 0"
    hh, wh, h4, w4 = h // 2, w // 2, h // 4, w // 4

    def expand_conv(w_hwio, w_in, w_out, lane_stride):
        """We[ky, x_in*stride + ci, x_out*Cout + co] = w[ky, kx, ci, co],
        kx = x_in - x_out + 1; missing x_in == zero W-padding; lanes inside a
        stride group beyond Cin stay zero (masks pool-junk lanes)."""
        kh, kw, cin, cout = w_hwio.shape
        we = np.zeros((kh, w_in * lane_stride, w_out * cout), np.float32)
        wnp = np.asarray(w_hwio, np.float32)
        for ky in range(kh):
            for xo in range(w_out):
                for kx in range(kw):
                    xi = xo + kx - 1
                    if 0 <= xi < w_in:
                        we[ky, xi * lane_stride:xi * lane_stride + cin,
                           xo * cout:(xo + 1) * cout] = wnp[ky, kx]
        return we

    w1e = expand_conv(np.asarray(params["w_conv1"]), w, w, 3)        # (3, W*3, W*16)
    w2e = expand_conv(np.asarray(params["w_conv2"]), wh, wh, 2 * C1)  # (3, W*16, Wh*32)
    b1t = np.tile(np.asarray(params["b_conv1"], np.float32), w).reshape(1, -1)
    b2t = np.tile(np.asarray(params["b_conv2"], np.float32), wh).reshape(1, -1)

    # fc1: one (Wh*32, 128) slab per y4; rows follow pool2's un-compacted lane
    # layout (2*x4)*32 + c, columns are torch's NCHW flatten c*(h4*w4)+y4*w4+x4.
    wf1 = np.asarray(params["w_fc1"], np.float32)        # torch (64, fc_dim)
    wf1e = np.zeros((h4, wh * C2, HID_PAD), np.float32)
    for y4 in range(h4):
        for x4 in range(w4):
            for c in range(C2):
                j = c * (h4 * w4) + y4 * w4 + x4
                wf1e[y4, (2 * x4) * C2 + c, :wf1.shape[0]] = wf1[:, j]

    wf2 = np.asarray(params["w_fc2"], np.float32)        # torch (10, 64)
    wf2p = np.zeros((HID_PAD, OUT_PAD), np.float32)
    wf2p[:wf2.shape[1], :wf2.shape[0]] = wf2.T
    bf1p = np.zeros((1, HID_PAD), np.float32)
    bf1p[0, :64] = np.asarray(params["b_fc1"], np.float32)
    bf2p = np.zeros((1, OUT_PAD), np.float32)
    bf2p[0, :10] = np.asarray(params["b_fc2"], np.float32)

    bf16 = jnp.bfloat16
    return {"w1e": jnp.asarray(w1e, bf16), "b1t": jnp.asarray(b1t, jnp.float32),
            "w2e": jnp.asarray(w2e, bf16), "b2t": jnp.asarray(b2t, jnp.float32),
            "wf1e": jnp.asarray(wf1e, bf16), "bf1p": jnp.asarray(bf1p, jnp.float32),
            "wf2p": jnp.asarray(wf2p, bf16), "bf2p": jnp.asarray(bf2p, jnp.float32)}


def _pick_batch_block(n):
    """Images per grid step: divides n, multiple of 8 (sublane-aligned (B,128)
    output block), >=2 grid steps when possible (v7x megacore)."""
    for b in (32, 24, 16, 8):
        if n % b == 0 and n // b >= 2:
            return b
    return n


def small_cnn_forward(x_nchw, prep):
    """Forward pass matching SmallCNN.forward; input is NCHW like PyTorch."""
    n, cin, h, w = x_nchw.shape
    assert cin == 3 and h % 4 == 0 and w % 4 == 0
    b = _pick_batch_block(n)
    hh, h4 = h // 2, h // 4
    l0, l1, l2 = w * 3, w * C1, (w // 2) * C2

    # One pass over the tiny raw input: NCHW -> rows (n, y), lanes x*3+c, bf16.
    x = jnp.transpose(x_nchw, (0, 2, 3, 1)).reshape(n, h, l0).astype(jnp.bfloat16)

    def wspec3(shp): return pl.BlockSpec(shp, lambda i: (0, 0, 0))
    def wspec2(shp): return pl.BlockSpec(shp, lambda i: (0, 0))

    out = pl.pallas_call(
        fused_smallcnn_kernel,
        out_shape=jax.ShapeDtypeStruct((n, OUT_PAD), jnp.float32),
        grid=(n // b,),
        in_specs=[
            pl.BlockSpec((b, h, l0), lambda i: (i, 0, 0)),   # input batch block
            wspec3((3, l0, l1)), wspec2((1, l1)),            # conv1 weights/bias
            wspec3((3, l1, l2)), wspec2((1, l2)),            # conv2 weights/bias
            wspec3((h4, l2, HID_PAD)), wspec2((1, HID_PAD)),  # fc1
            wspec2((HID_PAD, OUT_PAD)), wspec2((1, OUT_PAD)),  # fc2
        ],
        out_specs=pl.BlockSpec((b, OUT_PAD), lambda i: (i, 0)),
        scratch_shapes=[pltpu.VMEM((b, h + 2, l0), jnp.bfloat16),   # padded conv1 in
                        pltpu.VMEM((b, hh + 2, l1), jnp.bfloat16)],  # padded conv2 in
        compiler_params=pltpu.CompilerParams(
            dimension_semantics=("parallel",)),
    )(x, prep["w1e"], prep["b1t"], prep["w2e"], prep["b2t"],
      prep["wf1e"], prep["bf1p"], prep["wf2p"], prep["bf2p"])
    return out[:, :10]


# ---------------------------------------------------------------------------
# Deterministic params (SmallCNN shapes; fc_dim derived like set_fc_dim) and a
# float32 pure-jnp reference for validation.
# ---------------------------------------------------------------------------
def init_params(key, h, w):
    ks = jax.random.split(key, 8)
    fc_dim = C2 * (h // 4) * (w // 4)
    return {
        # conv weights kept HWIO; a real torch OIHW weight maps via permute(2,3,1,0)
        "w_conv1": 0.10 * jax.random.normal(ks[0], (3, 3, 3, C1), jnp.float32),
        "b_conv1": 0.10 * jax.random.normal(ks[1], (C1,), jnp.float32),
        "w_conv2": 0.10 * jax.random.normal(ks[2], (3, 3, C1, C2), jnp.float32),
        "b_conv2": 0.10 * jax.random.normal(ks[3], (C2,), jnp.float32),
        # fc weights in torch (out_features, in_features) layout; fc1 columns
        # follow torch's NCHW x.view(N, -1) flatten order.
        "w_fc1": 0.05 * jax.random.normal(ks[4], (64, fc_dim), jnp.float32),
        "b_fc1": 0.05 * jax.random.normal(ks[5], (64,), jnp.float32),
        "w_fc2": 0.05 * jax.random.normal(ks[6], (10, 64), jnp.float32),
        "b_fc2": 0.05 * jax.random.normal(ks[7], (10,), jnp.float32),
    }


def reference_forward(x_nchw, params):
    x = jnp.transpose(x_nchw, (0, 2, 3, 1))
    def block(x, w_hwio, bias):
        y = jax.lax.conv_general_dilated(
            x, w_hwio, window_strides=(1, 1), padding="SAME",
            dimension_numbers=("NHWC", "HWIO", "NHWC"))
        y = jnp.maximum(y + bias, 0.0)
        return jax.lax.reduce_window(y, -jnp.inf, jax.lax.max,
                                     (1, 2, 2, 1), (1, 2, 2, 1), "VALID")
    x = block(x, params["w_conv1"], params["b_conv1"])
    x = block(x, params["w_conv2"], params["b_conv2"])
    x = jnp.transpose(x, (0, 3, 1, 2)).reshape(x.shape[0], -1)   # NCHW flatten
    x = jnp.maximum(x @ params["w_fc1"].T + params["b_fc1"], 0.0)
    return x @ params["w_fc2"].T + params["b_fc2"]


if __name__ == "__main__":
    key = jax.random.PRNGKey(0)
    pkey, xkey = jax.random.split(key)
    N, H, W = 16, 16, 16                    # small demo shapes (batch block = 8)
    x = jax.random.normal(xkey, (N, 3, H, W), jnp.float32)   # NCHW, like torch

    params = init_params(pkey, H, W)
    prep = prepare_params(params, H, W)     # one-time weight repack

    fwd = jax.jit(lambda inp: small_cnn_forward(inp, prep))
    out = fwd(x)
    jax.block_until_ready(out)
    assert out.shape == (N, 10) and out.dtype == jnp.float32
    assert bool(jnp.all(jnp.isfinite(out)))

    # bf16 kernel vs float32 reference (loose tolerance for bf16 MXU inputs).
    ref = reference_forward(x, params)
    err = float(jnp.max(jnp.abs(out - ref)))
    assert err < 0.1, f"kernel/reference mismatch: max abs err = {err}"
    print("KERNEL_OK")
</pallas_src>

<mosaic_0001>
module attributes {stable_mosaic.version = 11 : i64} {
  func.func @fused_smallcnn_kernel(%arg0: i32, %arg1: memref<8x16x48xbf16, #tpu.memory_space<vmem>>, %arg2: memref<3x48x256xbf16, #tpu.memory_space<vmem>>, %arg3: memref<1x256xf32, #tpu.memory_space<vmem>>, %arg4: memref<3x256x256xbf16, #tpu.memory_space<vmem>>, %arg5: memref<1x256xf32, #tpu.memory_space<vmem>>, %arg6: memref<4x256x128xbf16, #tpu.memory_space<vmem>>, %arg7: memref<1x128xf32, #tpu.memory_space<vmem>>, %arg8: memref<128x128xbf16, #tpu.memory_space<vmem>>, %arg9: memref<1x128xf32, #tpu.memory_space<vmem>>, %arg10: memref<8x128xf32, #tpu.memory_space<vmem>>, %arg11: memref<8x18x48xbf16, #tpu.memory_space<vmem>>, %arg12: memref<8x10x256xbf16, #tpu.memory_space<vmem>>) attributes {dimension_semantics = [#tpu.dimension_semantics<parallel>], iteration_bounds = array<i64: 2>, scalar_prefetch = 0 : i64, scratch_operands = 2 : i64, tpu.core_type = #tpu.core_type<tc>, window_params = [{transform_indices = @transform_0, window_bounds = array<i64: 8, 16, 48>}, {pipeline_mode = #tpu.pipeline_mode<synchronous>, transform_indices = @transform_1, window_bounds = array<i64: 3, 48, 256>}, {pipeline_mode = #tpu.pipeline_mode<synchronous>, transform_indices = @transform_2, window_bounds = array<i64: 1, 256>}, {pipeline_mode = #tpu.pipeline_mode<synchronous>, transform_indices = @transform_3, window_bounds = array<i64: 3, 256, 256>}, {pipeline_mode = #tpu.pipeline_mode<synchronous>, transform_indices = @transform_4, window_bounds = array<i64: 1, 256>}, {pipeline_mode = #tpu.pipeline_mode<synchronous>, transform_indices = @transform_5, window_bounds = array<i64: 4, 256, 128>}, {pipeline_mode = #tpu.pipeline_mode<synchronous>, transform_indices = @transform_6, window_bounds = array<i64: 1, 128>}, {pipeline_mode = #tpu.pipeline_mode<synchronous>, transform_indices = @transform_7, window_bounds = array<i64: 128, 128>}, {pipeline_mode = #tpu.pipeline_mode<synchronous>, transform_indices = @transform_8, window_bounds = array<i64: 1, 128>}, {transform_indices = @transform_9, window_bounds = array<i64: 8, 128>}]} {
    %cst = arith.constant 0.000000e+00 : bf16
    %0 = vector.broadcast %cst : bf16 to vector<8x18x48xbf16>
    %c0 = arith.constant 0 : index
    %c0_0 = arith.constant 0 : index
    %c0_1 = arith.constant 0 : index
    %1 = vector.load %arg11[%c0, %c0_0, %c0_1] : memref<8x18x48xbf16, #tpu.memory_space<vmem>>, vector<8x18x48xbf16>
    tpu.vector_store %arg11[%c0, %c0_0, %c0_1], %0 {strides = array<i32>} : memref<8x18x48xbf16, #tpu.memory_space<vmem>>, vector<8x18x48xbf16>,
    %c0_2 = arith.constant 0 : index
    %c0_3 = arith.constant 0 : index
    %c0_4 = arith.constant 0 : index
    %2 = vector.load %arg1[%c0_2, %c0_3, %c0_4] : memref<8x16x48xbf16, #tpu.memory_space<vmem>>, vector<8x16x48xbf16>
    %c0_5 = arith.constant 0 : index
    %c1 = arith.constant 1 : index
    %c0_6 = arith.constant 0 : index
    %3 = vector.load %arg11[%c0_5, %c1, %c0_6] : memref<8x18x48xbf16, #tpu.memory_space<vmem>>, vector<8x16x48xbf16>
    tpu.vector_store %arg11[%c0_5, %c1, %c0_6], %2 {strides = array<i32>} : memref<8x18x48xbf16, #tpu.memory_space<vmem>>, vector<8x16x48xbf16>,
    %c0_7 = arith.constant 0 : index
    %c0_8 = arith.constant 0 : index
    %c0_9 = arith.constant 0 : index
    %4 = vector.load %arg11[%c0_7, %c0_8, %c0_9] : memref<8x18x48xbf16, #tpu.memory_space<vmem>>, vector<8x16x48xbf16>
    %5 = vector.shape_cast %4 : vector<8x16x48xbf16> to vector<128x48xbf16>
    %c0_10 = arith.constant 0 : index
    %c0_11 = arith.constant 0 : index
    %c0_12 = arith.constant 0 : index
    %6 = vector.load %arg2[%c0_10, %c0_11, %c0_12] : memref<3x48x256xbf16, #tpu.memory_space<vmem>>, vector<1x48x256xbf16>
    %7 = vector.shape_cast %6 : vector<1x48x256xbf16> to vector<48x256xbf16>
    %cst_13 = arith.constant dense<0.000000e+00> : vector<128x256xf32>
    %8 = tpu.matmul %5, %7, %cst_13 {dimension_numbers = #tpu.dot_dimension_numbers<[1], [0], [0], [1], [0, 0, 1, 1], [], []>} : vector<128x48xbf16>, vector<48x256xbf16>, vector<128x256xf32> -> vector<128x256xf32>
    %c0_14 = arith.constant 0 : index
    %c1_15 = arith.constant 1 : index
    %c0_16 = arith.constant 0 : index
    %9 = vector.load %arg11[%c0_14, %c1_15, %c0_16] : memref<8x18x48xbf16, #tpu.memory_space<vmem>>, vector<8x16x48xbf16>
    %10 = vector.shape_cast %9 : vector<8x16x48xbf16> to vector<128x48xbf16>
    %c1_17 = arith.constant 1 : index
    %c0_18 = arith.constant 0 : index
    %c0_19 = arith.constant 0 : index
    %11 = vector.load %arg2[%c1_17, %c0_18, %c0_19] : memref<3x48x256xbf16, #tpu.memory_space<vmem>>, vector<1x48x256xbf16>
    %12 = vector.shape_cast %11 : vector<1x48x256xbf16> to vector<48x256xbf16>
    %cst_20 = arith.constant dense<0.000000e+00> : vector<128x256xf32>
    %13 = tpu.matmul %10, %12, %cst_20 {dimension_numbers = #tpu.dot_dimension_numbers<[1], [0], [0], [1], [0, 0, 1, 1], [], []>} : vector<128x48xbf16>, vector<48x256xbf16>, vector<128x256xf32> -> vector<128x256xf32>
    %14 = arith.addf %8, %13 : vector<128x256xf32>
    %c0_21 = arith.constant 0 : index
    %c2 = arith.constant 2 : index
    %c0_22 = arith.constant 0 : index
    %15 = vector.load %arg11[%c0_21, %c2, %c0_22] : memref<8x18x48xbf16, #tpu.memory_space<vmem>>, vector<8x16x48xbf16>
    %16 = vector.shape_cast %15 : vector<8x16x48xbf16> to vector<128x48xbf16>
    %c2_23 = arith.constant 2 : index
    %c0_24 = arith.constant 0 : index
    %c0_25 = arith.constant 0 : index
    %17 = vector.load %arg2[%c2_23, %c0_24, %c0_25] : memref<3x48x256xbf16, #tpu.memory_space<vmem>>, vector<1x48x256xbf16>
    %18 = vector.shape_cast %17 : vector<1x48x256xbf16> to vector<48x256xbf16>
    %cst_26 = arith.constant dense<0.000000e+00> : vector<128x256xf32>
    %19 = tpu.matmul %16, %18, %cst_26 {dimension_numbers = #tpu.dot_dimension_numbers<[1], [0], [0], [1], [0, 0, 1, 1], [], []>} : vector<128x48xbf16>, vector<48x256xbf16>, vector<128x256xf32> -> vector<128x256xf32>
    %20 = arith.addf %14, %19 : vector<128x256xf32>
    %c0_27 = arith.constant 0 : index
    %c0_28 = arith.constant 0 : index
    %21 = vector.load %arg3[%c0_27, %c0_28] : memref<1x256xf32, #tpu.memory_space<vmem>>, vector<1x256xf32>
    %22 = vector.broadcast %21 : vector<1x256xf32> to vector<128x256xf32>
    %23 = arith.addf %20, %22 : vector<128x256xf32>
    %cst_29 = arith.constant 0.000000e+00 : f32
    %24 = vector.broadcast %cst_29 : f32 to vector<128x256xf32>
    %25 = arith.maximumf %23, %24 : vector<128x256xf32>
    %26 = vector.shape_cast %25 : vector<128x256xf32> to vector<64x2x256xf32>
    %cst_30 = arith.constant dense<0xFF800000> : vector<64x256xf32>
    %27 = vector.multi_reduction <maximumf>, %26, %cst_30 [1] : vector<64x2x256xf32> to vector<64x256xf32>
    %c240_i32 = arith.constant 240 : i32
    %28 = tpu.dynamic_rotate %27 by %c240_i32 dim 1 : vector<64x256xf32>, i32 -> vector<64x256xf32>
    %29 = arith.maximumf %27, %28 : vector<64x256xf32>
    %cst_31 = arith.constant 0.000000e+00 : bf16
    %30 = vector.broadcast %cst_31 : bf16 to vector<8x10x256xbf16>
    %c0_32 = arith.constant 0 : index
    %c0_33 = arith.constant 0 : index
    %c0_34 = arith.constant 0 : index
    %31 = vector.load %arg12[%c0_32, %c0_33, %c0_34] : memref<8x10x256xbf16, #tpu.memory_space<vmem>>, vector<8x10x256xbf16>
    tpu.vector_store %arg12[%c0_32, %c0_33, %c0_34], %30 {strides = array<i32>} : memref<8x10x256xbf16, #tpu.memory_space<vmem>>, vector<8x10x256xbf16>,
    %32 = vector.shape_cast %29 : vector<64x256xf32> to vector<8x8x256xf32>
    %33 = arith.truncf %32 : vector<8x8x256xf32> to vector<8x8x256xbf16>
    %c0_35 = arith.constant 0 : index
    %c1_36 = arith.constant 1 : index
    %c0_37 = arith.constant 0 : index
    %34 = vector.load %arg12[%c0_35, %c1_36, %c0_37] : memref<8x10x256xbf16, #tpu.memory_space<vmem>>, vector<8x8x256xbf16>
    tpu.vector_store %arg12[%c0_35, %c1_36, %c0_37], %33 {strides = array<i32>} : memref<8x10x256xbf16, #tpu.memory_space<vmem>>, vector<8x8x256xbf16>,
    %c0_38 = arith.constant 0 : index
    %c0_39 = arith.constant 0 : index
    %c0_40 = arith.constant 0 : index
    %35 = vector.load %arg12[%c0_38, %c0_39, %c0_40] : memref<8x10x256xbf16, #tpu.memory_space<vmem>>, vector<8x8x256xbf16>
    %36 = vector.shape_cast %35 : vector<8x8x256xbf16> to vector<64x256xbf16>
    %c0_41 = arith.constant 0 : index
    %c0_42 = arith.constant 0 : index
    %c0_43 = arith.constant 0 : index
    %37 = vector.load %arg4[%c0_41, %c0_42, %c0_43] : memref<3x256x256xbf16, #tpu.memory_space<vmem>>, vector<1x256x256xbf16>
    %38 = vector.shape_cast %37 : vector<1x256x256xbf16> to vector<256x256xbf16>
    %cst_44 = arith.constant dense<0.000000e+00> : vector<64x256xf32>
    %39 = tpu.matmul %36, %38, %cst_44 {dimension_numbers = #tpu.dot_dimension_numbers<[1], [0], [0], [1], [0, 0, 1, 1], [], []>} : vector<64x256xbf16>, vector<256x256xbf16>, vector<64x256xf32> -> vector<64x256xf32>
    %c0_45 = arith.constant 0 : index
    %c1_46 = arith.constant 1 : index
    %c0_47 = arith.constant 0 : index
    %40 = vector.load %arg12[%c0_45, %c1_46, %c0_47] : memref<8x10x256xbf16, #tpu.memory_space<vmem>>, vector<8x8x256xbf16>
    %41 = vector.shape_cast %40 : vector<8x8x256xbf16> to vector<64x256xbf16>
    %c1_48 = arith.constant 1 : index
    %c0_49 = arith.constant 0 : index
    %c0_50 = arith.constant 0 : index
    %42 = vector.load %arg4[%c1_48, %c0_49, %c0_50] : memref<3x256x256xbf16, #tpu.memory_space<vmem>>, vector<1x256x256xbf16>
    %43 = vector.shape_cast %42 : vector<1x256x256xbf16> to vector<256x256xbf16>
    %cst_51 = arith.constant dense<0.000000e+00> : vector<64x256xf32>
    %44 = tpu.matmul %41, %43, %cst_51 {dimension_numbers = #tpu.dot_dimension_numbers<[1], [0], [0], [1], [0, 0, 1, 1], [], []>} : vector<64x256xbf16>, vector<256x256xbf16>, vector<64x256xf32> -> vector<64x256xf32>
    %45 = arith.addf %39, %44 : vector<64x256xf32>
    %c0_52 = arith.constant 0 : index
    %c2_53 = arith.constant 2 : index
    %c0_54 = arith.constant 0 : index
    %46 = vector.load %arg12[%c0_52, %c2_53, %c0_54] : memref<8x10x256xbf16, #tpu.memory_space<vmem>>, vector<8x8x256xbf16>
    %47 = vector.shape_cast %46 : vector<8x8x256xbf16> to vector<64x256xbf16>
    %c2_55 = arith.constant 2 : index
    %c0_56 = arith.constant 0 : index
    %c0_57 = arith.constant 0 : index
    %48 = vector.load %arg4[%c2_55, %c0_56, %c0_57] : memref<3x256x256xbf16, #tpu.memory_space<vmem>>, vector<1x256x256xbf16>
    %49 = vector.shape_cast %48 : vector<1x256x256xbf16> to vector<256x256xbf16>
    %cst_58 = arith.constant dense<0.000000e+00> : vector<64x256xf32>
    %50 = tpu.matmul %47, %49, %cst_58 {dimension_numbers = #tpu.dot_dimension_numbers<[1], [0], [0], [1], [0, 0, 1, 1], [], []>} : vector<64x256xbf16>, vector<256x256xbf16>, vector<64x256xf32> -> vector<64x256xf32>
    %51 = arith.addf %45, %50 : vector<64x256xf32>
    %c0_59 = arith.constant 0 : index
    %c0_60 = arith.constant 0 : index
    %52 = vector.load %arg5[%c0_59, %c0_60] : memref<1x256xf32, #tpu.memory_space<vmem>>, vector<1x256xf32>
    %53 = vector.broadcast %52 : vector<1x256xf32> to vector<64x256xf32>
    %54 = arith.addf %51, %53 : vector<64x256xf32>
    %cst_61 = arith.constant 0.000000e+00 : f32
    %55 = vector.broadcast %cst_61 : f32 to vector<64x256xf32>
    %56 = arith.maximumf %54, %55 : vector<64x256xf32>
    %57 = vector.shape_cast %56 : vector<64x256xf32> to vector<32x2x256xf32>
    %cst_62 = arith.constant dense<0xFF800000> : vector<32x256xf32>
    %58 = vector.multi_reduction <maximumf>, %57, %cst_62 [1] : vector<32x2x256xf32> to vector<32x256xf32>
    %c224_i32 = arith.constant 224 : i32
    %59 = tpu.dynamic_rotate %58 by %c224_i32 dim 1 : vector<32x256xf32>, i32 -> vector<32x256xf32>
    %60 = arith.maximumf %58, %59 : vector<32x256xf32>
    %61 = vector.shape_cast %60 : vector<32x256xf32> to vector<8x4x256xf32>
    %62 = arith.truncf %61 : vector<8x4x256xf32> to vector<8x4x256xbf16>
    %63 = vector.extract_strided_slice %62 {offsets = [0, 0, 0], sizes = [8, 1, 256], strides = [1, 1, 1]} : vector<8x4x256xbf16> to vector<8x1x256xbf16>
    %64 = vector.shape_cast %63 : vector<8x1x256xbf16> to vector<8x256xbf16>
    %c0_63 = arith.constant 0 : index
    %c0_64 = arith.constant 0 : index
    %c0_65 = arith.constant 0 : index
    %65 = vector.load %arg6[%c0_63, %c0_64, %c0_65] : memref<4x256x128xbf16, #tpu.memory_space<vmem>>, vector<1x256x128xbf16>
    %66 = vector.shape_cast %65 : vector<1x256x128xbf16> to vector<256x128xbf16>
    %cst_66 = arith.constant dense<0.000000e+00> : vector<8x128xf32>
    %67 = tpu.matmul %64, %66, %cst_66 {dimension_numbers = #tpu.dot_dimension_numbers<[1], [0], [0], [1], [0, 0, 1, 1], [], []>} : vector<8x256xbf16>, vector<256x128xbf16>, vector<8x128xf32> -> vector<8x128xf32>
    %68 = vector.extract_strided_slice %62 {offsets = [0, 1, 0], sizes = [8, 1, 256], strides = [1, 1, 1]} : vector<8x4x256xbf16> to vector<8x1x256xbf16>
    %69 = vector.shape_cast %68 : vector<8x1x256xbf16> to vector<8x256xbf16>
    %c1_67 = arith.constant 1 : index
    %c0_68 = arith.constant 0 : index
    %c0_69 = arith.constant 0 : index
    %70 = vector.load %arg6[%c1_67, %c0_68, %c0_69] : memref<4x256x128xbf16, #tpu.memory_space<vmem>>, vector<1x256x128xbf16>
    %71 = vector.shape_cast %70 : vector<1x256x128xbf16> to vector<256x128xbf16>
    %cst_70 = arith.constant dense<0.000000e+00> : vector<8x128xf32>
    %72 = tpu.matmul %69, %71, %cst_70 {dimension_numbers = #tpu.dot_dimension_numbers<[1], [0], [0], [1], [0, 0, 1, 1], [], []>} : vector<8x256xbf16>, vector<256x128xbf16>, vector<8x128xf32> -> vector<8x128xf32>
    %73 = arith.addf %67, %72 : vector<8x128xf32>
    %74 = vector.extract_strided_slice %62 {offsets = [0, 2, 0], sizes = [8, 1, 256], strides = [1, 1, 1]} : vector<8x4x256xbf16> to vector<8x1x256xbf16>
    %75 = vector.shape_cast %74 : vector<8x1x256xbf16> to vector<8x256xbf16>
    %c2_71 = arith.constant 2 : index
    %c0_72 = arith.constant 0 : index
    %c0_73 = arith.constant 0 : index
    %76 = vector.load %arg6[%c2_71, %c0_72, %c0_73] : memref<4x256x128xbf16, #tpu.memory_space<vmem>>, vector<1x256x128xbf16>
    %77 = vector.shape_cast %76 : vector<1x256x128xbf16> to vector<256x128xbf16>
    %cst_74 = arith.constant dense<0.000000e+00> : vector<8x128xf32>
    %78 = tpu.matmul %75, %77, %cst_74 {dimension_numbers = #tpu.dot_dimension_numbers<[1], [0], [0], [1], [0, 0, 1, 1], [], []>} : vector<8x256xbf16>, vector<256x128xbf16>, vector<8x128xf32> -> vector<8x128xf32>
    %79 = arith.addf %73, %78 : vector<8x128xf32>
    %80 = vector.extract_strided_slice %62 {offsets = [0, 3, 0], sizes = [8, 1, 256], strides = [1, 1, 1]} : vector<8x4x256xbf16> to vector<8x1x256xbf16>
    %81 = vector.shape_cast %80 : vector<8x1x256xbf16> to vector<8x256xbf16>
    %c3 = arith.constant 3 : index
    %c0_75 = arith.constant 0 : index
    %c0_76 = arith.constant 0 : index
    %82 = vector.load %arg6[%c3, %c0_75, %c0_76] : memref<4x256x128xbf16, #tpu.memory_space<vmem>>, vector<1x256x128xbf16>
    %83 = vector.shape_cast %82 : vector<1x256x128xbf16> to vector<256x128xbf16>
    %cst_77 = arith.constant dense<0.000000e+00> : vector<8x128xf32>
    %84 = tpu.matmul %81, %83, %cst_77 {dimension_numbers = #tpu.dot_dimension_numbers<[1], [0], [0], [1], [0, 0, 1, 1], [], []>} : vector<8x256xbf16>, vector<256x128xbf16>, vector<8x128xf32> -> vector<8x128xf32>
    %85 = arith.addf %79, %84 : vector<8x128xf32>
    %c0_78 = arith.constant 0 : index
    %c0_79 = arith.constant 0 : index
    %86 = vector.load %arg7[%c0_78, %c0_79] : memref<1x128xf32, #tpu.memory_space<vmem>>, vector<1x128xf32>
    %87 = vector.broadcast %86 : vector<1x128xf32> to vector<8x128xf32>
    %88 = arith.addf %85, %87 : vector<8x128xf32>
    %cst_80 = arith.constant 0.000000e+00 : f32
    %89 = vector.broadcast %cst_80 : f32 to vector<8x128xf32>
    %90 = arith.maximumf %88, %89 : vector<8x128xf32>
    %91 = arith.truncf %90 : vector<8x128xf32> to vector<8x128xbf16>
    %c0_81 = arith.constant 0 : index
    %c0_82 = arith.constant 0 : index
    %92 = vector.load %arg8[%c0_81, %c0_82] : memref<128x128xbf16, #tpu.memory_space<vmem>>, vector<128x128xbf16>
    %cst_83 = arith.constant dense<0.000000e+00> : vector<8x128xf32>
    %93 = tpu.matmul %91, %92, %cst_83 {dimension_numbers = #tpu.dot_dimension_numbers<[1], [0], [0], [1], [0, 0, 1, 1], [], []>} : vector<8x128xbf16>, vector<128x128xbf16>, vector<8x128xf32> -> vector<8x128xf32>
    %c0_84 = arith.constant 0 : index
    %c0_85 = arith.constant 0 : index
    %94 = vector.load %arg9[%c0_84, %c0_85] : memref<1x128xf32, #tpu.memory_space<vmem>>, vector<1x128xf32>
    %95 = vector.broadcast %94 : vector<1x128xf32> to vector<8x128xf32>
    %96 = arith.addf %93, %95 : vector<8x128xf32>
    %c0_86 = arith.constant 0 : index
    %c0_87 = arith.constant 0 : index
    %97 = vector.load %arg10[%c0_86, %c0_87] : memref<8x128xf32, #tpu.memory_space<vmem>>, vector<8x128xf32>
    tpu.vector_store %arg10[%c0_86, %c0_87], %96 {strides = array<i32>} : memref<8x128xf32, #tpu.memory_space<vmem>>, vector<8x128xf32>,
    return
  }
  func.func @transform_0(%arg0: i32) -> (i32, i32, i32) {
    %c0_i32 = arith.constant 0 : i32
    %c0_i32_0 = arith.constant 0 : i32
    %c0_i32_1 = arith.constant 0 : i32
    return %arg0, %c0_i32, %c0_i32_0 : i32, i32, i32
  }
  func.func @transform_1(%arg0: i32) -> (i32, i32, i32) {
    %c0_i32 = arith.constant 0 : i32
    %c0_i32_0 = arith.constant 0 : i32
    %c0_i32_1 = arith.constant 0 : i32
    %c0_i32_2 = arith.constant 0 : i32
    return %c0_i32, %c0_i32_0, %c0_i32_1 : i32, i32, i32
  }
  func.func @transform_2(%arg0: i32) -> (i32, i32) {
    %c0_i32 = arith.constant 0 : i32
    %c0_i32_0 = arith.constant 0 : i32
    %c0_i32_1 = arith.constant 0 : i32
    return %c0_i32, %c0_i32_0 : i32, i32
  }
  func.func @transform_3(%arg0: i32) -> (i32, i32, i32) {
    %c0_i32 = arith.constant 0 : i32
    %c0_i32_0 = arith.constant 0 : i32
    %c0_i32_1 = arith.constant 0 : i32
    %c0_i32_2 = arith.constant 0 : i32
    return %c0_i32, %c0_i32_0, %c0_i32_1 : i32, i32, i32
  }
  func.func @transform_4(%arg0: i32) -> (i32, i32) {
    %c0_i32 = arith.constant 0 : i32
    %c0_i32_0 = arith.constant 0 : i32
    %c0_i32_1 = arith.constant 0 : i32
    return %c0_i32, %c0_i32_0 : i32, i32
  }
  func.func @transform_5(%arg0: i32) -> (i32, i32, i32) {
    %c0_i32 = arith.constant 0 : i32
    %c0_i32_0 = arith.constant 0 : i32
    %c0_i32_1 = arith.constant 0 : i32
    %c0_i32_2 = arith.constant 0 : i32
    return %c0_i32, %c0_i32_0, %c0_i32_1 : i32, i32, i32
  }
  func.func @transform_6(%arg0: i32) -> (i32, i32) {
    %c0_i32 = arith.constant 0 : i32
    %c0_i32_0 = arith.constant 0 : i32
    %c0_i32_1 = arith.constant 0 : i32
    return %c0_i32, %c0_i32_0 : i32, i32
  }
  func.func @transform_7(%arg0: i32) -> (i32, i32) {
    %c0_i32 = arith.constant 0 : i32
    %c0_i32_0 = arith.constant 0 : i32
    %c0_i32_1 = arith.constant 0 : i32
    return %c0_i32, %c0_i32_0 : i32, i32
  }
  func.func @transform_8(%arg0: i32) -> (i32, i32) {
    %c0_i32 = arith.constant 0 : i32
    %c0_i32_0 = arith.constant 0 : i32
    %c0_i32_1 = arith.constant 0 : i32
    return %c0_i32, %c0_i32_0 : i32, i32
  }
  func.func @transform_9(%arg0: i32) -> (i32, i32) {
    %c0_i32 = arith.constant 0 : i32
    %c0_i32_0 = arith.constant 0 : i32
    return %arg0, %c0_i32 : i32, i32
  }
}

</mosaic_0001>

<bundles_post_ra>
// kernel: _lambda_.1
= control target key start
LH: loop header
LB: loop body
LE: loop exit
PB: predicated region body
PF: predicated region fallthrough
CT: control target
= control target key end

     0   :  { %14 = vsyncpa [#allocation5], 0  ;;  %s13893_s0 = inlined_call_operand.vmem [shape: bf16[16,16,48], index: 0, kind: input, shape index: {}]   ;;  %s13894_s1 = inlined_call_operand.vmem [shape: bf16[3,48,256], index: 1, kind: input, shape index: {}]   ;;  %s13895_s2 = inlined_call_operand.vmem [shape: f32[1,256], index: 2, kind: input, shape index: {}]   ;;  %s13896_s3 = inlined_call_operand.vmem [shape: bf16[3,256,256], index: 3, kind: input, shape index: {}]   ;;  %s13897_s4 = inlined_call_operand.vmem [shape: f32[1,256], index: 4, kind: input, shape index: {}]   ;;  %s13898_s5 = inlined_call_operand.vmem [shape: bf16[4,256,128], index: 5, kind: input, shape index: {}]   ;;  %s13899_s6 = inlined_call_operand.vmem [shape: f32[1,128], index: 6, kind: input, shape index: {}]   ;;  %s13900_s7 = inlined_call_operand.vmem [shape: bf16[128,128], index: 7, kind: input, shape index: {}]   ;;  %s13901_s8 = inlined_call_operand.vmem [shape: f32[1,128], index: 8, kind: input, shape index: {}]   ;;  %s13902_s9 = inlined_call_operand.hbm [shape: f32[16,128], index: 9, kind: output, shape index: {}]  }
   0x1   :  { %16 = vsyncpa [#allocation5 + $0x1], 0  ;;  %s9860_s30 = smov 0   ;;  %s9862_s10 = smov 0  }
   0x2   :  { %s9864_s11 = smov 0   ;;  %s9866_s12 = smov 0  }
   0x3 LB: > { %s9881_s13 = sadd.s32 4294967295, %s9801_s12   ;;  %s8680_s14 = sadd.s32 4294967294, %s9801_s12   ;;  %s9801_s12 = sphi %s9866_s12, %s14821_s12   ;;  %s9797_s11 = sphi %s9864_s11, %s14820_s11   ;;  %s9793_s10 = sphi %s9862_s10, %s14819_s10   ;;  %s9789_s30 = sphi %s9860_s30, %s14818_s30  }
   0x4   : > { %s9885_s15 = sadd.s32 1, %s9801_s12   ;;  %s223_s16 = sadd.s32 1, %s9797_s11 }
   0x5   : > { %s220_s17 = ssub.s32 %s9801_s12, %s9885_s15  ;;  %p233_p0 = scmp.ne.s32.totalorder %s9797_s11, %s9793_s10 }
   0x6   : > { %p221_p1 = scmp.eq.s32.totalorder %s220_s17, 0  ;;  %p234_p2 = scmp.eq.s32.totalorder %s9881_s13, 1 }
   0x7   : > { %p239_p3 = scmp.ne.s32.totalorder %s9793_s10, %s9789_s30  ;;  %p240_p4 = scmp.eq.s32.totalorder %s8680_s14, 1 }
   0x8   : > { %s9896_s18 = scalar_select %p221_p1, %s9797_s11, %s223_s16  }
   0x9   : > { %p9898_p5 = por %p234_p2, %p233_p0  ;;  %p9902_p6 = por %p240_p4, %p239_p3 }
   0xa   : > { %p8683_p7 = scmp.ge.s32.totalorder %s9801_s12, 1  ;;  %p292_p8 = scmp.lt.s32.totalorder %s9801_s12, 3 }
   0xc   : > { %p293_p9 = pnand %p8683_p7, %p292_p8 }
   0xe   : > { %296 = sbr.rel (%p293_p9) target bundleno = 1897 (0x769), region = 56 }
  0x13   : > { %v9497_v0 = vld [vmem:[%s13894_s1 + $0x54] ss:$8 sps:$4 sm:$0xff]   ;;  %s8685_s23 = sshll.u32 %s9881_s13, 3  ;;  %v9499_v1 = vld [vmem:[%s13894_s1 + $0x50] ss:$8 sps:$4 sm:$0xff]   ;;  %v9803_v2 = vmov 0  }
  0x14   : > { %946 = vmatprep.mubr.bf16.mxu0 %v9803_v2  ;;  %4179 = vst [vmem:[#allocation3] sm:$0x11] %v9803_v2  ;;  %4181 = vst [vmem:[#allocation3 + $0x18] sm:$0x11] %v9803_v2  ;;  %1006 = vmatprep.mubr.bf16.mxu1 %v9803_v2  ;;  %p9927_p10 = scmp.lt.s32.totalorder %s8685_s23, 15  ;;  %vm337_vm0 = vcmask 388096  }
  0x15   : > { %4183 = vst [vmem:[#allocation3 + $0x68] sm:$0x11] %v9803_v2  ;;  %4185 = vst [vmem:[#allocation3 + $0x48] sm:$0x11] %v9803_v2  ;;  %924 = vmatprep.subr.bf16.mxu0 %v9497_v0  ;;  %9386 = vmatprep.subr.bf16.mxu1 %v9497_v0  ;;  %v9500_v3 = vld [vmem:[%s13894_s1 + $0x44] ss:$8 sps:$4 sm:$0xff]  }
  0x16   : > { %4187 = vst [vmem:[#allocation3 + $0x20] sm:$0x11] %v9803_v2  ;;  %4189 = vst [vmem:[#allocation3 + $0x38] sm:$0x11] %v9803_v2  ;;  %vm340_vm1 = vcmask 385024   ;;  %925 = vmatpush1.bf16.msra.mxu0 %v9499_v1  ;;  %9389 = vmatpush1.bf16.msra.mxu1 %v9499_v1  ;;  %s14823_s23 = smov (!%p9927_p10, %s8685_s23), 15 }
  0x17   : > { %4191 = vst [vmem:[#allocation3 + $0x70] sm:$0x11] %v9803_v2  ;;  %4193 = vst [vmem:[#allocation3 + $0x28] sm:$0x11] %v9803_v2  ;;  %v9502_v4 = vld [vmem:[%s13894_s1 + $0x40] ss:$8 sps:$4 sm:$0xff]   ;;  %926 = vmatprep.subr.bf16.mxu0 %v9500_v3  ;;  %9387 = vmatprep.subr.bf16.mxu1 %v9500_v3 }
  0x18   : > { %338 = vst.msk [vmem:[#allocation2] sm:$0xf] %vm337_vm0, %v9803_v2  ;;  %339 = vst.msk [vmem:[#allocation2 + $0x4] sm:$0xf] %vm337_vm0, %v9803_v2  ;;  %v9503_v5 = vld [vmem:[%s13894_s1 + $0x34] ss:$8 sps:$4 sm:$0xff]  }
  0x19   : > { %342 = vst.msk [vmem:[#allocation2 + $0xc] sm:$0xf] %vm337_vm0, %v9803_v2  ;;  %343 = vst.msk [vmem:[#allocation2 + $0x10] sm:$0xf] %vm337_vm0, %v9803_v2  ;;  %v9505_v6 = vld [vmem:[%s13894_s1 + $0x30] ss:$8 sps:$4 sm:$0xff]  }
  0x1a   : > { %345 = vst.msk [vmem:[#allocation2 + $0x18] sm:$0xf] %vm337_vm0, %v9803_v2  ;;  %346 = vst.msk [vmem:[#allocation2 + $0x1c] sm:$0xf] %vm337_vm0, %v9803_v2  ;;  %s9204_s24 = sshll.u32 %s14823_s23, 3  ;;  %927 = vmatpush1.bf16.msra.mxu0 %v9502_v4  ;;  %9390 = vmatpush1.bf16.msra.mxu1 %v9502_v4  ;;  %vm889_vm10 = vcmask 392192  }
  0x1b   : > { %348 = vst.msk [vmem:[#allocation2 + $0x24] sm:$0xf] %vm337_vm0, %v9803_v2  ;;  %349 = vst.msk [vmem:[#allocation2 + $0x28] sm:$0xf] %vm337_vm0, %v9803_v2  ;;  %v9508_v7 = vld [vmem:[%s13894_s1 + $0x84] ss:$8 sps:$4 sm:$0xff]   ;;  %s10001_s29 = scalar_lea.vmem %s13893_s0, %s9204_s24  ;;  %928 = vmatprep.subr.bf16.mxu0 %v9503_v5  ;;  %9388 = vmatprep.subr.bf16.mxu1 %v9503_v5 }
  0x1c   : > { %351 = vst.msk [vmem:[#allocation2 + $0x30] sm:$0xf] %vm337_vm0, %v9803_v2  ;;  %352 = vst.msk [vmem:[#allocation2 + $0x34] sm:$0xf] %vm337_vm0, %v9803_v2  ;;  %vm379_vm2 = vsmask.f32 256 }
  0x1d   : > { %354 = vst.msk [vmem:[#allocation2 + $0x3c] sm:$0xf] %vm337_vm0, %v9803_v2  ;;  %355 = vst.msk [vmem:[#allocation2 + $0x40] sm:$0xf] %vm337_vm0, %v9803_v2  ;;  %vm380_vm3 = vsmask.f32 4368 }
  0x1e   : > { %357 = vst.msk [vmem:[#allocation2 + $0x48] sm:$0xf] %vm337_vm0, %v9803_v2  ;;  %358 = vst.msk [vmem:[#allocation2 + $0x4c] sm:$0xf] %vm337_vm0, %v9803_v2  ;;  %v363_v8 = vld [vmem:[%s10001_s29] sm:$0xf]  ;;  %929 = vmatpush1.bf16.msra.mxu0 %v9505_v6  ;;  %9391 = vmatpush1.bf16.msra.mxu1 %v9505_v6 }
  0x1f   : > { %360 = vst.msk [vmem:[#allocation2 + $0x54] sm:$0xf] %vm337_vm0, %v9803_v2  ;;  %361 = vst.msk [vmem:[#allocation2 + $0x58] sm:$0xf] %vm337_vm0, %v9803_v2  ;;  %v364_v9 = vld [vmem:[%s10001_s29 + $0x4] sm:$0xf]  ;;  %1412 = vmatprep.subr.bf16.mxu0 %v9508_v7 }
  0x20   : > { %341 = vst.msk [vmem:[#allocation2 + $0x8] sm:$0x1] %vm340_vm1, %v9803_v2  ;;  %344 = vst.msk [vmem:[#allocation2 + $0x14] sm:$0x1] %vm340_vm1, %v9803_v2  ;;  %vm543_vm4 = vsmask.f32 7938 }
  0x21   : > { %347 = vst.msk [vmem:[#allocation2 + $0x20] sm:$0x1] %vm340_vm1, %v9803_v2  ;;  %350 = vst.msk [vmem:[#allocation2 + $0x2c] sm:$0x1] %vm340_vm1, %v9803_v2  ;;  %v383_v10 = vshrl.u32 %v363_v8, 16  ;;  %v386_v11 = vshll.u32 %v363_v8, 16 }
  0x22   : > { %353 = vst.msk [vmem:[#allocation2 + $0x38] sm:$0x1] %vm340_vm1, %v9803_v2  ;;  %356 = vst.msk [vmem:[#allocation2 + $0x44] sm:$0x1] %vm340_vm1, %v9803_v2  ;;  %v391_v12 = vshrl.u32 %v364_v9, 16  ;;  %v394_v13 = vshll.u32 %v364_v9, 16 }
  0x23   : > { %359 = vst.msk [vmem:[#allocation2 + $0x50] sm:$0x1] %vm340_vm1, %v9803_v2  ;;  %362 = vst.msk [vmem:[#allocation2 + $0x5c] sm:$0x1] %vm340_vm1, %v9803_v2  ;;  %v375_v14 = vld [vmem:[%s10001_s29 + $0x30] sm:$0xf] }
  0x24   : > { %vm10008_vm5 = vmand %vm340_vm1, %vm379_vm2  ;;  %v376_v16 = vld [vmem:[%s10001_s29 + $0x34] sm:$0xf]  ;;  %v485_v17 = vshrl.u32 %v375_v14, 16  ;;  %v488_v18 = vshll.u32 %v375_v14, 16  ;;  %v385_v20 = vrot.slane %v383_v10, 7  ;;  %v393_v21 = vrot.slane %v391_v12, 7 }
  0x25   : > { %vm10015_vm6 = vmor %vm379_vm2, %vm380_vm3  ;;  %v545_v22 = vld [vmem:[#allocation2] sm:$0xf]  ;;  %v493_v23 = vshrl.u32 %v376_v16, 16  ;;  %v496_v27 = vshll.u32 %v376_v16, 16  ;;  %v589_v32 = vld [vmem:[#allocation2 + $0x48] sm:$0xf] }
  0x26   : > { %vm10021_vm7 = vmand %vm337_vm0, %vm543_vm4  ;;  %v487_v26 = vrot.slane %v485_v17, 7  ;;  %v388_v28 = vor.u32 %v386_v11, %v385_v20  ;;  %v389_v29 = vrot.slane %v385_v20, 4  ;;  %v396_v30 = vor.u32 %v394_v13, %v393_v21  ;;  %v9511_v36 = vld [vmem:[%s13894_s1 + $0x24] ss:$8 sps:$4 sm:$0xff]   ;;  %v365_v37 = vld [vmem:[%s10001_s29 + $0x8] sm:$0xf] }
  0x27   : > { %v551_v25 = vld [vmem:[#allocation2 + $0x8] sm:$0x1]  ;;  %v398_v31 = vrot.slane %v393_v21, 4  ;;  %v495_v35 = vrot.slane %v493_v23, 7  ;;  %v366_v42 = vld [vmem:[%s10001_s29 + $0xc] sm:$0xf]  ;;  %1131 = vmatprep.subr.bf16.mxu1 %v9511_v36 }
  0x28   : > { %v490_v33 = vor.u32 %v488_v18, %v487_v26  ;;  %v491_v34 = vrot.slane %v487_v26, 4  ;;  %v397_v38 = vsel %vm10015_vm6, %v389_v29, %v396_v30  ;;  %v546_v39 = vsel %vm10021_vm7, %v388_v28, %v545_v22  ;;  %v377_v48 = vld [vmem:[%s10001_s29 + $0x38] sm:$0xf]  ;;  %v378_v52 = vld [vmem:[%s10001_s29 + $0x3c] sm:$0xf]  ;;  %s9805_s14 = smov 112  }
  0x29   : > { %v552_v40 = vsel %vm10008_vm5, %v398_v31, %v551_v25  ;;  %v400_v43 = vshrl.u32 %v365_v37, 16  ;;  %547 = vst [vmem:[#allocation2] sm:$0xf] %v546_v39  ;;  %548 = vst.msk [vmem:[#allocation2 + $0x4] sm:$0xf] %vm337_vm0, %v397_v38  ;;  %v498_v44 = vor.u32 %v496_v27, %v495_v35  ;;  %v500_v45 = vrot.slane %v495_v35, 4 }
  0x2a   : > { %v593_v41 = vld [vmem:[#allocation2 + $0x50] sm:$0x1]  ;;  %553 = vst [vmem:[#allocation2 + $0x8] sm:$0x1] %v552_v40  ;;  %v590_v46 = vsel %vm10021_vm7, %v490_v33, %v589_v32  ;;  %v403_v47 = vshll.u32 %v365_v37, 16  ;;  %v408_v50 = vshrl.u32 %v366_v42, 16 }
  0x2b   : > { %591 = vst [vmem:[#allocation2 + $0x48] sm:$0xf] %v590_v46  ;;  %v402_v49 = vrot.slane %v400_v43, 7  ;;  %v411_v51 = vshll.u32 %v366_v42, 16  ;;  %v502_v53 = vshrl.u32 %v377_v48, 16  ;;  %v499_v54 = vsel %vm10015_vm6, %v491_v34, %v498_v44  ;;  %s9806_s16 = smov 96  }
  0x2c   : > { %v594_v55 = vsel %vm10008_vm5, %v500_v45, %v593_v41  ;;  %v554_v56 = vld [vmem:[#allocation2 + $0xc] sm:$0xf]  ;;  %v505_v57 = vshll.u32 %v377_v48, 16  ;;  %v510_v58 = vshrl.u32 %v378_v52, 16  ;;  %592 = vst.msk [vmem:[#allocation2 + $0x4c] sm:$0xf] %vm337_vm0, %v499_v54 }
  0x2d   : > { %595 = vst [vmem:[#allocation2 + $0x50] sm:$0x1] %v594_v55  ;;  %v405_v59 = vor.u32 %v403_v47, %v402_v49  ;;  %v406_v60 = vrot.slane %v402_v49, 4  ;;  %v410_v61 = vrot.slane %v408_v50, 7  ;;  %v558_v62 = vld [vmem:[#allocation2 + $0x14] sm:$0x1] }
  0x2e   : > { %v504_v63 = vrot.slane %v502_v53, 7  ;;  %v512_v0 = vrot.slane %v510_v58, 7  ;;  %v513_v1 = vshll.u32 %v378_v52, 16  ;;  %v596_v3 = vld [vmem:[#allocation2 + $0x54] sm:$0xf]  ;;  %v14137_v42 = vmov 0 }
  0x2f   : > { %v413_v4 = vor.u32 %v411_v51, %v410_v61  ;;  %v415_v5 = vrot.slane %v410_v61, 4  ;;  %v555_v6 = vsel %vm10021_vm7, %v405_v59, %v554_v56  ;;  %vm633_vm8 = vsmask.f32 3328  ;;  %v600_v27 = vld [vmem:[#allocation2 + $0x5c] sm:$0x1]  ;;  %s326_s28 = sand.u32 1, %s9793_s10  }
  0x30   : > { %v507_v7 = vor.u32 %v505_v57, %v504_v63  ;;  %vm634_vm9 = vsmask.f32 7440  ;;  %556 = vst [vmem:[#allocation2 + $0xc] sm:$0xf] %v555_v6  ;;  %v508_v8 = vrot.slane %v504_v63, 4  ;;  %v515_v25 = vor.u32 %v513_v1, %v512_v0  ;;  %s9201_s17 = sshll.u32 %s9881_s13, 7 }
  0x31   : > { %v10048_v9 = vld [vmem:[#allocation2] sm:$0xf]  ;;  %v10050_v10 = vld [vmem:[#allocation2 + $0x4] sm:$0xf]  ;;  %v10052_v11 = vld [vmem:[#allocation2 + $0x8] sm:$0x1]  ;;  %v414_v12 = vsel %vm10015_vm6, %v406_v60, %v413_v4  ;;  %v559_v13 = vsel %vm10008_vm5, %v415_v5, %v558_v62  ;;  %s13852_s25 = scalar_lea.hbm %s13902_s9, %s9201_s17 }
  0x32   : > { %v597_v14 = vsel %vm10021_vm7, %v507_v7, %v596_v3  ;;  %v637_v16 = vshrl.u32 %v10048_v9, 16  ;;  %v640_v17 = vshll.u32 %v10048_v9, 16  ;;  %v646_v18 = vshll.u32 %v10050_v10, 16  ;;  %v10064_v21 = vld [vmem:[#allocation2 + $0x48] sm:$0xf]  ;;  %vm10079_vm11 = vmor %vm633_vm8, %vm634_vm9  ;;  %s8608_s26 = scalar_lea.sflag [#allocation5], %s326_s28 }
  0x33   : > { %v650_v20 = vshrl.u32 %v10050_v10, 16  ;;  %557 = vst.msk [vmem:[#allocation2 + $0x10] sm:$0xf] %vm337_vm0, %v414_v12  ;;  %560 = vst [vmem:[#allocation2 + $0x14] sm:$0x1] %v559_v13  ;;  %v656_v22 = vshll.u32 %v10052_v11, 16  ;;  %v516_v46 = vsel %vm10015_vm6, %v508_v8, %v515_v25 }
  0x34   : > { %598 = vst [vmem:[#allocation2 + $0x54] sm:$0xf] %v597_v14  ;;  %v781_v23 = vshrl.u32 %v10064_v21, 16  ;;  %v517_v26 = vrot.slane %v512_v0, 4  ;;  %v639_v28 = vrot.slane %v637_v16, 4  ;;  %v642_v29 = vrot.slane %v640_v17, 5 }
  0x35   : > { %v648_v30 = vrot.slane %v646_v18, 5  ;;  %v652_v31 = vrot.slane %v650_v20, 4  ;;  %v10069_v32 = vld [vmem:[#allocation2 + $0x4c] sm:$0xf]  ;;  %v658_v33 = vrot.slane %v656_v22, 5  ;;  %v784_v36 = vshll.u32 %v10064_v21, 16 }
  0x36   : > { %v10071_v34 = vld [vmem:[#allocation2 + $0x50] sm:$0x1]  ;;  %v783_v35 = vrot.slane %v781_v23, 4  ;;  %v790_v37 = vshll.u32 %v10069_v32, 16  ;;  %v643_v38 = vor.u32 %v642_v29, %v639_v28  ;;  %v794_v40 = vshrl.u32 %v10069_v32, 16  ;;  %s9809_s13 = smov [#allocation4]  }
  0x37   : > { %v653_v39 = vor.u32 %v652_v31, %v648_v30  ;;  %v800_v41 = vshll.u32 %v10071_v34, 16  ;;  %v14138_v42 = vsel %vm10079_vm11, 4294967295, %v14137_v42  ;;  %v786_v43 = vrot.slane %v784_v36, 5  ;;  %v10083_v45 = vld [vmem:[#allocation2 + $0xc] sm:$0xf] }
  0x38   : > { %14139 = vst [vmem:[#allocation7_spill] sm:$0xff] %v14138_v42  ;;  %v792_v44 = vrot.slane %v790_v37, 5  ;;  %v601_v47 = vsel %vm10008_vm5, %v517_v26, %v600_v27  ;;  %v9506_v48 = vld [vmem:[%s13894_s1 + $0x80] ss:$8 sps:$4 sm:$0xff]   ;;  %v644_v49 = vrot.slane %v643_v38, 4  ;;  %v796_v51 = vrot.slane %v794_v40, 4 }
  0x39   : > { %v654_v50 = vrot.slane %v653_v39, 4  ;;  %v802_v52 = vrot.slane %v800_v41, 5  ;;  %599 = vst.msk [vmem:[#allocation2 + $0x58] sm:$0xf] %vm337_vm0, %v516_v46  ;;  %602 = vst [vmem:[#allocation2 + $0x5c] sm:$0x1] %v601_v47  ;;  %v787_v53 = vor.u32 %v786_v43, %v783_v35 }
  0x3a   : > { %v10093_v54 = vld [vmem:[#allocation2 + $0x10] sm:$0xf]  ;;  %v10095_v55 = vld [vmem:[#allocation2 + $0x14] sm:$0x1]  ;;  %v661_v56 = vshrl.u32 %v10083_v45, 16  ;;  %v664_v57 = vshll.u32 %v10083_v45, 16  ;;  %v649_v58 = vsel %vm10079_vm11, %v644_v49, %v648_v30  ;;  %v797_v60 = vor.u32 %v796_v51, %v792_v44 }
  0x3b   : > { %v659_v59 = vsel %vm10079_vm11, %v654_v50, %v658_v33  ;;  %v670_v61 = vshll.u32 %v10093_v54, 16  ;;  %v10104_v62 = vld [vmem:[#allocation2 + $0x54] sm:$0xf]  ;;  %v788_v1 = vrot.slane %v787_v53, 4  ;;  %v367_v5 = vld [vmem:[%s10001_s29 + $0x10] sm:$0xf]  ;;  %v8717_v24 = vcombine.low %v10083_v45, %v10093_v54 }
  0x3c   : > { %v9520_v63 = vld [vmem:[%s13894_s1 + $0x74] ss:$8 sps:$4 sm:$0xff]   ;;  %v8694_v0 = vcombine.low %v649_v58, %v659_v59  ;;  %v663_v3 = vrot.slane %v661_v56, 4  ;;  %v666_v4 = vrot.slane %v664_v57, 5  ;;  %v798_v6 = vrot.slane %v797_v60, 4 }
  0x3d   : > { %v9509_v7 = vld [vmem:[%s13894_s1 + $0x20] ss:$8 sps:$4 sm:$0xff]   ;;  %v672_v8 = vrot.slane %v670_v61, 5  ;;  %v674_v12 = vshrl.u32 %v10093_v54, 16  ;;  %v680_v13 = vshll.u32 %v10095_v55, 16  ;;  %v793_v14 = vsel %vm10079_vm11, %v788_v1, %v792_v44 }
  0x3e   : > { %8708 = vmatmul.mubr.msk.bf16.vlgmr.msra.gmra.mxu0 %vm889_vm10, %v8694_v0  ;;  %v667_v16 = vor.u32 %v666_v4, %v663_v3  ;;  %v805_v17 = vshrl.u32 %v10104_v62, 16  ;;  %v808_v18 = vshll.u32 %v10104_v62, 16  ;;  %v9514_v20 = vld [vmem:[%s13894_s1 + $0x14] ss:$8 sps:$4 sm:$0xff]   ;;  %v9518_v22 = vld [vmem:[%s13894_s1 + $0x70] ss:$8 sps:$4 sm:$0xff]   ;;  %v803_v23 = vsel %vm10079_vm11, %v798_v6, %v802_v52 }
  0x3f   : > { %1413 = vmatpush1.bf16.msra.mxu0 %v9506_v48  ;;  %956 = vmatprep.mubr.bf16.mxu0 %v9803_v2  ;;  %v676_v25 = vrot.slane %v674_v12, 4  ;;  %v682_v26 = vrot.slane %v680_v13, 5  ;;  %v368_v27 = vld [vmem:[%s10001_s29 + $0x14] sm:$0xf]  ;;  %v417_v28 = vshrl.u32 %v367_v5, 16  ;;  %v8700_v29 = vcombine.low %v793_v14, %v803_v23 }
  0x40   : > { %v668_v30 = vrot.slane %v667_v16, 4  ;;  %v10130_v31 = vld [vmem:[#allocation2 + $0x58] sm:$0xf]  ;;  %v10132_v33 = vld [vmem:[#allocation2 + $0x5c] sm:$0x1]  ;;  %v807_v35 = vrot.slane %v805_v17, 4  ;;  %1414 = vmatprep.subr.bf16.mxu0 %v9520_v63 }
  0x41   : > { %v677_v36 = vor.u32 %v676_v25, %v672_v8  ;;  %v810_v37 = vrot.slane %v808_v18, 5  ;;  %v814_v38 = vshll.u32 %v10130_v31, 16  ;;  %v818_v39 = vshrl.u32 %v10130_v31, 16  ;;  %v9512_v40 = vld [vmem:[%s13894_s1 + $0x10] ss:$8 sps:$4 sm:$0xff]   ;;  %8714 = vmatmul.mubr.msk.bf16.vlgmr.msra.gmra.mxu1 %vm889_vm10, %v8700_v29 }
  0x42   : > { %v9523_v41 = vld [vmem:[%s13894_s1 + $0x64] ss:$8 sps:$4 sm:$0xff]   ;;  %v673_v43 = vsel %vm10079_vm11, %v668_v30, %v672_v8  ;;  %v824_v44 = vshll.u32 %v10132_v33, 16  ;;  %v419_v47 = vrot.slane %v417_v28, 7  ;;  %v420_v48 = vshll.u32 %v367_v5, 16  ;;  %1132 = vmatpush1.bf16.msra.mxu1 %v9509_v7  ;;  %1016 = vmatprep.mubr.bf16.mxu1 %v9803_v2 }
  0x43   : > { %v9517_v46 = vld [vmem:[%s13894_s1 + $0x4] ss:$8 sps:$4 sm:$0xff]   ;;  %v561_v49 = vld [vmem:[#allocation2 + $0x18] sm:$0xf]  ;;  %v678_v50 = vrot.slane %v677_v36, 4  ;;  %v811_v51 = vor.u32 %v810_v37, %v807_v35  ;;  %v816_v52 = vrot.slane %v814_v38, 5  ;;  %1133 = vmatprep.subr.bf16.mxu1 %v9514_v20  ;;  %1415 = vmatpush1.bf16.msra.mxu0 %v9518_v22 }
  0x44   : > { %v820_v53 = vrot.slane %v818_v39, 4  ;;  %v369_v56 = vld [vmem:[%s10001_s29 + $0x18] sm:$0xf]  ;;  %v826_v57 = vrot.slane %v824_v44, 5  ;;  %v422_v58 = vor.u32 %v420_v48, %v419_v47  ;;  %v423_v59 = vrot.slane %v419_v47, 4  ;;  %1416 = vmatprep.subr.bf16.mxu0 %v9523_v41 }
  0x45   : > { %v425_v60 = vshrl.u32 %v368_v27, 16  ;;  %v370_v61 = vld [vmem:[%s10001_s29 + $0x1c] sm:$0xf]  ;;  %v683_v63 = vsel %vm10079_vm11, %v678_v50, %v682_v26  ;;  %v812_v0 = vrot.slane %v811_v51, 4  ;;  %v9515_v3 = vld [vmem:[%s13894_s1] ss:$8 sps:$4 sm:$0xff]  }
  0x46   : > { %v821_v1 = vor.u32 %v820_v53, %v816_v52  ;;  %v428_v4 = vshll.u32 %v368_v27, 16  ;;  %v9521_v5 = vld [vmem:[%s13894_s1 + $0x60] ss:$8 sps:$4 sm:$0xff]   ;;  %v8695_v6 = vcombine.low %v673_v43, %v683_v63  ;;  %v562_v8 = vsel %vm10021_vm7, %v422_v58, %v561_v49  ;;  %1134 = vmatpush1.bf16.msra.mxu1 %v9512_v40  ;;  %v568_v22 = vld [vmem:[#allocation2 + $0x24] sm:$0xf] }
  0x47   : > { %v427_v7 = vrot.slane %v425_v60, 7  ;;  %v565_v12 = vld [vmem:[#allocation2 + $0x20] sm:$0x1]  ;;  %v434_v13 = vshrl.u32 %v369_v56, 16  ;;  %v817_v16 = vsel %vm10079_vm11, %v812_v0, %v816_v52  ;;  %563 = vst [vmem:[#allocation2 + $0x18] sm:$0xf] %v562_v8  ;;  %1135 = vmatprep.subr.bf16.mxu1 %v9517_v46  ;;  %1417 = vmatpush1.bf16.msra.mxu0 %v9521_v5  ;;  %v8716_v8 = vcombine.low %v10048_v9, %v10050_v10 }
  0x48   : > { %v371_v14 = vld [vmem:[%s10001_s29 + $0x20] sm:$0xf]  ;;  %v822_v17 = vrot.slane %v821_v1, 4  ;;  %v437_v18 = vshll.u32 %v369_v56, 16  ;;  %v442_v20 = vshrl.u32 %v370_v61, 16  ;;  %8709 = vmatmul.mubr.msk.bf16.gmra.mxu0 %vm889_vm10, %v8695_v6  ;;  %v445_v28 = vshll.u32 %v370_v61, 16 }
  0x49   : > { %v372_v23 = vld [vmem:[%s10001_s29 + $0x24] sm:$0xf]  ;;  %v430_v25 = vor.u32 %v428_v4, %v427_v7  ;;  %v432_v26 = vrot.slane %v427_v7, 4  ;;  %v436_v27 = vrot.slane %v434_v13, 7  ;;  %v572_v29 = vld [vmem:[#allocation2 + $0x2c] sm:$0x1]  ;;  %966 = vmatprep.mubr.bf16.mxu0 %v9803_v2 }
  0x4a   : > { %v373_v30 = vld [vmem:[%s10001_s29 + $0x28] sm:$0xf]  ;;  %v827_v35 = vsel %vm10079_vm11, %v822_v17, %v826_v57  ;;  %v444_v36 = vrot.slane %v442_v20, 7  ;;  %v451_v37 = vshrl.u32 %v371_v14, 16  ;;  %v454_v38 = vshll.u32 %v371_v14, 16  ;;  %1136 = vmatpush1.bf16.msra.mxu1 %v9515_v3 }
  0x4b   : > { %v10172_v39 = vld [vmem:[%s10001_s29 + $0x2c] sm:$0xf]  ;;  %v8701_v40 = vcombine.low %v817_v16, %v827_v35  ;;  %v431_v41 = vsel %vm10015_vm6, %v423_v59, %v430_v25  ;;  %v566_v43 = vsel %vm10008_vm5, %v432_v26, %v565_v12  ;;  %v439_v44 = vor.u32 %v437_v18, %v436_v27  ;;  %v575_v46 = vld [vmem:[#allocation2 + $0x30] sm:$0xf]  ;;  %v579_v61 = vld [vmem:[#allocation2 + $0x38] sm:$0x1] }
  0x4c   : > { %564 = vst.msk [vmem:[#allocation2 + $0x1c] sm:$0xf] %vm337_vm0, %v431_v41  ;;  %567 = vst [vmem:[#allocation2 + $0x20] sm:$0x1] %v566_v43  ;;  %v440_v47 = vrot.slane %v436_v27, 4  ;;  %v447_v48 = vor.u32 %v445_v28, %v444_v36  ;;  %v449_v49 = vrot.slane %v444_v36, 4 }
  0x4d   : > { %v453_v50 = vrot.slane %v451_v37, 7  ;;  %8715 = vmatmul.mubr.msk.bf16.gmra.mxu1 %vm889_vm10, %v8701_v40  ;;  %v569_v51 = vsel %vm10021_vm7, %v439_v44, %v568_v22  ;;  %v459_v52 = vshrl.u32 %v372_v23, 16  ;;  %v462_v53 = vshll.u32 %v372_v23, 16  ;;  %v582_v63 = vld [vmem:[#allocation2 + $0x3c] sm:$0xf]  ;;  %s8684_s29 = sshll.u32 %s326_s28, 3 }
  0x4e   : > { %v468_v56 = vshrl.u32 %v373_v30, 16  ;;  %1153 = vmatprep.mubr.bf16.mxu1 %v9803_v2  ;;  %v448_v57 = vsel %vm10015_vm6, %v440_v47, %v447_v48  ;;  %570 = vst [vmem:[#allocation2 + $0x24] sm:$0xf] %v569_v51  ;;  %v573_v58 = vsel %vm10008_vm5, %v449_v49, %v572_v29  ;;  %v10187_v0 = vld [vmem:[#allocation2 + $0x18] sm:$0xf]  ;;  %v471_v4 = vshll.u32 %v373_v30, 16 }
  0x4f   : > { %v456_v59 = vor.u32 %v454_v38, %v453_v50  ;;  %v457_v60 = vrot.slane %v453_v50, 4  ;;  %571 = vst.msk [vmem:[#allocation2 + $0x28] sm:$0xf] %vm337_vm0, %v448_v57  ;;  %574 = vst [vmem:[#allocation2 + $0x2c] sm:$0x1] %v573_v58  ;;  %v461_v1 = vrot.slane %v459_v52, 7 }
  0x50   : > { %v470_v3 = vrot.slane %v468_v56, 7  ;;  %v476_v5 = vshrl.u32 %v10172_v39, 16  ;;  %v685_v6 = vshrl.u32 %v10187_v0, 16  ;;  %v688_v7 = vshll.u32 %v10187_v0, 16  ;;  %v10197_v13 = vld [vmem:[#allocation2] sm:$0xe] }
  0x51   : > { %v576_v12 = vsel %vm10021_vm7, %v456_v59, %v575_v46  ;;  %v464_v14 = vor.u32 %v462_v53, %v461_v1  ;;  %v466_v16 = vrot.slane %v461_v1, 4  ;;  %v479_v18 = vshll.u32 %v10172_v39, 16  ;;  %v586_v50 = vld [vmem:[#allocation2 + $0x44] sm:$0x1]  ;;  %s328_s21 = scalar_lea.vmem [#allocation4], %s8684_s29  ;;  %s9745_s29 = sshll.u32 %s9809_s13, 4  ;;  %s9746_s29 = int_to_ptr.vmem [resolvable:$false] %s9745_s29 }
  0x52   : > { %577 = vst [vmem:[#allocation2 + $0x30] sm:$0xf] %v576_v12  ;;  %v473_v17 = vor.u32 %v471_v4, %v470_v3  ;;  %vm1258_vm12 = vcmask 1042432   ;;  %vm1259_vm13 = vcmask 1046532   ;;  %v1263_v20 = vrot.slane %v10050_v10, 5 }
  0x53   : > { %v687_v22 = vrot.slane %v685_v6, 4  ;;  %v690_v23 = vrot.slane %v688_v7, 5  ;;  %v478_v25 = vrot.slane %v476_v5, 7  ;;  %v10201_v26 = vld [vmem:[#allocation2 + $0x1c] sm:$0xf]  ;;  %v465_v27 = vsel %vm10015_vm6, %v457_v60, %v464_v14  ;;  %vm10254_vm14 = vmor %vm1258_vm12, %vm1259_vm13 }
  0x54   : > { %v10203_v9 = vld [vmem:[#allocation2 + $0x20] sm:$0x1]  ;;  %v580_v28 = vsel %vm10008_vm5, %v466_v16, %v579_v61  ;;  %v474_v29 = vrot.slane %v470_v3, 4  ;;  %v583_v30 = vsel %vm10021_vm7, %v473_v17, %v582_v63  ;;  %v694_v36 = vshll.u32 %v10201_v26, 16  ;;  %578 = vst.msk [vmem:[#allocation2 + $0x34] sm:$0xf] %vm337_vm0, %v465_v27 }
  0x55   : > { %v691_v35 = vor.u32 %v690_v23, %v687_v22  ;;  %v698_v37 = vshrl.u32 %v10201_v26, 16  ;;  %v704_v38 = vshll.u32 %v10203_v9, 16  ;;  %581 = vst [vmem:[#allocation2 + $0x38] sm:$0x1] %v580_v28  ;;  %584 = vst [vmem:[#allocation2 + $0x3c] sm:$0xf] %v583_v30  ;;  %8730 = vmatmul.mubr.msk.bf16.vlgmr.msra.gmra.mxu1 %vm889_vm10, %v8716_v8  ;;  %v481_v41 = vor.u32 %v479_v18, %v478_v25 }
  0x56   : > { %v1266_v39 = vrot.slane %v10052_v11, 5  ;;  %v10217_v40 = vld [vmem:[#allocation2 + $0x24] sm:$0xf]  ;;  %v8738_v43 = vrot.slane %v10197_v13, 9  ;;  %v696_v46 = vrot.slane %v694_v36, 5  ;;  %1163 = vmatprep.mubr.bf16.mxu1 %v9803_v2  ;;  %v483_v49 = vrot.slane %v478_v25, 4 }
  0x57   : > { %v692_v44 = vrot.slane %v691_v35, 4  ;;  %v700_v47 = vrot.slane %v698_v37, 4  ;;  %v10223_v48 = vld [vmem:[#allocation2 + $0x28] sm:$0xf]  ;;  %v10225_v51 = vld [vmem:[#allocation2 + $0x2c] sm:$0x1]  ;;  %v482_v61 = vsel %vm10015_vm6, %v474_v29, %v481_v41 }
  0x58   : > { %v709_v52 = vshrl.u32 %v10217_v40, 16  ;;  %v712_v53 = vshll.u32 %v10217_v40, 16  ;;  %v718_v45 = vshll.u32 %v10223_v48, 16  ;;  %v722_v56 = vshrl.u32 %v10223_v48, 16  ;;  %585 = vst.msk [vmem:[#allocation2 + $0x40] sm:$0xf] %vm337_vm0, %v482_v61 }
  0x59   : > { %v701_v57 = vor.u32 %v700_v47, %v696_v46  ;;  %v706_v58 = vrot.slane %v704_v38, 5  ;;  %v728_v59 = vshll.u32 %v10225_v51, 16  ;;  %v10232_v60 = vld [vmem:[#allocation2 + $0x30] sm:$0xf]  ;;  %v697_v5 = vsel %vm10079_vm11, %v692_v44, %v696_v46 }
  0x5a   : > { %v711_v63 = vrot.slane %v709_v52, 4  ;;  %v714_v1 = vrot.slane %v712_v53, 5  ;;  %v720_v3 = vrot.slane %v718_v45, 5  ;;  %v724_v4 = vrot.slane %v722_v56, 4  ;;  %v1235_v45 = vld [vmem:[#allocation2 + $0xc] sm:$0xe] }
  0x5b   : > { %v702_v6 = vrot.slane %v701_v57, 4  ;;  %v733_v7 = vshrl.u32 %v10232_v60, 16  ;;  %v736_v8 = vshll.u32 %v10232_v60, 16  ;;  %v730_v16 = vrot.slane %v728_v59, 5  ;;  %v10241_v17 = vld [vmem:[#allocation2 + $0x34] sm:$0xf] }
  0x5c   : > { %v715_v12 = vor.u32 %v714_v1, %v711_v63  ;;  %v725_v14 = vor.u32 %v724_v4, %v720_v3  ;;  %v587_v19 = vsel %vm10008_vm5, %v483_v49, %v586_v50  ;;  %v10245_v18 = vld [vmem:[#allocation2 + $0x3c] sm:$0xf]  ;;  %v10249_v23 = vld [vmem:[#allocation2 + $0x38] sm:$0x1]  ;;  %v742_v28 = vshll.u32 %v10241_v17, 16 }
  0x5d   : > { %v707_v22 = vsel %vm10079_vm11, %v702_v6, %v706_v58  ;;  %v735_v25 = vrot.slane %v733_v7, 4  ;;  %v738_v27 = vrot.slane %v736_v8, 5  ;;  %588 = vst [vmem:[#allocation2 + $0x44] sm:$0x1] %v587_v19  ;;  %v14140_v29 = vmov 0  ;;  %8731 = vmatmul.mubr.msk.bf16.gmra.mxu1 %vm889_vm10, %v8717_v24 }
  0x5e   : > { %v14141_v29 = vsel %vm10254_vm14, 4294967295, %v14140_v29  ;;  %v8696_v15 = vcombine.low %v697_v5, %v707_v22  ;;  %v716_v30 = vrot.slane %v715_v12, 4  ;;  %v726_v35 = vrot.slane %v725_v14, 4  ;;  %1173 = vmatprep.mubr.bf16.mxu1 %v9803_v2  ;;  %v10315_v22 = vld [vmem:[#allocation2 + $0x24] sm:$0xe] }
  0x5f   : > { %14142 = vst [vmem:[#allocation8_spill] sm:$0xff] %v14141_v29  ;;  %v746_v36 = vshrl.u32 %v10241_v17, 16  ;;  %v739_v37 = vor.u32 %v738_v27, %v735_v25  ;;  %v744_v38 = vrot.slane %v742_v28, 5  ;;  %v757_v41 = vshrl.u32 %v10245_v18, 16  ;;  %v10274_v53 = vld [vmem:[#allocation2 + $0x40] sm:$0xf] }
  0x60   : > { %v1265_v44 = vrot.slane %v1263_v20, 4  ;;  %8710 = vmatmul.mubr.msk.bf16.gmra.mxu0 %vm889_vm10, %v8696_v15  ;;  %v752_v47 = vshll.u32 %v10249_v23, 16  ;;  %v760_v49 = vshll.u32 %v10245_v18, 16  ;;  %v721_v24 = vsel %vm10079_vm11, %v716_v30, %v720_v3 }
  0x61   : > { %v748_v46 = vrot.slane %v746_v36, 4  ;;  %976 = vmatprep.mubr.bf16.mxu0 %v9803_v2  ;;  %v731_v50 = vsel %vm10079_vm11, %v726_v35, %v730_v16  ;;  %v8718_v52 = vcombine.low %v10187_v0, %v10201_v26  ;;  %v766_v57 = vshll.u32 %v10274_v53, 16  ;;  %v10307_v16 = vld [vmem:[#allocation2 + $0x18] sm:$0xe] }
  0x62   : > { %v770_v58 = vshrl.u32 %v10274_v53, 16  ;;  %v10284_v59 = vsel %vm10254_vm14, %v8738_v43, %v1263_v20  ;;  %v740_v61 = vrot.slane %v739_v37, 4  ;;  %v759_v63 = vrot.slane %v757_v41, 4  ;;  %v10329_v37 = vld [vmem:[#allocation2 + $0x30] sm:$0xe] }
  0x63   : > { %v749_v56 = vor.u32 %v748_v46, %v744_v38  ;;  %v762_v1 = vrot.slane %v760_v49, 5  ;;  %v10290_v0 = vsel %vm10254_vm14, %v1265_v44, %v1266_v39  ;;  %v8697_v3 = vcombine.low %v721_v24, %v731_v50  ;;  %v1240_v46 = vld [vmem:[#allocation2 + $0x48] sm:$0xe] }
  0x64   : > { %v754_v4 = vrot.slane %v752_v47, 5  ;;  %v10292_v5 = vld [vmem:[#allocation2 + $0x44] sm:$0x1]  ;;  %v10294_v10 = vrot.slane %v766_v57, 5  ;;  %v772_v13 = vrot.slane %v770_v58, 4  ;;  %v8752_v20 = vcombine.low %v10284_v59, %v10290_v0 }
  0x65   : > { %v750_v6 = vrot.slane %v749_v56, 4  ;;  %v8739_v43 = vrot.slane %v1235_v45, 9  ;;  %v1270_v7 = vrot.slane %v10093_v54, 5  ;;  %8732 = vmatmul.mubr.msk.bf16.gmra.mxu1 %vm889_vm10, %v8718_v52  ;;  %v1273_v11 = vrot.slane %v10095_v55, 5  ;;  %v1241_v52 = vld [vmem:[#allocation2 + $0x54] sm:$0xe] }
  0x66   : > { %1183 = vmatprep.mubr.bf16.mxu1 %v9803_v2  ;;  %v763_v39 = vor.u32 %v762_v1, %v759_v63  ;;  %v776_v8 = vshll.u32 %v10292_v5, 16  ;;  %v745_v54 = vsel %vm10079_vm11, %v740_v61, %v744_v38  ;;  %v773_v19 = vor.u32 %v772_v13, %v10294_v10  ;;  %v10331_v38 = vld [vmem:[#allocation2 + $0x3c] sm:$0xe] }
  0x67   : > { %v10305_v12 = vsel %vm10254_vm14, %v8739_v43, %v1270_v7  ;;  %v1272_v14 = vrot.slane %v1270_v7, 4  ;;  %v8722_v55 = vcombine.low %v10064_v21, %v10069_v32  ;;  %v755_v25 = vsel %vm10079_vm11, %v750_v6, %v754_v4 }
  0x68   : > { %8711 = vmatmul.mubr.msk.bf16.gmra.mxu0 %vm889_vm10, %v8697_v3  ;;  %v1277_v28 = vrot.slane %v10201_v26, 5  ;;  %v8723_v15 = vcombine.low %v10104_v62, %v10130_v31  ;;  %v8719_v30 = vcombine.low %v10217_v40, %v10223_v48  ;;  %v1284_v36 = vrot.slane %v10223_v48, 5 }
  0x69   : > { %986 = vmatprep.mubr.bf16.mxu0 %v9803_v2  ;;  %v1274_v27 = vsel %vm10254_vm14, %v1272_v14, %v1273_v11  ;;  %v764_v41 = vrot.slane %v763_v39, 4  ;;  %v778_v44 = vrot.slane %v776_v8, 5  ;;  %v8698_v47 = vcombine.low %v745_v54, %v755_v25 }
  0x6a   : > { %v8753_v35 = vcombine.low %v10305_v12, %v1274_v27  ;;  %v774_v49 = vrot.slane %v773_v19, 4  ;;  %v8740_v24 = vrot.slane %v10307_v16, 9  ;;  %v1280_v50 = vrot.slane %v10203_v9, 5 }
  0x6b   : > { %v1279_v40 = vrot.slane %v1277_v28, 4  ;;  %v8741_v45 = vrot.slane %v10315_v22, 9  ;;  %v1291_v56 = vrot.slane %v10241_v17, 5  ;;  %v1286_v57 = vrot.slane %v1284_v36, 4 }
  0x6c   : > { %v1287_v58 = vrot.slane %v10225_v51, 5  ;;  %v1298_v61 = vrot.slane %v10274_v53, 5  ;;  %v8720_v9 = vcombine.low %v10232_v60, %v10241_v17  ;;  %v8742_v63 = vrot.slane %v10329_v37, 9 }
  0x6d   : > { %8733 = vmatmul.mubr.msk.bf16.gmra.mxu1 %vm889_vm10, %v8719_v30  ;;  %v1294_v1 = vrot.slane %v10249_v23, 5  ;;  %v8743_v3 = vrot.slane %v10331_v38, 9  ;;  %v769_v4 = vsel %vm10079_vm11, %v764_v41, %v10294_v10  ;;  %v8744_v51 = vrot.slane %v1240_v46, 9 }
  0x6e   : > { %1193 = vmatprep.mubr.bf16.mxu1 %v9803_v2  ;;  %v1305_v13 = vrot.slane %v10069_v32, 5  ;;  %v1308_v6 = vrot.slane %v10071_v34, 5  ;;  %v779_v60 = vsel %vm10079_vm11, %v774_v49, %v778_v44  ;;  %v1293_v17 = vrot.slane %v1291_v56, 4 }
  0x6f   : > { %v8745_v23 = vrot.slane %v1241_v52, 9  ;;  %v1312_v43 = vrot.slane %v10130_v31, 5  ;;  %v1300_v7 = vrot.slane %v1298_v61, 4  ;;  %v1315_v10 = vrot.slane %v10132_v33, 5 }
  0x70   : > { %8712 = vmatmul.mubr.msk.bf16.gmra.mxu0 %vm889_vm10, %v8698_v47  ;;  %v1306_v11 = vsel %vm10254_vm14, %v8744_v51, %v1305_v13  ;;  %v1307_v39 = vrot.slane %v1305_v13, 4  ;;  %v1301_v8 = vrot.slane %v10292_v5, 5  ;;  %v8699_v14 = vcombine.low %v769_v4, %v779_v60 }
  0x71   : > { %996 = vmatprep.mubr.bf16.mxu0 %v9803_v2  ;;  %v1313_v34 = vsel %vm10254_vm14, %v8745_v23, %v1312_v43  ;;  %v1314_v12 = vrot.slane %v1312_v43, 4  ;;  %v8721_v33 = vcombine.low %v10245_v18, %v10274_v53  ;;  %v1278_v18 = vsel %vm10254_vm14, %v8740_v24, %v1277_v28 }
  0x72   : > { %v1309_v16 = vsel %vm10254_vm14, %v1307_v39, %v1308_v6  ;;  %v1281_v53 = vsel %vm10254_vm14, %v1279_v40, %v1280_v50  ;;  %v1285_v21 = vsel %vm10254_vm14, %v8741_v45, %v1284_v36  ;;  %v1288_v32 = vsel %vm10254_vm14, %v1286_v57, %v1287_v58 }
  0x73   : > { %v8758_v54 = vcombine.low %v1306_v11, %v1309_v16  ;;  %v1316_v19 = vsel %vm10254_vm14, %v1314_v12, %v1315_v10  ;;  %v8754_v59 = vcombine.low %v1278_v18, %v1281_v53  ;;  %v8755_v26 = vcombine.low %v1285_v21, %v1288_v32 }
  0x74   : > { %v8759_v22 = vcombine.low %v1313_v34, %v1316_v19  ;;  %v1292_v62 = vsel %vm10254_vm14, %v8742_v63, %v1291_v56  ;;  %v1295_v31 = vsel %vm10254_vm14, %v1293_v17, %v1294_v1  ;;  %v1299_v48 = vsel %vm10254_vm14, %v8743_v3, %v1298_v61 }
  0x75   : > { %8734 = vmatmul.mubr.msk.bf16.gmra.mxu1 %vm889_vm10, %v8720_v9  ;;  %v8756_v0 = vcombine.low %v1292_v62, %v1295_v31  ;;  %v1302_v5 = vsel %vm10254_vm14, %v1300_v7, %v1301_v8  ;;  %v13903_v8 = vlaneseq  ;;  %v9804_v18 = vmov 1983009808  }
  0x76   : > { %1203 = vmatprep.mubr.bf16.mxu1 %v9803_v2  ;;  %v1658_v53 = vunpack.c.l.s4 %v9804_v18  ;;  %vm14078_vm15 = vcmask 1041408   ;;  %vm14077_vm0 = vcmask 1041409   ;;  %vm3610_vm1 = vcmask 1042434  }
  0x77   : > { %vm3612_vm3 = vcmask 1043459   ;;  %vm3614_vm5 = vcmask 1044484   ;;  %vm3616_vm6 = vcmask 1045509   ;;  %vm3618_vm7 = vcmask 1046534  }
  0x78   : > { %8713 = vmatmul.mubr.msk.bf16.gmra.mxu0 %vm889_vm10, %v8699_v14  ;;  %vm14080_vm8 = vcmask 1047559   ;;  %vm5022_vm12 = vsmask.f32 4352  ;;  %vm5010_vm13 = vcmask 1043456  }
  0x79   : > { %1434 = vmatprep.mubr.bf16.mxu0 %v9803_v2 }
  0x7d   : > { %8735 = vmatmul.mubr.msk.bf16.gmra.mxu1 %vm889_vm10, %v8721_v33 }
  0x7e   : > { %1213 = vmatprep.mubr.bf16.mxu1 %v9803_v2 }
  0x80   : > { %8766 = vmatmul.mubr.msk.bf16.vlgmr.msra.gmra.mxu0 %vm889_vm10, %v8752_v20  ;;  %v8757_v20 = vcombine.low %v1299_v48, %v1302_v5  ;;  %v1659_v48 = vunpack.c.0.s8 %v1658_v53 }
  0x81   : > { %1444 = vmatprep.mubr.bf16.mxu0 %v9803_v2 }
  0x85   : > { %8736 = vmatmul.mubr.msk.bf16.gmra.mxu1 %vm889_vm10, %v8722_v55 }
  0x86   : > { %1223 = vmatprep.mubr.bf16.mxu1 %v9803_v2 }
  0x88   : > { %8767 = vmatmul.mubr.msk.bf16.gmra.mxu0 %vm889_vm10, %v8753_v35 }
  0x89   : > { %1454 = vmatprep.mubr.bf16.mxu0 %v9803_v2 }
  0x8d   : > { %8737 = vmatmul.mubr.msk.bf16.gmra.mxu1 %vm889_vm10, %v8723_v15 }
  0x90   : > { %8768 = vmatmul.mubr.msk.bf16.gmra.mxu0 %vm889_vm10, %v8754_v59 }
  0x91   : > { %1464 = vmatprep.mubr.bf16.mxu0 %v9803_v2 }
  0x98   : > { %8769 = vmatmul.mubr.msk.bf16.gmra.mxu0 %vm889_vm10, %v8755_v26  ;;  %v1547_v26 = vld [vmem:[%s13895_s2] sm:$0x3] }
  0x99   : > { %1474 = vmatprep.mubr.bf16.mxu0 %v9803_v2 }
  0xa0   : > { %8770 = vmatmul.mubr.msk.bf16.gmra.mxu0 %vm889_vm10, %v8756_v0 }
  0xa1   : > { %1484 = vmatprep.mubr.bf16.mxu0 %v9803_v2 }
  0xa8   : > { %8771 = vmatmul.mubr.msk.bf16.gmra.mxu0 %vm889_vm10, %v8757_v20 }
  0xa9   : > { %1494 = vmatprep.mubr.bf16.mxu0 %v9803_v2 }
  0xb0   : > { %8772 = vmatmul.mubr.msk.bf16.gmra.mxu0 %vm889_vm10, %v8758_v54  ;;  %v10452_v54 = vshrl.u32 %v13903_v8, 7 }
  0xb1   : > { %1504 = vmatprep.mubr.bf16.mxu0 %v9803_v2 }
  0xb2   : > { %14149 = vst [vmem:[#allocation15_spill] sm:$0xff] %v10452_v54  ;;  %v13908_v21 = vsub.s32 0, %v10452_v54  ;;  %v13909_v31 = vsub.s32 1, %v10452_v54 }
  0xb4   : > { %v10461_v8 = vrot.slane %v1547_v26, %v13908_v21 }
  0xb8   : > { %8773 = vmatmul.mubr.msk.bf16.gmra.mxu0 %vm889_vm10, %v8759_v22  ;;  %vm5019_vm10 = vcmask 1040384  }
  0xfe   : > { %v948_v55 = vpop.f32.mrf.mxu0 }
 0x100   : > { %v10427_v27 = vpop.f32.mrf.mxu0 }
 0x101   : > { %v10425_v25 = vpop.f32.mrf.mxu1 }
 0x102   : > { %v10431_v15 = vpop.f32.mrf.mxu0 }
 0x103   : > { %v10429_v28 = vpop.f32.mrf.mxu1 }
 0x104   : > { %v10437_v36 = vpop.f32.mrf.mxu0 }
 0x105   : > { %v10433_v30 = vpop.f32.mrf.mxu1 }
 0x106   : > { %14143 = vst [vmem:[#allocation9_spill] sm:$0xff] %v10433_v30 }
 0x107   : > { %v10435_v35 = vpop.f32.mrf.mxu1 }
 0x108   : > { %14144 = vst [vmem:[#allocation10_spill] sm:$0xff] %v10435_v35  ;;  %v10441_v2 = vpop.f32.mrf.mxu0 }
 0x10a   : > { %v10447_v44 = vpop.f32.mrf.mxu0 }
 0x10c   : > { %v962_v49 = vpop.f32.mrf.mxu0 }
 0x10d   : > { %v10439_v37 = vpop.f32.mrf.mxu1 }
 0x10e   : > { %14145 = vst [vmem:[#allocation11_spill] sm:$0xff] %v10439_v37  ;;  %v964_v52 = vpop.f32.mrf.mxu0 }
 0x10f   : > { %v10443_v38 = vpop.f32.mrf.mxu1 }
 0x110   : > { %14146 = vst [vmem:[#allocation12_spill] sm:$0xff] %v10443_v38  ;;  %v10469_v38 = vsub.s32 %v1659_v48, %v10452_v54 }
 0x111   : > { %v10445_v41 = vpop.f32.mrf.mxu1 }
 0x112   : > { %14147 = vst [vmem:[#allocation13_spill] sm:$0xff] %v10445_v41  ;;  %v10466_v41 = vrot.slane %v1547_v26, %v13909_v31  ;;  %14150 = vst [vmem:[#allocation16_spill] sm:$0xff] %v10469_v38 }
 0x113   : > { %v10449_v46 = vpop.f32.mrf.mxu1 }
 0x114   : > { %14148 = vst [vmem:[#allocation14_spill] sm:$0xff] %v10449_v46 }
 0x115   : > { %v1155_v47 = vpop.f32.mrf.mxu1 }
 0x116   : > { %v1156_v20 = vadd.f32 %v1155_v47, %v948_v55 }
 0x117   : > { %v1157_v24 = vpop.f32.mrf.mxu1 }
 0x118   : > { %v1158_v42 = vadd.f32 %v1157_v24, %v10427_v27 }
 0x119   : > { %v1159_v50 = vpop.f32.mrf.mxu1 }
 0x11a   : > { %v1160_v55 = vadd.f32 %v1159_v50, %v10431_v15 }
 0x11b   : > { %v1161_v40 = vpop.f32.mrf.mxu1 }
 0x11c   : > { %v1162_v47 = vadd.f32 %v1161_v40, %v10437_v36 }
 0x11d   : > { %v1165_v45 = vpop.f32.mrf.mxu1 }
 0x11e   : > { %v1166_v30 = vadd.f32 %v1165_v45, %v10441_v2 }
 0x11f   : > { %v1167_v57 = vpop.f32.mrf.mxu1 }
 0x120   : > { %v968_v56 = vpop.f32.mrf.mxu0  ;;  %v1168_v27 = vadd.f32 %v1167_v57, %v10447_v44 }
 0x121   : > { %v1169_v61 = vpop.f32.mrf.mxu1 }
 0x122   : > { %v970_v58 = vpop.f32.mrf.mxu0  ;;  %v10476_v24 = vadd.f32 %v1169_v61, %v962_v49 }
 0x123   : > { %v1171_v63 = vpop.f32.mrf.mxu1 }
 0x124   : > { %v972_v9 = vpop.f32.mrf.mxu0  ;;  %v10478_v26 = vadd.f32 %v1171_v63, %v964_v52 }
 0x125   : > { %v1175_v3 = vpop.f32.mrf.mxu1 }
 0x126   : > { %v974_v1 = vpop.f32.mrf.mxu0 }
 0x127   : > { %v1177_v51 = vpop.f32.mrf.mxu1 }
 0x128   : > { %v978_v4 = vpop.f32.mrf.mxu0  ;;  %v10482_v31 = vadd.f32 %v1177_v51, %v970_v58 }
 0x129   : > { %v1179_v6 = vpop.f32.mrf.mxu1 }
 0x12a   : > { %v980_v13 = vpop.f32.mrf.mxu0 }
 0x12b   : > { %v1181_v17 = vpop.f32.mrf.mxu1 }
 0x12c   : > { %v982_v60 = vpop.f32.mrf.mxu0 }
 0x12d   : > { %v1185_v43 = vpop.f32.mrf.mxu1 }
 0x12e   : > { %v984_v23 = vpop.f32.mrf.mxu0 }
 0x12f   : > { %v1187_v11 = vpop.f32.mrf.mxu1 }
 0x130   : > { %v988_v7 = vpop.f32.mrf.mxu0  ;;  %v10491_v2 = vadd.f32 %v1187_v11, %v980_v13 }
 0x131   : > { %v1189_v10 = vpop.f32.mrf.mxu1 }
 0x132   : > { %v990_v39 = vpop.f32.mrf.mxu0  ;;  %v10493_v50 = vadd.f32 %v1189_v10, %v982_v60 }
 0x133   : > { %v1191_v12 = vpop.f32.mrf.mxu1 }
 0x134   : > { %v992_v34 = vpop.f32.mrf.mxu0 }
 0x135   : > { %v1195_v16 = vpop.f32.mrf.mxu1 }
 0x136   : > { %v994_v14 = vpop.f32.mrf.mxu0 }
 0x137   : > { %v1197_v22 = vpop.f32.mrf.mxu1 }
 0x138   : > { %v998_v19 = vpop.f32.mrf.mxu0  ;;  %v10499_v57 = vadd.f32 %v1197_v22, %v990_v39 }
 0x139   : > { %v1199_v59 = vpop.f32.mrf.mxu1 }
 0x13a   : > { %v1000_v33 = vpop.f32.mrf.mxu0 }
 0x13b   : > { %v1201_v62 = vpop.f32.mrf.mxu1 }
 0x13c   : > { %v1002_v32 = vpop.f32.mrf.mxu0  ;;  %v10505_v51 = vadd.f32 %v1201_v62, %v994_v14 }
 0x13d   : > { %v1205_v5 = vpop.f32.mrf.mxu1 }
 0x13e   : > { %v1004_v0 = vpop.f32.mrf.mxu0  ;;  %v10507_v13 = vadd.f32 %v1205_v5, %v998_v19 }
 0x13f   : > { %v1207_v29 = vpop.f32.mrf.mxu1 }
 0x140   : > { %v1436_v18 = vpop.f32.mrf.mxu0  ;;  %v10509_v60 = vadd.f32 %v1207_v29, %v1000_v33 }
 0x141   : > { %v1515_v46 = vadd.f32 %v1436_v18, %v1156_v20  ;;  %v1209_v53 = vpop.f32.mrf.mxu1  ;;  %v10480_v18 = vadd.f32 %v1175_v3, %v968_v56  ;;  %v10495_v56 = vadd.f32 %v1191_v12, %v984_v23 }
 0x142   : > { %v1438_v37 = vpop.f32.mrf.mxu0  ;;  %v10513_v11 = vadd.f32 %v1209_v53, %v1002_v32 }
 0x143   : > { %v1559_v21 = vadd.f32 %v10461_v8, %v1515_v46  ;;  %v1516_v35 = vadd.f32 %v1438_v37, %v1158_v42  ;;  %v1211_v48 = vpop.f32.mrf.mxu1  ;;  %v10485_v46 = vadd.f32 %v1179_v6, %v972_v9  ;;  %v10487_v42 = vadd.f32 %v1181_v17, %v974_v1 }
 0x144   : > { %v1440_v20 = vpop.f32.mrf.mxu0  ;;  %v10489_v37 = vadd.f32 %v1185_v43, %v978_v4  ;;  %v10502_v1 = vadd.f32 %v1199_v59, %v992_v34  ;;  %v10515_v10 = vadd.f32 %v1211_v48, %v1004_v0 }
 0x145   : > { %v1560_v15 = vadd.f32 %v10466_v41, %v1516_v35  ;;  %v1517_v36 = vadd.f32 %v1440_v20, %v1160_v55  ;;  %v1215_v49 = vpop.f32.mrf.mxu1  ;;  %v1591_v52 = vmax.f32 %v1559_v21, 0.0  ;;  %v10497_v35 = vadd.f32 %v1195_v16, %v988_v7 }
 0x146   : > { %v1442_v44 = vpop.f32.mrf.mxu0  ;;  %v10518_v34 = vadd.f32 %v1215_v49, %v10425_v25 }
 0x147   : > { %v1592_v40 = vmax.f32 %v1560_v15, 0.0  ;;  %v1518_v45 = vadd.f32 %v1442_v44, %v1162_v47  ;;  %v1561_v58 = vadd.f32 %v10461_v8, %v1517_v36  ;;  %v1217_v4 = vpop.f32.mrf.mxu1 }
 0x148   : > { %v1446_v61 = vpop.f32.mrf.mxu0  ;;  %14151 = vst [vmem:[#allocation17_spill] sm:$0xff] %v10518_v34  ;;  %v10521_v12 = vadd.f32 %v1217_v4, %v10429_v28 }
 0x149   : > { %v1655_v9 = vcombine.low %v1591_v52, %v1592_v40  ;;  %v1656_v63 = vcombine.high %v1591_v52, %v1592_v40  ;;  %v1562_v3 = vadd.f32 %v10466_v41, %v1518_v45  ;;  %v1519_v6 = vadd.f32 %v1446_v61, %v1166_v30 }
 0x14a   : > { %v1448_v7 = vpop.f32.mrf.mxu0  ;;  %v1593_v39 = vmax.f32 %v1561_v58, 0.0  ;;  %14152 = vst [vmem:[#allocation18_spill] sm:$0xff] %v10521_v12 }
 0x14b   : > { %v1663_v17 = vrot.slane %v1655_v9, %v10469_v38  ;;  %v1670_v23 = vrot.slane %v1656_v63, %v10469_v38  ;;  %v1594_v43 = vmax.f32 %v1562_v3, 0.0  ;;  %v10526_v33 = vadd.f32 %v10461_v8, %v1519_v6 }
 0x14c   : > { %v1520_v59 = vadd.f32 %v1448_v7, %v1168_v27 }
 0x14d   : > { %v1671_v30 = vcombine.high %v1663_v17, %v1663_v17  ;;  %v1672_v29 = vcombine.high %v1670_v23, %v1670_v23  ;;  %v1949_v14 = vrot.slane %v1663_v17, %v10469_v38  ;;  %v1965_v16 = vrot.slane %v1670_v23, %v10469_v38 }
 0x14e   : > { %v1673_v19 = vcombine.low %v1593_v39, %v1594_v43  ;;  %v1674_v22 = vcombine.high %v1593_v39, %v1594_v43 }
 0x14f   : > { %v1950_v21 = vcombine.high %v1949_v14, %v1949_v14  ;;  %v1957_v32 = vrot.slane %v1671_v30, %v10469_v38  ;;  %v1966_v25 = vcombine.high %v1965_v16, %v1965_v16  ;;  %v1973_v62 = vrot.slane %v1672_v29, %v10469_v38 }
 0x150   : > { %v2584_v28 = vsel %vm14078_vm15, %v1949_v14, -inf  ;;  %v2612_v0 = vsel %vm14078_vm15, %v1965_v16, -inf  ;;  %v10533_v5 = vrot.slane %v1673_v19, %v10469_v38  ;;  %v10536_v53 = vrot.slane %v1674_v22, %v10469_v38 }
 0x151   : > { %v1958_v55 = vcombine.high %v1957_v32, %v1957_v32  ;;  %v1974_v47 = vcombine.high %v1973_v62, %v1973_v62  ;;  %v2585_v20 = vrot.slane %v2584_v28, 4  ;;  %v2591_v27 = vsel %vm14078_vm15, %v1950_v21, -inf }
 0x152   : > { %v2592_v48 = vrot.slane %v2591_v27, 4  ;;  %v2598_v15 = vsel %vm14078_vm15, %v1957_v32, -inf  ;;  %v2613_v36 = vrot.slane %v2612_v0, 4  ;;  %v2619_v44 = vsel %vm14078_vm15, %v1966_v25, -inf  ;;  %v1219_v25 = vpop.f32.mrf.mxu1 }
 0x153   : > { %v2586_v49 = vmax.f32 %v2584_v28, %v2585_v20  ;;  %v2599_v52 = vrot.slane %v2598_v15, 4  ;;  %v2605_v40 = vsel %vm14078_vm15, %v1958_v55, -inf  ;;  %v2620_v45 = vrot.slane %v2619_v44, 4 }
 0x154   : > { %v2593_v58 = vmax.f32 %v2591_v27, %v2592_v48  ;;  %v2606_v61 = vrot.slane %v2605_v40, 4  ;;  %v2614_v9 = vmax.f32 %v2612_v0, %v2613_v36  ;;  %v2626_v63 = vsel %vm14078_vm15, %v1973_v62, -inf }
 0x155   : > { %v2587_v3 = vrot.slane %v2586_v49, 2  ;;  %v2600_v4 = vmax.f32 %v2598_v15, %v2599_v52  ;;  %v2621_v6 = vmax.f32 %v2619_v44, %v2620_v45  ;;  %v2627_v17 = vrot.slane %v2626_v63, 4 }
 0x156   : > { %v2594_v23 = vrot.slane %v2593_v58, 2  ;;  %v2607_v43 = vmax.f32 %v2605_v40, %v2606_v61  ;;  %v2615_v7 = vrot.slane %v2614_v9, 2  ;;  %v2633_v39 = vsel %vm14078_vm15, %v1974_v47, -inf }
 0x157   : > { %v2588_v30 = vmax.f32 %v2586_v49, %v2587_v3  ;;  %v2601_v29 = vrot.slane %v2600_v4, 2  ;;  %v2622_v14 = vrot.slane %v2621_v6, 2  ;;  %v2628_v16 = vmax.f32 %v2626_v63, %v2627_v17  ;;  %v14153_v49 = vld [vmem:[#allocation9_spill] sm:$0xff] }
 0x158   : > { %v2595_v19 = vmax.f32 %v2593_v58, %v2594_v23  ;;  %v2608_v22 = vrot.slane %v2607_v43, 2  ;;  %v2616_v21 = vmax.f32 %v2614_v9, %v2615_v7  ;;  %v2634_v32 = vrot.slane %v2633_v39, 4  ;;  %v1450_v23 = vpop.f32.mrf.mxu0 }
 0x159   : > { %v2589_v28 = vrot.slane %v2588_v30, 1  ;;  %v2602_v62 = vmax.f32 %v2600_v4, %v2601_v29  ;;  %v2623_v0 = vmax.f32 %v2621_v6, %v2622_v14  ;;  %v2629_v55 = vrot.slane %v2628_v16, 2 }
 0x15a   : > { %v2596_v20 = vrot.slane %v2595_v19, 1  ;;  %v2609_v27 = vmax.f32 %v2607_v43, %v2608_v22  ;;  %v2617_v48 = vrot.slane %v2616_v21, 1  ;;  %v2635_v15 = vmax.f32 %v2633_v39, %v2634_v32 }
 0x15b   : > { %v2603_v36 = vrot.slane %v2602_v62, 1  ;;  %v2624_v44 = vrot.slane %v2623_v0, 1  ;;  %v1595_v47 = vmax.f32 %v10526_v33, 0.0  ;;  %v10546_v52 = vadd.f32 %v1219_v25, %v14153_v49 }
 0x15c   : > { %v10548_v40 = vmax.f32 %v2588_v30, %v2589_v28  ;;  %v2610_v45 = vrot.slane %v2609_v27, 1  ;;  %v2636_v58 = vrot.slane %v2635_v15, 2  ;;  %v1564_v61 = vadd.f32 %v10466_v41, %v1520_v59 }
 0x15d   : > { %14154 = vst [vmem:[#allocation9_spill] sm:$0xff] %v10546_v52  ;;  %v10551_v9 = vmax.f32 %v2595_v19, %v2596_v20  ;;  %v10553_v63 = vmax.f32 %v2628_v16, %v2629_v55  ;;  %v1689_v3 = vcombine.high %v10533_v5, %v10533_v5  ;;  %v1690_v4 = vcombine.high %v10536_v53, %v10536_v53 }
 0x15e   : > { %14155 = vst [vmem:[#allocation19_spill] sm:$0xff] %v10548_v40  ;;  %v10559_v33 = vmax.f32 %v2602_v62, %v2603_v36  ;;  %v10561_v6 = vmax.f32 %v2616_v21, %v2617_v48  ;;  %v1981_v17 = vrot.slane %v10533_v5, %v10469_v38  ;;  %v1997_v59 = vrot.slane %v10536_v53, %v10469_v38 }
 0x15f   : > { %14156 = vst [vmem:[#allocation20_spill] sm:$0xff] %v10551_v9  ;;  %v10567_v43 = vmax.f32 %v2609_v27, %v2610_v45  ;;  %v10569_v7 = vmax.f32 %v2623_v0, %v2624_v44  ;;  %v10571_v39 = vmax.f32 %v2635_v15, %v2636_v58  ;;  %v1989_v30 = vrot.slane %v1689_v3, %v10469_v38  ;;  %v1452_v0 = vpop.f32.mrf.mxu0 }
 0x160   : > { %14157 = vst [vmem:[#allocation21_spill] sm:$0xff] %v10559_v33  ;;  %14158 = vst [vmem:[#allocation22_spill] sm:$0xff] %v10561_v6  ;;  %v1982_v29 = vcombine.high %v1981_v17, %v1981_v17  ;;  %v1998_v14 = vcombine.high %v1997_v59, %v1997_v59  ;;  %v2640_v16 = vsel %vm14078_vm15, %v1981_v17, -inf  ;;  %v1596_v19 = vmax.f32 %v1564_v61, 0.0 }
 0x161   : > { %14159 = vst [vmem:[#allocation23_spill] sm:$0xff] %v10567_v43  ;;  %14160 = vst [vmem:[#allocation24_spill] sm:$0xff] %v10569_v7  ;;  %v1990_v22 = vcombine.high %v1989_v30, %v1989_v30  ;;  %v10576_v5 = vrot.slane %v1690_v4, %v10469_v38  ;;  %v2641_v21 = vrot.slane %v2640_v16, 4  ;;  %v2654_v53 = vsel %vm14078_vm15, %v1989_v30, -inf }
 0x162   : > { %14161 = vst [vmem:[#allocation25_spill] sm:$0xff] %v10571_v39  ;;  %v2647_v32 = vsel %vm14078_vm15, %v1982_v29, -inf  ;;  %v2655_v25 = vrot.slane %v2654_v53, 4  ;;  %v2668_v28 = vsel %vm14078_vm15, %v1997_v59, -inf  ;;  %v2675_v62 = vsel %vm14078_vm15, %v1998_v14, -inf  ;;  %v1456_v29 = vpop.f32.mrf.mxu0 }
 0x163   : > { %v2642_v55 = vmax.f32 %v2640_v16, %v2641_v21  ;;  %v2648_v20 = vrot.slane %v2647_v32, 4  ;;  %v2661_v27 = vsel %vm14078_vm15, %v1990_v22, -inf  ;;  %v2669_v48 = vrot.slane %v2668_v28, 4 }
 0x164   : > { %v2662_v15 = vrot.slane %v2661_v27, 4  ;;  %v2676_v36 = vrot.slane %v2675_v62, 4  ;;  %v1691_v44 = vcombine.low %v1595_v47, %v1596_v19  ;;  %v1521_v49 = vadd.f32 %v1450_v23, %v10476_v24 }
 0x165   : > { %v2643_v58 = vrot.slane %v2642_v55, 2  ;;  %v2649_v61 = vmax.f32 %v2647_v32, %v2648_v20  ;;  %v1692_v3 = vcombine.high %v1595_v47, %v1596_v19  ;;  %v10587_v17 = vmax.f32 %v2654_v53, %v2655_v25 }
 0x166   : > { %v10589_v59 = vmax.f32 %v2668_v28, %v2669_v48  ;;  %v1699_v30 = vrot.slane %v1691_v44, %v10469_v38  ;;  %v10592_v16 = vmax.f32 %v2661_v27, %v2662_v15  ;;  %v1522_v23 = vadd.f32 %v1452_v0, %v10478_v26 }
 0x167   : > { %v2650_v14 = vrot.slane %v2649_v61, 2  ;;  %v1706_v24 = vrot.slane %v1692_v3, %v10469_v38  ;;  %v10596_v22 = vmax.f32 %v2675_v62, %v2676_v36  ;;  %v10600_v21 = vadd.f32 %v10461_v8, %v1521_v49 }
 0x168   : > { %14162 = vst [vmem:[#allocation26_spill] sm:$0xff] %v10592_v16  ;;  %v1707_v47 = vcombine.high %v1699_v30, %v1699_v30  ;;  %v2013_v19 = vrot.slane %v1699_v30, %v10469_v38  ;;  %v10602_v53 = vmax.f32 %v2642_v55, %v2643_v58  ;;  %v1523_v28 = vadd.f32 %v1456_v29, %v10480_v18 }
 0x169   : > { %14163 = vst [vmem:[#allocation27_spill] sm:$0xff] %v10596_v22  ;;  %v1708_v32 = vcombine.high %v1706_v24, %v1706_v24  ;;  %v2029_v25 = vrot.slane %v1706_v24, %v10469_v38  ;;  %v10606_v20 = vmax.f32 %v2649_v61, %v2650_v14  ;;  %v1566_v36 = vadd.f32 %v10466_v41, %v1522_v23 }
 0x16a   : > { %v2014_v27 = vcombine.high %v2013_v19, %v2013_v19  ;;  %v2021_v26 = vrot.slane %v1707_v47, %v10469_v38  ;;  %v2696_v62 = vsel %vm14078_vm15, %v2013_v19, -inf }
 0x16b   : > { %14164 = vst [vmem:[#allocation28_spill] sm:$0xff] %v10606_v20  ;;  %v2030_v0 = vcombine.high %v2029_v25, %v2029_v25  ;;  %v2037_v48 = vrot.slane %v1708_v32, %v10469_v38  ;;  %v2697_v15 = vrot.slane %v2696_v62, 4  ;;  %v2724_v18 = vsel %vm14078_vm15, %v2029_v25, -inf }
 0x16c   : > { %v2022_v55 = vcombine.high %v2021_v26, %v2021_v26  ;;  %v2703_v44 = vsel %vm14078_vm15, %v2014_v27, -inf  ;;  %v2710_v49 = vsel %vm14078_vm15, %v2021_v26, -inf  ;;  %v2725_v14 = vrot.slane %v2724_v18, 4  ;;  %v1458_v27 = vpop.f32.mrf.mxu0 }
 0x16d   : > { %v2038_v58 = vcombine.high %v2037_v48, %v2037_v48  ;;  %v2698_v61 = vmax.f32 %v2696_v62, %v2697_v15  ;;  %v2704_v3 = vrot.slane %v2703_v44, 4  ;;  %v2711_v30 = vrot.slane %v2710_v49, 4 }
 0x16e   : > { %v2717_v29 = vsel %vm14078_vm15, %v2022_v55, -inf  ;;  %v2731_v24 = vsel %vm14078_vm15, %v2030_v0, -inf  ;;  %v2738_v47 = vsel %vm14078_vm15, %v2037_v48, -inf  ;;  %v2726_v45 = vmax.f32 %v2724_v18, %v2725_v14 }
 0x16f   : > { %v2699_v19 = vrot.slane %v2698_v61, 2  ;;  %v2705_v23 = vmax.f32 %v2703_v44, %v2704_v3  ;;  %v2712_v32 = vmax.f32 %v2710_v49, %v2711_v30  ;;  %v2718_v4 = vrot.slane %v2717_v29, 4  ;;  %v1460_v49 = vpop.f32.mrf.mxu0  ;;  %v1221_v3 = vpop.f32.mrf.mxu1 }
 0x170   : > { %v2732_v26 = vrot.slane %v2731_v24, 4  ;;  %v2739_v54 = vrot.slane %v2738_v47, 4  ;;  %v2745_v25 = vsel %vm14078_vm15, %v2038_v58, -inf  ;;  %v2727_v55 = vrot.slane %v2726_v45, 2 }
 0x171   : > { %v2700_v62 = vmax.f32 %v2698_v61, %v2699_v19  ;;  %v2706_v15 = vrot.slane %v2705_v23, 2  ;;  %v2713_v7 = vrot.slane %v2712_v32, 2  ;;  %v2719_v52 = vmax.f32 %v2717_v29, %v2718_v4 }
 0x172   : > { %v2733_v43 = vmax.f32 %v2731_v24, %v2732_v26  ;;  %v2740_v9 = vmax.f32 %v2738_v47, %v2739_v54  ;;  %v2746_v0 = vrot.slane %v2745_v25, 4  ;;  %v2728_v30 = vmax.f32 %v2726_v45, %v2727_v55  ;;  %v1462_v45 = vpop.f32.mrf.mxu0  ;;  %v1225_v26 = vpop.f32.mrf.mxu1 }
 0x173   : > { %v2701_v22 = vrot.slane %v2700_v62, 1  ;;  %v2707_v48 = vmax.f32 %v2705_v23, %v2706_v15  ;;  %v2714_v39 = vmax.f32 %v2712_v32, %v2713_v7  ;;  %v2720_v44 = vrot.slane %v2719_v52, 2 }
 0x174   : > { %v2734_v18 = vrot.slane %v2733_v43, 2  ;;  %v2741_v14 = vrot.slane %v2740_v9, 2  ;;  %v2747_v16 = vmax.f32 %v2745_v25, %v2746_v0  ;;  %v1597_v19 = vmax.f32 %v10600_v21, 0.0 }
 0x175   : > { %v2708_v12 = vrot.slane %v2707_v48, 1  ;;  %v2715_v58 = vrot.slane %v2714_v39, 1  ;;  %v2721_v61 = vmax.f32 %v2719_v52, %v2720_v44  ;;  %v2729_v4 = vrot.slane %v2728_v30, 1 }
 0x176   : > { %v2735_v29 = vmax.f32 %v2733_v43, %v2734_v18  ;;  %v2748_v24 = vrot.slane %v2747_v16, 2  ;;  %v1567_v54 = vadd.f32 %v10461_v8, %v1523_v28  ;;  %v10622_v7 = vmax.f32 %v2700_v62, %v2701_v22  ;;  %v1227_v18 = vpop.f32.mrf.mxu1 }
 0x177   : > { %v2722_v23 = vrot.slane %v2721_v61, 1  ;;  %v1598_v32 = vmax.f32 %v1566_v36, 0.0  ;;  %v10624_v15 = vmax.f32 %v2707_v48, %v2708_v12  ;;  %v10626_v55 = vmax.f32 %v2740_v9, %v2741_v14  ;;  %v1466_v48 = vpop.f32.mrf.mxu0 }
 0x178   : > { %14165 = vst [vmem:[#allocation29_spill] sm:$0xff] %v10622_v7  ;;  %v2736_v25 = vrot.slane %v2735_v29, 1  ;;  %v10628_v52 = vmax.f32 %v2747_v16, %v2748_v24  ;;  %v10630_v21 = vmax.f32 %v2714_v39, %v2715_v58  ;;  %v1524_v28 = vadd.f32 %v1458_v27, %v10482_v31  ;;  %v14172_v27 = vld [vmem:[#allocation10_spill] sm:$0xff] }
 0x179   : > { %14166 = vst [vmem:[#allocation30_spill] sm:$0xff] %v10624_v15  ;;  %v1709_v43 = vcombine.low %v1597_v19, %v1598_v32  ;;  %v1710_v0 = vcombine.high %v1597_v19, %v1598_v32  ;;  %v10633_v44 = vmax.f32 %v2721_v61, %v2722_v23  ;;  %v10635_v22 = vmax.f32 %v2728_v30, %v2729_v4  ;;  %v14176_v23 = vld [vmem:[#allocation12_spill] sm:$0xff] }
 0x17a   : > { %14167 = vst [vmem:[#allocation31_spill] sm:$0xff] %v10628_v52  ;;  %14168 = vst [vmem:[#allocation32_spill] sm:$0xff] %v10630_v21  ;;  %v1599_v36 = vmax.f32 %v1567_v54, 0.0  ;;  %v1525_v62 = vadd.f32 %v1460_v49, %v10485_v46  ;;  %v10638_v12 = vmax.f32 %v2735_v29, %v2736_v25  ;;  %v1568_v39 = vadd.f32 %v10466_v41, %v1524_v28  ;;  %v14174_v29 = vld [vmem:[#allocation11_spill] sm:$0xff] }
 0x17b   : > { %14169 = vst [vmem:[#allocation33_spill] sm:$0xff] %v10633_v44  ;;  %14170 = vst [vmem:[#allocation34_spill] sm:$0xff] %v10635_v22  ;;  %v1717_v9 = vrot.slane %v1709_v43, %v10469_v38  ;;  %v1724_v16 = vrot.slane %v1710_v0, %v10469_v38  ;;  %v10648_v30 = vadd.f32 %v1221_v3, %v14172_v27 }
 0x17c   : > { %14171 = vst [vmem:[#allocation35_spill] sm:$0xff] %v10638_v12  ;;  %v10645_v31 = vadd.f32 %v10461_v8, %v1525_v62  ;;  %v1526_v46 = vadd.f32 %v1462_v45, %v10487_v42  ;;  %v1600_v4 = vmax.f32 %v1568_v39, 0.0  ;;  %v10654_v24 = vadd.f32 %v1225_v26, %v14174_v29 }
 0x17d   : > { %14173 = vst [vmem:[#allocation10_spill] sm:$0xff] %v10648_v30  ;;  %v1725_v49 = vcombine.high %v1717_v9, %v1717_v9  ;;  %v1726_v58 = vcombine.high %v1724_v16, %v1724_v16  ;;  %v2045_v61 = vrot.slane %v1717_v9, %v10469_v38  ;;  %v2061_v19 = vrot.slane %v1724_v16, %v10469_v38 }
 0x17e   : > { %14175 = vst [vmem:[#allocation11_spill] sm:$0xff] %v10654_v24  ;;  %v1527_v54 = vadd.f32 %v1466_v48, %v10489_v37  ;;  %v10658_v32 = vadd.f32 %v1227_v18, %v14176_v23  ;;  %v1727_v28 = vcombine.low %v1599_v36, %v1600_v4  ;;  %v1728_v62 = vcombine.high %v1599_v36, %v1600_v4 }
 0x17f   : > { %v2046_v25 = vcombine.high %v2045_v61, %v2045_v61  ;;  %v2053_v3 = vrot.slane %v1725_v49, %v10469_v38  ;;  %v2062_v43 = vcombine.high %v2061_v19, %v2061_v19  ;;  %v2752_v45 = vsel %vm14078_vm15, %v2045_v61, -inf }
 0x180   : > { %14177 = vst [vmem:[#allocation12_spill] sm:$0xff] %v10658_v32  ;;  %v2780_v0 = vsel %vm14078_vm15, %v2061_v19, -inf  ;;  %v10665_v26 = vrot.slane %v1726_v58, %v10469_v38  ;;  %v2753_v37 = vrot.slane %v2752_v45, 4  ;;  %v1735_v58 = vrot.slane %v1727_v28, %v10469_v38 }
 0x181   : > { %v2054_v9 = vcombine.high %v2053_v3, %v2053_v3  ;;  %v2759_v16 = vsel %vm14078_vm15, %v2046_v25, -inf  ;;  %v2766_v48 = vsel %vm14078_vm15, %v2053_v3, -inf  ;;  %v2781_v18 = vrot.slane %v2780_v0, 4 }
 0x182   : > { %v2760_v39 = vrot.slane %v2759_v16, 4  ;;  %v2787_v27 = vsel %vm14078_vm15, %v2062_v43, -inf  ;;  %v10670_v49 = vmax.f32 %v2752_v45, %v2753_v37  ;;  %v2767_v61 = vrot.slane %v2766_v48, 4 }
 0x183   : > { %v10673_v19 = vsel %vm14078_vm15, %v2054_v9, -inf  ;;  %v2788_v36 = vrot.slane %v2787_v27, 4  ;;  %v10677_v29 = vadd.f32 %v10466_v41, %v1526_v46  ;;  %v10680_v23 = vadd.f32 %v10461_v8, %v1527_v54 }
 0x184   : > { %v2761_v4 = vmax.f32 %v2759_v16, %v2760_v39  ;;  %v2774_v3 = vrot.slane %v10673_v19, 4  ;;  %v10685_v43 = vmax.f32 %v2780_v0, %v2781_v18  ;;  %v1742_v45 = vrot.slane %v1728_v62, %v10469_v38 }
 0x185   : > { %v2755_v9 = vrot.slane %v10670_v49, 2  ;;  %v1743_v16 = vcombine.high %v1735_v58, %v1735_v58  ;;  %v2077_v28 = vrot.slane %v1735_v58, %v10469_v38  ;;  %v10690_v46 = vmax.f32 %v2766_v48, %v2767_v61 }
 0x186   : > { %v2762_v37 = vrot.slane %v2761_v4, 2  ;;  %v10692_v39 = vmax.f32 %v2787_v27, %v2788_v36  ;;  %v1744_v54 = vcombine.high %v1742_v45, %v1742_v45  ;;  %v2093_v14 = vrot.slane %v1742_v45, %v10469_v38 }
 0x187   : > { %v2078_v25 = vcombine.high %v2077_v28, %v2077_v28  ;;  %v2085_v47 = vrot.slane %v1743_v16, %v10469_v38  ;;  %v2808_v0 = vsel %vm14078_vm15, %v2077_v28, -inf  ;;  %v1602_v62 = vmax.f32 %v10677_v29, 0.0 }
 0x188   : > { %14178 = vst [vmem:[#allocation36_spill] sm:$0xff] %v10692_v39  ;;  %v2094_v18 = vcombine.high %v2093_v14, %v2093_v14  ;;  %v2101_v42 = vrot.slane %v1744_v54, %v10469_v38  ;;  %v2809_v32 = vrot.slane %v2808_v0, 4  ;;  %v2836_v58 = vsel %vm14078_vm15, %v2093_v14, -inf }
 0x189   : > { %v10700_v48 = vmax.f32 %v2761_v4, %v2762_v37  ;;  %v2086_v27 = vcombine.high %v2085_v47, %v2085_v47  ;;  %v2815_v61 = vsel %vm14078_vm15, %v2078_v25, -inf  ;;  %v2822_v36 = vsel %vm14078_vm15, %v2085_v47, -inf }
 0x18a   : > { %v2102_v45 = vcombine.high %v2101_v42, %v2101_v42  ;;  %v2810_v24 = vmax.f32 %v2808_v0, %v2809_v32  ;;  %v2816_v16 = vrot.slane %v2815_v61, 4  ;;  %v2823_v30 = vrot.slane %v2822_v36, 4 }
 0x18b   : > { %v2829_v28 = vsel %vm14078_vm15, %v2086_v27, -inf  ;;  %v2837_v29 = vrot.slane %v2836_v58, 4  ;;  %v2843_v12 = vsel %vm14078_vm15, %v2094_v18, -inf  ;;  %v2850_v54 = vsel %vm14078_vm15, %v2101_v42, -inf }
 0x18c   : > { %v2811_v44 = vrot.slane %v2810_v24, 2  ;;  %v2817_v14 = vmax.f32 %v2815_v61, %v2816_v16  ;;  %v2824_v4 = vmax.f32 %v2822_v36, %v2823_v30  ;;  %v2830_v37 = vrot.slane %v2829_v28, 4  ;;  %v1468_v61 = vpop.f32.mrf.mxu0 }
 0x18d   : > { %v2838_v15 = vmax.f32 %v2836_v58, %v2837_v29  ;;  %v2844_v39 = vrot.slane %v2843_v12, 4  ;;  %v2851_v25 = vrot.slane %v2850_v54, 4  ;;  %v2857_v47 = vsel %vm14078_vm15, %v2102_v45, -inf }
 0x18e   : > { %v2812_v52 = vmax.f32 %v2810_v24, %v2811_v44  ;;  %v2818_v32 = vrot.slane %v2817_v14, 2  ;;  %v2825_v0 = vrot.slane %v2824_v4, 2  ;;  %v2831_v20 = vmax.f32 %v2829_v28, %v2830_v37  ;;  %v1470_v37 = vpop.f32.mrf.mxu0 }
 0x18f   : > { %v2839_v22 = vrot.slane %v2838_v15, 2  ;;  %v2845_v27 = vmax.f32 %v2843_v12, %v2844_v39  ;;  %v2852_v34 = vmax.f32 %v2850_v54, %v2851_v25  ;;  %v2858_v21 = vrot.slane %v2857_v47, 4 }
 0x190   : > { %v2813_v18 = vrot.slane %v2812_v52, 1  ;;  %v2819_v7 = vmax.f32 %v2817_v14, %v2818_v32  ;;  %v2826_v42 = vmax.f32 %v2824_v4, %v2825_v0  ;;  %v2832_v6 = vrot.slane %v2831_v20, 2 }
 0x191   : > { %v2840_v30 = vmax.f32 %v2838_v15, %v2839_v22  ;;  %v2846_v36 = vrot.slane %v2845_v27, 2  ;;  %v2853_v58 = vrot.slane %v2852_v34, 2  ;;  %v2859_v16 = vmax.f32 %v2857_v47, %v2858_v21 }
 0x192   : > { %v10709_v29 = vmax.f32 %v10673_v19, %v2774_v3  ;;  %v2820_v44 = vrot.slane %v2819_v7, 1  ;;  %v2827_v24 = vrot.slane %v2826_v42, 1  ;;  %v2833_v45 = vmax.f32 %v2831_v20, %v2832_v6 }
 0x193   : > { %v10712_v28 = vmax.f32 %v10670_v49, %v2755_v9  ;;  %v2841_v12 = vrot.slane %v2840_v30, 1  ;;  %v2847_v39 = vmax.f32 %v2845_v27, %v2846_v36  ;;  %v2860_v54 = vrot.slane %v2859_v16, 2 }
 0x194   : > { %v10715_v4 = vmax.f32 %v2812_v52, %v2813_v18  ;;  %v2834_v15 = vrot.slane %v2833_v45, 1  ;;  %v14180_v22 = vmax.f32 %v10645_v31, 0.0  ;;  %v10719_v3 = vmax.f32 %v2852_v34, %v2853_v58  ;;  %v1229_v18 = vpop.f32.mrf.mxu1 }
 0x195   : > { %v2848_v19 = vrot.slane %v2847_v39, 1  ;;  %v10721_v25 = vmax.f32 %v2859_v16, %v2860_v54  ;;  %v10725_v49 = vmax.f32 %v2819_v7, %v2820_v44  ;;  %v10727_v9 = vmax.f32 %v2826_v42, %v2827_v24  ;;  %v1472_v42 = vpop.f32.mrf.mxu0 }
 0x196   : > { %14179 = vst [vmem:[#allocation37_spill] sm:$0xff] %v10715_v4  ;;  %v1745_v21 = vcombine.low %v14180_v22, %v1602_v62  ;;  %14181 = vst [vmem:[#allocation38_spill] sm:$0xff] %v10719_v3  ;;  %v14183_v6 = vmov %v14180_v22  ;;  %v1528_v47 = vadd.f32 %v1468_v61, %v10491_v2  ;;  %v10731_v32 = vmax.f32 %v2833_v45, %v2834_v15  ;;  %v1231_v54 = vpop.f32.mrf.mxu1 }
 0x197   : > { %14182 = vst [vmem:[#allocation39_spill] sm:$0xff] %v10721_v25  ;;  %v1746_v20 = vcombine.high %v14183_v6, %v1602_v62  ;;  %14184 = vst [vmem:[#allocation40_spill] sm:$0xff] %v10725_v49  ;;  %v10733_v0 = vmax.f32 %v2840_v30, %v2841_v12  ;;  %v1603_v27 = vmax.f32 %v10680_v23, 0.0  ;;  %v10737_v36 = vmax.f32 %v2847_v39, %v2848_v19 }
 0x198   : > { %14185 = vst [vmem:[#allocation41_spill] sm:$0xff] %v10727_v9  ;;  %v1753_v52 = vrot.slane %v1745_v21, %v10469_v38  ;;  %14186 = vst [vmem:[#allocation42_spill] sm:$0xff] %v10731_v32  ;;  %v1572_v62 = vadd.f32 %v10466_v41, %v1528_v47  ;;  %v1529_v30 = vadd.f32 %v1470_v37, %v10493_v50 }
 0x199   : > { %14187 = vst [vmem:[#allocation43_spill] sm:$0xff] %v10733_v0  ;;  %v1760_v34 = vrot.slane %v1746_v20, %v10469_v38  ;;  %14188 = vst [vmem:[#allocation44_spill] sm:$0xff] %v10737_v36  ;;  %v1530_v15 = vadd.f32 %v1472_v42, %v10495_v56 }
 0x19a   : > { %v1761_v31 = vcombine.high %v1753_v52, %v1753_v52  ;;  %v2109_v7 = vrot.slane %v1753_v52, %v10469_v38  ;;  %v1604_v24 = vmax.f32 %v1572_v62, 0.0  ;;  %v14192_v62 = vld [vmem:[#allocation14_spill] sm:$0xff] }
 0x19b   : > { %v1762_v2 = vcombine.high %v1760_v34, %v1760_v34  ;;  %v2125_v61 = vrot.slane %v1760_v34, %v10469_v38  ;;  %v10758_v56 = vadd.f32 %v1231_v54, %v14192_v62  ;;  %v1574_v54 = vadd.f32 %v10466_v41, %v1530_v15 }
 0x19c   : > { %v2110_v16 = vcombine.high %v2109_v7, %v2109_v7  ;;  %v2117_v44 = vrot.slane %v1761_v31, %v10469_v38  ;;  %v2864_v23 = vsel %vm14078_vm15, %v2109_v7, -inf  ;;  %v1763_v34 = vcombine.low %v1603_v27, %v1604_v24  ;;  %v14190_v31 = vld [vmem:[#allocation13_spill] sm:$0xff] }
 0x19d   : > { %v2126_v45 = vcombine.high %v2125_v61, %v2125_v61  ;;  %v2865_v12 = vrot.slane %v2864_v23, 4  ;;  %v2892_v39 = vsel %vm14078_vm15, %v2125_v61, -inf  ;;  %v10749_v21 = vrot.slane %v1762_v2, %v10469_v38  ;;  %14193 = vst [vmem:[#allocation14_spill] sm:$0xff] %v10758_v56 }
 0x19e   : > { %v2118_v22 = vcombine.high %v2117_v44, %v2117_v44  ;;  %v2871_v19 = vsel %vm14078_vm15, %v2110_v16, -inf  ;;  %v2878_v50 = vsel %vm14078_vm15, %v2117_v44, -inf  ;;  %v2893_v52 = vrot.slane %v2892_v39, 4  ;;  %v10775_v44 = vpop.f32.mrf.mxu0 }
 0x19f   : > { %14189 = vst [vmem:[#allocation45_spill] sm:$0xff] %v10749_v21  ;;  %v2866_v37 = vmax.f32 %v2864_v23, %v2865_v12  ;;  %v2872_v6 = vrot.slane %v2871_v19, 4  ;;  %v2879_v20 = vrot.slane %v2878_v50, 4  ;;  %v10755_v7 = vadd.f32 %v1229_v18, %v14190_v31 }
 0x1a0   : > { %v2885_v47 = vsel %vm14078_vm15, %v2118_v22, -inf  ;;  %v10761_v16 = vsel %vm14078_vm15, %v2126_v45, -inf  ;;  %v1764_v23 = vcombine.high %v1603_v27, %v1604_v24  ;;  %v1771_v12 = vrot.slane %v1763_v34, %v10469_v38 }
 0x1a1   : > { %14191 = vst [vmem:[#allocation13_spill] sm:$0xff] %v10755_v7  ;;  %v2867_v42 = vrot.slane %v2866_v37, 2  ;;  %v2873_v2 = vmax.f32 %v2871_v19, %v2872_v6  ;;  %v2886_v61 = vrot.slane %v2885_v47, 4  ;;  %v1573_v22 = vadd.f32 %v10461_v8, %v1529_v30 }
 0x1a2   : > { %v10767_v18 = vmax.f32 %v2878_v50, %v2879_v20  ;;  %v10769_v31 = vmax.f32 %v2892_v39, %v2893_v52  ;;  %v2900_v19 = vrot.slane %v10761_v16, 4  ;;  %v1778_v45 = vrot.slane %v1764_v23, %v10469_v38 }
 0x1a3   : > { %v2874_v58 = vrot.slane %v2873_v2, 2  ;;  %v1779_v6 = vcombine.high %v1771_v12, %v1771_v12  ;;  %v2141_v62 = vrot.slane %v1771_v12, %v10469_v38  ;;  %v10777_v27 = vmax.f32 %v2866_v37, %v2867_v42  ;;  %v10787_v42 = vpop.f32.mrf.mxu0 }
 0x1a4   : > { %14194 = vst [vmem:[#allocation46_spill] sm:$0xff] %v10767_v18  ;;  %14195 = vst [vmem:[#allocation47_spill] sm:$0xff] %v10769_v31  ;;  %v10779_v24 = vmax.f32 %v2885_v47, %v2886_v61  ;;  %v1605_v30 = vmax.f32 %v1573_v22, 0.0  ;;  %v1606_v50 = vmax.f32 %v1574_v54, 0.0  ;;  %v1780_v20 = vcombine.high %v1778_v45, %v1778_v45 }
 0x1a5   : > { %14196 = vst [vmem:[#allocation48_spill] sm:$0xff] %v10777_v27  ;;  %v2142_v39 = vcombine.high %v2141_v62, %v2141_v62  ;;  %v2149_v52 = vrot.slane %v1779_v6, %v10469_v38  ;;  %v2157_v15 = vrot.slane %v1778_v45, %v10469_v38  ;;  %v10783_v34 = vmax.f32 %v2873_v2, %v2874_v58 }
 0x1a6   : > { %14197 = vst [vmem:[#allocation49_spill] sm:$0xff] %v10779_v24  ;;  %v2920_v23 = vsel %vm14078_vm15, %v2141_v62, -inf  ;;  %v1781_v14 = vcombine.low %v1605_v30, %v1606_v50  ;;  %v1782_v12 = vcombine.high %v1605_v30, %v1606_v50  ;;  %v2165_v37 = vrot.slane %v1780_v20, %v10469_v38 }
 0x1a7   : > { %14198 = vst [vmem:[#allocation50_spill] sm:$0xff] %v10783_v34  ;;  %v2150_v36 = vcombine.high %v2149_v52, %v2149_v52  ;;  %v2158_v32 = vcombine.high %v2157_v15, %v2157_v15  ;;  %v2921_v47 = vrot.slane %v2920_v23, 4  ;;  %v2927_v61 = vsel %vm14078_vm15, %v2142_v39, -inf }
 0x1a8   : > { %v2934_v22 = vsel %vm14078_vm15, %v2149_v52, -inf  ;;  %v2948_v54 = vsel %vm14078_vm15, %v2157_v15, -inf  ;;  %v1789_v58 = vrot.slane %v1781_v14, %v10469_v38  ;;  %v2166_v2 = vcombine.high %v2165_v37, %v2165_v37  ;;  %v10796_v52 = vpop.f32.mrf.mxu0 }
 0x1a9   : > { %v2922_v45 = vmax.f32 %v2920_v23, %v2921_v47  ;;  %v2928_v6 = vrot.slane %v2927_v61, 4  ;;  %v2935_v62 = vrot.slane %v2934_v22, 4  ;;  %v2941_v30 = vsel %vm14078_vm15, %v2150_v36, -inf }
 0x1aa   : > { %v2949_v50 = vrot.slane %v2948_v54, 4  ;;  %v2955_v20 = vsel %vm14078_vm15, %v2158_v32, -inf  ;;  %v2962_v49 = vsel %vm14078_vm15, %v2165_v37, -inf  ;;  %v2942_v0 = vrot.slane %v2941_v30, 4 }
 0x1ab   : > { %v2923_v24 = vrot.slane %v2922_v45, 2  ;;  %v2929_v25 = vmax.f32 %v2927_v61, %v2928_v6  ;;  %v2936_v39 = vmax.f32 %v2934_v22, %v2935_v62  ;;  %v2956_v9 = vrot.slane %v2955_v20, 4  ;;  %v1482_v6 = vpop.f32.mrf.mxu0 }
 0x1ac   : > { %v2950_v15 = vmax.f32 %v2948_v54, %v2949_v50  ;;  %v2963_v14 = vrot.slane %v2962_v49, 4  ;;  %v2969_v23 = vsel %vm14078_vm15, %v2166_v2, -inf  ;;  %v2943_v36 = vmax.f32 %v2941_v30, %v2942_v0 }
 0x1ad   : > { %v2924_v47 = vmax.f32 %v2922_v45, %v2923_v24  ;;  %v2930_v4 = vrot.slane %v2929_v25, 2  ;;  %v2937_v21 = vrot.slane %v2936_v39, 2  ;;  %v2957_v18 = vmax.f32 %v2955_v20, %v2956_v9 }
 0x1ae   : > { %v2951_v31 = vrot.slane %v2950_v15, 2  ;;  %v2964_v32 = vmax.f32 %v2962_v49, %v2963_v14  ;;  %v2970_v27 = vrot.slane %v2969_v23, 4  ;;  %v2944_v22 = vrot.slane %v2943_v36, 2 }
 0x1af   : > { %v2925_v37 = vrot.slane %v2924_v47, 1  ;;  %v2931_v3 = vmax.f32 %v2929_v25, %v2930_v4  ;;  %v2938_v61 = vmax.f32 %v2936_v39, %v2937_v21  ;;  %v2958_v56 = vrot.slane %v2957_v18, 2 }
 0x1b0   : > { %v2952_v62 = vmax.f32 %v2950_v15, %v2951_v31  ;;  %v2965_v54 = vrot.slane %v2964_v32, 2  ;;  %v2971_v50 = vmax.f32 %v2969_v23, %v2970_v27  ;;  %v10800_v7 = vmax.f32 %v10761_v16, %v2900_v19  ;;  %v1486_v27 = vpop.f32.mrf.mxu0 }
 0x1b1   : > { %v2932_v24 = vrot.slane %v2931_v3, 1  ;;  %v2939_v2 = vrot.slane %v2938_v61, 1  ;;  %v2945_v45 = vmax.f32 %v2943_v36, %v2944_v22  ;;  %v2959_v30 = vmax.f32 %v2957_v18, %v2958_v56 }
 0x1b2   : > { %14199 = vst [vmem:[#allocation51_spill] sm:$0xff] %v10800_v7  ;;  %v2953_v0 = vrot.slane %v2952_v62, 1  ;;  %v2972_v9 = vrot.slane %v2971_v50, 2  ;;  %v1531_v49 = vadd.f32 %v10775_v44, %v10497_v35  ;;  %v10805_v25 = vmax.f32 %v2924_v47, %v2925_v37  ;;  %v1488_v37 = vpop.f32.mrf.mxu0 }
 0x1b3   : > { %v2946_v21 = vrot.slane %v2945_v45, 1  ;;  %v1796_v31 = vrot.slane %v1782_v12, %v10469_v38  ;;  %v10808_v20 = vmax.f32 %v2931_v3, %v2932_v24  ;;  %v10810_v16 = vmax.f32 %v2938_v61, %v2939_v2 }
 0x1b4   : > { %14200 = vst [vmem:[#allocation52_spill] sm:$0xff] %v10805_v25  ;;  %v10812_v19 = vmax.f32 %v2964_v32, %v2965_v54  ;;  %v1797_v39 = vcombine.high %v1789_v58, %v1789_v58  ;;  %v10814_v56 = vmax.f32 %v2952_v62, %v2953_v0  ;;  %v2173_v35 = vrot.slane %v1789_v58, %v10469_v38 }
 0x1b5   : > { %14201 = vst [vmem:[#allocation53_spill] sm:$0xff] %v10808_v20  ;;  %14202 = vst [vmem:[#allocation54_spill] sm:$0xff] %v10810_v16  ;;  %v1798_v18 = vcombine.high %v1796_v31, %v1796_v31  ;;  %v2189_v44 = vrot.slane %v1796_v31, %v10469_v38  ;;  %v10818_v15 = vmax.f32 %v2945_v45, %v2946_v21  ;;  %v2960_v14 = vrot.slane %v2959_v30, 1 }
 0x1b6   : > { %14203 = vst [vmem:[#allocation55_spill] sm:$0xff] %v10814_v56  ;;  %v10820_v23 = vmax.f32 %v2971_v50, %v2972_v9  ;;  %v2181_v3 = vrot.slane %v1797_v39, %v10469_v38  ;;  %v2174_v12 = vcombine.high %v2173_v35, %v2173_v35  ;;  %v2976_v32 = vsel %vm14078_vm15, %v2173_v35, -inf }
 0x1b7   : > { %14204 = vst [vmem:[#allocation56_spill] sm:$0xff] %v10818_v15  ;;  %v2190_v47 = vcombine.high %v2189_v44, %v2189_v44  ;;  %v10824_v36 = vrot.slane %v1798_v18, %v10469_v38  ;;  %v2977_v22 = vrot.slane %v2976_v32, 4  ;;  %v3004_v62 = vsel %vm14078_vm15, %v2189_v44, -inf  ;;  %v1490_v44 = vpop.f32.mrf.mxu0 }
 0x1b8   : > { %14205 = vst [vmem:[#allocation57_spill] sm:$0xff] %v10820_v23  ;;  %v2182_v61 = vcombine.high %v2181_v3, %v2181_v3  ;;  %v2990_v58 = vsel %vm14078_vm15, %v2181_v3, -inf  ;;  %v2983_v54 = vsel %vm14078_vm15, %v2174_v12, -inf  ;;  %v3005_v24 = vrot.slane %v3004_v62, 4 }
 0x1b9   : > { %v2991_v50 = vrot.slane %v2990_v58, 4  ;;  %v1575_v2 = vadd.f32 %v10461_v8, %v1531_v49  ;;  %v2978_v45 = vmax.f32 %v2976_v32, %v2977_v22  ;;  %v2984_v0 = vrot.slane %v2983_v54, 4 }
 0x1ba   : > { %v2997_v9 = vsel %vm14078_vm15, %v2182_v61, -inf  ;;  %v3011_v21 = vsel %vm14078_vm15, %v2190_v47, -inf  ;;  %v10833_v31 = vmax.f32 %v2959_v30, %v2960_v14  ;;  %v10840_v4 = vmax.f32 %v3004_v62, %v3005_v24 }
 0x1bb   : > { %v10838_v35 = vmax.f32 %v2990_v58, %v2991_v50  ;;  %v2985_v3 = vmax.f32 %v2983_v54, %v2984_v0  ;;  %v2998_v12 = vrot.slane %v2997_v9, 4  ;;  %v1532_v49 = vadd.f32 %v10787_v42, %v10499_v57  ;;  %v1492_v42 = vpop.f32.mrf.mxu0 }
 0x1bc   : > { %14206 = vst [vmem:[#allocation58_spill] sm:$0xff] %v10833_v31  ;;  %v2979_v32 = vrot.slane %v2978_v45, 2  ;;  %v3012_v61 = vrot.slane %v3011_v21, 4  ;;  %v1533_v30 = vadd.f32 %v10796_v52, %v10502_v1  ;;  %v1534_v14 = vadd.f32 %v1482_v6, %v10505_v51 }
 0x1bd   : > { %v2986_v47 = vrot.slane %v2985_v3, 2  ;;  %v1607_v22 = vmax.f32 %v1575_v2, 0.0  ;;  %v1576_v58 = vadd.f32 %v10466_v41, %v1532_v49  ;;  %v1535_v50 = vadd.f32 %v1486_v27, %v10507_v13 }
 0x1be   : > { %v1577_v54 = vadd.f32 %v10461_v8, %v1533_v30  ;;  %v1578_v62 = vadd.f32 %v10466_v41, %v1534_v14  ;;  %v1536_v24 = vadd.f32 %v1488_v37, %v10509_v60  ;;  %v1537_v57 = vadd.f32 %v1490_v44, %v10513_v11 }
 0x1bf   : > { %v10853_v0 = vmax.f32 %v2985_v3, %v2986_v47  ;;  %v10855_v1 = vmax.f32 %v2997_v9, %v2998_v12  ;;  %v1608_v51 = vmax.f32 %v1576_v58, 0.0  ;;  %v1579_v52 = vadd.f32 %v10461_v8, %v1535_v50 }
 0x1c0   : > { %v10858_v6 = vmax.f32 %v3011_v21, %v3012_v61  ;;  %v1609_v2 = vmax.f32 %v1577_v54, 0.0  ;;  %v1610_v13 = vmax.f32 %v1578_v62, 0.0  ;;  %v1580_v27 = vadd.f32 %v10466_v41, %v1536_v24 }
 0x1c1   : > { %14207 = vst [vmem:[#allocation59_spill] sm:$0xff] %v10853_v0  ;;  %14208 = vst [vmem:[#allocation60_spill] sm:$0xff] %v10855_v1  ;;  %v1799_v49 = vcombine.low %v1607_v22, %v1608_v51  ;;  %v1800_v30 = vcombine.high %v1607_v22, %v1608_v51  ;;  %v10862_v60 = vadd.f32 %v10461_v8, %v1537_v57  ;;  %v1611_v9 = vmax.f32 %v1579_v52, 0.0 }
 0x1c2   : > { %14209 = vst [vmem:[#allocation61_spill] sm:$0xff] %v10858_v6  ;;  %v1538_v11 = vadd.f32 %v1492_v42, %v10515_v10  ;;  %v1817_v37 = vcombine.low %v1609_v2, %v1610_v13  ;;  %v1818_v44 = vcombine.high %v1609_v2, %v1610_v13  ;;  %v1612_v3 = vmax.f32 %v1580_v27, 0.0 }
 0x1c3   : > { %v10865_v12 = vmax.f32 %v2978_v45, %v2979_v32  ;;  %v1807_v61 = vrot.slane %v1799_v49, %v10469_v38  ;;  %v1814_v14 = vrot.slane %v1800_v30, %v10469_v38 }
 0x1c4   : > { %v1825_v47 = vrot.slane %v1817_v37, %v10469_v38  ;;  %v10872_v22 = vrot.slane %v1818_v44, %v10469_v38  ;;  %v10874_v58 = vcombine.low %v1611_v9, %v1612_v3  ;;  %v10876_v10 = vcombine.high %v1611_v9, %v1612_v3 }
 0x1c5   : > { %v1815_v50 = vcombine.high %v1807_v61, %v1807_v61  ;;  %v1816_v54 = vcombine.high %v1814_v14, %v1814_v14  ;;  %v2205_v45 = vrot.slane %v1807_v61, %v10469_v38  ;;  %v2221_v32 = vrot.slane %v1814_v14, %v10469_v38 }
 0x1c6   : > { %v1833_v62 = vcombine.high %v1825_v47, %v1825_v47  ;;  %v10881_v24 = vrot.slane %v1825_v47, %v10469_v38  ;;  %v10885_v42 = vadd.f32 %v10466_v41, %v1538_v11  ;;  %v10896_v37 = vrot.slane %v10872_v22, %v10469_v38 }
 0x1c7   : > { %v2206_v51 = vcombine.high %v2205_v45, %v2205_v45  ;;  %v2213_v52 = vrot.slane %v1815_v50, %v10469_v38  ;;  %v2222_v2 = vcombine.high %v2221_v32, %v2221_v32  ;;  %v2229_v13 = vrot.slane %v1816_v54, %v10469_v38 }
 0x1c8   : > { %v3032_v27 = vsel %vm14078_vm15, %v2205_v45, -inf  ;;  %v3060_v49 = vsel %vm14078_vm15, %v2221_v32, -inf  ;;  %v10892_v30 = vrot.slane %v1833_v62, %v10469_v38 }
 0x1c9   : > { %v2214_v44 = vcombine.high %v2213_v52, %v2213_v52  ;;  %v2230_v11 = vcombine.high %v2229_v13, %v2229_v13  ;;  %v3033_v9 = vrot.slane %v3032_v27, 4  ;;  %v3039_v3 = vsel %vm14078_vm15, %v2206_v51, -inf }
 0x1ca   : > { %v3040_v61 = vrot.slane %v3039_v3, 4  ;;  %v3046_v14 = vsel %vm14078_vm15, %v2213_v52, -inf  ;;  %v3061_v47 = vrot.slane %v3060_v49, 4  ;;  %v3067_v50 = vsel %vm14078_vm15, %v2222_v2, -inf }
 0x1cb   : > { %v3034_v54 = vmax.f32 %v3032_v27, %v3033_v9  ;;  %v3047_v45 = vrot.slane %v3046_v14, 4  ;;  %v3053_v32 = vsel %vm14078_vm15, %v2214_v44, -inf  ;;  %v3068_v62 = vrot.slane %v3067_v50, 4 }
 0x1cc   : > { %v3041_v18 = vmax.f32 %v3039_v3, %v3040_v61  ;;  %v3054_v21 = vrot.slane %v3053_v32, 4  ;;  %v3062_v39 = vmax.f32 %v3060_v49, %v3061_v47  ;;  %v3074_v57 = vsel %vm14078_vm15, %v2229_v13, -inf }
 0x1cd   : > { %v3035_v31 = vrot.slane %v3034_v54, 2  ;;  %v3048_v15 = vmax.f32 %v3046_v14, %v3047_v45  ;;  %v3069_v20 = vmax.f32 %v3067_v50, %v3068_v62  ;;  %v3075_v51 = vrot.slane %v3074_v57, 4 }
 0x1ce   : > { %v3042_v6 = vrot.slane %v3041_v18, 2  ;;  %v3055_v1 = vmax.f32 %v3053_v32, %v3054_v21  ;;  %v3063_v52 = vrot.slane %v3062_v39, 2  ;;  %v3081_v0 = vsel %vm14078_vm15, %v2230_v11, -inf }
 0x1cf   : > { %v3036_v2 = vmax.f32 %v3034_v54, %v3035_v31  ;;  %v3049_v27 = vrot.slane %v3048_v15, 2  ;;  %v3070_v9 = vrot.slane %v3069_v20, 2  ;;  %v3076_v23 = vmax.f32 %v3074_v57, %v3075_v51 }
 0x1d0   : > { %v3043_v44 = vmax.f32 %v3041_v18, %v3042_v6  ;;  %v3056_v7 = vrot.slane %v3055_v1, 2  ;;  %v3064_v3 = vmax.f32 %v3062_v39, %v3063_v52  ;;  %v3082_v61 = vrot.slane %v3081_v0, 4 }
 0x1d1   : > { %v3037_v49 = vrot.slane %v3036_v2, 1  ;;  %v3050_v47 = vmax.f32 %v3048_v15, %v3049_v27  ;;  %v3071_v13 = vmax.f32 %v3069_v20, %v3070_v9  ;;  %v3077_v34 = vrot.slane %v3076_v23, 2 }
 0x1d2   : > { %v3044_v14 = vrot.slane %v3043_v44, 1  ;;  %v3057_v50 = vmax.f32 %v3055_v1, %v3056_v7  ;;  %v3065_v45 = vrot.slane %v3064_v3, 1  ;;  %v3083_v62 = vmax.f32 %v3081_v0, %v3082_v61 }
 0x1d3   : > { %v3051_v21 = vrot.slane %v3050_v47, 1  ;;  %v3072_v32 = vrot.slane %v3071_v13, 1  ;;  %v3078_v56 = vmax.f32 %v3076_v23, %v3077_v34  ;;  %v2238_v31 = vcombine.high %v10881_v24, %v10881_v24 }
 0x1d4   : > { %v3058_v11 = vrot.slane %v3057_v50, 1  ;;  %v3084_v57 = vrot.slane %v3083_v62, 2  ;;  %v1834_v39 = vcombine.high %v10872_v22, %v10872_v22  ;;  %v10909_v15 = vmax.f32 %v3036_v2, %v3037_v49 }
 0x1d5   : > { %v10911_v20 = vmax.f32 %v3043_v44, %v3044_v14  ;;  %v10913_v7 = vmax.f32 %v3064_v3, %v3065_v45  ;;  %v2246_v0 = vcombine.high %v10892_v30, %v10892_v30  ;;  %v10917_v34 = vmax.f32 %v3050_v47, %v3051_v21 }
 0x1d6   : > { %14210 = vst [vmem:[#allocation62_spill] sm:$0xff] %v10909_v15  ;;  %v10919_v23 = vmax.f32 %v3071_v13, %v3072_v32  ;;  %v3079_v1 = vrot.slane %v3078_v56, 1  ;;  %v2254_v6 = vcombine.high %v10896_v37, %v10896_v37  ;;  %v10923_v22 = vmax.f32 %v3057_v50, %v3058_v11 }
 0x1d7   : > { %14211 = vst [vmem:[#allocation63_spill] sm:$0xff] %v10911_v20  ;;  %14212 = vst [vmem:[#allocation64_spill] sm:$0xff] %v10913_v7  ;;  %v3088_v54 = vsel %vm14078_vm15, %v10881_v24, -inf  ;;  %v3095_v51 = vsel %vm14078_vm15, %v2238_v31, -inf  ;;  %v3102_v52 = vsel %vm14078_vm15, %v10892_v30, -inf  ;;  %v10930_v2 = vmax.f32 %v3083_v62, %v3084_v57 }
 0x1d8   : > { %14213 = vst [vmem:[#allocation65_spill] sm:$0xff] %v10917_v34  ;;  %14214 = vst [vmem:[#allocation66_spill] sm:$0xff] %v10919_v23  ;;  %v10933_v27 = vrot.slane %v1834_v39, %v10469_v38  ;;  %v3089_v9 = vrot.slane %v3088_v54, 4  ;;  %v3096_v44 = vrot.slane %v3095_v51, 4  ;;  %v3103_v3 = vrot.slane %v3102_v52, 4 }
 0x1d9   : > { %14215 = vst [vmem:[#allocation67_spill] sm:$0xff] %v10923_v22  ;;  %14216 = vst [vmem:[#allocation68_spill] sm:$0xff] %v10930_v2  ;;  %v3109_v61 = vsel %vm14078_vm15, %v2246_v0, -inf  ;;  %v3116_v49 = vsel %vm14078_vm15, %v10896_v37, -inf  ;;  %v3123_v24 = vsel %vm14078_vm15, %v2254_v6, -inf  ;;  %v10939_v30 = vmax.f32 %v3078_v56, %v3079_v1 }
 0x1da   : > { %14217 = vst [vmem:[#allocation69_spill] sm:$0xff] %v10933_v27  ;;  %v3090_v47 = vmax.f32 %v3088_v54, %v3089_v9  ;;  %v3097_v13 = vmax.f32 %v3095_v51, %v3096_v44  ;;  %v3110_v14 = vrot.slane %v3109_v61, 4  ;;  %v3117_v50 = vrot.slane %v3116_v49, 4 }
 0x1db   : > { %14218 = vst [vmem:[#allocation70_spill] sm:$0xff] %v10939_v30  ;;  %v10941_v45 = vmax.f32 %v3102_v52, %v3103_v3  ;;  %v3124_v62 = vrot.slane %v3123_v24, 4  ;;  %v1843_v21 = vrot.slane %v10874_v58, %v10469_v38  ;;  %v10949_v37 = vsel %vm14078_vm15, %v10933_v27, -inf }
 0x1dc   : > { %v3091_v32 = vrot.slane %v3090_v47, 2  ;;  %v3098_v31 = vrot.slane %v3097_v13, 2  ;;  %v10945_v11 = vmax.f32 %v3116_v49, %v3117_v50  ;;  %v10954_v39 = vmax.f32 %v3109_v61, %v3110_v14 }
 0x1dd   : > { %v1850_v0 = vrot.slane %v10876_v10, %v10469_v38  ;;  %v10961_v6 = vmax.f32 %v3123_v24, %v3124_v62  ;;  %v1851_v54 = vcombine.high %v1843_v21, %v1843_v21  ;;  %v2269_v9 = vrot.slane %v1843_v21, %v10469_v38 }
 0x1de   : > { %14219 = vst [vmem:[#allocation71_spill] sm:$0xff] %v10954_v39  ;;  %v10958_v1 = vmax.f32 %v3090_v47, %v3091_v32  ;;  %v10966_v3 = vmax.f32 %v3097_v13, %v3098_v31  ;;  %v1614_v49 = vmax.f32 %v10885_v42, 0.0 }
 0x1df   : > { %14220 = vst [vmem:[#allocation72_spill] sm:$0xff] %v10961_v6  ;;  %v1852_v52 = vcombine.high %v1850_v0, %v1850_v0  ;;  %v2285_v44 = vrot.slane %v1850_v0, %v10469_v38  ;;  %v2277_v10 = vrot.slane %v1851_v54, %v10469_v38  ;;  %v2270_v47 = vcombine.high %v2269_v9, %v2269_v9 }
 0x1e0   : > { %14221 = vst [vmem:[#allocation73_spill] sm:$0xff] %v10966_v3  ;;  %v3144_v50 = vsel %vm14078_vm15, %v2269_v9, -inf  ;;  %v3093_v62 = vrot.slane %v10958_v1, 1 }
 0x1e1   : > { %v2286_v14 = vcombine.high %v2285_v44, %v2285_v44  ;;  %v2293_v24 = vrot.slane %v1852_v52, %v10469_v38  ;;  %v2278_v32 = vcombine.high %v2277_v10, %v2277_v10  ;;  %v3145_v21 = vrot.slane %v3144_v50, 4 }
 0x1e2   : > { %v3158_v0 = vsel %vm14078_vm15, %v2277_v10, -inf  ;;  %v3151_v31 = vsel %vm14078_vm15, %v2270_v47, -inf  ;;  %v3172_v54 = vsel %vm14078_vm15, %v2285_v44, -inf }
 0x1e3   : > { %v2294_v13 = vcombine.high %v2293_v24, %v2293_v24  ;;  %v3159_v56 = vrot.slane %v3158_v0, 4  ;;  %v3146_v57 = vmax.f32 %v3144_v50, %v3145_v21  ;;  %v3152_v42 = vrot.slane %v3151_v31, 4 }
 0x1e4   : > { %v3165_v51 = vsel %vm14078_vm15, %v2278_v32, -inf  ;;  %v3173_v61 = vrot.slane %v3172_v54, 4  ;;  %v3179_v9 = vsel %vm14078_vm15, %v2286_v14, -inf  ;;  %v3186_v18 = vsel %vm14078_vm15, %v2293_v24, -inf }
 0x1e5   : > { %v3160_v52 = vmax.f32 %v3158_v0, %v3159_v56  ;;  %v3166_v58 = vrot.slane %v3165_v51, 4  ;;  %v3147_v23 = vrot.slane %v3146_v57, 2  ;;  %v3153_v22 = vmax.f32 %v3151_v31, %v3152_v42 }
 0x1e6   : > { %v3174_v10 = vmax.f32 %v3172_v54, %v3173_v61  ;;  %v3180_v20 = vrot.slane %v3179_v9, 4  ;;  %v3187_v6 = vrot.slane %v3186_v18, 4  ;;  %v3193_v44 = vsel %vm14078_vm15, %v2294_v13, -inf }
 0x1e7   : > { %v3161_v27 = vrot.slane %v3160_v52, 2  ;;  %v3167_v47 = vmax.f32 %v3165_v51, %v3166_v58  ;;  %v3148_v50 = vmax.f32 %v3146_v57, %v3147_v23  ;;  %v3154_v21 = vrot.slane %v3153_v22, 2 }
 0x1e8   : > { %v3175_v39 = vrot.slane %v3174_v10, 2  ;;  %v3181_v32 = vmax.f32 %v3179_v9, %v3180_v20  ;;  %v3188_v0 = vmax.f32 %v3186_v18, %v3187_v6  ;;  %v3194_v30 = vrot.slane %v3193_v44, 4 }
 0x1e9   : > { %v3162_v2 = vmax.f32 %v3160_v52, %v3161_v27  ;;  %v3168_v56 = vrot.slane %v3167_v47, 2  ;;  %v3149_v14 = vrot.slane %v3148_v50, 1  ;;  %v3155_v7 = vmax.f32 %v3153_v22, %v3154_v21 }
 0x1ea   : > { %v3176_v24 = vmax.f32 %v3174_v10, %v3175_v39  ;;  %v3182_v34 = vrot.slane %v3181_v32, 2  ;;  %v3189_v54 = vrot.slane %v3188_v0, 2  ;;  %v3195_v42 = vmax.f32 %v3193_v44, %v3194_v30 }
 0x1eb   : > { %v3163_v31 = vrot.slane %v3162_v2, 1  ;;  %v3169_v61 = vmax.f32 %v3167_v47, %v3168_v56  ;;  %v3156_v51 = vrot.slane %v3155_v7, 1  ;;  %v14222_v27 = vrot.slane %v10553_v63, 1 }
 0x1ec   : > { %v3177_v13 = vrot.slane %v3176_v24, 1  ;;  %v3183_v23 = vmax.f32 %v3181_v32, %v3182_v34  ;;  %v3190_v15 = vmax.f32 %v3188_v0, %v3189_v54  ;;  %v3196_v20 = vrot.slane %v3195_v42, 2 }
 0x1ed   : > { %v3170_v57 = vrot.slane %v3169_v61, 1  ;;  %v10985_v18 = vmax.f32 %v10553_v63, %v14222_v27  ;;  %v10988_v22 = vmax.f32 %v10958_v1, %v3093_v62  ;;  %v10990_v39 = vmax.f32 %v3148_v50, %v3149_v14 }
 0x1ee   : > { %v3184_v6 = vrot.slane %v3183_v23, 1  ;;  %v14225_v30 = vmax.f32 %v10862_v60, 0.0  ;;  %v10994_v9 = vmax.f32 %v3155_v7, %v3156_v51  ;;  %v10996_v34 = vmax.f32 %v3162_v2, %v3163_v31 }
 0x1ef   : > { %14223 = vst [vmem:[#allocation74_spill] sm:$0xff] %v10985_v18  ;;  %14224 = vst [vmem:[#allocation75_spill] sm:$0xff] %v10988_v22  ;;  %v3191_v10 = vrot.slane %v3190_v15, 1  ;;  %v11000_v21 = vmax.f32 %v3169_v61, %v3170_v57  ;;  %v11002_v63 = vmax.f32 %v3176_v24, %v3177_v13  ;;  %v2657_v62 = vrot.slane %v10587_v17, 2 }
 0x1f0   : > { %v1853_v52 = vcombine.low %v14225_v30, %v1614_v49  ;;  %14226 = vst [vmem:[#allocation76_spill] sm:$0xff] %v10994_v9  ;;  %v14227_v47 = vmov %v14225_v30  ;;  %v11006_v50 = vmax.f32 %v3183_v23, %v3184_v6  ;;  %v11008_v32 = vmax.f32 %v3195_v42, %v3196_v20 }
 0x1f1   : > { %v1854_v44 = vcombine.high %v14227_v47, %v1614_v49  ;;  %14228 = vst [vmem:[#allocation77_spill] sm:$0xff] %v11000_v21  ;;  %v2671_v2 = vrot.slane %v10589_v59, 2  ;;  %v11012_v56 = vmax.f32 %v3190_v15, %v3191_v10  ;;  %v2645_v0 = vrot.slane %v10602_v53, 1 }
 0x1f2   : > { %v1861_v1 = vrot.slane %v1853_v52, %v10469_v38  ;;  %14229 = vst [vmem:[#allocation78_spill] sm:$0xff] %v11006_v50  ;;  %14230 = vst [vmem:[#allocation79_spill] sm:$0xff] %v11008_v32  ;;  %v2658_v31 = vmax.f32 %v10587_v17, %v2657_v62  ;;  %v2682_v15 = vsel %vm14078_vm15, %v10576_v5, -inf  ;;  %v2783_v58 = vrot.slane %v10685_v43, 2 }
 0x1f3   : > { %v1868_v7 = vrot.slane %v1854_v44, %v10469_v38  ;;  %14231 = vst [vmem:[#allocation80_spill] sm:$0xff] %v11012_v56  ;;  %v2672_v61 = vmax.f32 %v10589_v59, %v2671_v2 }
 0x1f4   : > { %v1869_v60 = vcombine.high %v1861_v1, %v1861_v1  ;;  %v2301_v49 = vrot.slane %v1861_v1, %v10469_v38  ;;  %v2659_v47 = vrot.slane %v2658_v31, 1 }
 0x1f5   : > { %v1870_v14 = vcombine.high %v1868_v7, %v1868_v7  ;;  %v2317_v24 = vrot.slane %v1868_v7, %v10469_v38 }
 0x1f6   : > { %v2302_v54 = vcombine.high %v2301_v49, %v2301_v49  ;;  %v2309_v42 = vrot.slane %v1869_v60, %v10469_v38  ;;  %v3200_v51 = vsel %vm14078_vm15, %v2301_v49, -inf }
 0x1f7   : > { %v2318_v13 = vcombine.high %v2317_v24, %v2317_v24  ;;  %v11024_v23 = vrot.slane %v1870_v14, %v10469_v38  ;;  %v3201_v57 = vrot.slane %v3200_v51, 4  ;;  %v3228_v20 = vsel %vm14078_vm15, %v2317_v24, -inf }
 0x1f8   : > { %v2310_v27 = vcombine.high %v2309_v42, %v2309_v42  ;;  %v3207_v17 = vsel %vm14078_vm15, %v2302_v54, -inf  ;;  %v3214_v59 = vsel %vm14078_vm15, %v2309_v42, -inf  ;;  %v3229_v6 = vrot.slane %v3228_v20, 4 }
 0x1f9   : > { %14232 = vst [vmem:[#allocation81_spill] sm:$0xff] %v11024_v23  ;;  %v3202_v30 = vmax.f32 %v3200_v51, %v3201_v57  ;;  %v3208_v52 = vrot.slane %v3207_v17, 4  ;;  %v3215_v10 = vrot.slane %v3214_v59, 4  ;;  %v3235_v62 = vsel %vm14078_vm15, %v2318_v13, -inf }
 0x1fa   : > { %v3221_v44 = vsel %vm14078_vm15, %v2310_v27, -inf  ;;  %v11030_v1 = vmax.f32 %v3228_v20, %v3229_v6  ;;  %v11035_v7 = vsel %vm14078_vm15, %v11024_v23, -inf  ;;  %v3236_v42 = vrot.slane %v3235_v62, 4 }
 0x1fb   : > { %v3203_v2 = vrot.slane %v3202_v30, 2  ;;  %v3209_v60 = vmax.f32 %v3207_v17, %v3208_v52  ;;  %v11037_v49 = vmax.f32 %v3214_v59, %v3215_v10  ;;  %v3222_v14 = vrot.slane %v3221_v44, 4 }
 0x1fc   : > { %v11043_v51 = vmax.f32 %v10602_v53, %v2645_v0  ;;  %v11047_v6 = vmax.f32 %v2658_v31, %v2659_v47  ;;  %v2673_v17 = vrot.slane %v2672_v61, 1  ;;  %v2683_v59 = vrot.slane %v2682_v15, 4 }
 0x1fd   : > { %v3204_v57 = vmax.f32 %v3202_v30, %v3203_v2  ;;  %v3210_v13 = vrot.slane %v3209_v60, 2  ;;  %v2743_v52 = vrot.slane %v10626_v55, 1  ;;  %v11051_v24 = vmax.f32 %v3221_v44, %v3222_v14 }
 0x1fe   : > { %14233 = vst [vmem:[#allocation82_spill] sm:$0xff] %v11043_v51  ;;  %14234 = vst [vmem:[#allocation83_spill] sm:$0xff] %v11047_v6  ;;  %v11053_v54 = vmax.f32 %v3235_v62, %v3236_v42  ;;  %v2769_v53 = vrot.slane %v10690_v46, 2  ;;  %v2684_v2 = vmax.f32 %v2682_v15, %v2683_v59  ;;  %v11059_v31 = vmax.f32 %v2672_v61, %v2673_v17  ;;  %v14240_v59 = vld [vmem:[#allocation22_spill] sm:$0xff] }
 0x1ff   : > { %14235 = vst [vmem:[#allocation84_spill] sm:$0xff] %v11051_v24  ;;  %v3205_v0 = vrot.slane %v3204_v57, 1  ;;  %v11056_v30 = vmax.f32 %v3209_v60, %v3210_v13  ;;  %v11062_v47 = vmax.f32 %v10626_v55, %v2743_v52  ;;  %v2757_v27 = vrot.slane %v10712_v28, 1  ;;  %v1496_v60 = vpop.f32.mrf.mxu0 }
 0x200   : > { %14236 = vst [vmem:[#allocation85_spill] sm:$0xff] %v11053_v54  ;;  %14238 = vst [vmem:[#allocation87_spill] sm:$0xff] %v11059_v31  ;;  %v2770_v44 = vmax.f32 %v10690_v46, %v2769_v53  ;;  %v2685_v14 = vrot.slane %v2684_v2, 2  ;;  %v2784_v62 = vmax.f32 %v10685_v43, %v2783_v58  ;;  %v2794_v42 = vsel %vm14078_vm15, %v10665_v26, -inf }
 0x201   : > { %14237 = vst [vmem:[#allocation86_spill] sm:$0xff] %v11056_v30  ;;  %14239 = vst [vmem:[#allocation88_spill] sm:$0xff] %v11062_v47  ;;  %v2795_v13 = vrot.slane %v2794_v42, 4  ;;  %v3609_v61 = vsel %vm14077_vm0, %v10559_v33, %v10548_v40  ;;  %v11074_v52 = vmax.f32 %v3204_v57, %v3205_v0 }
 0x202   : > { %v2771_v15 = vrot.slane %v2770_v44, 1  ;;  %v2686_v55 = vmax.f32 %v2684_v2, %v2685_v14  ;;  %v2785_v17 = vrot.slane %v2784_v62, 1  ;;  %v3611_v46 = vsel %vm3610_vm1, %v14240_v59, %v3609_v61  ;;  %v1498_v2 = vpop.f32.mrf.mxu0  ;;  %v14248_v59 = vld [vmem:[#allocation34_spill] sm:$0xff] }
 0x203   : > { %14241 = vst [vmem:[#allocation89_spill] sm:$0xff] %v11074_v52  ;;  %v2796_v43 = vmax.f32 %v2794_v42, %v2795_v13  ;;  %v3613_v58 = vsel %vm3612_vm3, %v10985_v18, %v3611_v46  ;;  %v11082_v14 = vmax.f32 %v10712_v28, %v2757_v27  ;;  %v14245_v13 = vld [vmem:[#allocation29_spill] sm:$0xff]  ;;  %v14246_v46 = vld [vmem:[#allocation32_spill] sm:$0xff]  ;;  %v14249_v27 = vld [vmem:[#allocation18_spill] sm:$0xff] }
 0x204   : > { %v2687_v20 = vrot.slane %v2686_v55, 1  ;;  %v3615_v10 = vsel %vm3614_vm5, %v11043_v51, %v3613_v58  ;;  %v11086_v0 = vmax.f32 %v2770_v44, %v2771_v15  ;;  %v11088_v42 = vmax.f32 %v2784_v62, %v2785_v17  ;;  %v14247_v18 = vld [vmem:[#allocation17_spill] sm:$0xff]  ;;  %v14251_v17 = vld [vmem:[#allocation26_spill] sm:$0xff] }
 0x205   : > { %14242 = vst [vmem:[#allocation90_spill] sm:$0xff] %v11082_v14  ;;  %v2797_v61 = vrot.slane %v2796_v43, 2  ;;  %v3617_v57 = vsel %vm3616_vm6, %v11047_v6, %v3615_v10  ;;  %v3629_v53 = vsel %vm14077_vm0, %v14246_v46, %v14245_v13  ;;  %v1539_v58 = vadd.f32 %v1496_v60, %v14247_v18  ;;  %v14258_v6 = vld [vmem:[#allocation28_spill] sm:$0xff] }
 0x206   : > { %14243 = vst [vmem:[#allocation91_spill] sm:$0xff] %v11086_v0  ;;  %14244 = vst [vmem:[#allocation92_spill] sm:$0xff] %v11088_v42  ;;  %v3630_v28 = vsel %vm3610_vm1, %v14248_v59, %v3629_v53  ;;  %v1540_v33 = vadd.f32 %v1498_v2, %v14249_v27  ;;  %v11097_v40 = vmax.f32 %v2686_v55, %v2687_v20  ;;  %v14252_v55 = vld [vmem:[#allocation25_spill] sm:$0xff] }
 0x207   : > { %v2798_v51 = vmax.f32 %v2796_v43, %v2797_v61  ;;  %v3619_v10 = vsel %vm3618_vm7, %v11059_v31, %v3617_v57  ;;  %v3631_v44 = vsel %vm3612_vm3, %v11062_v47, %v3630_v28  ;;  %v1583_v62 = vadd.f32 %v10461_v8, %v1539_v58  ;;  %v14255_v61 = vld [vmem:[#allocation27_spill] sm:$0xff] }
 0x208   : > { %14250 = vst [vmem:[#allocation17_spill] sm:$0xff] %v11097_v40  ;;  %v3632_v18 = vsel %vm3614_vm5, %v11082_v14, %v3631_v44  ;;  %v1584_v60 = vadd.f32 %v10466_v41, %v1540_v33  ;;  %v2664_v43 = vrot.slane %v14251_v17, 2  ;;  %v14253_v53 = vrot.slane %v14252_v55, 1 }
 0x209   : > { %v2799_v15 = vrot.slane %v2798_v51, 1  ;;  %v3633_v20 = vsel %vm3616_vm6, %v11086_v0, %v3632_v18  ;;  %v2678_v57 = vrot.slane %v14255_v61, 2  ;;  %v14256_v58 = vcombine.high %v10576_v5, %v10576_v5 }
 0x20a   : > { %v11113_v2 = vmax.f32 %v14252_v55, %v14253_v53  ;;  %v3634_v33 = vsel %vm3618_vm7, %v11088_v42, %v3633_v20  ;;  %v1615_v44 = vmax.f32 %v1583_v62, 0.0  ;;  %v1616_v31 = vmax.f32 %v1584_v60, 0.0 }
 0x20b   : > { %v2689_v28 = vsel %vm14078_vm15, %v14256_v58, -inf  ;;  %v11120_v27 = vmax.f32 %v2798_v51, %v2799_v15  ;;  %v3621_v18 = vsel %vm14080_vm8, %v11097_v40, %v3619_v10  ;;  %v14259_v55 = vrot.slane %v14258_v6, 1  ;;  %v14261_v10 = vld [vmem:[#allocation31_spill] sm:$0xff] }
 0x20c   : > { %14254 = vst [vmem:[#allocation18_spill] sm:$0xff] %v11113_v2  ;;  %v11132_v0 = vmax.f32 %v14251_v17, %v2664_v43  ;;  %v2690_v5 = vrot.slane %v2689_v28, 4  ;;  %v1871_v15 = vcombine.low %v1615_v44, %v1616_v31  ;;  %v1872_v58 = vcombine.high %v1615_v44, %v1616_v31 }
 0x20d   : > { %14257 = vst [vmem:[#allocation26_spill] sm:$0xff] %v11120_v27  ;;  %v11129_v53 = vmax.f32 %v14258_v6, %v14259_v55  ;;  %v3635_v51 = vsel %vm14080_vm8, %v11120_v27, %v3634_v33  ;;  %v11137_v62 = vmax.f32 %v14255_v61, %v2678_v57  ;;  %v14262_v40 = vrot.slane %v14261_v10, 1  ;;  %v14266_v61 = vld [vmem:[#allocation36_spill] sm:$0xff] }
 0x20e   : > { %v9437_v60 = vpack.i.bf16 %v3635_v51, %v3621_v18  ;;  %v2691_v20 = vmax.f32 %v2689_v28, %v2690_v5  ;;  %v2776_v6 = vrot.slane %v10709_v29, 2  ;;  %v1879_v17 = vrot.slane %v1871_v15, %v10469_v38  ;;  %v11175_v28 = vpop.f32.mrf.mxu0 }
 0x20f   : > { %14260 = vst [vmem:[#allocation25_spill] sm:$0xff] %v11129_v53  ;;  %v11142_v42 = vmax.f32 %v14261_v10, %v14262_v40  ;;  %v1886_v43 = vrot.slane %v1872_v58, %v10469_v38  ;;  %v14264_v33 = vrot.slane %v10700_v48, 1  ;;  %v2790_v57 = vrot.slane %v14266_v61, 2 }
 0x210   : > { %9438 = vrot.lane.b32.xlu0 %v9437_v60, %s9805_s14  ;;  %v2692_v40 = vrot.slane %v2691_v20, 2  ;;  %v11156_v44 = vmax.f32 %v10709_v29, %v2776_v6  ;;  %v14267_v18 = vcombine.high %v10665_v26, %v10665_v26  ;;  %v1887_v5 = vcombine.high %v1879_v17, %v1879_v17  ;;  %v11185_v46 = vpop.f32.mrf.mxu0 }
 0x211   : > { %14263 = vst [vmem:[#allocation27_spill] sm:$0xff] %v11142_v42  ;;  %v11150_v31 = vmax.f32 %v10700_v48, %v14264_v33  ;;  %v1888_v48 = vcombine.high %v1886_v43, %v1886_v43  ;;  %v2333_v51 = vrot.slane %v1879_v17, %v10469_v38  ;;  %v2349_v15 = vrot.slane %v1886_v43, %v10469_v38 }
 0x212   : > { %v11162_v55 = vsel %vm14078_vm15, %v14267_v18, -inf  ;;  %v11167_v60 = vmax.f32 %v2691_v20, %v2692_v40  ;;  %v11171_v29 = vmax.f32 %v14266_v61, %v2790_v57  ;;  %v2341_v26 = vrot.slane %v1887_v5, %v10469_v38  ;;  %v1506_v32 = vpop.f32.mrf.mxu0 }
 0x213   : > { %14265 = vst [vmem:[#allocation28_spill] sm:$0xff] %v11150_v31  ;;  %v2334_v6 = vcombine.high %v2333_v51, %v2333_v51  ;;  %v2350_v33 = vcombine.high %v2349_v15, %v2349_v15  ;;  %v2357_v18 = vrot.slane %v1888_v48, %v10469_v38  ;;  %v3256_v17 = vsel %vm14078_vm15, %v2333_v51, -inf }
 0x214   : > { %v3284_v43 = vsel %vm14078_vm15, %v2349_v15, -inf  ;;  %v2342_v10 = vcombine.high %v2341_v26, %v2341_v26  ;;  %v3257_v61 = vrot.slane %v3256_v17, 4  ;;  %v3270_v5 = vsel %vm14078_vm15, %v2341_v26, -inf }
 0x215   : > { %v2358_v58 = vcombine.high %v2357_v18, %v2357_v18  ;;  %v3263_v57 = vsel %vm14078_vm15, %v2334_v6, -inf  ;;  %v3285_v14 = vrot.slane %v3284_v43, 4  ;;  %v3291_v48 = vsel %vm14078_vm15, %v2350_v33, -inf }
 0x216   : > { %v3264_v27 = vrot.slane %v3263_v57, 4  ;;  %v3258_v47 = vmax.f32 %v3256_v17, %v3257_v61  ;;  %v3271_v59 = vrot.slane %v3270_v5, 4  ;;  %v3277_v51 = vsel %vm14078_vm15, %v2342_v10, -inf }
 0x217   : > { %v3292_v15 = vrot.slane %v3291_v48, 4  ;;  %v3278_v40 = vrot.slane %v3277_v51, 4  ;;  %v3286_v13 = vmax.f32 %v3284_v43, %v3285_v14  ;;  %v3298_v50 = vsel %vm14078_vm15, %v2357_v18, -inf }
 0x218   : > { %v3265_v20 = vmax.f32 %v3263_v57, %v3264_v27  ;;  %v3259_v21 = vrot.slane %v3258_v47, 2  ;;  %v3272_v6 = vmax.f32 %v3270_v5, %v3271_v59  ;;  %v3299_v30 = vrot.slane %v3298_v50, 4 }
 0x219   : > { %v3293_v9 = vmax.f32 %v3291_v48, %v3292_v15  ;;  %v3279_v23 = vmax.f32 %v3277_v51, %v3278_v40  ;;  %v3287_v54 = vrot.slane %v3286_v13, 2  ;;  %v3305_v33 = vsel %vm14078_vm15, %v2358_v58, -inf }
 0x21a   : > { %v3266_v26 = vrot.slane %v3265_v20, 2  ;;  %v3260_v17 = vmax.f32 %v3258_v47, %v3259_v21  ;;  %v3273_v61 = vrot.slane %v3272_v6, 2  ;;  %v3300_v24 = vmax.f32 %v3298_v50, %v3299_v30 }
 0x21b   : > { %v3294_v10 = vrot.slane %v3293_v9, 2  ;;  %v3280_v27 = vrot.slane %v3279_v23, 2  ;;  %v3288_v57 = vmax.f32 %v3286_v13, %v3287_v54  ;;  %v3306_v14 = vrot.slane %v3305_v33, 4  ;;  %v1508_v54 = vpop.f32.mrf.mxu0 }
 0x21c   : > { %v3267_v3 = vmax.f32 %v3265_v20, %v3266_v26  ;;  %v3261_v43 = vrot.slane %v3260_v17, 1  ;;  %v3274_v18 = vmax.f32 %v3272_v6, %v3273_v61  ;;  %v3301_v59 = vrot.slane %v3300_v24, 2  ;;  %v9530_v26 = vld [vmem:[%s13896_s3 + $0x64] ss:$8 sps:$4 sm:$0xff]  }
 0x21d   : > { %v3295_v52 = vmax.f32 %v3293_v9, %v3294_v10  ;;  %v11189_v48 = vmax.f32 %v3279_v23, %v3280_v27  ;;  %v3289_v40 = vrot.slane %v3288_v57, 1  ;;  %v3307_v51 = vmax.f32 %v3305_v33, %v3306_v14  ;;  %v9525_v9 = vld [vmem:[%s13896_s3 + $0x70] ss:$8 sps:$4 sm:$0xff]   ;;  %v9527_v23 = vld [vmem:[%s13896_s3 + $0x74] ss:$8 sps:$4 sm:$0xff]  }
 0x21e   : > { %v3268_v5 = vrot.slane %v3267_v3, 1  ;;  %v3275_v15 = vrot.slane %v3274_v18, 1  ;;  %v11191_v21 = vmax.f32 %v3300_v24, %v3301_v59  ;;  %v14268_v50 = vrot.slane %v11132_v0, 1  ;;  %5728 = vmatprep.subr.bf16.mxu0 %v9527_v23 }
 0x21f   : > { %v3296_v58 = vrot.slane %v3295_v52, 1  ;;  %v11204_v47 = vmax.f32 %v3260_v17, %v3261_v43  ;;  %v3308_v13 = vrot.slane %v3307_v51, 2  ;;  %v14271_v24 = vrot.slane %v11137_v62, 1  ;;  %5729 = vmatpush1.bf16.msra.mxu0 %v9525_v9  ;;  %v1510_v9 = vpop.f32.mrf.mxu0  ;;  %v14289_v17 = vld [vmem:[#allocation24_spill] sm:$0xff] }
 0x220   : > { %v11196_v30 = vmax.f32 %v11132_v0, %v14268_v50  ;;  %v14273_v0 = vrot.slane %v11156_v44, 1  ;;  %v11219_v33 = vmax.f32 %v3267_v3, %v3268_v5  ;;  %v11221_v61 = vmax.f32 %v3274_v18, %v3275_v15  ;;  %v9528_v18 = vld [vmem:[%s13896_s3 + $0x60] ss:$8 sps:$4 sm:$0xff]   ;;  %5730 = vmatprep.subr.bf16.mxu0 %v9530_v26  ;;  %v14290_v26 = vld [vmem:[#allocation35_spill] sm:$0xff] }
 0x221   : > { %14270 = vst [vmem:[#allocation36_spill] sm:$0xff] %v11204_v47  ;;  %v11209_v20 = vmax.f32 %v11137_v62, %v14271_v24  ;;  %v11224_v10 = vmax.f32 %v3288_v57, %v3289_v40  ;;  %v9531_v62 = vld [vmem:[%s13896_s3 + $0x170] ss:$8 sps:$4 sm:$0xff]   ;;  %v11232_v27 = vmax.f32 %v3295_v52, %v3296_v58  ;;  %v2792_v14 = vrot.slane %v11171_v29, 1  ;;  %v14284_v58 = vld [vmem:[#allocation30_spill] sm:$0xff]  ;;  %v14285_v50 = vld [vmem:[#allocation33_spill] sm:$0xff] }
 0x222   : > { %14269 = vst [vmem:[#allocation31_spill] sm:$0xff] %v11196_v30  ;;  %v11214_v6 = vmax.f32 %v11156_v44, %v14273_v0  ;;  %14275 = vst [vmem:[#allocation95_spill] sm:$0xff] %v11219_v33  ;;  %v9533_v44 = vld [vmem:[%s13896_s3 + $0x174] ss:$8 sps:$4 sm:$0xff]   ;;  %v14279_v43 = vrot.slane %v11162_v55, 4  ;;  %v14280_v59 = vrot.slane %v11167_v60, 1  ;;  %v3636_v23 = vsel %vm14077_vm0, %v14285_v50, %v14284_v58 }
 0x223   : > { %14272 = vst [vmem:[#allocation93_spill] sm:$0xff] %v11209_v20  ;;  %14276 = vst [vmem:[#allocation96_spill] sm:$0xff] %v11221_v61  ;;  %v14282_v52 = vld [vmem:[#allocation20_spill] sm:$0xff]  ;;  %v14283_v40 = vld [vmem:[#allocation23_spill] sm:$0xff]  ;;  %5455 = vmatprep.subr.bf16.mxu1 %v9533_v44  ;;  %5731 = vmatpush1.bf16.msra.mxu0 %v9528_v18 }
 0x224   : > { %14274 = vst [vmem:[#allocation94_spill] sm:$0xff] %v11214_v6  ;;  %14277 = vst [vmem:[#allocation97_spill] sm:$0xff] %v11224_v10  ;;  %v2803_v57 = vmax.f32 %v11162_v55, %v14279_v43  ;;  %v11245_v5 = vmax.f32 %v11167_v60, %v14280_v59  ;;  %v3622_v15 = vsel %vm14077_vm0, %v14283_v40, %v14282_v52  ;;  %v14286_v24 = vld [vmem:[#allocation9_spill] sm:$0xff]  ;;  %v9536_v0 = vld [vmem:[%s13896_s3 + $0x54] ss:$8 sps:$4 sm:$0xff]   ;;  %5456 = vmatpush1.bf16.msra.mxu1 %v9531_v62 }
 0x225   : > { %14278 = vst [vmem:[#allocation98_spill] sm:$0xff] %v11232_v27  ;;  %v1541_v55 = vadd.f32 %v11175_v28, %v14286_v24  ;;  %v9539_v60 = vld [vmem:[%s13896_s3 + $0x164] ss:$8 sps:$4 sm:$0xff]   ;;  %v11261_v43 = vmax.f32 %v3307_v51, %v3308_v13  ;;  %v11264_v59 = vmax.f32 %v11171_v29, %v2792_v14  ;;  %v3623_v40 = vsel %vm3610_vm1, %v14289_v17, %v3622_v15  ;;  %v9537_v29 = vld [vmem:[%s13896_s3 + $0x160] ss:$8 sps:$4 sm:$0xff]  }
 0x226   : > { %14281 = vst [vmem:[#allocation99_spill] sm:$0xff] %v11245_v5  ;;  %v2804_v3 = vrot.slane %v2803_v57, 2  ;;  %v3624_v28 = vsel %vm3612_vm3, %v11113_v2, %v3623_v40  ;;  %v3637_v24 = vsel %vm3610_vm1, %v14290_v26, %v3636_v23  ;;  %v14291_v50 = vld [vmem:[#allocation10_spill] sm:$0xff]  ;;  %v14292_v40 = vld [vmem:[#allocation11_spill] sm:$0xff]  ;;  %5732 = vmatprep.subr.bf16.mxu0 %v9536_v0  ;;  %5457 = vmatprep.subr.bf16.mxu1 %v9539_v60 }
 0x227   : > { %14287 = vst [vmem:[#allocation9_spill] sm:$0xff] %v11261_v43  ;;  %14288 = vst [vmem:[#allocation100_spill] sm:$0xff] %v11264_v59  ;;  %v1585_v52 = vadd.f32 %v10461_v8, %v1541_v55  ;;  %v1542_v51 = vadd.f32 %v11185_v46, %v14291_v50  ;;  %v3625_v44 = vsel %vm3614_vm5, %v11129_v53, %v3624_v28  ;;  %v9534_v23 = vld [vmem:[%s13896_s3 + $0x50] ss:$8 sps:$4 sm:$0xff]   ;;  %v9545_v46 = vld [vmem:[%s13896_s3 + $0x154] ss:$8 sps:$4 sm:$0xff]   ;;  %v1512_v55 = vpop.f32.mrf.mxu0 }
 0x228   : > { %v2805_v13 = vmax.f32 %v2803_v57, %v2804_v3  ;;  %v3638_v14 = vsel %vm3612_vm3, %v11142_v42, %v3637_v24  ;;  %v1543_v15 = vadd.f32 %v1506_v32, %v14292_v40  ;;  %v3626_v62 = vsel %vm3616_vm6, %v11196_v30, %v3625_v44  ;;  %v9542_v32 = vld [vmem:[%s13896_s3 + $0x44] ss:$8 sps:$4 sm:$0xff]   ;;  %5458 = vmatpush1.bf16.msra.mxu1 %v9537_v29  ;;  %v9543_v40 = vld [vmem:[%s13896_s3 + $0x150] ss:$8 sps:$4 sm:$0xff]  }
 0x229   : > { %v3639_v3 = vsel %vm3614_vm5, %v11150_v31, %v3638_v14  ;;  %v1617_v57 = vmax.f32 %v1585_v52, 0.0  ;;  %v1586_v50 = vadd.f32 %v10466_v41, %v1542_v51  ;;  %v3627_v28 = vsel %vm3618_vm7, %v11209_v20, %v3626_v62  ;;  %v14293_v51 = vld [vmem:[#allocation12_spill] sm:$0xff]  ;;  %v14296_v30 = vld [vmem:[#allocation14_spill] sm:$0xff]  ;;  %5733 = vmatpush1.bf16.msra.mxu0 %v9534_v23  ;;  %5459 = vmatprep.subr.bf16.mxu1 %v9545_v46 }
 0x22a   : > { %v2806_v18 = vrot.slane %v2805_v13, 1  ;;  %v3640_v24 = vsel %vm3616_vm6, %v11214_v6, %v3639_v3  ;;  %v1587_v44 = vadd.f32 %v10461_v8, %v1543_v15  ;;  %v3628_v52 = vsel %vm14080_vm8, %v11245_v5, %v3627_v28  ;;  %v14295_v3 = vld [vmem:[#allocation13_spill] sm:$0xff]  ;;  %5734 = vmatprep.subr.bf16.mxu0 %v9542_v32  ;;  %v14298_v46 = vld [vmem:[#allocation48_spill] sm:$0xff] }
 0x22b   : > { %v3641_v0 = vsel %vm3618_vm7, %v11264_v59, %v3640_v24  ;;  %v1618_v60 = vmax.f32 %v1586_v50, 0.0  ;;  %v1544_v14 = vadd.f32 %v1508_v54, %v14293_v51  ;;  %v1545_v15 = vadd.f32 %v1510_v9, %v14295_v3  ;;  %v9540_v50 = vld [vmem:[%s13896_s3 + $0x40] ss:$8 sps:$4 sm:$0xff]   ;;  %v9551_v54 = vld [vmem:[%s13896_s3 + $0x144] ss:$8 sps:$4 sm:$0xff]  }
 0x22c   : > { %v11311_v20 = vmax.f32 %v2805_v13, %v2806_v18  ;;  %v1546_v53 = vadd.f32 %v1512_v55, %v14296_v30  ;;  %v14297_v13 = vld [vmem:[#allocation38_spill] sm:$0xff]  ;;  %v2869_v55 = vrot.slane %v14298_v46, 1  ;;  %5460 = vmatpush1.bf16.msra.mxu1 %v9543_v40  ;;  %v9546_v40 = vld [vmem:[%s13896_s3 + $0x30] ss:$8 sps:$4 sm:$0xff]  }
 0x22d   : > { %v1889_v29 = vcombine.low %v1617_v57, %v1618_v60  ;;  %v1890_v28 = vcombine.high %v1617_v57, %v1618_v60  ;;  %v1588_v24 = vadd.f32 %v10466_v41, %v1544_v14  ;;  %v2855_v18 = vrot.slane %v14297_v13, 1  ;;  %v9548_v57 = vld [vmem:[%s13896_s3 + $0x34] ss:$8 sps:$4 sm:$0xff]   ;;  %5735 = vmatpush1.bf16.msra.mxu0 %v9540_v50  ;;  %5461 = vmatprep.subr.bf16.mxu1 %v9551_v54  ;;  %v9554_v50 = vld [vmem:[%s13896_s3 + $0x24] ss:$8 sps:$4 sm:$0xff]  }
 0x22e   : > { %14294 = vst [vmem:[#allocation10_spill] sm:$0xff] %v11311_v20  ;;  %v3642_v30 = vsel %vm14080_vm8, %v11311_v20, %v3641_v0  ;;  %v11326_v9 = vadd.f32 %v10461_v8, %v1545_v15  ;;  %v11329_v23 = vadd.f32 %v10466_v41, %v1546_v53  ;;  %v9549_v8 = vld [vmem:[%s13896_s3 + $0x140] ss:$8 sps:$4 sm:$0xff]   ;;  %v14299_v41 = vrot.slane %v11189_v48, 1  ;;  %5736 = vmatprep.subr.bf16.mxu0 %v9548_v57 }
 0x22f   : > { %v9442_v60 = vpack.i.bf16 %v3642_v30, %v3628_v52  ;;  %v1897_v51 = vrot.slane %v1889_v29, %v10469_v38  ;;  %v1904_v32 = vrot.slane %v1890_v28, %v10469_v38  ;;  %v1620_v14 = vmax.f32 %v1588_v24, 0.0  ;;  %v9557_v29 = vld [vmem:[%s13896_s3 + $0x134] ss:$8 sps:$4 sm:$0xff]  }
 0x230   : > { %v11343_v53 = vmax.f32 %v11189_v48, %v14299_v41  ;;  %v14301_v0 = vrot.slane %v11191_v21, 1  ;;  %v1619_v52 = vmax.f32 %v1587_v44, 0.0  ;;  %v1621_v15 = vmax.f32 %v11326_v9, 0.0  ;;  %5462 = vmatpush1.bf16.msra.mxu1 %v9549_v8 }
 0x231   : > { %9443 = vrot.lane.b32.xlu0 %v9442_v60, %s9805_s14  ;;  %v1905_v48 = vcombine.high %v1897_v51, %v1897_v51  ;;  %v1906_v28 = vcombine.high %v1904_v32, %v1904_v32  ;;  %v2381_v44 = vrot.slane %v1904_v32, %v10469_v38  ;;  %v1622_v54 = vmax.f32 %v11329_v23, 0.0  ;;  %v9555_v32 = vld [vmem:[%s13896_s3 + $0x130] ss:$8 sps:$4 sm:$0xff]   ;;  %5737 = vmatpush1.bf16.msra.mxu0 %v9546_v40  ;;  %v9560_v40 = vld [vmem:[%s13896_s3 + $0x14] ss:$8 sps:$4 sm:$0xff]  }
 0x232   : > { %14300 = vst [vmem:[#allocation11_spill] sm:$0xff] %v11343_v53  ;;  %v11348_v3 = vmax.f32 %v11191_v21, %v14301_v0  ;;  %v2365_v21 = vrot.slane %v1897_v51, %v10469_v38  ;;  %v1907_v24 = vcombine.low %v1619_v52, %v1620_v14  ;;  %v1908_v30 = vcombine.high %v1619_v52, %v1620_v14 }
 0x233   : > { %v11365_v9 = vmax.f32 %v14297_v13, %v2855_v18  ;;  %v2373_v60 = vrot.slane %v1905_v48, %v10469_v38  ;;  %v2382_v0 = vcombine.high %v2381_v44, %v2381_v44  ;;  %v11369_v51 = vmax.f32 %v14298_v46, %v2869_v55  ;;  %v9552_v46 = vld [vmem:[%s13896_s3 + $0x20] ss:$8 sps:$4 sm:$0xff]   ;;  %5463 = vmatprep.subr.bf16.mxu1 %v9557_v29  ;;  %v9563_v55 = vld [vmem:[%s13896_s3 + $0x124] ss:$8 sps:$4 sm:$0xff]  }
 0x234   : > { %14302 = vst [vmem:[#allocation12_spill] sm:$0xff] %v11348_v3  ;;  %v2366_v41 = vcombine.high %v2365_v21, %v2365_v21  ;;  %v11375_v14 = vrot.slane %v1906_v28, %v10469_v38  ;;  %v3312_v23 = vsel %vm14078_vm15, %v2365_v21, -inf  ;;  %v3340_v13 = vsel %vm14078_vm15, %v2381_v44, -inf  ;;  %5738 = vmatprep.subr.bf16.mxu0 %v9554_v50  ;;  %5464 = vmatpush1.bf16.msra.mxu1 %v9555_v32  ;;  %v9561_v50 = vld [vmem:[%s13896_s3 + $0x120] ss:$8 sps:$4 sm:$0xff]  }
 0x235   : > { %14303 = vst [vmem:[#allocation13_spill] sm:$0xff] %v11365_v9  ;;  %14304 = vst [vmem:[#allocation14_spill] sm:$0xff] %v11369_v51  ;;  %v1915_v18 = vrot.slane %v1907_v24, %v10469_v38  ;;  %v2374_v57 = vcombine.high %v2373_v60, %v2373_v60  ;;  %v3313_v8 = vrot.slane %v3312_v23, 4  ;;  %v1922_v48 = vrot.slane %v1908_v30, %v10469_v38 }
 0x236   : > { %14305 = vst [vmem:[#allocation38_spill] sm:$0xff] %v11375_v14  ;;  %v3319_v52 = vsel %vm14078_vm15, %v2366_v41, -inf  ;;  %v3326_v21 = vsel %vm14078_vm15, %v2373_v60, -inf  ;;  %v3341_v44 = vrot.slane %v3340_v13, 4  ;;  %v3347_v29 = vsel %vm14078_vm15, %v2382_v0, -inf  ;;  %5739 = vmatpush1.bf16.msra.mxu0 %v9552_v46  ;;  %5465 = vmatprep.subr.bf16.mxu1 %v9563_v55 }
 0x237   : > { %v3320_v28 = vrot.slane %v3319_v52, 4  ;;  %v3314_v24 = vmax.f32 %v3312_v23, %v3313_v8  ;;  %v3327_v62 = vrot.slane %v3326_v21, 4  ;;  %v3333_v5 = vsel %vm14078_vm15, %v2374_v57, -inf  ;;  %v9558_v0 = vld [vmem:[%s13896_s3 + $0x10] ss:$8 sps:$4 sm:$0xff]   ;;  %5740 = vmatprep.subr.bf16.mxu0 %v9560_v40 }
 0x238   : > { %v3348_v2 = vrot.slane %v3347_v29, 4  ;;  %v3334_v41 = vrot.slane %v3333_v5, 4  ;;  %v11397_v17 = vmax.f32 %v3340_v13, %v3341_v44  ;;  %v11401_v60 = vsel %vm14078_vm15, %v11375_v14, -inf  ;;  %v9566_v13 = vld [vmem:[%s13896_s3 + $0x4] ss:$8 sps:$4 sm:$0xff]   ;;  %5466 = vmatpush1.bf16.msra.mxu1 %v9561_v50 }
 0x239   : > { %v3321_v30 = vmax.f32 %v3319_v52, %v3320_v28  ;;  %v3315_v23 = vrot.slane %v3314_v24, 2  ;;  %v11406_v32 = vmax.f32 %v3326_v21, %v3327_v62  ;;  %v11408_v57 = vcombine.low %v1621_v15, %v1622_v54 }
 0x23a   : > { %v11410_v8 = vcombine.high %v1621_v15, %v1622_v54  ;;  %v11417_v28 = vmax.f32 %v3347_v29, %v3348_v2  ;;  %v1923_v44 = vcombine.high %v1915_v18, %v1915_v18  ;;  %v1924_v21 = vcombine.high %v1922_v48, %v1922_v48  ;;  %5741 = vmatpush1.bf16.msra.mxu0 %v9558_v0  ;;  %v9564_v2 = vld [vmem:[%s13896_s3] ss:$8 sps:$4 sm:$0xff]  }
 0x23b   : > { %v3322_v52 = vrot.slane %v3321_v30, 2  ;;  %v11419_v55 = vmax.f32 %v3314_v24, %v3315_v23  ;;  %v2397_v15 = vrot.slane %v1915_v18, %v10469_v38  ;;  %v11423_v54 = vmax.f32 %v3333_v5, %v3334_v41  ;;  %5742 = vmatprep.subr.bf16.mxu0 %v9566_v13 }
 0x23c   : > { %14306 = vst [vmem:[#allocation48_spill] sm:$0xff] %v11417_v28  ;;  %v2405_v20 = vrot.slane %v1923_v44, %v10469_v38  ;;  %v2413_v46 = vrot.slane %v1922_v48, %v10469_v38  ;;  %v2421_v23 = vrot.slane %v1924_v21, %v10469_v38 }
 0x23d   : > { %14307 = vst [vmem:[#allocation101_spill] sm:$0xff] %v11423_v54  ;;  %v2398_v24 = vcombine.high %v2397_v15, %v2397_v15  ;;  %v3368_v18 = vsel %vm14078_vm15, %v2397_v15, -inf  ;;  %v11434_v5 = vmax.f32 %v3321_v30, %v3322_v52  ;;  %v3317_v48 = vrot.slane %v11419_v55, 1 }
 0x23e   : > { %v2406_v50 = vcombine.high %v2405_v20, %v2405_v20  ;;  %v2414_v41 = vcombine.high %v2413_v46, %v2413_v46  ;;  %v3369_v44 = vrot.slane %v3368_v18, 4  ;;  %v2422_v0 = vcombine.high %v2421_v23, %v2421_v23  ;;  %5743 = vmatpush1.bf16.msra.mxu0 %v9564_v2 }
 0x23f   : > { %v3375_v62 = vsel %vm14078_vm15, %v2398_v24, -inf  ;;  %v3382_v40 = vsel %vm14078_vm15, %v2405_v20, -inf  ;;  %v3396_v30 = vsel %vm14078_vm15, %v2413_v46, -inf  ;;  %v3410_v52 = vsel %vm14078_vm15, %v2421_v23, -inf }
 0x240   : > { %v3370_v59 = vmax.f32 %v3368_v18, %v3369_v44  ;;  %v3376_v29 = vrot.slane %v3375_v62, 4  ;;  %v3383_v6 = vrot.slane %v3382_v40, 4  ;;  %v3389_v21 = vsel %vm14078_vm15, %v2406_v50, -inf }
 0x241   : > { %v3390_v15 = vrot.slane %v3389_v21, 4  ;;  %v3403_v13 = vsel %vm14078_vm15, %v2414_v41, -inf  ;;  %v3397_v58 = vrot.slane %v3396_v30, 4  ;;  %v3411_v20 = vrot.slane %v3410_v52, 4 }
 0x242   : > { %v3371_v31 = vrot.slane %v3370_v59, 2  ;;  %v3377_v42 = vmax.f32 %v3375_v62, %v3376_v29  ;;  %v3384_v26 = vmax.f32 %v3382_v40, %v3383_v6  ;;  %v3404_v27 = vrot.slane %v3403_v13, 4 }
 0x243   : > { %v3391_v24 = vmax.f32 %v3389_v21, %v3390_v15  ;;  %v3417_v18 = vsel %vm14078_vm15, %v2422_v0, -inf  ;;  %v3398_v2 = vmax.f32 %v3396_v30, %v3397_v58  ;;  %v3412_v46 = vmax.f32 %v3410_v52, %v3411_v20 }
 0x244   : > { %v3372_v44 = vmax.f32 %v3370_v59, %v3371_v31  ;;  %v3378_v53 = vrot.slane %v3377_v42, 2  ;;  %v3385_v50 = vrot.slane %v3384_v26, 2  ;;  %v3405_v14 = vmax.f32 %v3403_v13, %v3404_v27 }
 0x245   : > { %v3392_v33 = vrot.slane %v3391_v24, 2  ;;  %v3418_v43 = vrot.slane %v3417_v18, 4  ;;  %v3399_v54 = vrot.slane %v3398_v2, 2  ;;  %v3413_v40 = vrot.slane %v3412_v46, 2 }
 0x246   : > { %v3373_v41 = vrot.slane %v3372_v44, 1  ;;  %v3379_v28 = vmax.f32 %v3377_v42, %v3378_v53  ;;  %v3386_v23 = vmax.f32 %v3384_v26, %v3385_v50  ;;  %v3406_v6 = vrot.slane %v3405_v14, 2 }
 0x247   : > { %v3393_v62 = vmax.f32 %v3391_v24, %v3392_v33  ;;  %v3419_v29 = vmax.f32 %v3417_v18, %v3418_v43  ;;  %v3400_v3 = vmax.f32 %v3398_v2, %v3399_v54  ;;  %v1933_v31 = vrot.slane %v11408_v57, %v10469_v38 }
 0x248   : > { %v3380_v21 = vrot.slane %v3379_v28, 1  ;;  %v3387_v15 = vrot.slane %v3386_v23, 1  ;;  %v3407_v58 = vmax.f32 %v3405_v14, %v3406_v6  ;;  %v3414_v0 = vmax.f32 %v3412_v46, %v3413_v40 }
 0x249   : > { %v3394_v59 = vrot.slane %v3393_v62, 1  ;;  %v3420_v27 = vrot.slane %v3419_v29, 2  ;;  %v11447_v30 = vmax.f32 %v11419_v55, %v3317_v48  ;;  %v3401_v26 = vrot.slane %v3400_v3, 1 }
 0x24a   : > { %v1940_v33 = vrot.slane %v11410_v8, %v10469_v38  ;;  %v11452_v43 = vmax.f32 %v3372_v44, %v3373_v41  ;;  %v11454_v53 = vmax.f32 %v3379_v28, %v3380_v21  ;;  %v11456_v54 = vmax.f32 %v3386_v23, %v3387_v15  ;;  %v14315_v23 = vld [vmem:[#allocation46_spill] sm:$0xff] }
 0x24b   : > { %14308 = vst [vmem:[#allocation102_spill] sm:$0xff] %v11447_v30  ;;  %v11458_v57 = vmax.f32 %v3393_v62, %v3394_v59  ;;  %v3408_v14 = vrot.slane %v3407_v58, 1  ;;  %v1941_v13 = vcombine.high %v1933_v31, %v1933_v31  ;;  %v2429_v55 = vrot.slane %v1933_v31, %v10469_v38 }
 0x24c   : > { %14309 = vst [vmem:[#allocation103_spill] sm:$0xff] %v11452_v43  ;;  %14310 = vst [vmem:[#allocation104_spill] sm:$0xff] %v11454_v53  ;;  %v1942_v52 = vcombine.high %v1940_v33, %v1940_v33  ;;  %v11461_v48 = vmax.f32 %v3400_v3, %v3401_v26  ;;  %v3415_v24 = vrot.slane %v3414_v0, 1  ;;  %v11463_v20 = vmax.f32 %v3419_v29, %v3420_v27 }
 0x24d   : > { %14311 = vst [vmem:[#allocation105_spill] sm:$0xff] %v11456_v54  ;;  %14312 = vst [vmem:[#allocation106_spill] sm:$0xff] %v11458_v57  ;;  %v2445_v8 = vrot.slane %v1940_v33, %v10469_v38  ;;  %v2430_v18 = vcombine.high %v2429_v55, %v2429_v55  ;;  %v2437_v28 = vrot.slane %v1941_v13, %v10469_v38  ;;  %v3424_v50 = vsel %vm14078_vm15, %v2429_v55, -inf }
 0x24e   : > { %14313 = vst [vmem:[#allocation107_spill] sm:$0xff] %v11461_v48  ;;  %14314 = vst [vmem:[#allocation108_spill] sm:$0xff] %v11463_v20  ;;  %v11468_v44 = vrot.slane %v1942_v52, %v10469_v38  ;;  %v3425_v46 = vrot.slane %v3424_v50, 4  ;;  %v2881_v3 = vrot.slane %v14315_v23, 2  ;;  %v11473_v62 = vmax.f32 %v3407_v58, %v3408_v14 }
 0x24f   : > { %v2446_v2 = vcombine.high %v2445_v8, %v2445_v8  ;;  %v3452_v41 = vsel %vm14078_vm15, %v2445_v8, -inf  ;;  %v2438_v6 = vcombine.high %v2437_v28, %v2437_v28  ;;  %v3431_v40 = vsel %vm14078_vm15, %v2430_v18, -inf }
 0x250   : > { %14316 = vst [vmem:[#allocation46_spill] sm:$0xff] %v11473_v62  ;;  %v3438_v29 = vsel %vm14078_vm15, %v2437_v28, -inf  ;;  %v3426_v21 = vmax.f32 %v3424_v50, %v3425_v46  ;;  %v3432_v15 = vrot.slane %v3431_v40, 4  ;;  %v3453_v59 = vrot.slane %v3452_v41, 4  ;;  %v14323_v62 = vld [vmem:[#allocation41_spill] sm:$0xff] }
 0x251   : > { %v3439_v31 = vrot.slane %v3438_v29, 4  ;;  %v3445_v27 = vsel %vm14078_vm15, %v2438_v6, -inf  ;;  %v11479_v26 = vsel %vm14078_vm15, %v2446_v2, -inf  ;;  %v11483_v33 = vsel %vm14078_vm15, %v11468_v44, -inf }
 0x252   : > { %v2882_v58 = vmax.f32 %v14315_v23, %v2881_v3  ;;  %v3427_v14 = vrot.slane %v3426_v21, 2  ;;  %v3433_v13 = vmax.f32 %v3431_v40, %v3432_v15  ;;  %v3446_v55 = vrot.slane %v3445_v27, 4  ;;  %v9567_v23 = vld [vmem:[%s13896_s3 + $0x110] ss:$8 sps:$4 sm:$0xff]   ;;  %v9569_v3 = vld [vmem:[%s13896_s3 + $0x114] ss:$8 sps:$4 sm:$0xff]  }
 0x253   : > { %v11486_v52 = vmax.f32 %v3438_v29, %v3439_v31  ;;  %v11489_v18 = vmax.f32 %v3452_v41, %v3453_v59  ;;  %v11492_v2 = vmax.f32 %v3414_v0, %v3415_v24  ;;  %v14318_v24 = vld [vmem:[#allocation47_spill] sm:$0xff]  ;;  %5467 = vmatprep.subr.bf16.mxu1 %v9569_v3  ;;  %v2981_v42 = vrot.slane %v10865_v12, 1 }
 0x254   : > { %v2883_v50 = vrot.slane %v2882_v58, 1  ;;  %v11494_v46 = vmax.f32 %v3426_v21, %v3427_v14  ;;  %v3434_v6 = vrot.slane %v3433_v13, 2  ;;  %v11506_v0 = vmax.f32 %v3445_v27, %v3446_v55  ;;  %v9570_v21 = vld [vmem:[%s13896_s3 + $0xf0] ss:$8 sps:$4 sm:$0xff]   ;;  %v9572_v15 = vld [vmem:[%s13896_s3 + $0xf4] ss:$8 sps:$4 sm:$0xff]   ;;  %5468 = vmatpush1.bf16.msra.mxu1 %v9567_v23 }
 0x255   : > { %14317 = vst [vmem:[#allocation109_spill] sm:$0xff] %v11492_v2  ;;  %v2895_v29 = vrot.slane %v14318_v24, 2  ;;  %v14320_v14 = vld [vmem:[#allocation45_spill] sm:$0xff]  ;;  %v2967_v27 = vrot.slane %v10812_v19, 1  ;;  %v2993_v40 = vrot.slane %v10838_v35, 2  ;;  %5744 = vmatprep.subr.bf16.mxu0 %v9572_v15 }
 0x256   : > { %v11516_v59 = vmax.f32 %v2882_v58, %v2883_v50  ;;  %v2906_v8 = vsel %vm14078_vm15, %v14320_v14, -inf  ;;  %v9573_v55 = vld [vmem:[%s13896_s3 + $0x100] ss:$8 sps:$4 sm:$0xff]   ;;  %v9575_v58 = vld [vmem:[%s13896_s3 + $0x104] ss:$8 sps:$4 sm:$0xff]   ;;  %v11531_v3 = vmax.f32 %v3433_v13, %v3434_v6  ;;  %5745 = vmatpush2.bf16.msra.mxu0 %v9570_v21  ;;  %v11544_v50 = vmax.f32 %v10865_v12, %v2981_v42 }
 0x257   : > { %v2896_v41 = vmax.f32 %v14318_v24, %v2895_v29  ;;  %v2907_v28 = vrot.slane %v2906_v8, 4  ;;  %v11534_v31 = vmax.f32 %v10812_v19, %v2967_v27  ;;  %v3007_v24 = vrot.slane %v10840_v4, 2  ;;  %v9576_v29 = vld [vmem:[%s13896_s3 + $0xe0] ss:$8 sps:$4 sm:$0xff]   ;;  %v9578_v23 = vld [vmem:[%s13896_s3 + $0xe4] ss:$8 sps:$4 sm:$0xff]   ;;  %5469 = vmatprep.subr.bf16.mxu1 %v9575_v58 }
 0x258   : > { %14319 = vst [vmem:[#allocation47_spill] sm:$0xff] %v11516_v59  ;;  %14321 = vst [vmem:[#allocation45_spill] sm:$0xff] %v11544_v50  ;;  %v2994_v13 = vmax.f32 %v10838_v35, %v2993_v40  ;;  %v9581_v19 = vld [vmem:[%s13896_s3 + $0x1f4] ss:$8 sps:$4 sm:$0xff]   ;;  %v3018_v21 = vsel %vm14078_vm15, %v10824_v36, -inf  ;;  %v14322_v27 = vld [vmem:[#allocation37_spill] sm:$0xff]  ;;  %v3657_v12 = vsel %vm14077_vm0, %v10810_v16, %v10805_v25  ;;  %5746 = vmatprep.subr.bf16.mxu0 %v9578_v23  ;;  %5470 = vmatpush1.bf16.msra.mxu1 %v9573_v55 }
 0x259   : > { %v2897_v15 = vrot.slane %v2896_v41, 1  ;;  %v2908_v38 = vmax.f32 %v2906_v8, %v2907_v28  ;;  %v3008_v6 = vmax.f32 %v10840_v4, %v3007_v24  ;;  %v3643_v20 = vsel %vm14077_vm0, %v14323_v62, %v14322_v27  ;;  %v9584_v35 = vld [vmem:[%s13896_s3 + $0xd4] ss:$8 sps:$4 sm:$0xff]   ;;  %v9579_v40 = vld [vmem:[%s13896_s3 + $0x1f0] ss:$8 sps:$4 sm:$0xff]   ;;  %5471 = vmatprep.subr.bf16.mxu1 %v9581_v19 }
 0x25a   : > { %v2995_v4 = vrot.slane %v2994_v13, 1  ;;  %v3019_v28 = vrot.slane %v3018_v21, 4  ;;  %v14325_v24 = vld [vmem:[#allocation43_spill] sm:$0xff]  ;;  %5747 = vmatpush2.bf16.msra.mxu0 %v9576_v29 }
 0x25b   : > { %v11562_v42 = vmax.f32 %v2896_v41, %v2897_v15  ;;  %v2909_v8 = vrot.slane %v2908_v38, 2  ;;  %v3009_v58 = vrot.slane %v3008_v6, 1  ;;  %v3644_v62 = vsel %vm3610_vm1, %v14325_v24, %v3643_v20  ;;  %v14326_v27 = vld [vmem:[#allocation55_spill] sm:$0xff]  ;;  %5748 = vmatprep.subr.bf16.mxu0 %v9584_v35 }
 0x25c   : > { %v3658_v23 = vsel %vm3610_vm1, %v14326_v27, %v3657_v12  ;;  %v14327_v16 = vld [vmem:[#allocation39_spill] sm:$0xff]  ;;  %v11579_v57 = vmax.f32 %v2994_v13, %v2995_v4  ;;  %v3020_v53 = vmax.f32 %v3018_v21, %v3019_v28  ;;  %v3645_v20 = vsel %vm3612_vm3, %v11365_v9, %v3644_v62  ;;  %v9587_v12 = vld [vmem:[%s13896_s3 + $0x1e4] ss:$8 sps:$4 sm:$0xff]   ;;  %5472 = vmatpush2.bf16.msra.mxu1 %v9579_v40  ;;  %v9585_v4 = vld [vmem:[%s13896_s3 + $0x1e0] ss:$8 sps:$4 sm:$0xff]  }
 0x25d   : > { %14324 = vst [vmem:[#allocation110_spill] sm:$0xff] %v11562_v42  ;;  %v14328_v25 = vrot.slane %v14327_v16, 1  ;;  %v9582_v55 = vld [vmem:[%s13896_s3 + $0xd0] ss:$8 sps:$4 sm:$0xff]   ;;  %v2910_v15 = vmax.f32 %v2908_v38, %v2909_v8  ;;  %v3659_v29 = vsel %vm3612_vm3, %v11534_v31, %v3658_v23  ;;  %v14332_v38 = vld [vmem:[#allocation50_spill] sm:$0xff]  ;;  %v14335_v23 = vld [vmem:[#allocation49_spill] sm:$0xff]  ;;  %5473 = vmatprep.subr.bf16.mxu1 %v9587_v12 }
 0x25e   : > { %14330 = vst [vmem:[#allocation39_spill] sm:$0xff] %v11579_v57  ;;  %v14333_v13 = vrot.slane %v14332_v38, 1  ;;  %v9590_v62 = vld [vmem:[%s13896_s3 + $0xc4] ss:$8 sps:$4 sm:$0xff]   ;;  %v3021_v35 = vrot.slane %v3020_v53, 2  ;;  %v3660_v8 = vsel %vm3614_vm5, %v11544_v50, %v3659_v29  ;;  %5749 = vmatpush2.bf16.msra.mxu0 %v9582_v55 }
 0x25f   : > { %v11574_v41 = vmax.f32 %v14327_v16, %v14328_v25  ;;  %v11586_v25 = vmax.f32 %v3008_v6, %v3009_v58  ;;  %v3646_v16 = vsel %vm3614_vm5, %v11369_v51, %v3645_v20  ;;  %v2911_v21 = vrot.slane %v2910_v15, 1  ;;  %v9588_v40 = vld [vmem:[%s13896_s3 + $0xc0] ss:$8 sps:$4 sm:$0xff]   ;;  %5750 = vmatprep.subr.bf16.mxu0 %v9590_v62  ;;  %v14343_v62 = vld [vmem:[#allocation60_spill] sm:$0xff] }
 0x260   : > { %v11595_v19 = vmax.f32 %v14332_v38, %v14333_v13  ;;  %v3647_v6 = vsel %vm3616_vm6, %v11516_v59, %v3646_v16  ;;  %v3661_v58 = vsel %vm3616_vm6, %v11579_v57, %v3660_v8  ;;  %v2888_v20 = vrot.slane %v14335_v23, 2  ;;  %v14336_v38 = vld [vmem:[#allocation51_spill] sm:$0xff]  ;;  %v14339_v51 = vld [vmem:[#allocation57_spill] sm:$0xff]  ;;  %5474 = vmatpush2.bf16.msra.mxu1 %v9585_v4 }
 0x261   : > { %14329 = vst [vmem:[#allocation55_spill] sm:$0xff] %v11574_v41  ;;  %14331 = vst [vmem:[#allocation111_spill] sm:$0xff] %v11586_v25  ;;  %v3648_v28 = vsel %vm3618_vm7, %v11562_v42, %v3647_v6  ;;  %v2902_v13 = vrot.slane %v14336_v38, 2  ;;  %v11616_v16 = vmax.f32 %v2910_v15, %v2911_v21  ;;  %v3022_v29 = vmax.f32 %v3020_v53, %v3021_v35  ;;  %v14341_v35 = vld [vmem:[#allocation59_spill] sm:$0xff] }
 0x262   : > { %14334 = vst [vmem:[#allocation50_spill] sm:$0xff] %v11595_v19  ;;  %v3662_v59 = vsel %vm3618_vm7, %v11586_v25, %v3661_v58  ;;  %v14338_v6 = vcombine.high %v14320_v14, %v14320_v14  ;;  %v2889_v42 = vmax.f32 %v14335_v23, %v2888_v20  ;;  %v14340_v9 = vrot.slane %v14339_v51, 1  ;;  %5751 = vmatpush2.bf16.msra.mxu0 %v9588_v40 }
 0x263   : > { %14337 = vst [vmem:[#allocation49_spill] sm:$0xff] %v11616_v16  ;;  %v2903_v55 = vmax.f32 %v14336_v38, %v2902_v13  ;;  %v3023_v53 = vrot.slane %v3022_v29, 1  ;;  %v3649_v21 = vsel %vm14080_vm8, %v11616_v16, %v3648_v28  ;;  %v14342_v58 = vrot.slane %v14341_v35, 1  ;;  %v14344_v13 = vld [vmem:[#allocation61_spill] sm:$0xff] }
 0x264   : > { %v2913_v8 = vsel %vm14078_vm15, %v14338_v6, -inf  ;;  %v11629_v15 = vmax.f32 %v14339_v51, %v14340_v9  ;;  %v3000_v6 = vrot.slane %v14343_v62, 2  ;;  %v2890_v23 = vrot.slane %v2889_v42, 1 }
 0x265   : > { %v2914_v12 = vrot.slane %v2913_v8, 4  ;;  %v11636_v14 = vmax.f32 %v14341_v35, %v14342_v58  ;;  %v2904_v20 = vrot.slane %v2903_v55, 1  ;;  %v3014_v24 = vrot.slane %v14344_v13, 2  ;;  %v14346_v35 = vld [vmem:[#allocation40_spill] sm:$0xff]  ;;  %v14347_v58 = vld [vmem:[#allocation42_spill] sm:$0xff] }
 0x266   : > { %v11640_v9 = vmax.f32 %v3022_v29, %v3023_v53  ;;  %v3001_v51 = vmax.f32 %v14343_v62, %v3000_v6  ;;  %v14345_v28 = vcombine.high %v10824_v36, %v10824_v36  ;;  %v3650_v25 = vsel %vm14077_vm0, %v14347_v58, %v14346_v35  ;;  %v14350_v62 = vld [vmem:[#allocation44_spill] sm:$0xff] }
 0x267   : > { %v2915_v38 = vmax.f32 %v2913_v8, %v2914_v12  ;;  %v11650_v4 = vmax.f32 %v2889_v42, %v2890_v23  ;;  %v11652_v57 = vmax.f32 %v2903_v55, %v2904_v20  ;;  %v3015_v40 = vmax.f32 %v14344_v13, %v3014_v24  ;;  %v14351_v20 = vld [vmem:[#allocation53_spill] sm:$0xff]  ;;  %v14352_v13 = vld [vmem:[#allocation56_spill] sm:$0xff] }
 0x268   : > { %v3025_v16 = vsel %vm14078_vm15, %v14345_v28, -inf  ;;  %v3663_v29 = vsel %vm14080_vm8, %v11640_v9, %v3662_v59  ;;  %v3002_v12 = vrot.slane %v3001_v51, 1  ;;  %v3651_v36 = vsel %vm3610_vm1, %v14350_v62, %v3650_v25 }
 0x269   : > { %14348 = vst [vmem:[#allocation51_spill] sm:$0xff] %v11650_v4  ;;  %14349 = vst [vmem:[#allocation57_spill] sm:$0xff] %v11652_v57  ;;  %v2916_v8 = vrot.slane %v2915_v38, 2  ;;  %v3026_v53 = vrot.slane %v3025_v16, 4  ;;  %v9447_v6 = vpack.i.bf16 %v3663_v29, %v3649_v21  ;;  %v3016_v50 = vrot.slane %v3015_v40, 1 }
 0x26a   : > { %v3652_v42 = vsel %vm3612_vm3, %v11574_v41, %v3651_v36  ;;  %v11661_v23 = vmax.f32 %v3001_v51, %v3002_v12  ;;  %v3664_v59 = vsel %vm14077_vm0, %v14352_v13, %v14351_v20  ;;  %v14354_v12 = vrot.slane %v10941_v45, 2  ;;  %v14367_v41 = vld [vmem:[#allocation64_spill] sm:$0xff] }
 0x26b   : > { %v2917_v28 = vmax.f32 %v2915_v38, %v2916_v8  ;;  %v3027_v55 = vmax.f32 %v3025_v16, %v3026_v53  ;;  %v3653_v24 = vsel %vm3614_vm5, %v11595_v19, %v3652_v42  ;;  %9448 = vrot.lane.b32.xlu1 %v9447_v6, %s9805_s14  ;;  %v11669_v25 = vmax.f32 %v3015_v40, %v3016_v50  ;;  %v14353_v38 = vld [vmem:[#allocation58_spill] sm:$0xff] }
 0x26c   : > { %v3654_v21 = vsel %vm3616_vm6, %v11650_v4, %v3653_v24  ;;  %v3665_v51 = vsel %vm3610_vm1, %v14353_v38, %v3664_v59  ;;  %v3106_v53 = vmax.f32 %v10941_v45, %v14354_v12  ;;  %v14356_v40 = vrot.slane %v10945_v11, 2 }
 0x26d   : > { %v2918_v58 = vrot.slane %v2917_v28, 1  ;;  %v3028_v8 = vrot.slane %v3027_v55, 2  ;;  %v3655_v16 = vsel %vm3618_vm7, %v11652_v57, %v3654_v21  ;;  %v3666_v29 = vsel %vm3612_vm3, %v11629_v15, %v3665_v51  ;;  %v14364_v57 = vld [vmem:[#allocation62_spill] sm:$0xff] }
 0x26e   : > { %v3667_v50 = vsel %vm3614_vm5, %v11636_v14, %v3666_v29  ;;  %v3120_v6 = vmax.f32 %v10945_v11, %v14356_v40  ;;  %v14357_v42 = vrot.slane %v10949_v37, 4  ;;  %v3107_v51 = vrot.slane %v3106_v53, 1 }
 0x26f   : > { %v11682_v36 = vmax.f32 %v2917_v28, %v2918_v58  ;;  %v3029_v59 = vmax.f32 %v3027_v55, %v3028_v8  ;;  %v3668_v21 = vsel %vm3616_vm6, %v11661_v23, %v3667_v50  ;;  %v14358_v45 = vrot.slane %v11037_v49, 2 }
 0x270   : > { %v3132_v24 = vmax.f32 %v10949_v37, %v14357_v42  ;;  %v14359_v28 = vrot.slane %v11494_v46, 1  ;;  %v3121_v12 = vrot.slane %v3120_v6, 1  ;;  %v3669_v55 = vsel %vm3618_vm7, %v11669_v25, %v3668_v21 }
 0x271   : > { %14355 = vst [vmem:[#allocation59_spill] sm:$0xff] %v11682_v36  ;;  %v3218_v58 = vmax.f32 %v11037_v49, %v14358_v45  ;;  %v3656_v11 = vsel %vm14080_vm8, %v11682_v36, %v3655_v16  ;;  %v3030_v37 = vrot.slane %v3029_v59, 1  ;;  %v14361_v50 = vrot.slane %v11030_v1, 2  ;;  %v14365_v16 = vld [vmem:[#allocation65_spill] sm:$0xff] }
 0x272   : > { %v11700_v29 = vmax.f32 %v11494_v46, %v14359_v28  ;;  %v3133_v40 = vrot.slane %v3132_v24, 2  ;;  %v11709_v49 = vmax.f32 %v3106_v53, %v3107_v51  ;;  %v14363_v46 = vrot.slane %v11035_v7, 4  ;;  %v14368_v51 = vld [vmem:[#allocation70_spill] sm:$0xff] }
 0x273   : > { %v3219_v8 = vrot.slane %v3218_v58, 1  ;;  %v3232_v42 = vmax.f32 %v11030_v1, %v14361_v50  ;;  %v3671_v36 = vsel %vm14077_vm0, %v14365_v16, %v14364_v57  ;;  %v11717_v4 = vmax.f32 %v3029_v59, %v3030_v37 }
 0x274   : > { %14360 = vst [vmem:[#allocation60_spill] sm:$0xff] %v11700_v29  ;;  %14362 = vst [vmem:[#allocation61_spill] sm:$0xff] %v11709_v49  ;;  %v3134_v45 = vmax.f32 %v3132_v24, %v3133_v40  ;;  %v3244_v28 = vmax.f32 %v11035_v7, %v14363_v46  ;;  %v11719_v19 = vmax.f32 %v3120_v6, %v3121_v12 }
 0x275   : > { %v3233_v21 = vrot.slane %v3232_v42, 1  ;;  %v3672_v62 = vsel %vm3610_vm1, %v14367_v41, %v3671_v36  ;;  %v3685_v7 = vsel %vm14077_vm0, %v10996_v34, %v10990_v39  ;;  %v3670_v40 = vsel %vm14080_vm8, %v11717_v4, %v3669_v55 }
 0x276   : > { %14366 = vst [vmem:[#allocation40_spill] sm:$0xff] %v11719_v19  ;;  %v3135_v1 = vrot.slane %v3134_v45, 1  ;;  %v3245_v53 = vrot.slane %v3244_v28, 2  ;;  %v3673_v24 = vsel %vm3612_vm3, %v14368_v51, %v3672_v62  ;;  %v11730_v59 = vmax.f32 %v3218_v58, %v3219_v8  ;;  %v14372_v8 = vld [vmem:[#allocation68_spill] sm:$0xff] }
 0x277   : > { %v3674_v6 = vsel %vm3614_vm5, %v10988_v22, %v3673_v24  ;;  %v3686_v36 = vsel %vm3610_vm1, %v11002_v63, %v3685_v7  ;;  %v9452_v12 = vpack.i.bf16 %v3670_v40, %v3656_v11  ;;  %v11736_v37 = vmax.f32 %v3232_v42, %v3233_v21  ;;  %v14375_v42 = vld [vmem:[#allocation89_spill] sm:$0xff]  ;;  %v14386_v51 = vld [vmem:[#allocation84_spill] sm:$0xff] }
 0x278   : > { %14369 = vst [vmem:[#allocation53_spill] sm:$0xff] %v11730_v59  ;;  %v3246_v50 = vmax.f32 %v3244_v28, %v3245_v53  ;;  %v3675_v62 = vsel %vm3616_vm6, %v11709_v49, %v3674_v6  ;;  %v11740_v46 = vmax.f32 %v3134_v45, %v3135_v1  ;;  %v3687_v58 = vsel %vm3612_vm3, %v11012_v56, %v3686_v36  ;;  %v14376_v21 = vld [vmem:[#allocation73_spill] sm:$0xff]  ;;  %v14379_v53 = vld [vmem:[#allocation71_spill] sm:$0xff]  ;;  %v14380_v36 = vld [vmem:[#allocation72_spill] sm:$0xff] }
 0x279   : > { %14370 = vst [vmem:[#allocation56_spill] sm:$0xff] %v11736_v37  ;;  %v3676_v55 = vsel %vm3618_vm7, %v11719_v19, %v3675_v62  ;;  %v14373_v24 = vrot.slane %v14372_v8, 1  ;;  %9453 = vrot.lane.b32.xlu1 %v9452_v12, %s9805_s14  ;;  %v3688_v28 = vsel %vm3614_vm5, %v14375_v42, %v3687_v58  ;;  %v14377_v45 = vrot.slane %v14376_v21, 1  ;;  %v14381_v12 = vld [vmem:[#allocation69_spill] sm:$0xff]  ;;  %v14391_v42 = vld [vmem:[#allocation63_spill] sm:$0xff] }
 0x27a   : > { %14371 = vst [vmem:[#allocation58_spill] sm:$0xff] %v11740_v46  ;;  %v3247_v11 = vrot.slane %v3246_v50, 1  ;;  %v3112_v7 = vrot.slane %v14379_v53, 2  ;;  %v3677_v40 = vsel %vm14080_vm8, %v11740_v46, %v3676_v55  ;;  %v3689_v6 = vsel %vm3616_vm6, %v11730_v59, %v3688_v28  ;;  %v14384_v46 = vld [vmem:[#allocation79_spill] sm:$0xff] }
 0x27b   : > { %v11749_v22 = vmax.f32 %v14372_v8, %v14373_v24  ;;  %v11757_v1 = vmax.f32 %v14376_v21, %v14377_v45  ;;  %v3126_v62 = vrot.slane %v14380_v36, 2  ;;  %v14382_v8 = vcombine.high %v14381_v12, %v14381_v12  ;;  %v14387_v12 = vld [vmem:[#allocation85_spill] sm:$0xff]  ;;  %v14392_v56 = vld [vmem:[#allocation67_spill] sm:$0xff] }
 0x27c   : > { %v11769_v24 = vmax.f32 %v3246_v50, %v3247_v11  ;;  %v3690_v21 = vsel %vm3618_vm7, %v11736_v37, %v3689_v6  ;;  %v3113_v45 = vmax.f32 %v14379_v53, %v3112_v7  ;;  %v14385_v49 = vrot.slane %v14384_v46, 1  ;;  %v14388_v6 = vld [vmem:[#allocation81_spill] sm:$0xff] }
 0x27d   : > { %14374 = vst [vmem:[#allocation68_spill] sm:$0xff] %v11749_v22  ;;  %14378 = vst [vmem:[#allocation73_spill] sm:$0xff] %v11757_v1  ;;  %v3137_v58 = vsel %vm14078_vm15, %v14382_v8, -inf  ;;  %v3127_v55 = vmax.f32 %v14380_v36, %v3126_v62  ;;  %v3224_v41 = vrot.slane %v14386_v51, 2  ;;  %v3238_v16 = vrot.slane %v14387_v12, 2 }
 0x27e   : > { %14383 = vst [vmem:[#allocation71_spill] sm:$0xff] %v11769_v24  ;;  %v3138_v19 = vrot.slane %v3137_v58, 4  ;;  %v11778_v28 = vmax.f32 %v14384_v46, %v14385_v49  ;;  %v3691_v50 = vsel %vm14080_vm8, %v11769_v24, %v3690_v21  ;;  %v3114_v11 = vrot.slane %v3113_v45, 1 }
 0x27f   : > { %v14389_v53 = vcombine.high %v14388_v6, %v14388_v6  ;;  %v9457_v36 = vpack.i.bf16 %v3691_v50, %v3677_v40  ;;  %v3128_v62 = vrot.slane %v3127_v55, 1  ;;  %v3225_v57 = vmax.f32 %v14386_v51, %v3224_v41  ;;  %v14395_v41 = vld [vmem:[#allocation66_spill] sm:$0xff] }
 0x280   : > { %v3139_v8 = vmax.f32 %v3137_v58, %v3138_v19  ;;  %v3239_v49 = vmax.f32 %v14387_v12, %v3238_v16  ;;  %v11790_v46 = vmax.f32 %v3113_v45, %v3114_v11  ;;  %v3678_v21 = vsel %vm14077_vm0, %v14392_v56, %v14391_v42  ;;  %v14393_v19 = vld [vmem:[#allocation86_spill] sm:$0xff]  ;;  %v14396_v11 = vld [vmem:[#allocation76_spill] sm:$0xff] }
 0x281   : > { %v3249_v7 = vsel %vm14078_vm15, %v14389_v53, -inf  ;;  %9458 = vrot.lane.b32.xlu0 %v9457_v36, %s9805_s14  ;;  %v14394_v58 = vrot.slane %v14393_v19, 1  ;;  %v3226_v40 = vrot.slane %v3225_v57, 1  ;;  %v3679_v16 = vsel %vm3610_vm1, %v14395_v41, %v3678_v21  ;;  %v14397_v53 = vld [vmem:[#allocation77_spill] sm:$0xff] }
 0x282   : > { %14390 = vst [vmem:[#allocation72_spill] sm:$0xff] %v11790_v46  ;;  %v3140_v37 = vrot.slane %v3139_v8, 2  ;;  %v3250_v59 = vrot.slane %v3249_v7, 4  ;;  %v3240_v50 = vrot.slane %v3239_v49, 1  ;;  %v3680_v12 = vsel %vm3612_vm3, %v11749_v22, %v3679_v16 }
 0x283   : > { %v11799_v6 = vmax.f32 %v14393_v19, %v14394_v58  ;;  %v3692_v56 = vsel %vm14077_vm0, %v14397_v53, %v14396_v11  ;;  %v11808_v36 = vmax.f32 %v3127_v55, %v3128_v62  ;;  %v11810_v42 = vmax.f32 %v3225_v57, %v3226_v40  ;;  %v14399_v58 = vld [vmem:[#allocation78_spill] sm:$0xff]  ;;  %v9594_v62 = vld [vmem:[%s13896_s3 + $0xb0] ss:$8 sps:$4 sm:$0xff]  }
 0x284   : > { %v3141_v51 = vmax.f32 %v3139_v8, %v3140_v37  ;;  %v3251_v45 = vmax.f32 %v3249_v7, %v3250_v59  ;;  %v3681_v19 = vsel %vm3614_vm5, %v11757_v1, %v3680_v12  ;;  %v3693_v24 = vsel %vm3610_vm1, %v14399_v58, %v3692_v56  ;;  %v9593_v59 = vld [vmem:[%s13896_s3 + $0x1d4] ss:$8 sps:$4 sm:$0xff]   ;;  %v9591_v56 = vld [vmem:[%s13896_s3 + $0x1d0] ss:$8 sps:$4 sm:$0xff]  }
 0x285   : > { %14398 = vst [vmem:[#allocation69_spill] sm:$0xff] %v11808_v36  ;;  %v9596_v37 = vld [vmem:[%s13896_s3 + $0xb4] ss:$8 sps:$4 sm:$0xff]   ;;  %v3682_v57 = vsel %vm3616_vm6, %v11790_v46, %v3681_v19  ;;  %v3694_v55 = vsel %vm3612_vm3, %v11778_v28, %v3693_v24  ;;  %v11832_v21 = vmax.f32 %v3239_v49, %v3240_v50  ;;  %v14400_v16 = vrot.slane %v11406_v32, 2  ;;  %5475 = vmatprep.subr.bf16.mxu1 %v9593_v59  ;;  %v9602_v59 = vld [vmem:[%s13896_s3 + $0xa4] ss:$8 sps:$4 sm:$0xff]  }
 0x286   : > { %v3142_v8 = vrot.slane %v3141_v51, 1  ;;  %v3252_v7 = vrot.slane %v3251_v45, 2  ;;  %v3695_v40 = vsel %vm3614_vm5, %v11799_v6, %v3694_v55  ;;  %v14401_v19 = vrot.slane %v11397_v17, 2  ;;  %5752 = vmatprep.subr.bf16.mxu0 %v9596_v37  ;;  %5476 = vmatpush2.bf16.msra.mxu1 %v9591_v56 }
 0x287   : > { %v3330_v12 = vmax.f32 %v11406_v32, %v14400_v16  ;;  %v3683_v1 = vsel %vm3618_vm7, %v11808_v36, %v3682_v57  ;;  %v3696_v49 = vsel %vm3616_vm6, %v11810_v42, %v3695_v40  ;;  %v14402_v50 = vrot.slane %v11401_v60, 4  ;;  %5753 = vmatpush2.bf16.msra.mxu0 %v9594_v62 }
 0x288   : > { %v3344_v24 = vmax.f32 %v11397_v17, %v14401_v19  ;;  %v3253_v46 = vmax.f32 %v3251_v45, %v3252_v7  ;;  %v11849_v22 = vmax.f32 %v3141_v51, %v3142_v8  ;;  %v14404_v41 = vrot.slane %v11486_v52, 2  ;;  %v9599_v45 = vld [vmem:[%s13896_s3 + $0x1c4] ss:$8 sps:$4 sm:$0xff]   ;;  %5754 = vmatprep.subr.bf16.mxu0 %v9602_v59 }
 0x289   : > { %v3356_v55 = vmax.f32 %v11401_v60, %v14402_v50  ;;  %v3331_v32 = vrot.slane %v3330_v12, 1  ;;  %v3697_v51 = vsel %vm3618_vm7, %v11832_v21, %v3696_v49  ;;  %v14405_v8 = vrot.slane %v11489_v18, 2  ;;  %5477 = vmatprep.subr.bf16.mxu1 %v9599_v45  ;;  %v14410_v45 = vld [vmem:[#allocation12_spill] sm:$0xff] }
 0x28a   : > { %14403 = vst [vmem:[#allocation79_spill] sm:$0xff] %v11849_v22  ;;  %v3345_v16 = vrot.slane %v3344_v24, 1  ;;  %v3442_v17 = vmax.f32 %v11486_v52, %v14404_v41  ;;  %v3254_v60 = vrot.slane %v3253_v46, 1  ;;  %v9597_v52 = vld [vmem:[%s13896_s3 + $0x1c0] ss:$8 sps:$4 sm:$0xff]   ;;  %v3684_v57 = vsel %vm14080_vm8, %v11849_v22, %v3683_v1 }
 0x28b   : > { %v3357_v37 = vrot.slane %v3356_v55, 2  ;;  %v3456_v7 = vmax.f32 %v11489_v18, %v14405_v8  ;;  %v9600_v41 = vld [vmem:[%s13896_s3 + $0xa0] ss:$8 sps:$4 sm:$0xff]   ;;  %v11873_v56 = vmax.f32 %v3330_v12, %v3331_v32  ;;  %v14407_v40 = vrot.slane %v11483_v33, 4  ;;  %5478 = vmatpush2.bf16.msra.mxu1 %v9597_v52 }
 0x28c   : > { %v3443_v62 = vrot.slane %v3442_v17, 1  ;;  %v11878_v18 = vmax.f32 %v3253_v46, %v3254_v60  ;;  %v11880_v49 = vmax.f32 %v3344_v24, %v3345_v16  ;;  %v3699_v8 = vsel %vm14077_vm0, %v11221_v61, %v11204_v47  ;;  %5755 = vmatpush2.bf16.msra.mxu0 %v9600_v41  ;;  %v9605_v46 = vld [vmem:[%s13896_s3 + $0x1b4] ss:$8 sps:$4 sm:$0xff]   ;;  %v9603_v60 = vld [vmem:[%s13896_s3 + $0x1b0] ss:$8 sps:$4 sm:$0xff]   ;;  %v14443_v61 = vld [vmem:[#allocation29_spill] sm:$0xff] }
 0x28d   : > { %14406 = vst [vmem:[#allocation84_spill] sm:$0xff] %v11873_v56  ;;  %v3468_v19 = vmax.f32 %v11483_v33, %v14407_v40  ;;  %v3358_v50 = vmax.f32 %v3356_v55, %v3357_v37  ;;  %v3457_v36 = vrot.slane %v3456_v7, 1  ;;  %v3700_v12 = vsel %vm3610_vm1, %v11224_v10, %v3699_v8  ;;  %v9608_v24 = vld [vmem:[%s13896_s3 + $0x94] ss:$8 sps:$4 sm:$0xff]   ;;  %v9606_v37 = vld [vmem:[%s13896_s3 + $0x90] ss:$8 sps:$4 sm:$0xff]   ;;  %5479 = vmatprep.subr.bf16.mxu1 %v9605_v46 }
 0x28e   : > { %14408 = vst [vmem:[#allocation85_spill] sm:$0xff] %v11880_v49  ;;  %v3713_v33 = vsel %vm14077_vm0, %v11456_v54, %v11452_v43  ;;  %v3698_v55 = vsel %vm14080_vm8, %v11878_v18, %v3697_v51  ;;  %v11898_v16 = vmax.f32 %v3442_v17, %v3443_v62  ;;  %v3701_v59 = vsel %vm3612_vm3, %v14410_v45, %v3700_v12  ;;  %v14426_v45 = vld [vmem:[#allocation11_spill] sm:$0xff]  ;;  %v14444_v47 = vld [vmem:[#allocation30_spill] sm:$0xff]  ;;  %v14452_v54 = vld [vmem:[#allocation28_spill] sm:$0xff] }
 0x28f   : > { %v3469_v1 = vrot.slane %v3468_v19, 2  ;;  %v3359_v32 = vrot.slane %v3358_v50, 1  ;;  %v9462_v52 = vpack.i.bf16 %v3698_v55, %v3684_v57  ;;  %v3702_v40 = vsel %vm3614_vm5, %v11447_v30, %v3701_v59  ;;  %5756 = vmatprep.subr.bf16.mxu0 %v9608_v24  ;;  %5480 = vmatpush2.bf16.msra.mxu1 %v9603_v60  ;;  %v9614_v24 = vld [vmem:[%s13896_s3 + $0x84] ss:$8 sps:$4 sm:$0xff]   ;;  %v9609_v60 = vld [vmem:[%s13896_s3 + $0x1a0] ss:$8 sps:$4 sm:$0xff]  }
 0x290   : > { %14409 = vst [vmem:[#allocation81_spill] sm:$0xff] %v11898_v16  ;;  %v3714_v17 = vsel %vm3610_vm1, %v11461_v48, %v3713_v33  ;;  %v3436_v51 = vrot.slane %v11531_v3, 1  ;;  %v14411_v62 = vrot.slane %v11479_v26, 4  ;;  %v3703_v12 = vsel %vm3616_vm6, %v11873_v56, %v3702_v40  ;;  %5757 = vmatpush2.bf16.msra.mxu0 %v9606_v37  ;;  %v14451_v48 = vld [vmem:[#allocation90_spill] sm:$0xff]  ;;  %v14453_v43 = vld [vmem:[#allocation91_spill] sm:$0xff] }
 0x291   : > { %v3470_v41 = vmax.f32 %v3468_v19, %v3469_v1  ;;  %v3715_v57 = vsel %vm3612_vm3, %v11492_v2, %v3714_v17  ;;  %9463 = vrot.lane.b32.xlu1 %v9462_v52, %s9805_s14  ;;  %v11921_v19 = vmax.f32 %v3456_v7, %v3457_v36  ;;  %v3704_v33 = vsel %vm3618_vm7, %v11880_v49, %v3703_v12  ;;  %v14414_v7 = vld [vmem:[#allocation101_spill] sm:$0xff]  ;;  %v14415_v52 = vld [vmem:[#allocation48_spill] sm:$0xff]  ;;  %v14450_v2 = vld [vmem:[#allocation27_spill] sm:$0xff] }
 0x292   : > { %v3461_v8 = vmax.f32 %v11479_v26, %v14411_v62  ;;  %v3716_v46 = vsel %vm3614_vm5, %v11700_v29, %v3715_v57  ;;  %v9611_v26 = vld [vmem:[%s13896_s3 + $0x1a4] ss:$8 sps:$4 sm:$0xff]   ;;  %v11933_v55 = vmax.f32 %v3358_v50, %v3359_v32  ;;  %v3336_v59 = vrot.slane %v14414_v7, 2  ;;  %v9612_v17 = vld [vmem:[%s13896_s3 + $0x80] ss:$8 sps:$4 sm:$0xff]   ;;  %5758 = vmatprep.subr.bf16.mxu0 %v9614_v24  ;;  %v14449_v29 = vld [vmem:[#allocation88_spill] sm:$0xff] }
 0x293   : > { %14412 = vst [vmem:[#allocation86_spill] sm:$0xff] %v11921_v19  ;;  %v3471_v1 = vrot.slane %v3470_v41, 1  ;;  %v3717_v36 = vsel %vm3616_vm6, %v11898_v16, %v3716_v46  ;;  %v3350_v40 = vrot.slane %v14415_v52, 2  ;;  %v14417_v32 = vld [vmem:[#allocation9_spill] sm:$0xff]  ;;  %v14420_v46 = vld [vmem:[#allocation38_spill] sm:$0xff]  ;;  %5481 = vmatprep.subr.bf16.mxu1 %v9611_v26  ;;  %v14448_v16 = vld [vmem:[#allocation35_spill] sm:$0xff] }
 0x294   : > { %14413 = vst [vmem:[#allocation76_spill] sm:$0xff] %v11933_v55  ;;  %v3718_v50 = vsel %vm3618_vm7, %v11921_v19, %v3717_v36  ;;  %v14418_v12 = vrot.slane %v14417_v32, 1  ;;  %v14421_v37 = vcombine.high %v14420_v46, %v14420_v46  ;;  %v3705_v56 = vsel %vm14080_vm8, %v11933_v55, %v3704_v33  ;;  %5482 = vmatpush2.bf16.msra.mxu1 %v9609_v60  ;;  %v14425_v55 = vld [vmem:[#allocation95_spill] sm:$0xff]  ;;  %v14447_v19 = vld [vmem:[#allocation34_spill] sm:$0xff] }
 0x295   : > { %v11945_v62 = vmax.f32 %v3470_v41, %v3471_v1  ;;  %v3337_v41 = vmax.f32 %v14414_v7, %v3336_v59  ;;  %v3351_v1 = vmax.f32 %v14415_v52, %v3350_v40  ;;  %v14422_v46 = vcombine.high %v11468_v44, %v11468_v44  ;;  %5759 = vmatpush2.bf16.msra.mxu0 %v9612_v17 }
 0x296   : > { %v11952_v57 = vmax.f32 %v14417_v32, %v14418_v12  ;;  %v3361_v49 = vsel %vm14078_vm15, %v14421_v37, -inf  ;;  %v3448_v32 = vrot.slane %v11506_v0, 2  ;;  %v3462_v12 = vrot.slane %v3461_v8, 2 }
 0x297   : > { %14416 = vst [vmem:[#allocation77_spill] sm:$0xff] %v11945_v62  ;;  %v3362_v36 = vrot.slane %v3361_v49, 4  ;;  %v3719_v30 = vsel %vm14080_vm8, %v11945_v62, %v3718_v50  ;;  %v3473_v26 = vsel %vm14078_vm15, %v14422_v46, -inf  ;;  %v14423_v33 = vrot.slane %v11434_v5, 1  ;;  %v14446_v62 = vld [vmem:[#allocation33_spill] sm:$0xff] }
 0x298   : > { %14419 = vst [vmem:[#allocation78_spill] sm:$0xff] %v11952_v57  ;;  %v9467_v24 = vpack.i.bf16 %v3719_v30, %v3705_v56  ;;  %v3338_v59 = vrot.slane %v3337_v41, 1  ;;  %v3449_v40 = vmax.f32 %v11506_v0, %v3448_v32  ;;  %v3463_v50 = vmax.f32 %v3461_v8, %v3462_v12 }
 0x299   : > { %v11972_v7 = vmax.f32 %v11434_v5, %v14423_v33  ;;  %v3363_v52 = vmax.f32 %v3361_v49, %v3362_v36  ;;  %v3474_v37 = vrot.slane %v3473_v26, 4  ;;  %v3706_v44 = vsel %vm14077_vm0, %v14426_v45, %v14425_v55  ;;  %v14428_v5 = vld [vmem:[#allocation98_spill] sm:$0xff] }
 0x29a   : > { %9468 = vrot.lane.b32.xlu0 %v9467_v24, %s9805_s14  ;;  %v3352_v60 = vrot.slane %v3351_v1, 1  ;;  %v11980_v56 = vmax.f32 %v11531_v3, %v3436_v51  ;;  %v3707_v46 = vsel %vm3610_vm1, %v14428_v5, %v3706_v44  ;;  %v11984_v49 = vmax.f32 %v3337_v41, %v3338_v59  ;;  %v14430_v24 = vld [vmem:[#allocation104_spill] sm:$0xff]  ;;  %v14431_v33 = vld [vmem:[#allocation106_spill] sm:$0xff] }
 0x29b   : > { %14424 = vst [vmem:[#allocation101_spill] sm:$0xff] %v11972_v7  ;;  %v3364_v30 = vrot.slane %v3363_v52, 2  ;;  %v3450_v17 = vrot.slane %v3449_v40, 1  ;;  %v3475_v0 = vmax.f32 %v3473_v26, %v3474_v37  ;;  %v3708_v8 = vsel %vm3612_vm3, %v11952_v57, %v3707_v46  ;;  %v14432_v51 = vld [vmem:[#allocation108_spill] sm:$0xff]  ;;  %v14436_v59 = vld [vmem:[#allocation46_spill] sm:$0xff] }
 0x29c   : > { %14427 = vst [vmem:[#allocation48_spill] sm:$0xff] %v11980_v56  ;;  %14429 = vst [vmem:[#allocation9_spill] sm:$0xff] %v11984_v49  ;;  %v3464_v32 = vrot.slane %v3463_v50, 1  ;;  %v3709_v12 = vsel %vm3614_vm5, %v11972_v7, %v3708_v8  ;;  %v3720_v3 = vsel %vm14077_vm0, %v14431_v33, %v14430_v24  ;;  %v14433_v10 = vrot.slane %v14432_v51, 1 }
 0x29d   : > { %v3365_v36 = vmax.f32 %v3363_v52, %v3364_v30  ;;  %v11998_v41 = vmax.f32 %v3449_v40, %v3450_v17  ;;  %v3476_v26 = vrot.slane %v3475_v0, 2  ;;  %v3721_v37 = vsel %vm3610_vm1, %v14436_v59, %v3720_v3 }
 0x29e   : > { %v11996_v44 = vmax.f32 %v14432_v51, %v14433_v10  ;;  %v3710_v46 = vsel %vm3616_vm6, %v11984_v49, %v3709_v12  ;;  %v12006_v7 = vmax.f32 %v3351_v1, %v3352_v60  ;;  %v12008_v57 = vmax.f32 %v3463_v50, %v3464_v32  ;;  %v9439_v1 = vpop.permute.xlu0 %9438 }
 0x29f   : > { %14435 = vst [vmem:[#allocation108_spill] sm:$0xff] %v11998_v41  ;;  %v3366_v52 = vrot.slane %v3365_v36, 1  ;;  %v3477_v30 = vmax.f32 %v3475_v0, %v3476_v26  ;;  %v14441_v26 = vlaneseq  ;;  %vm5012_vm0 = vcmask 1047556  }
 0x2a0   : > { %14434 = vst [vmem:[#allocation38_spill] sm:$0xff] %v11996_v44  ;;  %v3722_v8 = vsel %vm3612_vm3, %v11996_v44, %v3721_v37  ;;  %14437 = vst [vmem:[#allocation112_spill] sm:$0xff] %v12006_v7  ;;  %v3711_v0 = vsel %vm3618_vm7, %v12006_v7, %v3710_v46  ;;  %vm5013_vm15 = vsmask.f32 7954 }
 0x2a1   : > { %14438 = vst [vmem:[#allocation113_spill] sm:$0xff] %v12008_v57  ;;  %v3723_v10 = vsel %vm3614_vm5, %v11980_v56, %v3722_v8  ;;  %v3478_v40 = vrot.slane %v3477_v30, 1  ;;  %v12018_v3 = vmax.f32 %v3365_v36, %v3366_v52  ;;  %v12027_v37 = vand.u32 127, %v14441_v26 }
 0x2a2   : > { %v3724_v17 = vsel %vm3616_vm6, %v11998_v41, %v3723_v10  ;;  %v9441_v36 = vunpack.i.h.bf16 %v9439_v1  ;;  %v9440_v52 = vunpack.i.l.bf16 %v9439_v1 }
 0x2a3   : > { %v3725_v12 = vsel %vm3618_vm7, %v12008_v57, %v3724_v17  ;;  %14439 = vst [vmem:[#allocation114_spill] sm:$0xff] %v12018_v3  ;;  %v12020_v51 = vmax.f32 %v3477_v30, %v3478_v40  ;;  %v3712_v50 = vsel %vm14080_vm8, %v12018_v3, %v3711_v0  ;;  %14442 = vst [vmem:[#allocation116_spill] sm:$0xff] %v12027_v37  ;;  %vm14079_vm9 = vcmp.lt.s32.totalorder %v12027_v37, 112  ;;  %v9444_v46 = vpop.permute.xlu0 %9443 }
 0x2a4   : > { %v9446_v30 = vunpack.i.h.bf16 %v9444_v46  ;;  %v9445_v8 = vunpack.i.l.bf16 %v9444_v46 }
 0x2a5   : > { %14440 = vst [vmem:[#allocation115_spill] sm:$0xff] %v12020_v51  ;;  %v3726_v60 = vsel %vm14080_vm8, %v12020_v51, %v3725_v12  ;;  %vm12076_vm8 = vmand %vm3614_vm5, %vm5022_vm12 }
 0x2a6   : > { %v9472_v32 = vpack.i.bf16 %v3726_v60, %v3712_v50  ;;  %v3779_v10 = vsel %vm14079_vm9, %v9441_v36, %v9446_v30  ;;  %v3787_v40 = vsel %vm14079_vm9, %v9446_v30, %v9441_v36  ;;  %v12037_v17 = vsel %vm14079_vm9, %v9440_v52, %v9445_v8 }
 0x2a7   : > { %v12041_v0 = vsel %vm14079_vm9, %v9445_v8, %v9440_v52  ;;  %v3824_v12 = vrot.slane %v3779_v10, 1  ;;  %v3825_v1 = vrot.slane %v3787_v40, 1  ;;  %v3826_v50 = vrot.slane %v3779_v10, 2  ;;  %v14445_v8 = vld [vmem:[#allocation32_spill] sm:$0xff]  ;;  %vm12067_vm9 = vmand %vm5019_vm10, %vm379_vm2 }
 0x2a8   : > { %9473 = vrot.lane.b32.xlu1 %v9472_v32, %s9805_s14  ;;  %v3827_v60 = vrot.slane %v3787_v40, 2  ;;  %v3828_v32 = vrot.slane %v3779_v10, 3  ;;  %v3829_v26 = vrot.slane %v3787_v40, 3  ;;  %v3830_v46 = vrot.slane %v3779_v10, 4  ;;  %vm12087_vm2 = vmor %vm12076_vm8, %vm12067_vm9  ;;  %s9747_s14 = scalar_lea.vmem %s9746_s29, 256 }
 0x2a9   : > { %v3831_v3 = vrot.slane %v3787_v40, 4  ;;  %v3832_v7 = vrot.slane %v3779_v10, 5  ;;  %v3833_v49 = vrot.slane %v3787_v40, 5  ;;  %v3834_v36 = vrot.slane %v3779_v10, 6  ;;  %vm12103_vm8 = vmand %vm5010_vm13, %vm543_vm4 }
 0x2aa   : > { %v3835_v30 = vrot.slane %v3787_v40, 6  ;;  %v3836_v5 = vrot.slane %v3779_v10, 7  ;;  %v3837_v45 = vrot.slane %v3787_v40, 7  ;;  %v4066_v55 = vmax.f32 %v14443_v61, %v3779_v10  ;;  %v14454_v10 = vld [vmem:[#allocation94_spill] sm:$0xff]  ;;  %vm5014_vm9 = vmand %vm5012_vm0, %vm5013_vm15 }
 0x2ab   : > { %v4067_v52 = vmax.f32 %v14444_v47, %v3787_v40  ;;  %v4068_v51 = vmax.f32 %v14445_v8, %v3824_v12  ;;  %v4069_v57 = vmax.f32 %v14446_v62, %v3825_v1  ;;  %v4070_v41 = vmax.f32 %v14447_v19, %v3826_v50  ;;  %v14455_v40 = vld [vmem:[#allocation92_spill] sm:$0xff]  ;;  %vm12127_vm15 = vmor %vm5014_vm9, %vm12103_vm8 }
 0x2ac   : > { %v4071_v56 = vmax.f32 %v14448_v16, %v3827_v60  ;;  %v4072_v44 = vmax.f32 %v14449_v29, %v3828_v32  ;;  %v4073_v59 = vmax.f32 %v14450_v2, %v3829_v26  ;;  %v4074_v33 = vmax.f32 %v14451_v48, %v3830_v46  ;;  %v14456_v8 = vld [vmem:[#allocation100_spill] sm:$0xff]  ;;  %v14457_v29 = vld [vmem:[#allocation26_spill] sm:$0xff] }
 0x2ad   : > { %v4075_v24 = vmax.f32 %v14452_v54, %v3831_v3  ;;  %v4076_v61 = vmax.f32 %v14453_v43, %v3832_v7  ;;  %v4077_v47 = vmax.f32 %v14454_v10, %v3833_v49  ;;  %v4078_v12 = vmax.f32 %v14455_v40, %v3834_v36  ;;  %v9617_v16 = vld [vmem:[%s13896_s3 + $0x194] ss:$8 sps:$4 sm:$0xff]   ;;  %v14458_v2 = vld [vmem:[#allocation10_spill] sm:$0xff]  ;;  %v9615_v43 = vld [vmem:[%s13896_s3 + $0x190] ss:$8 sps:$4 sm:$0xff]  }
 0x2ae   : > { %v4079_v62 = vmax.f32 %v14456_v8, %v3835_v30  ;;  %v4080_v19 = vmax.f32 %v14457_v29, %v3836_v5  ;;  %v4081_v1 = vmax.f32 %v14458_v2, %v3837_v45  ;;  %v9213_v48 = vpack.c.bf16 %v4067_v52, %v4066_v55  ;;  %5483 = vmatprep.subr.bf16.mxu1 %v9617_v16  ;;  %v9618_v36 = vld [vmem:[%s13896_s3 + $0x180] ss:$8 sps:$4 sm:$0xff]  }
 0x2af   : > { %v9214_v50 = vpack.c.bf16 %v4069_v57, %v4068_v51  ;;  %v9215_v54 = vpack.c.bf16 %v4071_v56, %v4070_v41  ;;  %v9216_v7 = vpack.c.bf16 %v4073_v59, %v4072_v44  ;;  %v9217_v49 = vpack.c.bf16 %v4075_v24, %v4074_v33  ;;  %5484 = vmatpush2.bf16.msra.mxu1 %v9615_v43  ;;  %v9620_v56 = vld [vmem:[%s13896_s3 + $0x184] ss:$8 sps:$4 sm:$0xff]  }
 0x2b0   : > { %v9218_v3 = vpack.c.bf16 %v4077_v47, %v4076_v61  ;;  %v9219_v60 = vpack.c.bf16 %v4079_v62, %v4078_v12  ;;  %v9220_v32 = vpack.c.bf16 %v4081_v1, %v4080_v19  ;;  %v4658_v26 = vunpack.c.l.b16 %v9213_v48  ;;  %5485 = vmatprep.subr.bf16.mxu1 %v9620_v56  ;;  %v5031_v47 = vld [vmem:[#allocation3 + $0x18] sm:$0x11] }
 0x2b1   : > { %v4659_v46 = vunpack.c.h.b16 %v9213_v48  ;;  %v4660_v55 = vunpack.c.l.b16 %v9214_v50  ;;  %v4661_v57 = vunpack.c.h.b16 %v9214_v50  ;;  %v4662_v5 = vunpack.c.l.b16 %v9215_v54  ;;  %v9623_v48 = vld [vmem:[%s13896_s3 + $0x274] ss:$8 sps:$4 sm:$0xff]  }
 0x2b2   : > { %v4663_v51 = vunpack.c.h.b16 %v9215_v54  ;;  %v4664_v33 = vunpack.c.l.b16 %v9216_v7  ;;  %v4665_v44 = vunpack.c.h.b16 %v9216_v7  ;;  %v4666_v41 = vunpack.c.l.b16 %v9217_v49 }
 0x2b3   : > { %v4667_v59 = vunpack.c.h.b16 %v9217_v49  ;;  %v4668_v30 = vunpack.c.l.b16 %v9218_v3  ;;  %v4669_v52 = vunpack.c.h.b16 %v9218_v3  ;;  %v4670_v61 = vunpack.c.l.b16 %v9219_v60  ;;  %5486 = vmatpush2.bf16.msra.mxu1 %v9618_v36 }
 0x2b4   : > { %v4671_v10 = vunpack.c.h.b16 %v9219_v60  ;;  %v4796_v40 = vrot.slane %v4658_v26, 7  ;;  %v4797_v12 = vrot.slane %v4660_v55, 6  ;;  %v4799_v8 = vrot.slane %v4662_v5, 5  ;;  %6082 = vmatprep.subr.bf16.mxu1 %v9623_v48 }
 0x2b5   : > { %v4801_v62 = vrot.slane %v4664_v33, 4  ;;  %v4803_v29 = vrot.slane %v4666_v41, 3  ;;  %v4805_v19 = vrot.slane %v4668_v30, 2  ;;  %v4807_v2 = vrot.slane %v4670_v61, 1 }
 0x2b6   : > { %v4809_v1 = vrot.slane %v4659_v46, 7  ;;  %v4798_v50 = vsel %vm3610_vm1, %v4797_v12, %v4796_v40  ;;  %v4810_v43 = vrot.slane %v4661_v57, 6  ;;  %v4812_v54 = vrot.slane %v4663_v51, 5 }
 0x2b7   : > { %v4814_v7 = vrot.slane %v4665_v44, 4  ;;  %v4800_v49 = vsel %vm3612_vm3, %v4799_v8, %v4798_v50  ;;  %v4816_v3 = vrot.slane %v4667_v59, 3  ;;  %v4818_v60 = vrot.slane %v4669_v52, 2  ;;  %v14471_v50 = vld [vmem:[#allocation19_spill] sm:$0xff] }
 0x2b8   : > { %v4820_v26 = vrot.slane %v4671_v10, 1  ;;  %v4802_v45 = vsel %vm3614_vm5, %v4801_v62, %v4800_v49  ;;  %v4811_v55 = vsel %vm3610_vm1, %v4810_v43, %v4809_v1  ;;  %v5032_v46 = vsel %vm12087_vm2, %v9220_v32, %v5031_v47  ;;  %v14473_v49 = vld [vmem:[#allocation21_spill] sm:$0xff] }
 0x2b9   : > { %v3810_v5 = vrot.slane %v12037_v17, 1  ;;  %v4804_v51 = vsel %vm3616_vm6, %v4803_v29, %v4802_v45  ;;  %v4813_v56 = vsel %vm3612_vm3, %v4812_v54, %v4811_v55  ;;  %5033 = vst [vmem:[#allocation3 + $0x18] sm:$0x11] %v5032_v46  ;;  %v3811_v24 = vrot.slane %v12041_v0, 1  ;;  %v14472_v54 = vld [vmem:[#allocation20_spill] sm:$0xff] }
 0x2ba   : > { %v3812_v33 = vrot.slane %v12037_v17, 2  ;;  %v4806_v32 = vsel %vm3618_vm7, %v4805_v19, %v4804_v51  ;;  %v4815_v44 = vsel %vm3614_vm5, %v4814_v7, %v4813_v56  ;;  %v3813_v41 = vrot.slane %v12041_v0, 2  ;;  %v14476_v46 = vld [vmem:[#allocation24_spill] sm:$0xff]  ;;  %v14477_v56 = vld [vmem:[#allocation74_spill] sm:$0xff] }
 0x2bb   : > { %v3814_v59 = vrot.slane %v12037_v17, 3  ;;  %vm14467_vm4 = vcmask 1047559   ;;  %v4817_v30 = vsel %vm3616_vm6, %v4816_v3, %v4815_v44  ;;  %v3815_v52 = vrot.slane %v12041_v0, 3  ;;  %v14478_v44 = vld [vmem:[#allocation18_spill] sm:$0xff] }
 0x2bc   : > { %v4808_v36 = vsel %vm14467_vm4, %v4807_v2, %v4806_v32  ;;  %v3816_v61 = vrot.slane %v12037_v17, 4  ;;  %v4819_v10 = vsel %vm3618_vm7, %v4818_v60, %v4817_v30  ;;  %v3817_v47 = vrot.slane %v12041_v0, 4  ;;  %vm14470_vm0 = vmmov %vm14467_vm4  ;;  %v14474_v60 = vld [vmem:[#allocation23_spill] sm:$0xff] }
 0x2bd   : > { %v3818_v40 = vrot.slane %v12037_v17, 5  ;;  %v3819_v12 = vrot.slane %v12041_v0, 5  ;;  %v4821_v62 = vsel %vm14470_vm0, %v4820_v26, %v4819_v10  ;;  %v3820_v29 = vrot.slane %v12037_v17, 6  ;;  %v14475_v26 = vld [vmem:[#allocation22_spill] sm:$0xff]  ;;  %v14480_v10 = vld [vmem:[#allocation25_spill] sm:$0xff]  ;;  %vm14487_vm10 = vmmov %vm14470_vm0 }
 0x2be   : > { %v3821_v19 = vrot.slane %v12041_v0, 6  ;;  %v3822_v2 = vrot.slane %v12037_v17, 7  ;;  %v4980_v1 = vpack.c.b16 %v4821_v62, %v4808_v36  ;;  %v3823_v48 = vrot.slane %v12041_v0, 7  ;;  %v14481_v62 = vld [vmem:[#allocation83_spill] sm:$0xff]  ;;  %vm14488_vm12 = vmmov %vm14470_vm0 }
 0x2bf   : > { %v4050_v43 = vmax.f32 %v14471_v50, %v12037_v17  ;;  %v4051_v7 = vmax.f32 %v14472_v54, %v12041_v0  ;;  %v4052_v3 = vmax.f32 %v14473_v49, %v3810_v5  ;;  %v4053_v45 = vmax.f32 %v14474_v60, %v3811_v24  ;;  %v14479_v17 = vld [vmem:[#allocation82_spill] sm:$0xff]  ;;  %v14482_v50 = vld [vmem:[#allocation31_spill] sm:$0xff] }
 0x2c0   : > { %v4054_v55 = vmax.f32 %v14475_v26, %v3812_v33  ;;  %v4055_v57 = vmax.f32 %v14476_v46, %v3813_v41  ;;  %v12146_v51 = vsel %vm12127_vm15, %v4980_v1, 0  ;;  %v4056_v32 = vmax.f32 %v14477_v56, %v3814_v59  ;;  %v14483_v54 = vld [vmem:[#allocation87_spill] sm:$0xff]  ;;  %v14484_v41 = vld [vmem:[#allocation93_spill] sm:$0xff] }
 0x2c1   : > { %v4057_v36 = vmax.f32 %v14478_v44, %v3815_v52  ;;  %v4058_v30 = vmax.f32 %v14479_v17, %v3816_v61  ;;  %v4059_v0 = vmax.f32 %v14480_v10, %v3817_v47  ;;  %v4060_v5 = vmax.f32 %v14481_v62, %v3818_v40  ;;  %5030 = vst [vmem:[#allocation3 + $0x58] sm:$0xff] %v12146_v51  ;;  %v14485_v1 = vld [vmem:[#allocation17_spill] sm:$0xff]  ;;  %v14486_v26 = vld [vmem:[#allocation99_spill] sm:$0xff] }
 0x2c2   : > { %v4061_v24 = vmax.f32 %v14482_v50, %v3819_v12  ;;  %v4062_v33 = vmax.f32 %v14483_v54, %v3820_v29  ;;  %v4063_v49 = vmax.f32 %v14484_v41, %v3821_v19  ;;  %v4064_v60 = vmax.f32 %v14485_v1, %v3822_v2 }
 0x2c3   : > { %v4065_v59 = vmax.f32 %v14486_v26, %v3823_v48  ;;  %v9205_v46 = vpack.c.bf16 %v4051_v7, %v4050_v43  ;;  %v9206_v52 = vpack.c.bf16 %v4053_v45, %v4052_v3  ;;  %v9207_v56 = vpack.c.bf16 %v4055_v57, %v4054_v55  ;;  %v5025_v45 = vld [vmem:[#allocation3] sm:$0x11] }
 0x2c4   : > { %v9208_v61 = vpack.c.bf16 %v4057_v36, %v4056_v32  ;;  %v9209_v44 = vpack.c.bf16 %v4059_v0, %v4058_v30  ;;  %v9210_v47 = vpack.c.bf16 %v4061_v24, %v4060_v5  ;;  %v9211_v17 = vpack.c.bf16 %v4063_v49, %v4062_v33 }
 0x2c5   : > { %v4642_v40 = vunpack.c.l.b16 %v9205_v46  ;;  %v4643_v10 = vunpack.c.h.b16 %v9205_v46  ;;  %v4644_v12 = vunpack.c.l.b16 %v9206_v52  ;;  %v4646_v62 = vunpack.c.l.b16 %v9207_v56 }
 0x2c6   : > { %v4645_v29 = vunpack.c.h.b16 %v9206_v52  ;;  %v4647_v50 = vunpack.c.h.b16 %v9207_v56  ;;  %v4648_v54 = vunpack.c.l.b16 %v9208_v61  ;;  %v4650_v22 = vunpack.c.l.b16 %v9209_v44 }
 0x2c7   : > { %v9212_v19 = vpack.c.bf16 %v4065_v59, %v4064_v60  ;;  %v4649_v41 = vunpack.c.h.b16 %v9208_v61  ;;  %v4652_v2 = vunpack.c.l.b16 %v9210_v47  ;;  %v4654_v1 = vunpack.c.l.b16 %v9211_v17 }
 0x2c8   : > { %v4651_v48 = vunpack.c.h.b16 %v9209_v44  ;;  %v4770_v43 = vrot.slane %v4642_v40, 7  ;;  %v4771_v7 = vrot.slane %v4644_v12, 6  ;;  %v4773_v3 = vrot.slane %v4646_v62, 5 }
 0x2c9   : > { %v4653_v55 = vunpack.c.h.b16 %v9210_v47  ;;  %v4655_v57 = vunpack.c.h.b16 %v9211_v17  ;;  %v4775_v32 = vrot.slane %v4648_v54, 4  ;;  %v4777_v36 = vrot.slane %v4650_v22, 3 }
 0x2ca   : > { %v4772_v30 = vsel %vm3610_vm1, %v4771_v7, %v4770_v43  ;;  %v4783_v0 = vrot.slane %v4643_v10, 7  ;;  %v4784_v5 = vrot.slane %v4645_v29, 6  ;;  %v4786_v24 = vrot.slane %v4647_v50, 5 }
 0x2cb   : > { %v4774_v33 = vsel %vm3612_vm3, %v4773_v3, %v4772_v30  ;;  %v4779_v49 = vrot.slane %v4652_v2, 2  ;;  %v4781_v60 = vrot.slane %v4654_v1, 1  ;;  %v4788_v26 = vrot.slane %v4649_v41, 4  ;;  %v5111_v2 = vld [vmem:[#allocation3 + $0x18] sm:$0x11] }
 0x2cc   : > { %v4776_v59 = vsel %vm3614_vm5, %v4775_v32, %v4774_v33  ;;  %v4785_v46 = vsel %vm3610_vm1, %v4784_v5, %v4783_v0  ;;  %v4790_v52 = vrot.slane %v4651_v48, 3  ;;  %v5026_v56 = vsel %vm12087_vm2, %v9212_v19, %v5025_v45 }
 0x2cd   : > { %v4778_v22 = vsel %vm3616_vm6, %v4777_v36, %v4776_v59  ;;  %v4787_v61 = vsel %vm3612_vm3, %v4786_v24, %v4785_v46  ;;  %5027 = vst [vmem:[#allocation3] sm:$0x11] %v5026_v56  ;;  %v5133_v44 = vshrl.u32 %v12146_v51, 16  ;;  %v5136_v47 = vshll.u32 %v12146_v51, 16 }
 0x2ce   : > { %v4780_v17 = vsel %vm3618_vm7, %v4779_v49, %v4778_v22  ;;  %v4789_v40 = vsel %vm3614_vm5, %v4788_v26, %v4787_v61  ;;  %v4792_v10 = vrot.slane %v4653_v55, 2  ;;  %v4794_v12 = vrot.slane %v4655_v57, 1  ;;  %v9626_v22 = vld [vmem:[%s13896_s3 + $0x264] ss:$8 sps:$4 sm:$0xff]   ;;  %v9624_v61 = vld [vmem:[%s13896_s3 + $0x260] ss:$8 sps:$4 sm:$0xff]  }
 0x2cf   : > { %v4782_v62 = vsel %vm14487_vm10, %v4781_v60, %v4780_v17  ;;  %v4791_v29 = vsel %vm3616_vm6, %v4790_v52, %v4789_v40  ;;  %v5135_v50 = vrot.slane %v5133_v44, 4  ;;  %v5138_v54 = vrot.slane %v5136_v47, 5  ;;  %v5802_v17 = vld [vmem:[#allocation3 + $0x58] sm:$0xee]  ;;  %vm14500_vm10 = vmmov %vm14470_vm0 }
 0x2d0   : > { %v4793_v19 = vsel %vm3618_vm7, %v4792_v10, %v4791_v29  ;;  %v5142_v3 = vshll.u32 %v5111_v2, 16  ;;  %vm14491_vm13 = vcmp.lt.s32.totalorder %v12027_v37, 112 }
 0x2d1   : > { %v4795_v41 = vsel %vm14488_vm12, %v4794_v12, %v4793_v19  ;;  %v5139_v48 = vor.u32 %v5138_v54, %v5135_v50  ;;  %v8951_v12 = vrot.slane %v5802_v17, 9  ;;  %vm14492_vm8 = vmmov %vm14491_vm13 }
 0x2d2   : > { %v4978_v1 = vpack.c.b16 %v4795_v41, %v4782_v62  ;;  %v5144_v33 = vrot.slane %v5142_v3, 5  ;;  %v5831_v62 = vrot.slane %v5111_v2, 5  ;;  %v9629_v3 = vld [vmem:[%s13896_s3 + $0x254] ss:$8 sps:$4 sm:$0xff]   ;;  %vm14493_vm9 = vmmov %vm14492_vm8 }
 0x2d3   : > { %v5140_v5 = vrot.slane %v5139_v48, 4  ;;  %vm14494_vm4 = vmmov %vm14492_vm8 }
 0x2d4   : > { %v5017_v43 = vsel %vm12127_vm15, %v4978_v1, 0  ;;  %v5110_v7 = vld [vmem:[#allocation3] sm:$0x11]  ;;  %vm14516_vm12 = vmmov %vm14470_vm0 }
 0x2d5   : > { %5018 = vst [vmem:[#allocation3 + $0x30] sm:$0xff] %v5017_v43  ;;  %v5119_v45 = vshrl.u32 %v5017_v43, 16  ;;  %v5122_v55 = vshll.u32 %v5017_v43, 16  ;;  %v8911_v57 = vcombine.high %v5017_v43, %v12146_v51  ;;  %v8910_v32 = vcombine.low %v5017_v43, %v12146_v51  ;;  %v9621_v51 = vld [vmem:[%s13896_s3 + $0x270] ss:$8 sps:$4 sm:$0xff]  }
 0x2d6   : > { %v5128_v0 = vshll.u32 %v5110_v7, 16  ;;  %v5145_v59 = vsel %vm10079_vm11, %v5140_v5, %v5144_v33  ;;  %v5827_v10 = vrot.slane %v5110_v7, 5  ;;  %v12198_v43 = vsel %vm10254_vm14, %v8951_v12, %v5831_v62  ;;  %v14496_v12 = vld [vmem:[#allocation54_spill] sm:$0xff] }
 0x2d7   : > { %5760 = vmatprep.mubr.bf16.mxu0 %v8911_v57  ;;  %v5121_v36 = vrot.slane %v5119_v45, 4  ;;  %v5124_v30 = vrot.slane %v5122_v55, 5 }
 0x2d8   : > { %5761 = vmatmul.mubr.bf16.vlgmr.msra.gmra.mxu0 %v8910_v32  ;;  %v5130_v60 = vrot.slane %v5128_v0, 5 }
 0x2d9   : > { %v5125_v24 = vor.u32 %v5124_v30, %v5121_v36  ;;  %v9627_v36 = vld [vmem:[%s13896_s3 + $0x250] ss:$8 sps:$4 sm:$0xff]  }
 0x2db   : > { %v5126_v49 = vrot.slane %v5125_v24, 4 }
 0x2dc   : > { %v5801_v47 = vld [vmem:[#allocation3 + $0x30] sm:$0xee] }
 0x2dd   : > { %v5131_v46 = vsel %vm10079_vm11, %v5126_v49, %v5130_v60  ;;  %v9449_v44 = vpop.permute.xlu1 %9448  ;;  %v8950_v40 = vrot.slane %v5801_v47, 9  ;;  %v14495_v47 = vld [vmem:[#allocation52_spill] sm:$0xff] }
 0x2de   : > { %v8870_v52 = vcombine.low %v5131_v46, %v5145_v59  ;;  %v8871_v56 = vcombine.high %v5131_v46, %v5145_v59  ;;  %v9451_v29 = vunpack.i.h.bf16 %v9449_v44  ;;  %v9450_v50 = vunpack.i.l.bf16 %v9449_v44 }
 0x2df   : > { %v12194_v48 = vsel %vm10254_vm14, %v8950_v40, %v5827_v10  ;;  %v9630_v10 = vld [vmem:[%s13896_s3 + $0x240] ss:$8 sps:$4 sm:$0xff]  }
 0x2e0   : > { %5487 = vmatprep.mubr.bf16.mxu1 %v8871_v56  ;;  %v8990_v2 = vcombine.low %v12194_v48, %v12198_v43  ;;  %v8991_v7 = vcombine.high %v12194_v48, %v12198_v43 }
 0x2e1   : > { %5488 = vmatmul.mubr.bf16.vlgmr.msra.gmra.mxu1 %v8870_v52 }
 0x2e2   : > { %6083 = vmatpush1.bf16.msra.mxu1 %v9621_v51 }
 0x2e3   : > { %6084 = vmatprep.subr.bf16.mxu1 %v9626_v22  ;;  %v9632_v22 = vld [vmem:[%s13896_s3 + $0x244] ss:$8 sps:$4 sm:$0xff]  }
 0x2e6   : > { %6085 = vmatpush1.bf16.msra.mxu1 %v9624_v61 }
 0x2e7   : > { %6086 = vmatprep.subr.bf16.mxu1 %v9629_v3  ;;  %v14497_v3 = vld [vmem:[#allocation45_spill] sm:$0xff] }
 0x2ea   : > { %6087 = vmatpush1.bf16.msra.mxu1 %v9627_v36 }
 0x2eb   : > { %v9454_v54 = vpop.permute.xlu1 %9453  ;;  %6088 = vmatprep.subr.bf16.mxu1 %v9632_v22 }
 0x2ec   : > { %v9456_v19 = vunpack.i.h.bf16 %v9454_v54  ;;  %v9455_v41 = vunpack.i.l.bf16 %v9454_v54 }
 0x2ee   : > { %v3781_v45 = vsel %vm14491_vm13, %v9451_v29, %v9456_v19  ;;  %v3789_v55 = vsel %vm14492_vm8, %v9456_v19, %v9451_v29  ;;  %v12213_v57 = vsel %vm14493_vm9, %v9450_v50, %v9455_v41  ;;  %v12217_v32 = vsel %vm14494_vm4, %v9455_v41, %v9450_v50  ;;  %6089 = vmatpush1.bf16.msra.mxu1 %v9630_v10  ;;  %vm14517_vm13 = vmmov %vm14494_vm4 }
 0x2ef   : > { %v3852_v30 = vrot.slane %v3781_v45, 1  ;;  %v3853_v0 = vrot.slane %v3789_v55, 1  ;;  %v3854_v5 = vrot.slane %v3781_v45, 2  ;;  %v3855_v24 = vrot.slane %v3789_v55, 2  ;;  %vm14518_vm8 = vmmov %vm14494_vm4 }
 0x2f0   : > { %v3856_v33 = vrot.slane %v3781_v45, 3  ;;  %v3857_v49 = vrot.slane %v3789_v55, 3  ;;  %v3858_v60 = vrot.slane %v3781_v45, 4  ;;  %v3859_v59 = vrot.slane %v3789_v55, 4  ;;  %vm14519_vm9 = vmmov %vm14494_vm4 }
 0x2f1   : > { %v3860_v46 = vrot.slane %v3781_v45, 5  ;;  %v3861_v52 = vrot.slane %v3789_v55, 5  ;;  %v3862_v56 = vrot.slane %v3781_v45, 6  ;;  %v3863_v51 = vrot.slane %v3789_v55, 6  ;;  %vm14520_vm4 = vmmov %vm14470_vm0 }
 0x2f2   : > { %v3864_v61 = vrot.slane %v3781_v45, 7  ;;  %v3865_v44 = vrot.slane %v3789_v55, 7  ;;  %v4098_v17 = vmax.f32 %v14495_v47, %v3781_v45  ;;  %v4099_v40 = vmax.f32 %v14351_v20, %v3789_v55  ;;  %v14498_v55 = vld [vmem:[#allocation39_spill] sm:$0xff] }
 0x2f3   : > { %v4100_v62 = vmax.f32 %v14496_v12, %v3852_v30  ;;  %v4101_v29 = vmax.f32 %v14352_v13, %v3853_v0  ;;  %v4102_v50 = vmax.f32 %v14326_v27, %v3854_v5  ;;  %v4103_v54 = vmax.f32 %v14353_v38, %v3855_v24  ;;  %v14499_v47 = vld [vmem:[#allocation111_spill] sm:$0xff] }
 0x2f4   : > { %v4104_v19 = vmax.f32 %v11534_v31, %v3856_v33  ;;  %v4105_v41 = vmax.f32 %v11629_v15, %v3857_v49  ;;  %v4106_v45 = vmax.f32 %v14497_v3, %v3858_v60  ;;  %v4107_v20 = vmax.f32 %v11636_v14, %v3859_v59  ;;  %v9633_v14 = vld [vmem:[%s13896_s3 + $0x230] ss:$8 sps:$4 sm:$0xff]  }
 0x2f5   : > { %v4108_v36 = vmax.f32 %v14498_v55, %v3860_v46  ;;  %v4109_v30 = vmax.f32 %v11661_v23, %v3861_v52  ;;  %v4110_v13 = vmax.f32 %v14499_v47, %v3862_v56  ;;  %v4111_v27 = vmax.f32 %v11669_v25, %v3863_v51  ;;  %v9635_v23 = vld [vmem:[%s13896_s3 + $0x234] ss:$8 sps:$4 sm:$0xff]  }
 0x2f6   : > { %v4112_v38 = vmax.f32 %v11640_v9, %v3864_v61  ;;  %v4113_v0 = vmax.f32 %v11717_v4, %v3865_v44  ;;  %v9229_v31 = vpack.c.bf16 %v4099_v40, %v4098_v17  ;;  %v9230_v5 = vpack.c.bf16 %v4101_v29, %v4100_v62  ;;  %v9638_v4 = vld [vmem:[%s13896_s3 + $0x224] ss:$8 sps:$4 sm:$0xff]   ;;  %6090 = vmatprep.subr.bf16.mxu1 %v9635_v23  ;;  %v9636_v40 = vld [vmem:[%s13896_s3 + $0x220] ss:$8 sps:$4 sm:$0xff]  }
 0x2f7   : > { %v9231_v15 = vpack.c.bf16 %v4103_v54, %v4102_v50  ;;  %v9232_v24 = vpack.c.bf16 %v4105_v41, %v4104_v19  ;;  %v9233_v33 = vpack.c.bf16 %v4107_v20, %v4106_v45  ;;  %v9234_v49 = vpack.c.bf16 %v4109_v30, %v4108_v36  ;;  %6091 = vmatpush1.bf16.msra.mxu1 %v9633_v14  ;;  %v9641_v50 = vld [vmem:[%s13896_s3 + $0x214] ss:$8 sps:$4 sm:$0xff]   ;;  %v5043_v45 = vld [vmem:[#allocation3 + $0x48] sm:$0x11] }
 0x2f8   : > { %v9235_v60 = vpack.c.bf16 %v4111_v27, %v4110_v13  ;;  %v9236_v25 = vpack.c.bf16 %v4113_v0, %v4112_v38  ;;  %v4690_v59 = vunpack.c.l.b16 %v9229_v31  ;;  %v4691_v9 = vunpack.c.h.b16 %v9229_v31  ;;  %6092 = vmatprep.subr.bf16.mxu1 %v9638_v4  ;;  %v9639_v0 = vld [vmem:[%s13896_s3 + $0x210] ss:$8 sps:$4 sm:$0xff]  }
 0x2f9   : > { %v4692_v46 = vunpack.c.l.b16 %v9230_v5  ;;  %v4693_v52 = vunpack.c.h.b16 %v9230_v5  ;;  %v4694_v56 = vunpack.c.l.b16 %v9231_v15  ;;  %v4695_v51 = vunpack.c.h.b16 %v9231_v15 }
 0x2fa   : > { %v4696_v22 = vunpack.c.l.b16 %v9232_v24  ;;  %v4697_v61 = vunpack.c.h.b16 %v9232_v24  ;;  %v4698_v44 = vunpack.c.l.b16 %v9233_v33  ;;  %v4699_v17 = vunpack.c.h.b16 %v9233_v33  ;;  %v9644_v33 = vld [vmem:[%s13896_s3 + $0x204] ss:$8 sps:$4 sm:$0xff]  }
 0x2fb   : > { %v4700_v10 = vunpack.c.l.b16 %v9234_v49  ;;  %v4701_v12 = vunpack.c.h.b16 %v9234_v49  ;;  %v4702_v62 = vunpack.c.l.b16 %v9235_v60  ;;  %v4703_v29 = vunpack.c.h.b16 %v9235_v60  ;;  %6093 = vmatpush1.bf16.msra.mxu1 %v9636_v40 }
 0x2fc   : > { %v4848_v54 = vrot.slane %v4690_v59, 7  ;;  %v4849_v19 = vrot.slane %v4692_v46, 6  ;;  %v4851_v41 = vrot.slane %v4694_v56, 5  ;;  %v4853_v3 = vrot.slane %v4696_v22, 4  ;;  %6094 = vmatprep.subr.bf16.mxu1 %v9641_v50 }
 0x2fd   : > { %v4855_v20 = vrot.slane %v4698_v44, 3  ;;  %v4857_v55 = vrot.slane %v4700_v10, 2  ;;  %v4859_v36 = vrot.slane %v4702_v62, 1  ;;  %v4861_v30 = vrot.slane %v4691_v9, 7  ;;  %v9647_v10 = vld [vmem:[%s13896_s3 + $0x2f4] ss:$8 sps:$4 sm:$0xff]  }
 0x2fe   : > { %v4850_v47 = vsel %vm3610_vm1, %v4849_v19, %v4848_v54  ;;  %v4862_v13 = vrot.slane %v4693_v52, 6  ;;  %v4864_v27 = vrot.slane %v4695_v51, 5  ;;  %v4866_v38 = vrot.slane %v4697_v61, 4 }
 0x2ff   : > { %v4852_v31 = vsel %vm3612_vm3, %v4851_v41, %v4850_v47  ;;  %v4868_v5 = vrot.slane %v4699_v17, 3  ;;  %v4870_v15 = vrot.slane %v4701_v12, 2  ;;  %v4872_v24 = vrot.slane %v4703_v29, 1  ;;  %6095 = vmatpush1.bf16.msra.mxu1 %v9639_v0  ;;  %v9645_v47 = vld [vmem:[%s13896_s3 + $0x2f0] ss:$8 sps:$4 sm:$0xff]  }
 0x300   : > { %v4854_v49 = vsel %vm3614_vm5, %v4853_v3, %v4852_v31  ;;  %v4863_v14 = vsel %vm3610_vm1, %v4862_v13, %v4861_v30  ;;  %v5044_v23 = vsel %vm12087_vm2, %v9236_v25, %v5043_v45  ;;  %v3838_v60 = vrot.slane %v12213_v57, 1  ;;  %v9642_v25 = vld [vmem:[%s13896_s3 + $0x200] ss:$8 sps:$4 sm:$0xff]   ;;  %6096 = vmatprep.subr.bf16.mxu1 %v9644_v33  ;;  %v14504_v31 = vld [vmem:[#allocation43_spill] sm:$0xff] }
 0x301   : > { %v4856_v59 = vsel %vm3616_vm6, %v4855_v20, %v4854_v49  ;;  %v4865_v9 = vsel %vm3612_vm3, %v4864_v27, %v4863_v14  ;;  %5045 = vst [vmem:[#allocation3 + $0x48] sm:$0x11] %v5044_v23  ;;  %v3839_v4 = vrot.slane %v12217_v32, 1  ;;  %v3840_v46 = vrot.slane %v12213_v57, 2  ;;  %v14502_v13 = vld [vmem:[#allocation41_spill] sm:$0xff]  ;;  %v14507_v49 = vld [vmem:[#allocation55_spill] sm:$0xff] }
 0x302   : > { %v4858_v52 = vsel %vm3618_vm7, %v4857_v55, %v4856_v59  ;;  %v4867_v56 = vsel %vm3614_vm5, %v4866_v38, %v4865_v9  ;;  %v3841_v51 = vrot.slane %v12217_v32, 2  ;;  %v3842_v22 = vrot.slane %v12213_v57, 3  ;;  %v14501_v55 = vld [vmem:[#allocation37_spill] sm:$0xff]  ;;  %v14503_v38 = vld [vmem:[#allocation42_spill] sm:$0xff] }
 0x303   : > { %v4860_v61 = vsel %vm14470_vm0, %v4859_v36, %v4858_v52  ;;  %v4869_v44 = vsel %vm3616_vm6, %v4868_v5, %v4867_v56  ;;  %v3843_v17 = vrot.slane %v12217_v32, 3  ;;  %v3844_v40 = vrot.slane %v12213_v57, 4  ;;  %6097 = vmatpush1.bf16.msra.mxu1 %v9642_v25  ;;  %v14508_v23 = vld [vmem:[#allocation14_spill] sm:$0xff]  ;;  %v14511_v52 = vld [vmem:[#allocation51_spill] sm:$0xff]  ;;  %vm14526_vm0 = vmmov %vm14518_vm8 }
 0x304   : > { %v4871_v12 = vsel %vm3618_vm7, %v4870_v15, %v4869_v44  ;;  %v3845_v62 = vrot.slane %v12217_v32, 4  ;;  %v3846_v29 = vrot.slane %v12213_v57, 5  ;;  %v3847_v50 = vrot.slane %v12217_v32, 5  ;;  %v14505_v15 = vld [vmem:[#allocation44_spill] sm:$0xff]  ;;  %6098 = vmatprep.subr.bf16.mxu1 %v9647_v10  ;;  %v14509_v59 = vld [vmem:[#allocation50_spill] sm:$0xff]  ;;  %v14514_v10 = vld [vmem:[#allocation49_spill] sm:$0xff] }
 0x305   : > { %v4873_v54 = vsel %vm14500_vm10, %v4872_v24, %v4871_v12  ;;  %v3848_v19 = vrot.slane %v12213_v57, 6  ;;  %v3849_v41 = vrot.slane %v12217_v32, 6  ;;  %v3850_v3 = vrot.slane %v12213_v57, 7  ;;  %vm14527_vm10 = vmmov %vm14520_vm4 }
 0x306   : > { %v4984_v45 = vpack.c.b16 %v4873_v54, %v4860_v61  ;;  %v3851_v20 = vrot.slane %v12217_v32, 7  ;;  %v4082_v36 = vmax.f32 %v14501_v55, %v12213_v57  ;;  %v4083_v30 = vmax.f32 %v14346_v35, %v12217_v32  ;;  %v9650_v57 = vld [vmem:[%s13896_s3 + $0x2e4] ss:$8 sps:$4 sm:$0xff]   ;;  %v14515_v54 = vld [vmem:[#allocation59_spill] sm:$0xff] }
 0x307   : > { %v4084_v27 = vmax.f32 %v14502_v13, %v3838_v60  ;;  %v4085_v0 = vmax.f32 %v14503_v38, %v3839_v4  ;;  %v4086_v5 = vmax.f32 %v14504_v31, %v3840_v46  ;;  %v4087_v24 = vmax.f32 %v14505_v15, %v3841_v51  ;;  %v14506_v32 = vld [vmem:[#allocation13_spill] sm:$0xff]  ;;  %v14510_v4 = vld [vmem:[#allocation47_spill] sm:$0xff]  ;;  %v14512_v51 = vld [vmem:[#allocation110_spill] sm:$0xff]  ;;  %6099 = vmatpush2.bf16.msra.mxu1 %v9645_v47 }
 0x308   : > { %v12315_v35 = vsel %vm12127_vm15, %v4984_v45, 0  ;;  %v4088_v33 = vmax.f32 %v14506_v32, %v3842_v22  ;;  %v4089_v14 = vmax.f32 %v14507_v49, %v3843_v17  ;;  %v4090_v60 = vmax.f32 %v14508_v23, %v3844_v40  ;;  %v14513_v61 = vld [vmem:[#allocation57_spill] sm:$0xff]  ;;  %6100 = vmatprep.subr.bf16.mxu1 %v9650_v57 }
 0x309   : > { %v4091_v9 = vmax.f32 %v14509_v59, %v3845_v62  ;;  %v4092_v46 = vmax.f32 %v14510_v4, %v3846_v29  ;;  %v4093_v56 = vmax.f32 %v14511_v52, %v3847_v50  ;;  %v4094_v25 = vmax.f32 %v14512_v51, %v3848_v19  ;;  %5042 = vst [vmem:[#allocation3 + $0x8] sm:$0xff] %v12315_v35  ;;  %v9648_v17 = vld [vmem:[%s13896_s3 + $0x2e0] ss:$8 sps:$4 sm:$0xff]   ;;  %v9653_v19 = vld [vmem:[%s13896_s3 + $0x2d4] ss:$8 sps:$4 sm:$0xff]   ;;  %v12340_v59 = vpop.permute.xlu0 %9458 }
 0x30a   : > { %v4095_v44 = vmax.f32 %v14513_v61, %v3849_v41  ;;  %v4096_v12 = vmax.f32 %v14514_v10, %v3850_v3  ;;  %v4097_v22 = vmax.f32 %v14515_v54, %v3851_v20  ;;  %v9221_v45 = vpack.c.bf16 %v4083_v30, %v4082_v36  ;;  %v9654_v10 = vld [vmem:[%s13896_s3 + $0x2c0] ss:$8 sps:$4 sm:$0xff]  }
 0x30b   : > { %v9222_v40 = vpack.c.bf16 %v4085_v0, %v4084_v27  ;;  %v9223_v62 = vpack.c.bf16 %v4087_v24, %v4086_v5  ;;  %v9224_v29 = vpack.c.bf16 %v4089_v14, %v4088_v33  ;;  %v9225_v50 = vpack.c.bf16 %v4091_v9, %v4090_v60  ;;  %6101 = vmatpush2.bf16.msra.mxu1 %v9648_v17  ;;  %v9651_v0 = vld [vmem:[%s13896_s3 + $0x2d0] ss:$8 sps:$4 sm:$0xff]   ;;  %v9656_v33 = vld [vmem:[%s13896_s3 + $0x2c4] ss:$8 sps:$4 sm:$0xff]   ;;  %v12347_v17 = vpop.permute.xlu1 %9463 }
 0x30c   : > { %v9226_v41 = vpack.c.bf16 %v4093_v56, %v4092_v46  ;;  %v9227_v55 = vpack.c.bf16 %v4095_v44, %v4094_v25  ;;  %v9228_v3 = vpack.c.bf16 %v4097_v22, %v4096_v12  ;;  %v4674_v13 = vunpack.c.l.b16 %v9221_v45  ;;  %6102 = vmatprep.subr.bf16.mxu1 %v9653_v19  ;;  %v5037_v9 = vld [vmem:[#allocation3 + $0x68] sm:$0x11] }
 0x30d   : > { %v4675_v20 = vunpack.c.h.b16 %v9221_v45  ;;  %v4676_v36 = vunpack.c.l.b16 %v9222_v40  ;;  %v4677_v30 = vunpack.c.h.b16 %v9222_v40  ;;  %v4678_v47 = vunpack.c.l.b16 %v9223_v62  ;;  %v9659_v40 = vld [vmem:[%s13896_s3 + $0x2b4] ss:$8 sps:$4 sm:$0xff]  }
 0x30e   : > { %v4679_v38 = vunpack.c.h.b16 %v9223_v62  ;;  %v4680_v31 = vunpack.c.l.b16 %v9224_v29  ;;  %v4681_v15 = vunpack.c.h.b16 %v9224_v29  ;;  %v4682_v27 = vunpack.c.l.b16 %v9225_v50 }
 0x30f   : > { %v4683_v5 = vunpack.c.h.b16 %v9225_v50  ;;  %v4684_v24 = vunpack.c.l.b16 %v9226_v41  ;;  %v4685_v57 = vunpack.c.h.b16 %v9226_v41  ;;  %v4686_v32 = vunpack.c.l.b16 %v9227_v55  ;;  %6103 = vmatpush2.bf16.msra.mxu1 %v9651_v0  ;;  %v12356_v41 = vpop.permute.xlu0 %9468 }
 0x310   : > { %v4687_v49 = vunpack.c.h.b16 %v9227_v55  ;;  %v4822_v14 = vrot.slane %v4674_v13, 7  ;;  %v4823_v23 = vrot.slane %v4676_v36, 6  ;;  %v4825_v60 = vrot.slane %v4678_v47, 5  ;;  %6104 = vmatprep.subr.bf16.mxu1 %v9656_v33 }
 0x311   : > { %v4827_v4 = vrot.slane %v4680_v31, 4  ;;  %v4829_v46 = vrot.slane %v4682_v27, 3  ;;  %v4831_v52 = vrot.slane %v4684_v24, 2  ;;  %v4833_v56 = vrot.slane %v4686_v32, 1  ;;  %v9662_v24 = vld [vmem:[%s13896_s3 + $0x2a4] ss:$8 sps:$4 sm:$0xff]  }
 0x312   : > { %v4824_v51 = vsel %vm3610_vm1, %v4823_v23, %v4822_v14  ;;  %v4835_v25 = vrot.slane %v4675_v20, 7  ;;  %v4836_v61 = vrot.slane %v4677_v30, 6  ;;  %v4838_v44 = vrot.slane %v4679_v38, 5 }
 0x313   : > { %v4826_v12 = vsel %vm3612_vm3, %v4825_v60, %v4824_v51  ;;  %v4840_v54 = vrot.slane %v4681_v15, 4  ;;  %v4842_v22 = vrot.slane %v4683_v5, 3  ;;  %v4844_v45 = vrot.slane %v4685_v57, 2  ;;  %6105 = vmatpush2.bf16.msra.mxu1 %v9654_v10  ;;  %v9660_v51 = vld [vmem:[%s13896_s3 + $0x2a0] ss:$8 sps:$4 sm:$0xff]  }
 0x314   : > { %v4828_v62 = vsel %vm3614_vm5, %v4827_v4, %v4826_v12  ;;  %v4837_v29 = vsel %vm3610_vm1, %v4836_v61, %v4835_v25  ;;  %v4846_v50 = vrot.slane %v4687_v49, 1  ;;  %v5038_v19 = vsel %vm12087_vm2, %v9228_v3, %v5037_v9  ;;  %v9657_v3 = vld [vmem:[%s13896_s3 + $0x2b0] ss:$8 sps:$4 sm:$0xff]   ;;  %6106 = vmatprep.subr.bf16.mxu1 %v9659_v40  ;;  %v9665_v12 = vld [vmem:[%s13896_s3 + $0x294] ss:$8 sps:$4 sm:$0xff]  }
 0x315   : > { %v4830_v55 = vsel %vm3616_vm6, %v4829_v46, %v4828_v62  ;;  %v4839_v13 = vsel %vm3612_vm3, %v4838_v44, %v4837_v29  ;;  %5039 = vst [vmem:[#allocation3 + $0x68] sm:$0x11] %v5038_v19  ;;  %v9461_v20 = vunpack.i.h.bf16 %v12340_v59  ;;  %v9460_v36 = vunpack.i.l.bf16 %v12340_v59 }
 0x316   : > { %v4832_v30 = vsel %vm3618_vm7, %v4831_v52, %v4830_v55  ;;  %v4841_v47 = vsel %vm3614_vm5, %v4840_v54, %v4839_v13  ;;  %v9466_v38 = vunpack.i.h.bf16 %v12347_v17  ;;  %v9465_v31 = vunpack.i.l.bf16 %v12347_v17 }
 0x317   : > { %v4834_v15 = vsel %vm14516_vm12, %v4833_v56, %v4832_v30  ;;  %v4843_v27 = vsel %vm3616_vm6, %v4842_v22, %v4841_v47  ;;  %v9471_v0 = vunpack.i.h.bf16 %v12356_v41  ;;  %v9470_v5 = vunpack.i.l.bf16 %v12356_v41  ;;  %6107 = vmatpush2.bf16.msra.mxu1 %v9657_v3  ;;  %v14521_v30 = vld [vmem:[#allocation80_spill] sm:$0xff]  ;;  %vm14528_vm12 = vmmov %vm14520_vm4 }
 0x318   : > { %v4845_v57 = vsel %vm3618_vm7, %v4844_v45, %v4843_v27  ;;  %v3783_v32 = vsel %vm14517_vm13, %v9461_v20, %v9466_v38  ;;  %v3791_v33 = vsel %vm14518_vm8, %v9466_v38, %v9461_v20  ;;  %v12387_v49 = vsel %vm14519_vm9, %v9460_v36, %v9465_v31  ;;  %6108 = vmatprep.subr.bf16.mxu1 %v9662_v24  ;;  %v9663_v38 = vld [vmem:[%s13896_s3 + $0x290] ss:$8 sps:$4 sm:$0xff]   ;;  %vm14545_vm13 = vmmov %vm14520_vm4 }
 0x319   : > { %v4847_v14 = vsel %vm14520_vm4, %v4846_v50, %v4845_v57  ;;  %v3880_v23 = vrot.slane %v3783_v32, 1  ;;  %v3881_v60 = vrot.slane %v3791_v33, 1  ;;  %v3882_v9 = vrot.slane %v3783_v32, 2  ;;  %vm14546_vm8 = vmmov %vm14526_vm0 }
 0x31a   : > { %v4982_v4 = vpack.c.b16 %v4847_v14, %v4834_v15  ;;  %v3883_v46 = vrot.slane %v3791_v33, 2  ;;  %v3884_v52 = vrot.slane %v3783_v32, 3  ;;  %v3885_v56 = vrot.slane %v3791_v33, 3  ;;  %vm14547_vm9 = vmmov %vm14526_vm0 }
 0x31b   : > { %v3886_v25 = vrot.slane %v3783_v32, 4  ;;  %v3887_v61 = vrot.slane %v3791_v33, 4  ;;  %v3888_v44 = vrot.slane %v3783_v32, 5  ;;  %v3889_v10 = vrot.slane %v3791_v33, 5  ;;  %6109 = vmatpush2.bf16.msra.mxu1 %v9660_v51 }
 0x31c   : > { %v12398_v54 = vsel %vm12127_vm15, %v4982_v4, 0  ;;  %v3890_v22 = vrot.slane %v3783_v32, 6  ;;  %v3891_v45 = vrot.slane %v3791_v33, 6  ;;  %v3892_v40 = vrot.slane %v3783_v32, 7  ;;  %6110 = vmatprep.subr.bf16.mxu1 %v9665_v12 }
 0x31d   : > { %5036 = vst [vmem:[#allocation3 + $0x50] sm:$0xff] %v12398_v54  ;;  %v3893_v62 = vrot.slane %v3791_v33, 7  ;;  %v4130_v29 = vmax.f32 %v10990_v39, %v3783_v32  ;;  %v4131_v50 = vmax.f32 %v14396_v11, %v3791_v33  ;;  %v4132_v19 = vmax.f32 %v10996_v34, %v3880_v23  ;;  %v14522_v39 = vld [vmem:[#allocation89_spill] sm:$0xff]  ;;  %v14525_v32 = vld [vmem:[#allocation71_spill] sm:$0xff] }
 0x31e   : > { %v4133_v55 = vmax.f32 %v14397_v53, %v3881_v60  ;;  %v4134_v13 = vmax.f32 %v11002_v63, %v3882_v9  ;;  %v4135_v20 = vmax.f32 %v14399_v58, %v3883_v46  ;;  %v4136_v47 = vmax.f32 %v14521_v30, %v3884_v52  ;;  %v14523_v34 = vld [vmem:[#allocation53_spill] sm:$0xff]  ;;  %v14524_v58 = vld [vmem:[#allocation56_spill] sm:$0xff] }
 0x31f   : > { %v4137_v3 = vmax.f32 %v11778_v28, %v3885_v56  ;;  %v4138_v15 = vmax.f32 %v14522_v39, %v3886_v25  ;;  %v4139_v11 = vmax.f32 %v11799_v6, %v3887_v61  ;;  %v4140_v27 = vmax.f32 %v14523_v34, %v3888_v44  ;;  %v9668_v63 = vld [vmem:[%s13896_s3 + $0x284] ss:$8 sps:$4 sm:$0xff]   ;;  %6111 = vmatpush2.bf16.msra.mxu1 %v9663_v38  ;;  %v5055_v30 = vld [vmem:[#allocation3 + $0x38] sm:$0x11] }
 0x320   : > { %v4141_v53 = vmax.f32 %v11810_v42, %v3889_v10  ;;  %v4142_v24 = vmax.f32 %v14524_v58, %v3890_v22  ;;  %v4143_v57 = vmax.f32 %v11832_v21, %v3891_v45  ;;  %v4144_v33 = vmax.f32 %v14525_v32, %v3892_v40  ;;  %v9666_v42 = vld [vmem:[%s13896_s3 + $0x280] ss:$8 sps:$4 sm:$0xff]   ;;  %6112 = vmatprep.subr.bf16.mxu1 %v9668_v63 }
 0x321   : > { %v4145_v28 = vmax.f32 %v11878_v18, %v3893_v62  ;;  %v9245_v14 = vpack.c.bf16 %v4131_v50, %v4130_v29  ;;  %v9246_v23 = vpack.c.bf16 %v4133_v55, %v4132_v19  ;;  %v9247_v6 = vpack.c.bf16 %v4135_v20, %v4134_v13 }
 0x322   : > { %v9248_v60 = vpack.c.bf16 %v4137_v3, %v4136_v47  ;;  %v9249_v9 = vpack.c.bf16 %v4139_v11, %v4138_v15  ;;  %v9250_v4 = vpack.c.bf16 %v4141_v53, %v4140_v27  ;;  %v9251_v46 = vpack.c.bf16 %v4143_v57, %v4142_v24 }
 0x323   : > { %v9252_v52 = vpack.c.bf16 %v4145_v28, %v4144_v33  ;;  %v4722_v56 = vunpack.c.l.b16 %v9245_v14  ;;  %v4723_v51 = vunpack.c.h.b16 %v9245_v14  ;;  %v4724_v21 = vunpack.c.l.b16 %v9246_v23  ;;  %6113 = vmatpush2.bf16.msra.mxu1 %v9666_v42 }
 0x324   : > { %v4725_v25 = vunpack.c.h.b16 %v9246_v23  ;;  %v4726_v61 = vunpack.c.l.b16 %v9247_v6  ;;  %v4727_v18 = vunpack.c.h.b16 %v9247_v6  ;;  %v4728_v44 = vunpack.c.l.b16 %v9248_v60 }
 0x325   : > { %v4729_v10 = vunpack.c.h.b16 %v9248_v60  ;;  %v4730_v12 = vunpack.c.l.b16 %v9249_v9  ;;  %v4731_v22 = vunpack.c.h.b16 %v9249_v9  ;;  %v4732_v45 = vunpack.c.l.b16 %v9250_v4 }
 0x326   : > { %v4733_v40 = vunpack.c.h.b16 %v9250_v4  ;;  %v4734_v62 = vunpack.c.l.b16 %v9251_v46  ;;  %v4735_v29 = vunpack.c.h.b16 %v9251_v46  ;;  %v4900_v50 = vrot.slane %v4722_v56, 7 }
 0x327   : > { %v4901_v19 = vrot.slane %v4724_v21, 6  ;;  %v4903_v55 = vrot.slane %v4726_v61, 5  ;;  %v4905_v13 = vrot.slane %v4728_v44, 4  ;;  %v4907_v20 = vrot.slane %v4730_v12, 3 }
 0x328   : > { %v4909_v47 = vrot.slane %v4732_v45, 2  ;;  %v4911_v38 = vrot.slane %v4734_v62, 1  ;;  %v4913_v3 = vrot.slane %v4723_v51, 7  ;;  %v4914_v39 = vrot.slane %v4725_v25, 6 }
 0x329   : > { %v4902_v15 = vsel %vm3610_vm1, %v4901_v19, %v4900_v50  ;;  %v4916_v11 = vrot.slane %v4727_v18, 5  ;;  %v4918_v34 = vrot.slane %v4729_v10, 4  ;;  %v4920_v27 = vrot.slane %v4731_v22, 3  ;;  %v14529_v22 = vld [vmem:[#allocation62_spill] sm:$0xff]  ;;  %v14531_v50 = vld [vmem:[#allocation65_spill] sm:$0xff] }
 0x32a   : > { %v4904_v63 = vsel %vm3612_vm3, %v4903_v55, %v4902_v15  ;;  %v4915_v53 = vsel %vm3610_vm1, %v4914_v39, %v4913_v3  ;;  %v4922_v58 = vrot.slane %v4733_v40, 2  ;;  %v4924_v24 = vrot.slane %v4735_v29, 1  ;;  %v14530_v40 = vld [vmem:[#allocation63_spill] sm:$0xff]  ;;  %v14535_v3 = vld [vmem:[#allocation70_spill] sm:$0xff]  ;;  %v14536_v15 = vld [vmem:[#allocation68_spill] sm:$0xff] }
 0x32b   : > { %v4906_v57 = vsel %vm3614_vm5, %v4905_v13, %v4904_v63  ;;  %v4917_v32 = vsel %vm3612_vm3, %v4916_v11, %v4915_v53  ;;  %v5056_v33 = vsel %vm12087_vm2, %v9252_v52, %v5055_v30  ;;  %v3790_v28 = vsel %vm14526_vm0, %v9465_v31, %v9460_v36  ;;  %v14532_v55 = vld [vmem:[#allocation67_spill] sm:$0xff]  ;;  %v14539_v53 = vld [vmem:[#allocation61_spill] sm:$0xff] }
 0x32c   : > { %v4908_v14 = vsel %vm3616_vm6, %v4907_v20, %v4906_v57  ;;  %v4919_v23 = vsel %vm3614_vm5, %v4918_v34, %v4917_v32  ;;  %5057 = vst [vmem:[#allocation3 + $0x38] sm:$0x11] %v5056_v33  ;;  %v3866_v6 = vrot.slane %v12387_v49, 1  ;;  %v3867_v60 = vrot.slane %v3790_v28, 1  ;;  %v14533_v20 = vld [vmem:[#allocation64_spill] sm:$0xff]  ;;  %v14537_v34 = vld [vmem:[#allocation75_spill] sm:$0xff] }
 0x32d   : > { %v4910_v9 = vsel %vm3618_vm7, %v4909_v47, %v4908_v14  ;;  %v4921_v4 = vsel %vm3616_vm6, %v4920_v27, %v4919_v23  ;;  %v3868_v46 = vrot.slane %v12387_v49, 2  ;;  %v3869_v59 = vrot.slane %v3790_v28, 2  ;;  %v14534_v47 = vld [vmem:[#allocation66_spill] sm:$0xff]  ;;  %v14538_v27 = vld [vmem:[#allocation73_spill] sm:$0xff]  ;;  %v14541_v32 = vld [vmem:[#allocation40_spill] sm:$0xff] }
 0x32e   : > { %v4912_v17 = vsel %vm14527_vm10, %v4911_v38, %v4910_v9  ;;  %v4923_v42 = vsel %vm3618_vm7, %v4922_v58, %v4921_v4  ;;  %v3870_v36 = vrot.slane %v12387_v49, 3  ;;  %v3871_v31 = vrot.slane %v3790_v28, 3  ;;  %v14543_v23 = vld [vmem:[#allocation58_spill] sm:$0xff]  ;;  %vm14564_vm10 = vmmov %vm14526_vm0 }
 0x32f   : > { %v4925_v52 = vsel %vm14528_vm12, %v4924_v24, %v4923_v42  ;;  %v3872_v56 = vrot.slane %v12387_v49, 4  ;;  %v3873_v51 = vrot.slane %v3790_v28, 4  ;;  %v3874_v21 = vrot.slane %v12387_v49, 5  ;;  %v14540_v24 = vld [vmem:[#allocation72_spill] sm:$0xff]  ;;  %vm14565_vm12 = vmmov %vm14520_vm4 }
 0x330   : > { %v4988_v25 = vpack.c.b16 %v4925_v52, %v4912_v17  ;;  %v3875_v61 = vrot.slane %v3790_v28, 5  ;;  %v3876_v18 = vrot.slane %v12387_v49, 6  ;;  %v3877_v44 = vrot.slane %v3790_v28, 6 }
 0x331   : > { %v3878_v10 = vrot.slane %v12387_v49, 7  ;;  %v3879_v12 = vrot.slane %v3790_v28, 7  ;;  %v4114_v45 = vmax.f32 %v14529_v22, %v12387_v49  ;;  %v4115_v62 = vmax.f32 %v14530_v40, %v3790_v28  ;;  %v14542_v28 = vld [vmem:[#allocation69_spill] sm:$0xff] }
 0x332   : > { %v12458_v29 = vsel %vm12127_vm15, %v4988_v25, 0  ;;  %v4116_v19 = vmax.f32 %v14531_v50, %v3866_v6  ;;  %v4117_v13 = vmax.f32 %v14532_v55, %v3867_v60  ;;  %v4118_v30 = vmax.f32 %v14533_v20, %v3868_v46  ;;  %v14544_v60 = vld [vmem:[#allocation79_spill] sm:$0xff]  ;;  %v5049_v20 = vld [vmem:[#allocation3 + $0x20] sm:$0x11] }
 0x333   : > { %v4119_v38 = vmax.f32 %v14534_v47, %v3869_v59  ;;  %v4120_v39 = vmax.f32 %v14535_v3, %v3870_v36  ;;  %v4121_v11 = vmax.f32 %v14536_v15, %v3871_v31  ;;  %v4122_v49 = vmax.f32 %v14537_v34, %v3872_v56  ;;  %5054 = vst [vmem:[#allocation3 + $0x10] sm:$0xff] %v12458_v29 }
 0x334   : > { %v4123_v63 = vmax.f32 %v14538_v27, %v3873_v51  ;;  %v4124_v58 = vmax.f32 %v14539_v53, %v3874_v21  ;;  %v4125_v57 = vmax.f32 %v14540_v24, %v3875_v61  ;;  %v4126_v33 = vmax.f32 %v14541_v32, %v3876_v18 }
 0x335   : > { %v4127_v14 = vmax.f32 %v14542_v28, %v3877_v44  ;;  %v4128_v6 = vmax.f32 %v14543_v23, %v3878_v10  ;;  %v4129_v9 = vmax.f32 %v14544_v60, %v3879_v12  ;;  %v9237_v4 = vpack.c.bf16 %v4115_v62, %v4114_v45 }
 0x336   : > { %v9238_v46 = vpack.c.bf16 %v4117_v13, %v4116_v19  ;;  %v9239_v59 = vpack.c.bf16 %v4119_v38, %v4118_v30  ;;  %v9240_v17 = vpack.c.bf16 %v4121_v11, %v4120_v39  ;;  %v9241_v42 = vpack.c.bf16 %v4123_v63, %v4122_v49  ;;  %v12476_v49 = vpop.permute.xlu1 %9473 }
 0x337   : > { %v9242_v36 = vpack.c.bf16 %v4125_v57, %v4124_v58  ;;  %v9243_v31 = vpack.c.bf16 %v4127_v14, %v4126_v33  ;;  %v9244_v52 = vpack.c.bf16 %v4129_v9, %v4128_v6  ;;  %v4706_v56 = vunpack.c.l.b16 %v9237_v4 }
 0x338   : > { %v4707_v51 = vunpack.c.h.b16 %v9237_v4  ;;  %v4708_v21 = vunpack.c.l.b16 %v9238_v46  ;;  %v4709_v25 = vunpack.c.h.b16 %v9238_v46  ;;  %v4710_v61 = vunpack.c.l.b16 %v9239_v59 }
 0x339   : > { %v4711_v18 = vunpack.c.h.b16 %v9239_v59  ;;  %v4712_v22 = vunpack.c.l.b16 %v9240_v17  ;;  %v4713_v44 = vunpack.c.h.b16 %v9240_v17  ;;  %v4714_v40 = vunpack.c.l.b16 %v9241_v42 }
 0x33a   : > { %v4715_v10 = vunpack.c.h.b16 %v9241_v42  ;;  %v4716_v50 = vunpack.c.l.b16 %v9242_v36  ;;  %v4717_v12 = vunpack.c.h.b16 %v9242_v36  ;;  %v4718_v45 = vunpack.c.l.b16 %v9243_v31 }
 0x33b   : > { %v4719_v62 = vunpack.c.h.b16 %v9243_v31  ;;  %v4874_v19 = vrot.slane %v4706_v56, 7  ;;  %v4875_v55 = vrot.slane %v4708_v21, 6  ;;  %v4877_v13 = vrot.slane %v4710_v61, 5 }
 0x33c   : > { %v4879_v30 = vrot.slane %v4712_v22, 4  ;;  %v4881_v47 = vrot.slane %v4714_v40, 3  ;;  %v4883_v38 = vrot.slane %v4716_v50, 2  ;;  %v4885_v3 = vrot.slane %v4718_v45, 1 }
 0x33d   : > { %v4876_v39 = vsel %vm3610_vm1, %v4875_v55, %v4874_v19  ;;  %v4887_v15 = vrot.slane %v4707_v51, 7  ;;  %v4888_v11 = vrot.slane %v4709_v25, 6  ;;  %v4890_v34 = vrot.slane %v4711_v18, 5  ;;  %v14548_v55 = vld [vmem:[#allocation103_spill] sm:$0xff] }
 0x33e   : > { %v4878_v27 = vsel %vm3612_vm3, %v4877_v13, %v4876_v39  ;;  %v4892_v63 = vrot.slane %v4713_v44, 4  ;;  %v4894_v53 = vrot.slane %v4715_v10, 3  ;;  %v4896_v58 = vrot.slane %v4717_v12, 2 }
 0x33f   : > { %v4880_v24 = vsel %vm3614_vm5, %v4879_v30, %v4878_v27  ;;  %v4889_v57 = vsel %vm3610_vm1, %v4888_v11, %v4887_v15  ;;  %v4898_v32 = vrot.slane %v4719_v62, 1  ;;  %v5050_v33 = vsel %vm12087_vm2, %v9244_v52, %v5049_v20  ;;  %v14549_v20 = vld [vmem:[#allocation104_spill] sm:$0xff]  ;;  %v14552_v15 = vld [vmem:[#allocation107_spill] sm:$0xff] }
 0x340   : > { %v4882_v28 = vsel %vm3616_vm6, %v4881_v47, %v4880_v24  ;;  %v4891_v14 = vsel %vm3612_vm3, %v4890_v34, %v4889_v57  ;;  %5051 = vst [vmem:[#allocation3 + $0x20] sm:$0x11] %v5050_v33  ;;  %v9476_v23 = vunpack.i.h.bf16 %v12476_v49  ;;  %v9475_v6 = vunpack.i.l.bf16 %v12476_v49  ;;  %v14550_v47 = vld [vmem:[#allocation105_spill] sm:$0xff]  ;;  %v14553_v34 = vld [vmem:[#allocation46_spill] sm:$0xff]  ;;  %v14556_v57 = vld [vmem:[#allocation60_spill] sm:$0xff] }
 0x341   : > { %v4884_v60 = vsel %vm3618_vm7, %v4883_v38, %v4882_v28  ;;  %v4893_v9 = vsel %vm3614_vm5, %v4892_v63, %v4891_v14  ;;  %v5147_v4 = vshrl.u32 %v12398_v54, 16  ;;  %v5150_v46 = vshll.u32 %v12398_v54, 16  ;;  %v14554_v63 = vld [vmem:[#allocation109_spill] sm:$0xff]  ;;  %v14557_v33 = vld [vmem:[#allocation48_spill] sm:$0xff] }
 0x342   : > { %v4886_v59 = vsel %vm14545_vm13, %v4885_v3, %v4884_v60  ;;  %v4895_v17 = vsel %vm3616_vm6, %v4894_v53, %v4893_v9  ;;  %v3785_v42 = vsel %vm14546_vm8, %v9471_v0, %v9476_v23  ;;  %v3793_v36 = vsel %vm14547_vm9, %v9476_v23, %v9471_v0  ;;  %v14551_v3 = vld [vmem:[#allocation106_spill] sm:$0xff]  ;;  %v14558_v14 = vld [vmem:[#allocation81_spill] sm:$0xff]  ;;  %v14559_v60 = vld [vmem:[#allocation108_spill] sm:$0xff] }
 0x343   : > { %v4897_v31 = vsel %vm3618_vm7, %v4896_v58, %v4895_v17  ;;  %v3908_v52 = vrot.slane %v3785_v42, 1  ;;  %v3909_v56 = vrot.slane %v3793_v36, 1  ;;  %v3910_v51 = vrot.slane %v3785_v42, 2  ;;  %v14555_v58 = vld [vmem:[#allocation38_spill] sm:$0xff]  ;;  %vm14566_vm13 = vmmov %vm14520_vm4 }
 0x344   : > { %v4899_v21 = vsel %vm14520_vm4, %v4898_v32, %v4897_v31  ;;  %v3911_v25 = vrot.slane %v3793_v36, 2  ;;  %v3912_v61 = vrot.slane %v3785_v42, 3  ;;  %v3913_v18 = vrot.slane %v3793_v36, 3  ;;  %v14562_v31 = vld [vmem:[#allocation77_spill] sm:$0xff] }
 0x345   : > { %v4986_v22 = vpack.c.b16 %v4899_v21, %v4886_v59  ;;  %v3914_v44 = vrot.slane %v3785_v42, 4  ;;  %v3915_v40 = vrot.slane %v3793_v36, 4  ;;  %v3916_v10 = vrot.slane %v3785_v42, 5  ;;  %v14560_v59 = vld [vmem:[#allocation86_spill] sm:$0xff] }
 0x346   : > { %v3917_v50 = vrot.slane %v3793_v36, 5  ;;  %v3918_v12 = vrot.slane %v3785_v42, 6  ;;  %v3919_v45 = vrot.slane %v3793_v36, 6  ;;  %v3920_v62 = vrot.slane %v3785_v42, 7 }
 0x347   : > { %v12505_v0 = vsel %vm12127_vm15, %v4986_v22, 0  ;;  %v3921_v19 = vrot.slane %v3793_v36, 7  ;;  %v4162_v13 = vmax.f32 %v14548_v55, %v3785_v42  ;;  %v4163_v30 = vmax.f32 %v14549_v20, %v3793_v36  ;;  %v14561_v42 = vld [vmem:[#allocation113_spill] sm:$0xff] }
 0x348   : > { %5048 = vst [vmem:[#allocation3 + $0x40] sm:$0xff] %v12505_v0  ;;  %v4164_v38 = vmax.f32 %v14550_v47, %v3908_v52  ;;  %v4165_v39 = vmax.f32 %v14551_v3, %v3909_v56  ;;  %v4166_v11 = vmax.f32 %v14552_v15, %v3910_v51  ;;  %v4167_v27 = vmax.f32 %v14553_v34, %v3911_v25  ;;  %v14563_v56 = vld [vmem:[#allocation115_spill] sm:$0xff] }
 0x349   : > { %v4168_v53 = vmax.f32 %v14554_v63, %v3912_v61  ;;  %v4169_v24 = vmax.f32 %v14555_v58, %v3913_v18  ;;  %v4170_v32 = vmax.f32 %v14556_v57, %v3914_v44  ;;  %v4171_v28 = vmax.f32 %v14557_v33, %v3915_v40 }
 0x34a   : > { %v4172_v23 = vmax.f32 %v14558_v14, %v3916_v10  ;;  %v4173_v9 = vmax.f32 %v14559_v60, %v3917_v50  ;;  %v4174_v17 = vmax.f32 %v14560_v59, %v3918_v12  ;;  %v4175_v36 = vmax.f32 %v14561_v42, %v3919_v45 }
 0x34b   : > { %v4176_v52 = vmax.f32 %v14562_v31, %v3920_v62  ;;  %v4177_v51 = vmax.f32 %v14563_v56, %v3921_v19  ;;  %v9261_v21 = vpack.c.bf16 %v4163_v30, %v4162_v13  ;;  %v9262_v25 = vpack.c.bf16 %v4165_v39, %v4164_v38 }
 0x34c   : > { %v9263_v61 = vpack.c.bf16 %v4167_v27, %v4166_v11  ;;  %v9264_v18 = vpack.c.bf16 %v4169_v24, %v4168_v53  ;;  %v9265_v22 = vpack.c.bf16 %v4171_v28, %v4170_v32  ;;  %v9266_v44 = vpack.c.bf16 %v4173_v9, %v4172_v23  ;;  %v5067_v53 = vld [vmem:[#allocation3 + $0x28] sm:$0x11] }
 0x34d   : > { %v9267_v55 = vpack.c.bf16 %v4175_v36, %v4174_v17  ;;  %v9268_v40 = vpack.c.bf16 %v4177_v51, %v4176_v52  ;;  %v4754_v20 = vunpack.c.l.b16 %v9261_v21  ;;  %v4755_v10 = vunpack.c.h.b16 %v9261_v21 }
 0x34e   : > { %v4756_v47 = vunpack.c.l.b16 %v9262_v25  ;;  %v4757_v50 = vunpack.c.h.b16 %v9262_v25  ;;  %v4758_v3 = vunpack.c.l.b16 %v9263_v61  ;;  %v4759_v12 = vunpack.c.h.b16 %v9263_v61 }
 0x34f   : > { %v4760_v15 = vunpack.c.l.b16 %v9264_v18  ;;  %v4761_v45 = vunpack.c.h.b16 %v9264_v18  ;;  %v4762_v34 = vunpack.c.l.b16 %v9265_v22  ;;  %v4763_v62 = vunpack.c.h.b16 %v9265_v22 }
 0x350   : > { %v4764_v63 = vunpack.c.l.b16 %v9266_v44  ;;  %v4765_v19 = vunpack.c.h.b16 %v9266_v44  ;;  %v4766_v13 = vunpack.c.l.b16 %v9267_v55  ;;  %v4767_v30 = vunpack.c.h.b16 %v9267_v55 }
 0x351   : > { %v4952_v38 = vrot.slane %v4754_v20, 7  ;;  %v4953_v39 = vrot.slane %v4756_v47, 6  ;;  %v4955_v11 = vrot.slane %v4758_v3, 5  ;;  %v4957_v27 = vrot.slane %v4760_v15, 4 }
 0x352   : > { %v4959_v58 = vrot.slane %v4762_v34, 3  ;;  %v4961_v24 = vrot.slane %v4764_v63, 2  ;;  %v4963_v57 = vrot.slane %v4766_v13, 1  ;;  %v4965_v32 = vrot.slane %v4755_v10, 7  ;;  %v14567_v63 = vld [vmem:[#allocation36_spill] sm:$0xff]  ;;  %v14568_v13 = vld [vmem:[#allocation95_spill] sm:$0xff] }
 0x353   : > { %v4954_v33 = vsel %vm3610_vm1, %v4953_v39, %v4952_v38  ;;  %v4966_v28 = vrot.slane %v4757_v50, 6  ;;  %v4968_v14 = vrot.slane %v4759_v12, 5  ;;  %v4970_v23 = vrot.slane %v4761_v45, 4  ;;  %v14569_v38 = vld [vmem:[#allocation96_spill] sm:$0xff] }
 0x354   : > { %v4956_v60 = vsel %vm3612_vm3, %v4955_v11, %v4954_v33  ;;  %v4972_v9 = vrot.slane %v4763_v62, 3  ;;  %v4974_v59 = vrot.slane %v4765_v19, 2  ;;  %v4976_v17 = vrot.slane %v4767_v30, 1  ;;  %v14570_v11 = vld [vmem:[#allocation11_spill] sm:$0xff]  ;;  %v14573_v33 = vld [vmem:[#allocation12_spill] sm:$0xff] }
 0x355   : > { %v4958_v42 = vsel %vm3614_vm5, %v4957_v27, %v4956_v60  ;;  %v4967_v36 = vsel %vm3610_vm1, %v4966_v28, %v4965_v32  ;;  %v5068_v31 = vsel %vm12087_vm2, %v9268_v40, %v5067_v53  ;;  %v3784_v52 = vsel %vm14526_vm0, %v9470_v5, %v9475_v6  ;;  %v14575_v60 = vld [vmem:[#allocation102_spill] sm:$0xff] }
 0x356   : > { %v4960_v56 = vsel %vm3616_vm6, %v4959_v58, %v4958_v42  ;;  %v4969_v51 = vsel %vm3612_vm3, %v4968_v14, %v4967_v36  ;;  %5069 = vst [vmem:[#allocation3 + $0x28] sm:$0x11] %v5068_v31  ;;  %v3792_v21 = vsel %vm14564_vm10, %v9475_v6, %v9470_v5  ;;  %v3894_v25 = vrot.slane %v3784_v52, 1  ;;  %v14571_v58 = vld [vmem:[#allocation97_spill] sm:$0xff]  ;;  %v14574_v14 = vld [vmem:[#allocation78_spill] sm:$0xff]  ;;  %v14577_v42 = vld [vmem:[#allocation84_spill] sm:$0xff] }
 0x357   : > { %v4962_v61 = vsel %vm3618_vm7, %v4961_v24, %v4960_v56  ;;  %v4971_v18 = vsel %vm3614_vm5, %v4970_v23, %v4969_v51  ;;  %v3895_v22 = vrot.slane %v3792_v21, 1  ;;  %v3896_v44 = vrot.slane %v3784_v52, 2  ;;  %v14578_v31 = vld [vmem:[#allocation9_spill] sm:$0xff] }
 0x358   : > { %v4964_v55 = vsel %vm14565_vm12, %v4963_v57, %v4962_v61  ;;  %v4973_v40 = vsel %vm3616_vm6, %v4972_v9, %v4971_v18  ;;  %v3897_v20 = vrot.slane %v3792_v21, 2  ;;  %v3898_v10 = vrot.slane %v3784_v52, 3  ;;  %v14572_v57 = vld [vmem:[#allocation98_spill] sm:$0xff]  ;;  %v14579_v56 = vld [vmem:[#allocation85_spill] sm:$0xff]  ;;  %v14581_v61 = vld [vmem:[#allocation76_spill] sm:$0xff] }
 0x359   : > { %v4975_v41 = vsel %vm3618_vm7, %v4974_v59, %v4973_v40  ;;  %v3899_v47 = vrot.slane %v3792_v21, 3  ;;  %v3900_v49 = vrot.slane %v3784_v52, 4  ;;  %v3901_v50 = vrot.slane %v3792_v21, 4  ;;  %v14576_v59 = vld [vmem:[#allocation101_spill] sm:$0xff] }
 0x35a   : > { %v4977_v5 = vsel %vm14566_vm13, %v4976_v17, %v4975_v41  ;;  %v3902_v6 = vrot.slane %v3784_v52, 5  ;;  %v3903_v3 = vrot.slane %v3792_v21, 5  ;;  %v3904_v12 = vrot.slane %v3784_v52, 6 }
 0x35b   : > { %v4992_v15 = vpack.c.b16 %v4977_v5, %v4964_v55  ;;  %v3905_v45 = vrot.slane %v3792_v21, 6  ;;  %v3906_v34 = vrot.slane %v3784_v52, 7  ;;  %v3907_v62 = vrot.slane %v3792_v21, 7 }
 0x35c   : > { %v4146_v19 = vmax.f32 %v14567_v63, %v3784_v52  ;;  %v4147_v30 = vmax.f32 %v14568_v13, %v3792_v21  ;;  %v4148_v39 = vmax.f32 %v14569_v38, %v3894_v25  ;;  %v4149_v27 = vmax.f32 %v14570_v11, %v3895_v22  ;;  %v14580_v21 = vld [vmem:[#allocation112_spill] sm:$0xff]  ;;  %v14582_v22 = vld [vmem:[#allocation114_spill] sm:$0xff] }
 0x35d   : > { %v12556_v53 = vsel %vm12127_vm15, %v4992_v15, 0  ;;  %v4150_v24 = vmax.f32 %v14571_v58, %v3896_v44  ;;  %v4151_v32 = vmax.f32 %v14572_v57, %v3897_v20  ;;  %v4152_v28 = vmax.f32 %v14573_v33, %v3898_v10 }
 0x35e   : > { %v4153_v23 = vmax.f32 %v14574_v14, %v3899_v47  ;;  %v4154_v9 = vmax.f32 %v14575_v60, %v3900_v49  ;;  %v4155_v17 = vmax.f32 %v14576_v59, %v3901_v50  ;;  %v4156_v36 = vmax.f32 %v14577_v42, %v3902_v6  ;;  %5066 = vst [vmem:[#allocation3 + $0x78] sm:$0xff] %v12556_v53 }
 0x35f   : > { %v4157_v52 = vmax.f32 %v14578_v31, %v3903_v3  ;;  %v4158_v51 = vmax.f32 %v14579_v56, %v3904_v12  ;;  %v4159_v25 = vmax.f32 %v14580_v21, %v3905_v45  ;;  %v4160_v18 = vmax.f32 %v14581_v61, %v3906_v34  ;;  %v12579_v61 = vld [vmem:[#allocation3 + $0x68] sm:$0x11] }
 0x360   : > { %v4161_v44 = vmax.f32 %v14582_v22, %v3907_v62  ;;  %v9253_v55 = vpack.c.bf16 %v4147_v30, %v4146_v19  ;;  %v9254_v40 = vpack.c.bf16 %v4149_v27, %v4148_v39  ;;  %v9255_v20 = vpack.c.bf16 %v4151_v32, %v4150_v24  ;;  %v5061_v32 = vld [vmem:[#allocation3 + $0x70] sm:$0x11] }
 0x361   : > { %v9256_v10 = vpack.c.bf16 %v4153_v23, %v4152_v28  ;;  %v9257_v41 = vpack.c.bf16 %v4155_v17, %v4154_v9  ;;  %v9258_v47 = vpack.c.bf16 %v4157_v52, %v4156_v36  ;;  %v9259_v49 = vpack.c.bf16 %v4159_v25, %v4158_v51 }
 0x362   : > { %v9260_v50 = vpack.c.bf16 %v4161_v44, %v4160_v18  ;;  %v4738_v5 = vunpack.c.l.b16 %v9253_v55  ;;  %v4739_v6 = vunpack.c.h.b16 %v9253_v55  ;;  %v4740_v15 = vunpack.c.l.b16 %v9254_v40 }
 0x363   : > { %v4741_v3 = vunpack.c.h.b16 %v9254_v40  ;;  %v4742_v63 = vunpack.c.l.b16 %v9255_v20  ;;  %v4743_v12 = vunpack.c.h.b16 %v9255_v20  ;;  %v4744_v13 = vunpack.c.l.b16 %v9256_v10  ;;  %v12586_v40 = vld [vmem:[#allocation3 + $0x48] sm:$0x11] }
 0x364   : > { %v4745_v45 = vunpack.c.h.b16 %v9256_v10  ;;  %v4746_v38 = vunpack.c.l.b16 %v9257_v41  ;;  %v4747_v34 = vunpack.c.h.b16 %v9257_v41  ;;  %v4748_v11 = vunpack.c.l.b16 %v9258_v47 }
 0x365   : > { %v4749_v62 = vunpack.c.h.b16 %v9258_v47  ;;  %v4750_v19 = vunpack.c.l.b16 %v9259_v49  ;;  %v4751_v30 = vunpack.c.h.b16 %v9259_v49  ;;  %v4926_v39 = vrot.slane %v4738_v5, 7 }
 0x366   : > { %v4927_v27 = vrot.slane %v4740_v15, 6  ;;  %v4929_v58 = vrot.slane %v4742_v63, 5  ;;  %v4931_v24 = vrot.slane %v4744_v13, 4  ;;  %v4933_v57 = vrot.slane %v4746_v38, 3 }
 0x367   : > { %v4935_v33 = vrot.slane %v4748_v11, 2  ;;  %v4937_v28 = vrot.slane %v4750_v19, 1  ;;  %v4939_v14 = vrot.slane %v4739_v6, 7  ;;  %v4940_v23 = vrot.slane %v4741_v3, 6 }
 0x368   : > { %v4928_v60 = vsel %vm3610_vm1, %v4927_v27, %v4926_v39  ;;  %v4942_v9 = vrot.slane %v4743_v12, 5  ;;  %v4944_v59 = vrot.slane %v4745_v45, 4  ;;  %v4946_v17 = vrot.slane %v4747_v34, 3  ;;  %v12611_v39 = vld [vmem:[#allocation3 + $0x38] sm:$0x11] }
 0x369   : > { %v4930_v42 = vsel %vm3612_vm3, %v4929_v58, %v4928_v60  ;;  %v4941_v36 = vsel %vm3610_vm1, %v4940_v23, %v4939_v14  ;;  %v4948_v31 = vrot.slane %v4749_v62, 2  ;;  %v4950_v52 = vrot.slane %v4751_v30, 1 }
 0x36a   : > { %v4932_v56 = vsel %vm3614_vm5, %v4931_v24, %v4930_v42  ;;  %v4943_v51 = vsel %vm3612_vm3, %v4942_v9, %v4941_v36  ;;  %v5062_v21 = vsel %vm12087_vm2, %v9260_v50, %v5061_v32  ;;  %v5161_v25 = vshrl.u32 %v12315_v35, 16  ;;  %vm14583_vm2 = vmmov %vm14520_vm4 }
 0x36b   : > { %v4934_v18 = vsel %vm3616_vm6, %v4933_v57, %v4932_v56  ;;  %v4945_v22 = vsel %vm3614_vm5, %v4944_v59, %v4943_v51  ;;  %5063 = vst [vmem:[#allocation3 + $0x70] sm:$0x11] %v5062_v21  ;;  %v5164_v44 = vshll.u32 %v12315_v35, 16  ;;  %v8913_v55 = vcombine.high %v12398_v54, %v12315_v35  ;;  %vm14584_vm8 = vmmov %vm14583_vm2  ;;  %v12624_v56 = vld [vmem:[#allocation3 + $0x28] sm:$0x11] }
 0x36c   : > { %v4936_v20 = vsel %vm3618_vm7, %v4935_v33, %v4934_v18  ;;  %v4947_v16 = vsel %vm3616_vm6, %v4946_v17, %v4945_v22  ;;  %v8912_v10 = vcombine.low %v12398_v54, %v12315_v35  ;;  %v5149_v41 = vrot.slane %v5147_v4, 4 }
 0x36d   : > { %v4938_v47 = vsel %vm14583_vm2, %v4937_v28, %v4936_v20  ;;  %v4949_v49 = vsel %vm3618_vm7, %v4948_v31, %v4947_v16  ;;  %5770 = vmatprep.mubr.bf16.mxu0 %v8913_v55  ;;  %v5152_v50 = vrot.slane %v5150_v46, 5  ;;  %v5156_v5 = vshll.u32 %v12579_v61, 16  ;;  %v12604_v46 = vld [vmem:[#allocation3 + $0x20] sm:$0x11] }
 0x36e   : > { %v4951_v6 = vsel %vm14584_vm8, %v4950_v52, %v4949_v49  ;;  %5771 = vmatmul.mubr.bf16.gmra.mxu0 %v8912_v10  ;;  %v5163_v15 = vrot.slane %v5161_v25, 4  ;;  %v5166_v3 = vrot.slane %v5164_v44, 5  ;;  %v5170_v35 = vshll.u32 %v12586_v40, 16 }
 0x36f   : > { %v4990_v63 = vpack.c.b16 %v4951_v6, %v4938_v47  ;;  %v5153_v12 = vor.u32 %v5152_v50, %v5149_v41  ;;  %v5158_v4 = vrot.slane %v5156_v5, 5  ;;  %v5175_v13 = vshrl.u32 %v12505_v0, 16 }
 0x370   : > { %v5167_v45 = vor.u32 %v5166_v3, %v5163_v15  ;;  %v5172_v38 = vrot.slane %v5170_v35, 5  ;;  %v5178_v34 = vshll.u32 %v12505_v0, 16  ;;  %v5189_v54 = vshrl.u32 %v12458_v29, 16 }
 0x371   : > { %v5059_v11 = vsel %vm12127_vm15, %v4990_v63, 0  ;;  %v5154_v62 = vrot.slane %v5153_v12, 4  ;;  %v5192_v19 = vshll.u32 %v12458_v29, 16  ;;  %v8915_v30 = vcombine.high %v12505_v0, %v12458_v29 }
 0x372   : > { %5060 = vst [vmem:[#allocation3 + $0x60] sm:$0xff] %v5059_v11  ;;  %v5168_v27 = vrot.slane %v5167_v45, 4  ;;  %v8914_v58 = vcombine.low %v12505_v0, %v12458_v29  ;;  %v5177_v24 = vrot.slane %v5175_v13, 4  ;;  %v5180_v57 = vrot.slane %v5178_v34, 5  ;;  %v12621_v0 = vld [vmem:[#allocation3 + $0x70] sm:$0x11] }
 0x373   : > { %v5159_v32 = vsel %vm10079_vm11, %v5154_v62, %v5158_v4  ;;  %5780 = vmatprep.mubr.bf16.mxu0 %v8915_v30  ;;  %v5184_v8 = vshll.u32 %v12604_v46, 16  ;;  %v5191_v33 = vrot.slane %v5189_v54, 4  ;;  %v5194_v28 = vrot.slane %v5192_v19, 5  ;;  %v5804_v34 = vld [vmem:[#allocation3 + $0x8] sm:$0xee] }
 0x374   : > { %v5173_v14 = vsel %vm10079_vm11, %v5168_v27, %v5172_v38  ;;  %v5181_v23 = vor.u32 %v5180_v57, %v5177_v24  ;;  %v5198_v60 = vshll.u32 %v12611_v39, 16  ;;  %v5203_v9 = vshrl.u32 %v5059_v11, 16  ;;  %v5805_v27 = vld [vmem:[#allocation3 + $0x40] sm:$0xee] }
 0x375   : > { %v8873_v59 = vcombine.high %v5159_v32, %v5173_v14  ;;  %v8872_v17 = vcombine.low %v5159_v32, %v5173_v14  ;;  %v5195_v29 = vor.u32 %v5194_v28, %v5191_v33  ;;  %v5186_v36 = vrot.slane %v5184_v8, 5  ;;  %v5808_v28 = vld [vmem:[#allocation3 + $0x78] sm:$0xee] }
 0x376   : > { %5781 = vmatmul.mubr.bf16.gmra.mxu0 %v8914_v58  ;;  %v5182_v42 = vrot.slane %v5181_v23, 4  ;;  %v5206_v31 = vshll.u32 %v5059_v11, 16  ;;  %v5217_v52 = vshrl.u32 %v12556_v53, 16  ;;  %v5200_v21 = vrot.slane %v5198_v60, 5  ;;  %v5806_v58 = vld [vmem:[#allocation3 + $0x10] sm:$0xee] }
 0x377   : > { %5497 = vmatprep.mubr.bf16.mxu1 %v8873_v59  ;;  %v5196_v51 = vrot.slane %v5195_v29, 4  ;;  %v5220_v25 = vshll.u32 %v12556_v53, 16  ;;  %v8917_v18 = vcombine.high %v5059_v11, %v12556_v53  ;;  %v5205_v44 = vrot.slane %v5203_v9, 4 }
 0x378   : > { %5498 = vmatmul.mubr.bf16.gmra.mxu1 %v8872_v17  ;;  %v5187_v22 = vsel %vm10079_vm11, %v5182_v42, %v5186_v36  ;;  %v5208_v55 = vrot.slane %v5206_v31, 5  ;;  %v5212_v20 = vshll.u32 %v12621_v0, 16  ;;  %v5219_v10 = vrot.slane %v5217_v52, 4 }
 0x379   : > { %v5201_v16 = vsel %vm10079_vm11, %v5196_v51, %v5200_v21  ;;  %5790 = vmatprep.mubr.bf16.mxu0 %v8917_v18  ;;  %v5222_v41 = vrot.slane %v5220_v25, 5  ;;  %v5226_v47 = vshll.u32 %v12624_v56, 16  ;;  %v8916_v50 = vcombine.low %v5059_v11, %v12556_v53  ;;  %v5803_v53 = vld [vmem:[#allocation3 + $0x50] sm:$0xee]  ;;  %v5807_v33 = vld [vmem:[#allocation3 + $0x60] sm:$0xee] }
 0x37a   : > { %v8875_v49 = vcombine.high %v5187_v22, %v5201_v16  ;;  %v5209_v5 = vor.u32 %v5208_v55, %v5205_v44  ;;  %v8874_v15 = vcombine.low %v5187_v22, %v5201_v16  ;;  %v5214_v35 = vrot.slane %v5212_v20, 5 }
 0x37b   : > { %v5223_v6 = vor.u32 %v5222_v41, %v5219_v10  ;;  %v5228_v12 = vrot.slane %v5226_v47, 5  ;;  %v8952_v54 = vrot.slane %v5803_v53, 9  ;;  %v8953_v11 = vrot.slane %v5804_v34, 9 }
 0x37c   : > { %5507 = vmatprep.mubr.bf16.mxu1 %v8875_v49  ;;  %v5210_v3 = vrot.slane %v5209_v5, 4  ;;  %v5835_v62 = vrot.slane %v12579_v61, 5  ;;  %v5839_v19 = vrot.slane %v12586_v40, 5  ;;  %v8954_v57 = vrot.slane %v5805_v27, 9 }
 0x37d   : > { %v5224_v63 = vrot.slane %v5223_v6, 4  ;;  %v8955_v32 = vrot.slane %v5806_v58, 9  ;;  %v5847_v61 = vrot.slane %v12611_v39, 5  ;;  %v8956_v48 = vrot.slane %v5807_v33, 9 }
 0x37e   : > { %5791 = vmatmul.mubr.bf16.gmra.mxu0 %v8916_v50  ;;  %v5215_v4 = vsel %vm10079_vm11, %v5210_v3, %v5214_v35  ;;  %v5836_v26 = vsel %vm10254_vm14, %v8952_v54, %v5835_v62  ;;  %v5840_v30 = vsel %vm10254_vm14, %v8953_v11, %v5839_v19  ;;  %v8957_v43 = vrot.slane %v5808_v28, 9  ;;  %v6171_v35 = vld [vmem:[%s13897_s4] sm:$0x3] }
 0x37f   : > { %v5229_v13 = vsel %vm10079_vm11, %v5224_v63, %v5228_v12  ;;  %v8993_v24 = vcombine.high %v5836_v26, %v5840_v30  ;;  %v5848_v8 = vsel %vm10254_vm14, %v8955_v32, %v5847_v61  ;;  %v8992_v14 = vcombine.low %v5836_v26, %v5840_v30 }
 0x380   : > { %5508 = vmatmul.mubr.bf16.gmra.mxu1 %v8874_v15  ;;  %v8877_v45 = vcombine.high %v5215_v4, %v5229_v13  ;;  %v8876_v38 = vcombine.low %v5215_v4, %v5229_v13  ;;  %vm14589_vm11 = vcmask 1041408  }
 0x381   : > { %vm14591_vm15 = vmmov %vm14589_vm11 }
 0x382   : > { %5517 = vmatprep.mubr.bf16.mxu1 %v8877_v45  ;;  %v14585_v45 = vld [vmem:[#allocation15_spill] sm:$0xff]  ;;  %vm14592_vm9 = vmmov %vm14589_vm11 }
 0x383   : > { %v14587_v62 = vsub.s32 1, %v14585_v45  ;;  %vm14593_vm4 = vmmov %vm14592_vm9 }
 0x384   : > { %vm14594_vm0 = vmmov %vm14593_vm4 }
 0x385   : > { %v12672_v19 = vrot.slane %v6171_v35, %v14587_v62  ;;  %vm14595_vm10 = vmmov %vm14594_vm0 }
 0x386   : > { %vm14596_vm12 = vmmov %vm14594_vm0 }
 0x387   : > { %vm14599_vm13 = vmmov %vm14594_vm0 }
 0x388   : > { %5518 = vmatmul.mubr.bf16.gmra.mxu1 %v8876_v38  ;;  %v14586_v38 = vsub.s32 0, %v14585_v45  ;;  %vm14600_vm2 = vmmov %vm14594_vm0 }
 0x389   : > { %6114 = vmatprep.mubr.bf16.mxu1 %v8991_v7  ;;  %v5843_v7 = vrot.slane %v12604_v46, 5  ;;  %v5855_v46 = vrot.slane %v12624_v56, 5  ;;  %vm14601_vm8 = vmmov %vm14594_vm0 }
 0x38a   : > { %v12668_v53 = vrot.slane %v6171_v35, %v14586_v38 }
 0x38b   : > { %v5844_v40 = vsel %vm10254_vm14, %v8954_v57, %v5843_v7  ;;  %v5856_v60 = vsel %vm10254_vm14, %v8957_v43, %v5855_v46 }
 0x38c   : > { %v8995_v23 = vcombine.high %v5844_v40, %v5848_v8  ;;  %v8994_v9 = vcombine.low %v5844_v40, %v5848_v8 }
 0x390   : > { %6115 = vmatmul.mubr.bf16.vlgmr.msra.gmra.mxu1 %v8990_v2  ;;  %v5851_v2 = vrot.slane %v12621_v0, 5 }
 0x391   : > { %6124 = vmatprep.mubr.bf16.mxu1 %v8993_v24 }
 0x392   : > { %v5852_v39 = vsel %vm10254_vm14, %v8956_v48, %v5851_v2  ;;  %vm14590_vm14 = vmmov %vm14589_vm11 }
 0x393   : > { %v8997_v59 = vcombine.high %v5852_v39, %v5856_v60  ;;  %v8996_v17 = vcombine.low %v5852_v39, %v5856_v60 }
 0x398   : > { %6125 = vmatmul.mubr.bf16.gmra.mxu1 %v8992_v14  ;;  %v5762_v29 = vpop.f32.mrf.mxu0 }
 0x399   : > { %6134 = vmatprep.mubr.bf16.mxu1 %v8995_v23 }
 0x39a   : > { %v5764_v42 = vpop.f32.mrf.mxu0 }
 0x39c   : > { %v5766_v31 = vpop.f32.mrf.mxu0 }
 0x39e   : > { %v5768_v0 = vpop.f32.mrf.mxu0 }
 0x3a0   : > { %6135 = vmatmul.mubr.bf16.gmra.mxu1 %v8994_v9 }
 0x3a1   : > { %6144 = vmatprep.mubr.bf16.mxu1 %v8997_v59  ;;  %v5489_v36 = vpop.f32.mrf.mxu1 }
 0x3a2   : > { %v5763_v4 = vadd.f32 %v5762_v29, %v5489_v36 }
 0x3a3   : > { %v5491_v52 = vpop.f32.mrf.mxu1 }
 0x3a4   : > { %v5765_v54 = vadd.f32 %v5764_v42, %v5491_v52 }
 0x3a5   : > { %v5493_v51 = vpop.f32.mrf.mxu1 }
 0x3a6   : > { %v5767_v30 = vadd.f32 %v5766_v31, %v5493_v51  ;;  %v14588_v51 = vld [vmem:[#allocation16_spill] sm:$0xff] }
 0x3a7   : > { %v5495_v21 = vpop.f32.mrf.mxu1 }
 0x3a8   : > { %6145 = vmatmul.mubr.bf16.gmra.mxu1 %v8996_v17  ;;  %v5769_v32 = vadd.f32 %v5768_v0, %v5495_v21 }
 0x42e   : > { %v5772_v56 = vpop.f32.mrf.mxu0 }
 0x430   : > { %v5774_v25 = vpop.f32.mrf.mxu0 }
 0x432   : > { %v5776_v1 = vpop.f32.mrf.mxu0 }
 0x434   : > { %v5778_v20 = vpop.f32.mrf.mxu0 }
 0x436   : > { %v5782_v10 = vpop.f32.mrf.mxu0 }
 0x438   : > { %v5499_v18 = vpop.f32.mrf.mxu1  ;;  %v5784_v49 = vpop.f32.mrf.mxu0 }
 0x439   : > { %v5773_v8 = vadd.f32 %v5772_v56, %v5499_v18 }
 0x43a   : > { %v5501_v22 = vpop.f32.mrf.mxu1  ;;  %v5786_v6 = vpop.f32.mrf.mxu0 }
 0x43b   : > { %v5775_v48 = vadd.f32 %v5774_v25, %v5501_v22 }
 0x43c   : > { %v5503_v44 = vpop.f32.mrf.mxu1  ;;  %v5788_v63 = vpop.f32.mrf.mxu0 }
 0x43d   : > { %v12676_v43 = vadd.f32 %v5776_v1, %v5503_v44 }
 0x43e   : > { %v5505_v55 = vpop.f32.mrf.mxu1  ;;  %v5792_v13 = vpop.f32.mrf.mxu0 }
 0x43f   : > { %v12678_v2 = vadd.f32 %v5778_v20, %v5505_v55 }
 0x440   : > { %v5509_v16 = vpop.f32.mrf.mxu1  ;;  %v5794_v27 = vpop.f32.mrf.mxu0 }
 0x441   : > { %v12681_v60 = vadd.f32 %v5782_v10, %v5509_v16 }
 0x442   : > { %v5511_v41 = vpop.f32.mrf.mxu1  ;;  %v5796_v33 = vpop.f32.mrf.mxu0 }
 0x443   : > { %v12684_v29 = vadd.f32 %v5784_v49, %v5511_v41 }
 0x444   : > { %v5513_v47 = vpop.f32.mrf.mxu1  ;;  %v5798_v52 = vpop.f32.mrf.mxu0 }
 0x445   : > { %v12686_v42 = vadd.f32 %v5786_v6, %v5513_v47 }
 0x446   : > { %v5515_v50 = vpop.f32.mrf.mxu1 }
 0x447   : > { %v12688_v36 = vadd.f32 %v5788_v63, %v5515_v50 }
 0x448   : > { %v5519_v5 = vpop.f32.mrf.mxu1 }
 0x449   : > { %v12690_v0 = vadd.f32 %v5792_v13, %v5519_v5 }
 0x44a   : > { %v5521_v15 = vpop.f32.mrf.mxu1 }
 0x44b   : > { %v12694_v22 = vadd.f32 %v5794_v27, %v5521_v15 }
 0x44c   : > { %v5523_v3 = vpop.f32.mrf.mxu1 }
 0x44d   : > { %v12696_v1 = vadd.f32 %v5796_v33, %v5523_v3 }
 0x44e   : > { %v5525_v12 = vpop.f32.mrf.mxu1 }
 0x44f   : > { %v12698_v44 = vadd.f32 %v5798_v52, %v5525_v12 }
 0x450   : > { %v6116_v34 = vpop.f32.mrf.mxu1 }
 0x451   : > { %v6155_v11 = vadd.f32 %v6116_v34, %v5763_v4 }
 0x452   : > { %v6118_v26 = vpop.f32.mrf.mxu1 }
 0x453   : > { %v6183_v58 = vadd.f32 %v12668_v53, %v6155_v11  ;;  %v6156_v24 = vadd.f32 %v6118_v26, %v5765_v54 }
 0x454   : > { %v6120_v57 = vpop.f32.mrf.mxu1 }
 0x455   : > { %v6184_v7 = vadd.f32 %v12672_v19, %v6156_v24  ;;  %v6157_v61 = vadd.f32 %v6120_v57, %v5767_v30  ;;  %v6199_v28 = vmax.f32 %v6183_v58, 0.0 }
 0x456   : > { %v6122_v40 = vpop.f32.mrf.mxu1 }
 0x457   : > { %v6200_v14 = vmax.f32 %v6184_v7, 0.0  ;;  %v6158_v23 = vadd.f32 %v6122_v40, %v5769_v32  ;;  %v6185_v46 = vadd.f32 %v12668_v53, %v6157_v61 }
 0x458   : > { %v6126_v39 = vpop.f32.mrf.mxu1 }
 0x459   : > { %v6231_v9 = vcombine.low %v6199_v28, %v6200_v14  ;;  %v6232_v59 = vcombine.high %v6199_v28, %v6200_v14  ;;  %v6186_v17 = vadd.f32 %v12672_v19, %v6158_v23  ;;  %v6159_v31 = vadd.f32 %v6126_v39, %v5773_v8 }
 0x45a   : > { %v6128_v18 = vpop.f32.mrf.mxu1  ;;  %v6201_v55 = vmax.f32 %v6185_v46, 0.0 }
 0x45b   : > { %v6239_v56 = vrot.slane %v6231_v9, %v14588_v51  ;;  %v6246_v21 = vrot.slane %v6232_v59, %v14588_v51  ;;  %v6202_v25 = vmax.f32 %v6186_v17, 0.0  ;;  %v12703_v50 = vadd.f32 %v12668_v53, %v6159_v31 }
 0x45c   : > { %v6160_v5 = vadd.f32 %v6128_v18, %v5775_v48 }
 0x45d   : > { %v6247_v20 = vcombine.high %v6239_v56, %v6239_v56  ;;  %v6248_v16 = vcombine.high %v6246_v21, %v6246_v21  ;;  %v6381_v10 = vrot.slane %v6239_v56, %v14588_v51  ;;  %v6397_v41 = vrot.slane %v6246_v21, %v14588_v51 }
 0x45e   : > { %v6249_v47 = vcombine.low %v6201_v55, %v6202_v25  ;;  %v6250_v49 = vcombine.high %v6201_v55, %v6202_v25 }
 0x45f   : > { %v6382_v6 = vcombine.high %v6381_v10, %v6381_v10  ;;  %v6389_v15 = vrot.slane %v6247_v20, %v14588_v51  ;;  %v6398_v3 = vcombine.high %v6397_v41, %v6397_v41  ;;  %v6405_v35 = vrot.slane %v6248_v16, %v14588_v51 }
 0x460   : > { %v6695_v63 = vsel %vm14589_vm11, %v6381_v10, -inf  ;;  %v6723_v12 = vsel %vm14590_vm14, %v6397_v41, -inf  ;;  %v6257_v4 = vrot.slane %v6249_v47, %v14588_v51  ;;  %v12711_v13 = vrot.slane %v6250_v49, %v14588_v51  ;;  %vm14602_vm11 = vmmov %vm14594_vm0 }
 0x461   : > { %v6390_v45 = vcombine.high %v6389_v15, %v6389_v15  ;;  %v6406_v38 = vcombine.high %v6405_v35, %v6405_v35  ;;  %v6696_v34 = vrot.slane %v6695_v63, 4  ;;  %v6702_v54 = vsel %vm14591_vm15, %v6382_v6, -inf  ;;  %vm14603_vm14 = vmmov %vm14594_vm0 }
 0x462   : > { %v6703_v11 = vrot.slane %v6702_v54, 4  ;;  %v6709_v62 = vsel %vm14592_vm9, %v6389_v15, -inf  ;;  %v6724_v26 = vrot.slane %v6723_v12, 4  ;;  %v6730_v30 = vsel %vm14593_vm4, %v6398_v3, -inf  ;;  %vm14604_vm15 = vmmov %vm14594_vm0 }
 0x463   : > { %v6697_v27 = vmax.f32 %v6695_v63, %v6696_v34  ;;  %v6710_v58 = vrot.slane %v6709_v62, 4  ;;  %v6716_v24 = vsel %vm14594_vm0, %v6390_v45, -inf  ;;  %v6731_v57 = vrot.slane %v6730_v30, 4  ;;  %v6130_v34 = vpop.f32.mrf.mxu1  ;;  %vm14605_vm9 = vmmov %vm14594_vm0 }
 0x464   : > { %v6704_v32 = vmax.f32 %v6702_v54, %v6703_v11  ;;  %v6717_v7 = vrot.slane %v6716_v24, 4  ;;  %v6725_v61 = vmax.f32 %v6723_v12, %v6724_v26  ;;  %v6737_v40 = vsel %vm14595_vm10, %v6405_v35, -inf  ;;  %vm14606_vm4 = vmmov %vm14594_vm0 }
 0x465   : > { %v6698_v8 = vrot.slane %v6697_v27, 2  ;;  %v6711_v33 = vmax.f32 %v6709_v62, %v6710_v58  ;;  %v6732_v28 = vmax.f32 %v6730_v30, %v6731_v57  ;;  %v6738_v14 = vrot.slane %v6737_v40, 4  ;;  %vm14607_vm10 = vmmov %vm14594_vm0 }
 0x466   : > { %v6705_v23 = vrot.slane %v6704_v32, 2  ;;  %v6718_v48 = vmax.f32 %v6716_v24, %v6717_v7  ;;  %v6726_v46 = vrot.slane %v6725_v61, 2  ;;  %v6744_v39 = vsel %vm14596_vm12, %v6406_v38, -inf  ;;  %vm14608_vm12 = vmmov %vm14594_vm0 }
 0x467   : > { %v6699_v9 = vmax.f32 %v6697_v27, %v6698_v8  ;;  %v6712_v59 = vrot.slane %v6711_v33, 2  ;;  %v6733_v17 = vrot.slane %v6732_v28, 2  ;;  %v6739_v31 = vmax.f32 %v6737_v40, %v6738_v14 }
 0x468   : > { %v6706_v52 = vmax.f32 %v6704_v32, %v6705_v23  ;;  %v6719_v56 = vrot.slane %v6718_v48, 2  ;;  %v6727_v21 = vmax.f32 %v6725_v61, %v6726_v46  ;;  %v6745_v25 = vrot.slane %v6744_v39, 4 }
 0x469   : > { %v6700_v18 = vrot.slane %v6699_v9, 1  ;;  %v6713_v55 = vmax.f32 %v6711_v33, %v6712_v59  ;;  %v6734_v20 = vmax.f32 %v6732_v28, %v6733_v17  ;;  %v6740_v16 = vrot.slane %v6739_v31, 2  ;;  %v6132_v33 = vpop.f32.mrf.mxu1 }
 0x46a   : > { %v6707_v10 = vrot.slane %v6706_v52, 1  ;;  %v6720_v41 = vmax.f32 %v6718_v48, %v6719_v56  ;;  %v6728_v47 = vrot.slane %v6727_v21, 1  ;;  %v6746_v49 = vmax.f32 %v6744_v39, %v6745_v25 }
 0x46b   : > { %v6714_v6 = vrot.slane %v6713_v55, 1  ;;  %v6735_v15 = vrot.slane %v6734_v20, 1  ;;  %v6741_v3 = vmax.f32 %v6739_v31, %v6740_v16  ;;  %v6203_v35 = vmax.f32 %v12703_v50, 0.0 }
 0x46c   : > { %v12720_v63 = vmax.f32 %v6699_v9, %v6700_v18  ;;  %v6721_v12 = vrot.slane %v6720_v41, 1  ;;  %v6747_v45 = vrot.slane %v6746_v49, 2  ;;  %v6188_v38 = vadd.f32 %v12672_v19, %v6160_v5  ;;  %v6136_v18 = vpop.f32.mrf.mxu1 }
 0x46d   : > { %v12723_v54 = vmax.f32 %v6706_v52, %v6707_v10  ;;  %v12725_v11 = vmax.f32 %v6727_v21, %v6728_v47  ;;  %v6742_v62 = vrot.slane %v6741_v3, 1  ;;  %v6265_v26 = vcombine.high %v6257_v4, %v6257_v4 }
 0x46e   : > { %v12727_v30 = vmax.f32 %v6713_v55, %v6714_v6  ;;  %v12729_v27 = vmax.f32 %v6734_v20, %v6735_v15  ;;  %v6266_v50 = vcombine.high %v12711_v13, %v12711_v13  ;;  %v6413_v58 = vrot.slane %v6257_v4, %v14588_v51 }
 0x46f   : > { %v12734_v24 = vmax.f32 %v6720_v41, %v6721_v12  ;;  %v12736_v57 = vmax.f32 %v6746_v49, %v6747_v45  ;;  %v6421_v5 = vrot.slane %v6265_v26, %v14588_v51  ;;  %v6429_v32 = vrot.slane %v12711_v13, %v14588_v51 }
 0x470   : > { %14597 = vst [vmem:[#allocation29_spill] sm:$0xff] %v12729_v27  ;;  %v12741_v7 = vmax.f32 %v6741_v3, %v6742_v62  ;;  %v6414_v61 = vcombine.high %v6413_v58, %v6413_v58  ;;  %v12744_v40 = vrot.slane %v6266_v50, %v14588_v51  ;;  %v6751_v8 = vsel %vm14599_vm13, %v6413_v58, -inf  ;;  %v6138_v58 = vpop.f32.mrf.mxu1  ;;  %vm14609_vm13 = vmmov %vm14594_vm0 }
 0x471   : > { %14598 = vst [vmem:[#allocation30_spill] sm:$0xff] %v12734_v24  ;;  %v6422_v28 = vcombine.high %v6421_v5, %v6421_v5  ;;  %v6430_v4 = vcombine.high %v6429_v32, %v6429_v32  ;;  %v6752_v14 = vrot.slane %v6751_v8, 4  ;;  %v6765_v23 = vsel %vm14600_vm2, %v6421_v5, -inf  ;;  %vm14610_vm2 = vmmov %vm14594_vm0 }
 0x472   : > { %v6758_v48 = vsel %vm14601_vm8, %v6414_v61, -inf  ;;  %v6766_v46 = vrot.slane %v6765_v23, 4  ;;  %v6779_v39 = vsel %vm14602_vm11, %v6429_v32, -inf  ;;  %v6204_v13 = vmax.f32 %v6188_v38, 0.0  ;;  %vm14611_vm8 = vmmov %vm14594_vm0 }
 0x473   : > { %v6753_v9 = vmax.f32 %v6751_v8, %v6752_v14  ;;  %v6759_v59 = vrot.slane %v6758_v48, 4  ;;  %v6772_v17 = vsel %vm14603_vm14, %v6422_v28, -inf  ;;  %v6780_v31 = vrot.slane %v6779_v39, 4  ;;  %vm14612_vm11 = vmmov %vm14594_vm0 }
 0x474   : > { %v12751_v52 = vmax.f32 %v6765_v23, %v6766_v46  ;;  %v6773_v56 = vrot.slane %v6772_v17, 4  ;;  %v6786_v21 = vsel %vm14604_vm15, %v6430_v4, -inf  ;;  %v12756_v25 = vsel %vm14605_vm9, %v12744_v40, -inf  ;;  %vm14621_vm14 = vmmov %vm14594_vm0 }
 0x475   : > { %v6754_v20 = vrot.slane %v6753_v9, 2  ;;  %v6760_v16 = vmax.f32 %v6758_v48, %v6759_v59  ;;  %v12759_v10 = vmax.f32 %v6779_v39, %v6780_v31  ;;  %v6787_v49 = vrot.slane %v6786_v21, 4  ;;  %vm14622_vm15 = vmmov %vm14594_vm0 }
 0x476   : > { %v6267_v6 = vcombine.low %v6203_v35, %v6204_v13  ;;  %v12764_v12 = vmax.f32 %v6772_v17, %v6773_v56  ;;  %v6268_v38 = vcombine.high %v6203_v35, %v6204_v13  ;;  %v6161_v26 = vadd.f32 %v6130_v34, %v12676_v43  ;;  %vm14623_vm9 = vmmov %vm14594_vm0 }
 0x477   : > { %v6755_v15 = vmax.f32 %v6753_v9, %v6754_v20  ;;  %v6761_v3 = vrot.slane %v6760_v16, 2  ;;  %v6162_v50 = vadd.f32 %v6132_v33, %v12678_v2  ;;  %v6163_v8 = vadd.f32 %v6136_v18, %v12681_v60 }
 0x478   : > { %v6275_v62 = vrot.slane %v6267_v6, %v14588_v51  ;;  %v6282_v28 = vrot.slane %v6268_v38, %v14588_v51  ;;  %v12777_v35 = vadd.f32 %v12668_v53, %v6161_v26  ;;  %v12781_v43 = vmax.f32 %v6786_v21, %v6787_v49 }
 0x479   : > { %v6756_v5 = vrot.slane %v6755_v15, 1  ;;  %v12770_v32 = vmax.f32 %v6760_v16, %v6761_v3  ;;  %v6190_v2 = vadd.f32 %v12672_v19, %v6162_v50  ;;  %v12785_v34 = vadd.f32 %v6138_v58, %v12684_v29 }
 0x47a   : > { %v6283_v4 = vcombine.high %v6275_v62, %v6275_v62  ;;  %v6445_v14 = vrot.slane %v6275_v62, %v14588_v51  ;;  %v6284_v33 = vcombine.high %v6282_v28, %v6282_v28  ;;  %v6461_v46 = vrot.slane %v6282_v28, %v14588_v51 }
 0x47b   : > { %v12779_v23 = vmax.f32 %v6755_v15, %v6756_v5  ;;  %v6205_v9 = vmax.f32 %v12777_v35, 0.0  ;;  %v12793_v59 = vadd.f32 %v12668_v53, %v6163_v8  ;;  %v6206_v16 = vmax.f32 %v6190_v2, 0.0 }
 0x47c   : > { %v6446_v48 = vcombine.high %v6445_v14, %v6445_v14  ;;  %v6453_v60 = vrot.slane %v6283_v4, %v14588_v51  ;;  %v6807_v13 = vsel %vm14606_vm4, %v6445_v14, -inf  ;;  %v6462_v31 = vcombine.high %v6461_v46, %v6461_v46  ;;  %vm14624_vm4 = vmmov %vm14594_vm0 }
 0x47d   : > { %v6469_v29 = vrot.slane %v6284_v33, %v14588_v51  ;;  %v6808_v56 = vrot.slane %v6807_v13, 4  ;;  %v6835_v20 = vsel %vm14608_vm12, %v6461_v46, -inf  ;;  %vm14627_vm12 = vmmov %vm14594_vm0 }
 0x47e   : > { %v6454_v17 = vcombine.high %v6453_v60, %v6453_v60  ;;  %v6814_v21 = vsel %vm14594_vm0, %v6446_v48, -inf  ;;  %v6821_v18 = vsel %vm14607_vm10, %v6453_v60, -inf  ;;  %v6836_v62 = vrot.slane %v6835_v20, 4  ;;  %vm14625_vm10 = vmmov %vm14594_vm0 }
 0x47f   : > { %v6470_v49 = vcombine.high %v6469_v29, %v6469_v29  ;;  %v6809_v6 = vmax.f32 %v6807_v13, %v6808_v56  ;;  %v6815_v15 = vrot.slane %v6814_v21, 4  ;;  %v6822_v3 = vrot.slane %v6821_v18, 4 }
 0x480   : > { %v6828_v38 = vsel %vm14609_vm13, %v6454_v17, -inf  ;;  %v6842_v26 = vsel %vm14610_vm2, %v6462_v31, -inf  ;;  %v6849_v50 = vsel %vm14611_vm8, %v6469_v29, -inf  ;;  %v6837_v4 = vmax.f32 %v6835_v20, %v6836_v62  ;;  %vm14630_vm13 = vmmov %vm14594_vm0 }
 0x481   : > { %v6810_v58 = vrot.slane %v6809_v6, 2  ;;  %v6816_v5 = vmax.f32 %v6814_v21, %v6815_v15  ;;  %v6823_v8 = vmax.f32 %v6821_v18, %v6822_v3  ;;  %v6829_v28 = vrot.slane %v6828_v38, 4  ;;  %vm14631_vm2 = vmmov %vm14594_vm0 }
 0x482   : > { %v6843_v14 = vrot.slane %v6842_v26, 4  ;;  %v6850_v35 = vrot.slane %v6849_v50, 4  ;;  %v6856_v2 = vsel %vm14612_vm11, %v6470_v49, -inf  ;;  %v6838_v13 = vrot.slane %v6837_v4, 2  ;;  %vm14632_vm8 = vmmov %vm14594_vm0 }
 0x483   : > { %v6811_v33 = vmax.f32 %v6809_v6, %v6810_v58  ;;  %v6817_v48 = vrot.slane %v6816_v5, 2  ;;  %v6824_v60 = vrot.slane %v6823_v8, 2  ;;  %v6830_v46 = vmax.f32 %v6828_v38, %v6829_v28  ;;  %v6140_v28 = vpop.f32.mrf.mxu1  ;;  %vm14633_vm11 = vmmov %vm14594_vm0 }
 0x484   : > { %v6844_v17 = vmax.f32 %v6842_v26, %v6843_v14  ;;  %v6851_v56 = vmax.f32 %v6849_v50, %v6850_v35  ;;  %v6857_v41 = vrot.slane %v6856_v2, 4  ;;  %v6839_v21 = vmax.f32 %v6837_v4, %v6838_v13 }
 0x485   : > { %v6812_v31 = vrot.slane %v6811_v33, 1  ;;  %v6818_v45 = vmax.f32 %v6816_v5, %v6817_v48  ;;  %v6825_v29 = vmax.f32 %v6823_v8, %v6824_v60  ;;  %v6831_v61 = vrot.slane %v6830_v46, 2 }
 0x486   : > { %v6845_v18 = vrot.slane %v6844_v17, 2  ;;  %v6852_v15 = vrot.slane %v6851_v56, 2  ;;  %v6858_v20 = vmax.f32 %v6856_v2, %v6857_v41  ;;  %v6285_v49 = vcombine.low %v6205_v9, %v6206_v16 }
 0x487   : > { %v6819_v3 = vrot.slane %v6818_v45, 1  ;;  %v6826_v62 = vrot.slane %v6825_v29, 1  ;;  %v6832_v47 = vmax.f32 %v6830_v46, %v6831_v61  ;;  %v6840_v6 = vrot.slane %v6839_v21, 1 }
 0x488   : > { %v6846_v58 = vmax.f32 %v6844_v17, %v6845_v18  ;;  %v6853_v39 = vmax.f32 %v6851_v56, %v6852_v15  ;;  %v6859_v38 = vrot.slane %v6858_v20, 2  ;;  %v12803_v26 = vmax.f32 %v6811_v33, %v6812_v31 }
 0x489   : > { %v6833_v50 = vrot.slane %v6832_v47, 1  ;;  %v6286_v14 = vcombine.high %v6205_v9, %v6206_v16  ;;  %v6207_v5 = vmax.f32 %v12793_v59, 0.0  ;;  %v12806_v8 = vmax.f32 %v6818_v45, %v6819_v3  ;;  %v6142_v16 = vpop.f32.mrf.mxu1 }
 0x48a   : > { %14613 = vst [vmem:[#allocation32_spill] sm:$0xff] %v12803_v26  ;;  %v6847_v4 = vrot.slane %v6846_v58, 1  ;;  %v6854_v35 = vrot.slane %v6853_v39, 1  ;;  %v12808_v41 = vmax.f32 %v6858_v20, %v6859_v38  ;;  %v12810_v2 = vmax.f32 %v6825_v29, %v6826_v62 }
 0x48b   : > { %14614 = vst [vmem:[#allocation33_spill] sm:$0xff] %v12806_v8  ;;  %v6293_v61 = vrot.slane %v6285_v49, %v14588_v51  ;;  %v6300_v48 = vrot.slane %v6286_v14, %v14588_v51  ;;  %v6192_v33 = vadd.f32 %v12672_v19, %v12785_v34  ;;  %v12816_v60 = vmax.f32 %v6832_v47, %v6833_v50 }
 0x48c   : > { %14615 = vst [vmem:[#allocation34_spill] sm:$0xff] %v12810_v2  ;;  %v12818_v9 = vmax.f32 %v6839_v21, %v6840_v6  ;;  %v12820_v59 = vmax.f32 %v6846_v58, %v6847_v4  ;;  %v6165_v45 = vadd.f32 %v6140_v28, %v12686_v42  ;;  %v12825_v31 = vmax.f32 %v6853_v39, %v6854_v35 }
 0x48d   : > { %14616 = vst [vmem:[#allocation35_spill] sm:$0xff] %v12816_v60  ;;  %v6301_v46 = vcombine.high %v6293_v61, %v6293_v61  ;;  %v6302_v13 = vcombine.high %v6300_v48, %v6300_v48  ;;  %v6477_v17 = vrot.slane %v6293_v61, %v14588_v51  ;;  %v6493_v56 = vrot.slane %v6300_v48, %v14588_v51 }
 0x48e   : > { %14617 = vst [vmem:[#allocation88_spill] sm:$0xff] %v12818_v9  ;;  %14618 = vst [vmem:[#allocation27_spill] sm:$0xff] %v12820_v59  ;;  %v6208_v34 = vmax.f32 %v6192_v33, 0.0  ;;  %v12829_v47 = vadd.f32 %v12668_v53, %v6165_v45  ;;  %v6166_v42 = vadd.f32 %v6142_v16, %v12688_v36  ;;  %v6146_v36 = vpop.f32.mrf.mxu1 }
 0x48f   : > { %14619 = vst [vmem:[#allocation90_spill] sm:$0xff] %v12825_v31  ;;  %v6478_v21 = vcombine.high %v6477_v17, %v6477_v17  ;;  %v6485_v18 = vrot.slane %v6301_v46, %v14588_v51  ;;  %v6494_v15 = vcombine.high %v6493_v56, %v6493_v56  ;;  %v12834_v20 = vrot.slane %v6302_v13, %v14588_v51 }
 0x490   : > { %v6863_v3 = vsel %vm14621_vm14, %v6477_v17, -inf  ;;  %v6891_v39 = vsel %vm14622_vm15, %v6493_v56, -inf  ;;  %v6303_v62 = vcombine.low %v6207_v5, %v6208_v34  ;;  %v6304_v38 = vcombine.high %v6207_v5, %v6208_v34  ;;  %vm14634_vm14 = vmmov %vm14594_vm0  ;;  %v6148_v60 = vpop.f32.mrf.mxu1 }
 0x491   : > { %14620 = vst [vmem:[#allocation28_spill] sm:$0xff] %v12834_v20  ;;  %v6486_v49 = vcombine.high %v6485_v18, %v6485_v18  ;;  %v6864_v6 = vrot.slane %v6863_v3, 4  ;;  %v6870_v58 = vsel %vm14623_vm9, %v6478_v21, -inf  ;;  %v6877_v50 = vsel %vm14624_vm4, %v6485_v18, -inf  ;;  %vm14635_vm15 = vmmov %vm14594_vm0 }
 0x492   : > { %v6871_v28 = vrot.slane %v6870_v58, 4  ;;  %v6892_v14 = vrot.slane %v6891_v39, 4  ;;  %v6898_v4 = vsel %vm14594_vm0, %v6494_v15, -inf  ;;  %v6878_v61 = vrot.slane %v6877_v50, 4  ;;  %vm14636_vm9 = vmmov %vm14594_vm0 }
 0x493   : > { %v6865_v35 = vmax.f32 %v6863_v3, %v6864_v6  ;;  %v6884_v48 = vsel %vm14625_vm10, %v6486_v49, -inf  ;;  %v6899_v33 = vrot.slane %v6898_v4, 4  ;;  %v12846_v13 = vsel %vm14627_vm12, %v12834_v20, -inf  ;;  %vm14637_vm4 = vmmov %vm14594_vm0 }
 0x494   : > { %v6872_v45 = vmax.f32 %v6870_v58, %v6871_v28  ;;  %v6885_v16 = vrot.slane %v6884_v48, 4  ;;  %v12842_v46 = vmax.f32 %v6891_v39, %v6892_v14  ;;  %14628 = vst [vmem:[#allocation94_spill] sm:$0xff] %v12846_v13  ;;  %v12850_v56 = vmax.f32 %v6877_v50, %v6878_v61  ;;  %vm14653_vm10 = vmmov %vm14594_vm0 }
 0x495   : > { %v6866_v17 = vrot.slane %v6865_v35, 2  ;;  %v6167_v34 = vadd.f32 %v6146_v36, %v12690_v0  ;;  %v12853_v18 = vmax.f32 %v6898_v4, %v6899_v33  ;;  %v6311_v3 = vrot.slane %v6303_v62, %v14588_v51  ;;  %vm14654_vm12 = vmmov %vm14594_vm0 }
 0x496   : > { %14626 = vst [vmem:[#allocation91_spill] sm:$0xff] %v12842_v46  ;;  %v6873_v21 = vrot.slane %v6872_v45, 2  ;;  %v12859_v49 = vmax.f32 %v6884_v48, %v6885_v16  ;;  %v6318_v58 = vrot.slane %v6304_v38, %v14588_v51 }
 0x497   : > { %14629 = vst [vmem:[#allocation92_spill] sm:$0xff] %v12853_v18  ;;  %v12857_v39 = vmax.f32 %v6865_v35, %v6866_v17  ;;  %v6319_v50 = vcombine.high %v6311_v3, %v6311_v3  ;;  %v6509_v0 = vrot.slane %v6311_v3, %v14588_v51  ;;  %v12870_v35 = vadd.f32 %v12672_v19, %v6166_v42 }
 0x498   : > { %v12866_v4 = vmax.f32 %v6872_v45, %v6873_v21  ;;  %v6320_v36 = vcombine.high %v6318_v58, %v6318_v58  ;;  %v6525_v62 = vrot.slane %v6318_v58, %v14588_v51  ;;  %v12877_v45 = vadd.f32 %v12668_v53, %v6167_v34 }
 0x499   : > { %v6868_v61 = vrot.slane %v12857_v39, 1  ;;  %v6510_v48 = vcombine.high %v6509_v0, %v6509_v0  ;;  %v6517_v38 = vrot.slane %v6319_v50, %v14588_v51  ;;  %v6919_v33 = vsel %vm14630_vm13, %v6509_v0, -inf  ;;  %vm14655_vm13 = vmmov %vm14594_vm0 }
 0x49a   : > { %v6526_v16 = vcombine.high %v6525_v62, %v6525_v62  ;;  %v6533_v17 = vrot.slane %v6320_v36, %v14588_v51  ;;  %v6920_v3 = vrot.slane %v6919_v33, 4  ;;  %v6947_v5 = vsel %vm14633_vm11, %v6525_v62, -inf  ;;  %vm14658_vm11 = vmmov %vm14594_vm0 }
 0x49b   : > { %v6518_v21 = vcombine.high %v6517_v38, %v6517_v38  ;;  %v6926_v58 = vsel %vm14631_vm2, %v6510_v48, -inf  ;;  %v6933_v42 = vsel %vm14632_vm8, %v6517_v38, -inf  ;;  %v6948_v29 = vrot.slane %v6947_v5, 4  ;;  %vm14656_vm2 = vmmov %vm14594_vm0 }
 0x49c   : > { %v6534_v15 = vcombine.high %v6533_v17, %v6533_v17  ;;  %v6921_v6 = vmax.f32 %v6919_v33, %v6920_v3  ;;  %v6927_v28 = vrot.slane %v6926_v58, 4  ;;  %v6934_v50 = vrot.slane %v6933_v42, 4  ;;  %vm14657_vm8 = vmmov %vm14594_vm0 }
 0x49d   : > { %v6940_v0 = vsel %vm14634_vm14, %v6518_v21, -inf  ;;  %v6954_v36 = vsel %vm14635_vm15, %v6526_v16, -inf  ;;  %v6961_v55 = vsel %vm14636_vm9, %v6533_v17, -inf  ;;  %v6949_v48 = vmax.f32 %v6947_v5, %v6948_v29  ;;  %vm14660_vm14 = vmmov %vm14594_vm0 }
 0x49e   : > { %v6922_v34 = vrot.slane %v6921_v6, 2  ;;  %v6928_v14 = vmax.f32 %v6926_v58, %v6927_v28  ;;  %v6935_v37 = vmax.f32 %v6933_v42, %v6934_v50  ;;  %v6941_v59 = vrot.slane %v6940_v0, 4  ;;  %v6150_v50 = vpop.f32.mrf.mxu1  ;;  %vm14661_vm15 = vmmov %vm14594_vm0 }
 0x49f   : > { %v6955_v31 = vrot.slane %v6954_v36, 4  ;;  %v6962_v38 = vrot.slane %v6961_v55, 4  ;;  %v6968_v62 = vsel %vm14637_vm4, %v6534_v15, -inf  ;;  %v6950_v21 = vrot.slane %v6949_v48, 2  ;;  %vm14662_vm9 = vmmov %vm14594_vm0 }
 0x4a0   : > { %v6923_v33 = vmax.f32 %v6921_v6, %v6922_v34  ;;  %v6929_v3 = vrot.slane %v6928_v14, 2  ;;  %v6936_v8 = vrot.slane %v6935_v37, 2  ;;  %v6942_v9 = vmax.f32 %v6940_v0, %v6941_v59  ;;  %vm14663_vm4 = vmmov %vm14594_vm0 }
 0x4a1   : > { %v6956_v2 = vmax.f32 %v6954_v36, %v6955_v31  ;;  %v6963_v26 = vmax.f32 %v6961_v55, %v6962_v38  ;;  %v6969_v16 = vrot.slane %v6968_v62, 4  ;;  %v6951_v58 = vmax.f32 %v6949_v48, %v6950_v21 }
 0x4a2   : > { %v6924_v20 = vrot.slane %v6923_v33, 1  ;;  %v6930_v17 = vmax.f32 %v6928_v14, %v6929_v3  ;;  %v6937_v13 = vmax.f32 %v6935_v37, %v6936_v8  ;;  %v6943_v28 = vrot.slane %v6942_v9, 2  ;;  %v6152_v3 = vpop.f32.mrf.mxu1 }
 0x4a3   : > { %v6957_v42 = vrot.slane %v6956_v2, 2  ;;  %v6964_v29 = vrot.slane %v6963_v26, 2  ;;  %v6970_v5 = vmax.f32 %v6968_v62, %v6969_v16  ;;  %v6952_v46 = vrot.slane %v6951_v58, 1 }
 0x4a4   : > { %v6931_v18 = vrot.slane %v6930_v17, 1  ;;  %v6938_v6 = vrot.slane %v6937_v13, 1  ;;  %v6944_v34 = vmax.f32 %v6942_v9, %v6943_v28  ;;  %v12888_v55 = vmax.f32 %v12857_v39, %v6868_v61 }
 0x4a5   : > { %v6958_v59 = vmax.f32 %v6956_v2, %v6957_v42  ;;  %v6965_v0 = vmax.f32 %v6963_v26, %v6964_v29  ;;  %v6971_v31 = vrot.slane %v6970_v5, 2  ;;  %v12890_v14 = vmax.f32 %v6923_v33, %v6924_v20 }
 0x4a6   : > { %v6945_v37 = vrot.slane %v6944_v34, 1  ;;  %v6210_v8 = vmax.f32 %v12870_v35, 0.0  ;;  %v12893_v36 = vmax.f32 %v6930_v17, %v6931_v18  ;;  %v12897_v9 = vmax.f32 %v6937_v13, %v6938_v6 }
 0x4a7   : > { %14638 = vst [vmem:[#allocation100_spill] sm:$0xff] %v12890_v14  ;;  %v6959_v48 = vrot.slane %v6958_v59, 1  ;;  %v6966_v38 = vrot.slane %v6965_v0, 1  ;;  %v12895_v62 = vmax.f32 %v6970_v5, %v6971_v31  ;;  %v12899_v2 = vmax.f32 %v6951_v58, %v6952_v46 }
 0x4a8   : > { %14639 = vst [vmem:[#allocation26_spill] sm:$0xff] %v12893_v36  ;;  %14640 = vst [vmem:[#allocation10_spill] sm:$0xff] %v12897_v9  ;;  %v14642_v26 = vmax.f32 %v12829_v47, 0.0  ;;  %v12905_v33 = vmax.f32 %v6944_v34, %v6945_v37  ;;  %v6211_v18 = vmax.f32 %v12877_v45, 0.0  ;;  %v6168_v21 = vadd.f32 %v6148_v60, %v12694_v22 }
 0x4a9   : > { %14641 = vst [vmem:[#allocation19_spill] sm:$0xff] %v12899_v2  ;;  %v12907_v35 = vmax.f32 %v6958_v59, %v6959_v48  ;;  %v6169_v46 = vadd.f32 %v6150_v50, %v12696_v1  ;;  %v6170_v17 = vadd.f32 %v6152_v3, %v12698_v44  ;;  %v12915_v28 = vmax.f32 %v6965_v0, %v6966_v38 }
 0x4aa   : > { %v6321_v39 = vcombine.low %v14642_v26, %v6210_v8  ;;  %v14643_v20 = vmov %v14642_v26  ;;  %14644 = vst [vmem:[#allocation20_spill] sm:$0xff] %v12905_v33  ;;  %v6196_v58 = vadd.f32 %v12672_v19, %v6168_v21  ;;  %v14647_v42 = vrot.slane %v12736_v57, 1 }
 0x4ab   : > { %v6322_v61 = vcombine.high %v14643_v20, %v6210_v8  ;;  %14645 = vst [vmem:[#allocation21_spill] sm:$0xff] %v12907_v35  ;;  %14646 = vst [vmem:[#allocation23_spill] sm:$0xff] %v12915_v28  ;;  %v12927_v44 = vadd.f32 %v12668_v53, %v6169_v46  ;;  %v14649_v50 = vrot.slane %v12770_v32, 1  ;;  %v14651_v34 = vrot.slane %v12751_v52, 2 }
 0x4ac   : > { %v6329_v16 = vrot.slane %v6321_v39, %v14588_v51  ;;  %v12922_v45 = vmax.f32 %v12736_v57, %v14647_v42  ;;  %v6212_v1 = vmax.f32 %v6196_v58, 0.0  ;;  %v12939_v37 = vadd.f32 %v12672_v19, %v6170_v17 }
 0x4ad   : > { %v6336_v13 = vrot.slane %v6322_v61, %v14588_v51  ;;  %v12932_v6 = vmax.f32 %v12770_v32, %v14649_v50  ;;  %v6769_v57 = vmax.f32 %v12751_v52, %v14651_v34 }
 0x4ae   : > { %14648 = vst [vmem:[#allocation22_spill] sm:$0xff] %v12922_v45  ;;  %v6337_v22 = vcombine.high %v6329_v16, %v6329_v16  ;;  %v6541_v29 = vrot.slane %v6329_v16, %v14588_v51  ;;  %v6339_v32 = vcombine.low %v6211_v18, %v6212_v1  ;;  %v6340_v52 = vcombine.high %v6211_v18, %v6212_v1 }
 0x4af   : > { %v6338_v60 = vcombine.high %v6336_v13, %v6336_v13  ;;  %v6557_v5 = vrot.slane %v6336_v13, %v14588_v51  ;;  %14650 = vst [vmem:[#allocation24_spill] sm:$0xff] %v12932_v6 }
 0x4b0   : > { %v6542_v59 = vcombine.high %v6541_v29, %v6541_v29  ;;  %v6549_v0 = vrot.slane %v6337_v22, %v14588_v51  ;;  %v6975_v53 = vsel %vm14594_vm0, %v6541_v29, -inf }
 0x4b1   : > { %v6558_v31 = vcombine.high %v6557_v5, %v6557_v5  ;;  %v12942_v8 = vrot.slane %v6338_v60, %v14588_v51  ;;  %v7003_v48 = vsel %vm14653_vm10, %v6557_v5, -inf  ;;  %v6976_v3 = vrot.slane %v6975_v53, 4  ;;  %vm14664_vm10 = vmmov %vm14594_vm0 }
 0x4b2   : > { %v6550_v38 = vcombine.high %v6549_v0, %v6549_v0  ;;  %v6982_v26 = vsel %vm14654_vm12, %v6542_v59, -inf  ;;  %v6989_v20 = vsel %vm14655_vm13, %v6549_v0, -inf  ;;  %v7004_v61 = vrot.slane %v7003_v48, 4  ;;  %vm14665_vm12 = vmmov %vm14594_vm0 }
 0x4b3   : > { %14652 = vst [vmem:[#allocation74_spill] sm:$0xff] %v12942_v8  ;;  %v6983_v39 = vrot.slane %v6982_v26, 4  ;;  %v7010_v19 = vsel %vm14656_vm2, %v6558_v31, -inf  ;;  %v6977_v21 = vmax.f32 %v6975_v53, %v6976_v3  ;;  %v6990_v16 = vrot.slane %v6989_v20, 4  ;;  %vm14666_vm13 = vmmov %vm14594_vm0 }
 0x4b4   : > { %v6996_v13 = vsel %vm14657_vm8, %v6550_v38, -inf  ;;  %v7011_v46 = vrot.slane %v7010_v19, 4  ;;  %v12950_v42 = vmax.f32 %v7003_v48, %v7004_v61  ;;  %v12954_v22 = vsel %vm14658_vm11, %v12942_v8, -inf  ;;  %vm14673_vm2 = vmmov %vm14594_vm0 }
 0x4b5   : > { %v6984_v17 = vmax.f32 %v6982_v26, %v6983_v39  ;;  %v6997_v58 = vrot.slane %v6996_v13, 4  ;;  %14659 = vst [vmem:[#allocation18_spill] sm:$0xff] %v12954_v22  ;;  %v6978_v60 = vrot.slane %v6977_v21, 2  ;;  %v12958_v29 = vmax.f32 %v6989_v20, %v6990_v16  ;;  %vm14676_vm8 = vmmov %vm14594_vm0 }
 0x4b6   : > { %v6770_v5 = vrot.slane %v6769_v57, 1  ;;  %v12960_v50 = vmax.f32 %v7010_v19, %v7011_v46  ;;  %v6347_v59 = vrot.slane %v6339_v32, %v14588_v51  ;;  %v6354_v48 = vrot.slane %v6340_v52, %v14588_v51  ;;  %vm14677_vm11 = vmmov %vm14594_vm0 }
 0x4b7   : > { %v6985_v1 = vrot.slane %v6984_v17, 2  ;;  %v12964_v0 = vmax.f32 %v6977_v21, %v6978_v60  ;;  %v12966_v31 = vmax.f32 %v6996_v13, %v6997_v58  ;;  %v6214_v19 = vmax.f32 %v12939_v37, 0.0 }
 0x4b8   : > { %v6355_v3 = vcombine.high %v6347_v59, %v6347_v59  ;;  %v6573_v26 = vrot.slane %v6347_v59, %v14588_v51  ;;  %v6356_v61 = vcombine.high %v6354_v48, %v6354_v48  ;;  %v6589_v32 = vrot.slane %v6354_v48, %v14588_v51 }
 0x4b9   : > { %v12973_v20 = vmax.f32 %v6984_v17, %v6985_v1  ;;  %v6980_v21 = vrot.slane %v12964_v0, 1  ;;  %v12981_v59 = vmax.f32 %v6769_v57, %v6770_v5 }
 0x4ba   : > { %v6574_v16 = vcombine.high %v6573_v26, %v6573_v26  ;;  %v6581_v13 = vrot.slane %v6355_v3, %v14588_v51  ;;  %v7031_v52 = vsel %vm14660_vm14, %v6573_v26, -inf  ;;  %v6590_v46 = vcombine.high %v6589_v32, %v6589_v32  ;;  %vm14678_vm14 = vmmov %vm14594_vm0 }
 0x4bb   : > { %v6597_v58 = vrot.slane %v6356_v61, %v14588_v51  ;;  %v7032_v60 = vrot.slane %v7031_v52, 4  ;;  %v7059_v37 = vsel %vm14663_vm4, %v6589_v32, -inf  ;;  %vm14681_vm4 = vmmov %vm14594_vm0 }
 0x4bc   : > { %v6582_v17 = vcombine.high %v6581_v13, %v6581_v13  ;;  %v7038_v1 = vsel %vm14661_vm15, %v6574_v16, -inf  ;;  %v7045_v48 = vsel %vm14662_vm9, %v6581_v13, -inf  ;;  %v7060_v26 = vrot.slane %v7059_v37, 4  ;;  %vm14679_vm15 = vmmov %vm14594_vm0 }
 0x4bd   : > { %v6598_v18 = vcombine.high %v6597_v58, %v6597_v58  ;;  %v7033_v34 = vmax.f32 %v7031_v52, %v7032_v60  ;;  %v7039_v53 = vrot.slane %v7038_v1, 4  ;;  %v7046_v38 = vrot.slane %v7045_v48, 4  ;;  %vm14680_vm9 = vmmov %vm14594_vm0 }
 0x4be   : > { %v7052_v3 = vsel %vm14594_vm0, %v6582_v17, -inf  ;;  %v7066_v47 = vsel %vm14664_vm10, %v6590_v46, -inf  ;;  %v7073_v61 = vsel %vm14665_vm12, %v6597_v58, -inf  ;;  %v7061_v16 = vmax.f32 %v7059_v37, %v7060_v26 }
 0x4bf   : > { %v7034_v57 = vrot.slane %v7033_v34, 2  ;;  %v7040_v5 = vmax.f32 %v7038_v1, %v7039_v53  ;;  %v7047_v15 = vmax.f32 %v7045_v48, %v7046_v38  ;;  %v7053_v39 = vrot.slane %v7052_v3, 4 }
 0x4c0   : > { %v7067_v35 = vrot.slane %v7066_v47, 4  ;;  %v7074_v13 = vrot.slane %v7073_v61, 4  ;;  %v7080_v32 = vsel %vm14666_vm13, %v6598_v18, -inf  ;;  %v7062_v28 = vrot.slane %v7061_v16, 2 }
 0x4c1   : > { %v7035_v33 = vmax.f32 %v7033_v34, %v7034_v57  ;;  %v7041_v52 = vrot.slane %v7040_v5, 2  ;;  %v7048_v60 = vrot.slane %v7047_v15, 2  ;;  %v7054_v36 = vmax.f32 %v7052_v3, %v7053_v39 }
 0x4c2   : > { %v7068_v17 = vmax.f32 %v7066_v47, %v7067_v35  ;;  %v7075_v2 = vmax.f32 %v7073_v61, %v7074_v13  ;;  %v7081_v9 = vrot.slane %v7080_v32, 4  ;;  %v7063_v53 = vmax.f32 %v7061_v16, %v7062_v28 }
 0x4c3   : > { %v7036_v46 = vrot.slane %v7035_v33, 1  ;;  %v7042_v14 = vmax.f32 %v7040_v5, %v7041_v52  ;;  %v7049_v58 = vmax.f32 %v7047_v15, %v7048_v60  ;;  %v7055_v8 = vrot.slane %v7054_v36, 2 }
 0x4c4   : > { %v7069_v38 = vrot.slane %v7068_v17, 2  ;;  %v7076_v1 = vrot.slane %v7075_v2, 2  ;;  %v7082_v48 = vmax.f32 %v7080_v32, %v7081_v9  ;;  %v7064_v57 = vrot.slane %v7063_v53, 1 }
 0x4c5   : > { %v7043_v26 = vrot.slane %v7042_v14, 1  ;;  %v7050_v18 = vrot.slane %v7049_v58, 1  ;;  %v7056_v34 = vmax.f32 %v7054_v36, %v7055_v8  ;;  %v12992_v35 = vmax.f32 %v12964_v0, %v6980_v21 }
 0x4c6   : > { %v7070_v22 = vmax.f32 %v7068_v17, %v7069_v38  ;;  %v7077_v39 = vmax.f32 %v7075_v2, %v7076_v1  ;;  %v7083_v3 = vrot.slane %v7082_v48, 2  ;;  %v12994_v47 = vmax.f32 %v7035_v33, %v7036_v46  ;;  %v14695_v38 = vld [vmem:[#allocation28_spill] sm:$0xff] }
 0x4c7   : > { %v7057_v15 = vrot.slane %v7056_v34, 1  ;;  %v14667_v28 = vmax.f32 %v12927_v44, 0.0  ;;  %v12998_v5 = vmax.f32 %v7042_v14, %v7043_v26  ;;  %v13002_v36 = vmax.f32 %v7049_v58, %v7050_v18 }
 0x4c8   : > { %v7071_v9 = vrot.slane %v7070_v22, 1  ;;  %v7078_v16 = vrot.slane %v7077_v39, 1  ;;  %v13000_v13 = vmax.f32 %v7082_v48, %v7083_v3  ;;  %v6775_v33 = vrot.slane %v12764_v12, 2 }
 0x4c9   : > { %v6357_v61 = vcombine.low %v14667_v28, %v6214_v19  ;;  %v14668_v2 = vmov %v14667_v28  ;;  %v13008_v21 = vmax.f32 %v7056_v34, %v7057_v15  ;;  %v13010_v32 = vmax.f32 %v7063_v53, %v7064_v57 }
 0x4ca   : > { %v6358_v8 = vcombine.high %v14668_v2, %v6214_v19  ;;  %v13012_v52 = vmax.f32 %v7070_v22, %v7071_v9  ;;  %v14671_v14 = vrot.slane %v12759_v10, 2  ;;  %v6776_v19 = vmax.f32 %v12764_v12, %v6775_v33 }
 0x4cb   : > { %v6365_v0 = vrot.slane %v6357_v61, %v14588_v51  ;;  %14669 = vst [vmem:[#allocation82_spill] sm:$0xff] %v13010_v32  ;;  %v13020_v58 = vmax.f32 %v7077_v39, %v7078_v16  ;;  %v6789_v53 = vrot.slane %v12781_v43, 2  ;;  %v14674_v57 = vrot.slane %v12756_v25, 4 }
 0x4cc   : > { %14670 = vst [vmem:[#allocation25_spill] sm:$0xff] %v13012_v52  ;;  %v6783_v60 = vmax.f32 %v12759_v10, %v14671_v14  ;;  %v6372_v17 = vrot.slane %v6358_v8, %v14588_v51  ;;  %v6777_v34 = vrot.slane %v6776_v19, 1  ;;  %v14675_v39 = vcombine.high %v12744_v40, %v12744_v40 }
 0x4cd   : > { %v6373_v46 = vcombine.high %v6365_v0, %v6365_v0  ;;  %v6605_v44 = vrot.slane %v6365_v0, %v14588_v51  ;;  %14672 = vst [vmem:[#allocation83_spill] sm:$0xff] %v13020_v58  ;;  %v6795_v12 = vmax.f32 %v12756_v25, %v14674_v57  ;;  %v6790_v0 = vmax.f32 %v12781_v43, %v6789_v53 }
 0x4ce   : > { %v6784_v1 = vrot.slane %v6783_v60, 1  ;;  %v6374_v22 = vcombine.high %v6372_v17, %v6372_v17  ;;  %v6621_v10 = vrot.slane %v6372_v17, %v14588_v51  ;;  %v6800_v3 = vsel %vm14676_vm8, %v14675_v39, -inf }
 0x4cf   : > { %v6606_v48 = vcombine.high %v6605_v44, %v6605_v44  ;;  %v6613_v26 = vrot.slane %v6373_v46, %v14588_v51  ;;  %v7087_v18 = vsel %vm14673_vm2, %v6605_v44, -inf  ;;  %vm14683_vm10 = vcmask 1041409   ;;  %vm14697_vm2 = vmmov %vm14594_vm0 }
 0x4d0   : > { %v6622_v28 = vcombine.high %v6621_v10, %v6621_v10  ;;  %v13035_v61 = vrot.slane %v6374_v22, %v14588_v51  ;;  %v7088_v9 = vrot.slane %v7087_v18, 4  ;;  %v7115_v8 = vsel %vm14679_vm15, %v6621_v10, -inf  ;;  %vm14685_vm12 = vmmov %vm14683_vm10 }
 0x4d1   : > { %v6614_v15 = vcombine.high %v6613_v26, %v6613_v26  ;;  %v7094_v16 = vsel %vm14677_vm11, %v6606_v48, -inf  ;;  %v7101_v2 = vsel %vm14678_vm14, %v6613_v26, -inf  ;;  %v13041_v40 = vmax.f32 %v6783_v60, %v6784_v1  ;;  %vm14700_vm8 = vmmov %vm14683_vm10 }
 0x4d2   : > { %v7089_v25 = vmax.f32 %v7087_v18, %v7088_v9  ;;  %v7095_v33 = vrot.slane %v7094_v16, 4  ;;  %v7102_v14 = vrot.slane %v7101_v2, 4  ;;  %v7116_v46 = vrot.slane %v7115_v8, 4  ;;  %vm14704_vm11 = vmmov %vm14700_vm8 }
 0x4d3   : > { %v7108_v17 = vsel %vm14680_vm9, %v6614_v15, -inf  ;;  %v7122_v51 = vsel %vm14681_vm4, %v6622_v28, -inf  ;;  %v13047_v44 = vsel %vm14594_vm0, %v13035_v61, -inf  ;;  %v13053_v18 = vmax.f32 %v6776_v19, %v6777_v34  ;;  %vm14718_vm15 = vmmov %vm14594_vm0 }
 0x4d4   : > { %v7090_v22 = vrot.slane %v7089_v25, 2  ;;  %v7096_v48 = vmax.f32 %v7094_v16, %v7095_v33  ;;  %v13049_v26 = vmax.f32 %v7101_v2, %v7102_v14  ;;  %v7109_v10 = vrot.slane %v7108_v17, 4  ;;  %v14693_v16 = vld [vmem:[#allocation94_spill] sm:$0xff]  ;;  %vm14722_vm4 = vmmov %vm14700_vm8 }
 0x4d5   : > { %v13051_v43 = vmax.f32 %v7115_v8, %v7116_v46  ;;  %v7123_v53 = vrot.slane %v7122_v51, 4  ;;  %14682 = vst [vmem:[#allocation31_spill] sm:$0xff] %v13053_v18  ;;  %v6791_v60 = vrot.slane %v6790_v0, 1  ;;  %v6796_v2 = vrot.slane %v6795_v12, 2 }
 0x4d6   : > { %v7091_v57 = vmax.f32 %v7089_v25, %v7090_v22  ;;  %v7097_v39 = vrot.slane %v7096_v48, 2  ;;  %v13059_v9 = vmax.f32 %v7108_v17, %v7109_v10  ;;  %v6801_v19 = vrot.slane %v6800_v3, 4 }
 0x4d7   : > { %v13062_v33 = vmax.f32 %v7122_v51, %v7123_v53  ;;  %v7207_v34 = vsel %vm14683_vm10, %v12727_v30, %v12720_v63  ;;  %v13067_v14 = vmax.f32 %v6790_v0, %v6791_v60  ;;  %v6797_v25 = vmax.f32 %v6795_v12, %v6796_v2  ;;  %vm14730_vm10 = vmmov %vm14722_vm4 }
 0x4d8   : > { %v7092_v8 = vrot.slane %v7091_v57, 1  ;;  %v7208_v46 = vsel %vm3610_vm1, %v12725_v11, %v7207_v34  ;;  %v7214_v17 = vsel %vm14685_vm12, %v12734_v24, %v12723_v54  ;;  %v13074_v22 = vmax.f32 %v7096_v48, %v7097_v39  ;;  %vm14740_vm12 = vmmov %vm14697_vm2 }
 0x4d9   : > { %14684 = vst [vmem:[#allocation87_spill] sm:$0xff] %v13067_v14  ;;  %v6802_v10 = vmax.f32 %v6800_v3, %v6801_v19  ;;  %v7209_v51 = vsel %vm3612_vm3, %v12741_v7, %v7208_v46  ;;  %v14686_v53 = vrot.slane %v12808_v41, 1  ;;  %v6798_v12 = vrot.slane %v6797_v25, 1 }
 0x4da   : > { %v13083_v0 = vmax.f32 %v7091_v57, %v7092_v8  ;;  %v7210_v60 = vsel %vm3614_vm5, %v12779_v23, %v7209_v51  ;;  %v7215_v2 = vsel %vm3610_vm1, %v12729_v27, %v7214_v17  ;;  %v14687_v19 = vrot.slane %v12850_v56, 2 }
 0x4db   : > { %v13081_v1 = vmax.f32 %v12808_v41, %v14686_v53  ;;  %v6803_v48 = vrot.slane %v6802_v10, 2  ;;  %v7211_v3 = vsel %vm3616_vm6, %v12981_v59, %v7210_v60  ;;  %v7216_v39 = vsel %vm3612_vm3, %v12922_v45, %v7215_v2  ;;  %v14688_v60 = vld [vmem:[#allocation91_spill] sm:$0xff] }
 0x4dc   : > { %v6881_v41 = vmax.f32 %v12850_v56, %v14687_v19  ;;  %v13096_v57 = vmax.f32 %v6797_v25, %v6798_v12  ;;  %v7212_v8 = vsel %vm3618_vm7, %v13041_v40, %v7211_v3  ;;  %v7217_v34 = vsel %vm3614_vm5, %v12932_v6, %v7216_v39  ;;  %v14692_v39 = vld [vmem:[#allocation92_spill] sm:$0xff] }
 0x4dd   : > { %v6887_v46 = vrot.slane %v12859_v49, 2  ;;  %v6804_v17 = vmax.f32 %v6802_v10, %v6803_v48  ;;  %v7218_v51 = vsel %vm3616_vm6, %v13053_v18, %v7217_v34  ;;  %v14689_v2 = vrot.slane %v14688_v60, 2 }
 0x4de   : > { %v6882_v53 = vrot.slane %v6881_v41, 1  ;;  %vm14690_vm13 = vcmask 1047559   ;;  %v14691_v25 = vrot.slane %v12866_v4, 1  ;;  %v6901_v10 = vrot.slane %v14692_v39, 2 }
 0x4df   : > { %v6895_v15 = vmax.f32 %v14688_v60, %v14689_v2  ;;  %v7213_v56 = vsel %vm14690_vm13, %v13096_v57, %v7212_v8  ;;  %v6888_v3 = vmax.f32 %v12859_v49, %v6887_v46  ;;  %v6805_v48 = vrot.slane %v6804_v17, 1  ;;  %v14698_v49 = vld [vmem:[#allocation32_spill] sm:$0xff]  ;;  %v14699_v46 = vld [vmem:[#allocation34_spill] sm:$0xff]  ;;  %vm14705_vm14 = vmmov %vm14690_vm13 }
 0x4e0   : > { %v13113_v12 = vmax.f32 %v12866_v4, %v14691_v25  ;;  %v7219_v19 = vsel %vm3618_vm7, %v13067_v14, %v7218_v51  ;;  %v14694_v28 = vrot.slane %v14693_v16, 4  ;;  %v6902_v8 = vmax.f32 %v14692_v39, %v6901_v10  ;;  %v14702_v10 = vld [vmem:[#allocation33_spill] sm:$0xff]  ;;  %vm14719_vm9 = vmmov %vm14690_vm13 }
 0x4e1   : > { %v6896_v34 = vrot.slane %v6895_v15, 1  ;;  %v6889_v2 = vrot.slane %v6888_v3, 1  ;;  %v14696_v4 = vcombine.high %v14695_v38, %v14695_v38  ;;  %v7221_v37 = vsel %vm14700_vm8, %v14699_v46, %v14698_v49  ;;  %v14703_v38 = vld [vmem:[#allocation35_spill] sm:$0xff]  ;;  %vm14723_vm0 = vmmov %vm14719_vm9 }
 0x4e2   : > { %v6907_v60 = vmax.f32 %v14693_v16, %v14694_v28  ;;  %v13130_v27 = vmax.f32 %v6804_v17, %v6805_v48  ;;  %v13132_v51 = vmax.f32 %v6881_v41, %v6882_v53  ;;  %v6903_v28 = vrot.slane %v6902_v8, 1  ;;  %v14701_v16 = vld [vmem:[#allocation88_spill] sm:$0xff]  ;;  %v14706_v48 = vld [vmem:[#allocation90_spill] sm:$0xff]  ;;  %vm14741_vm13 = vmmov %vm14723_vm0 }
 0x4e3   : > { %v6912_v25 = vsel %vm14697_vm2, %v14696_v4, -inf  ;;  %v13134_v18 = vmax.f32 %v6888_v3, %v6889_v2  ;;  %v7222_v39 = vsel %vm3610_vm1, %v14701_v16, %v7221_v37  ;;  %v7228_v4 = vsel %vm14704_vm11, %v14703_v38, %v14702_v10  ;;  %v14708_v2 = vld [vmem:[#allocation27_spill] sm:$0xff]  ;;  %vm14742_vm2 = vmmov %vm14723_vm0 }
 0x4e4   : > { %v6908_v14 = vrot.slane %v6907_v60, 2  ;;  %v6913_v45 = vrot.slane %v6912_v25, 4  ;;  %v7220_v24 = vsel %vm14705_vm14, %v13130_v27, %v7219_v19  ;;  %v7223_v41 = vsel %vm3612_vm3, %v14706_v48, %v7222_v39  ;;  %vm14743_vm8 = vmmov %vm14722_vm4 }
 0x4e5   : > { %v9477_v53 = vpack.i.bf16 %v7220_v24, %v7213_v56  ;;  %v13145_v49 = vmax.f32 %v6895_v15, %v6896_v34  ;;  %v7224_v3 = vsel %vm3614_vm5, %v12888_v55, %v7223_v41  ;;  %v7229_v37 = vsel %vm3610_vm1, %v14708_v2, %v7228_v4  ;;  %v9669_v41 = vld [vmem:[%s13898_s5 + $0x78] sm:$0xff]   ;;  %vm14744_vm11 = vmmov %vm14722_vm4 }
 0x4e6   : > { %v6909_v46 = vmax.f32 %v6907_v60, %v6908_v14  ;;  %v6914_v17 = vmax.f32 %v6912_v25, %v6913_v45  ;;  %v7225_v38 = vsel %vm3616_vm6, %v13132_v51, %v7224_v3  ;;  %v7230_v45 = vsel %vm3612_vm3, %v13081_v1, %v7229_v37  ;;  %v9670_v37 = vld [vmem:[%s13898_s5 + $0xf8] sm:$0xff]   ;;  %9291 = vmatprep.subr.bf16.mxu1 %v9669_v41  ;;  %vm14749_vm14 = vmmov %vm14723_vm0 }
 0x4e7   : > { %14707 = vst [vmem:[#allocation93_spill] sm:$0xff] %v13145_v49  ;;  %9478 = vrot.lane.b32.xlu0 %v9477_v53, %s9806_s16  ;;  %v13157_v24 = vmax.f32 %v6902_v8, %v6903_v28  ;;  %v7226_v15 = vsel %vm3618_vm7, %v13145_v49, %v7225_v38  ;;  %v7231_v56 = vsel %vm3614_vm5, %v13113_v12, %v7230_v45  ;;  %v14710_v60 = vrot.slane %v12895_v62, 1 }
 0x4e8   : > { %v6910_v16 = vrot.slane %v6909_v46, 1  ;;  %v6915_v6 = vrot.slane %v6914_v17, 2  ;;  %v7232_v34 = vsel %vm3616_vm6, %v13134_v18, %v7231_v56  ;;  %v14711_v39 = vrot.slane %v12958_v29, 2  ;;  %9269 = vmatprep.subr.bf16.mxu0 %v9670_v37  ;;  %v14724_v37 = vld [vmem:[#allocation19_spill] sm:$0xff] }
 0x4e9   : > { %14709 = vst [vmem:[#allocation17_spill] sm:$0xff] %v13157_v24  ;;  %v13168_v25 = vmax.f32 %v12895_v62, %v14710_v60  ;;  %v6999_v38 = vrot.slane %v12966_v31, 2  ;;  %v14713_v4 = vrot.slane %v12950_v42, 2  ;;  %v7233_v53 = vsel %vm3618_vm7, %v13157_v24, %v7232_v34 }
 0x4ea   : > { %v6916_v19 = vmax.f32 %v6914_v17, %v6915_v6  ;;  %v6993_v8 = vmax.f32 %v12958_v29, %v14711_v39  ;;  %v13173_v28 = vmax.f32 %v6909_v46, %v6910_v16  ;;  %v7013_v17 = vrot.slane %v12960_v50, 2  ;;  %v14714_v29 = vld [vmem:[#allocation18_spill] sm:$0xff] }
 0x4eb   : > { %v7007_v6 = vmax.f32 %v12950_v42, %v14713_v4  ;;  %v14715_v46 = vrot.slane %v14714_v29, 4  ;;  %v9671_v42 = vld [vmem:[%s13898_s5 + $0x38] sm:$0xff]   ;;  %v7000_v45 = vmax.f32 %v12966_v31, %v6999_v38  ;;  %v14716_v39 = vld [vmem:[#allocation74_spill] sm:$0xff]  ;;  %v14725_v24 = vrot.slane %v12973_v20, 1 }
 0x4ec   : > { %14712 = vst [vmem:[#allocation99_spill] sm:$0xff] %v13173_v28  ;;  %v6917_v62 = vrot.slane %v6916_v19, 1  ;;  %v6994_v3 = vrot.slane %v6993_v8, 1  ;;  %v7014_v60 = vmax.f32 %v12960_v50, %v7013_v17  ;;  %v14717_v34 = vcombine.high %v14716_v39, %v14716_v39  ;;  %9292 = vmatpush3.bf16.msra.mxu1 %v9671_v42  ;;  %v14720_v39 = vld [vmem:[#allocation100_spill] sm:$0xff]  ;;  %v9675_v42 = vld [vmem:[%s13898_s5 + $0x30] sm:$0xff]  }
 0x4ed   : > { %v7019_v16 = vmax.f32 %v14714_v29, %v14715_v46  ;;  %v7008_v56 = vrot.slane %v7007_v6, 1  ;;  %v9672_v29 = vld [vmem:[%s13898_s5 + $0xb8] sm:$0xff]   ;;  %v7227_v14 = vsel %vm14719_vm9, %v13173_v28, %v7226_v15  ;;  %v7001_v38 = vrot.slane %v7000_v45, 1 }
 0x4ee   : > { %v7024_v4 = vsel %vm14718_vm15, %v14717_v34, -inf  ;;  %v13203_v46 = vmax.f32 %v6916_v19, %v6917_v62  ;;  %v13207_v50 = vmax.f32 %v6993_v8, %v6994_v3  ;;  %v7015_v17 = vrot.slane %v7014_v60, 1  ;;  %v14721_v34 = vld [vmem:[#allocation10_spill] sm:$0xff]  ;;  %9270 = vmatpush3.bf16.msra.mxu0 %v9672_v29  ;;  %v9673_v19 = vld [vmem:[%s13898_s5 + $0x70] sm:$0xff]   ;;  %vm14750_vm15 = vmmov %vm14723_vm0 }
 0x4ef   : > { %v7020_v49 = vrot.slane %v7019_v16, 2  ;;  %v7025_v31 = vrot.slane %v7024_v4, 4  ;;  %v7235_v41 = vsel %vm14722_vm4, %v14721_v34, %v14720_v39  ;;  %v9674_v3 = vld [vmem:[%s13898_s5 + $0xf0] sm:$0xff]   ;;  %v13228_v2 = vmax.f32 %v12973_v20, %v14725_v24  ;;  %9293 = vmatprep.subr.bf16.mxu1 %v9673_v19  ;;  %v9677_v19 = vld [vmem:[%s13898_s5 + $0x68] sm:$0xff]  }
 0x4f0   : > { %v7234_v15 = vsel %vm14723_vm0, %v13203_v46, %v7233_v53  ;;  %v7236_v8 = vsel %vm3610_vm1, %v14724_v37, %v7235_v41  ;;  %v13230_v53 = vmax.f32 %v7007_v6, %v7008_v56  ;;  %v14729_v37 = vld [vmem:[#allocation20_spill] sm:$0xff]  ;;  %9271 = vmatprep.subr.bf16.mxu0 %v9674_v3  ;;  %9294 = vmatpush3.bf16.msra.mxu1 %v9675_v42  ;;  %v14733_v42 = vrot.slane %v13000_v13, 1 }
 0x4f1   : > { %v7021_v62 = vmax.f32 %v7019_v16, %v7020_v49  ;;  %v7026_v28 = vmax.f32 %v7024_v4, %v7025_v31  ;;  %v9482_v29 = vpack.i.bf16 %v7234_v15, %v7227_v14  ;;  %v14727_v49 = vld [vmem:[#allocation23_spill] sm:$0xff]  ;;  %v13237_v31 = vmax.f32 %v7000_v45, %v7001_v38  ;;  %v14728_v15 = vld [vmem:[#allocation26_spill] sm:$0xff]  ;;  %v14732_v45 = vld [vmem:[#allocation21_spill] sm:$0xff]  ;;  %9295 = vmatprep.subr.bf16.mxu1 %v9677_v19 }
 0x4f2   : > { %14726 = vst [vmem:[#allocation7_spill] sm:$0xff] %v13230_v53  ;;  %v7237_v16 = vsel %vm3612_vm3, %v14727_v49, %v7236_v8  ;;  %v9676_v4 = vld [vmem:[%s13898_s5 + $0xb0] sm:$0xff]   ;;  %v7242_v20 = vsel %vm14730_vm10, %v14729_v37, %v14728_v15  ;;  %v13245_v24 = vmax.f32 %v7014_v60, %v7015_v17  ;;  %v13259_v60 = vmax.f32 %v13000_v13, %v14733_v42  ;;  %v9681_v49 = vld [vmem:[%s13898_s5 + $0x60] sm:$0xff]   ;;  %vm14765_vm10 = vmmov %vm14722_vm4 }
 0x4f3   : > { %v7027_v41 = vrot.slane %v7026_v28, 2  ;;  %v7238_v14 = vsel %vm3614_vm5, %v12992_v35, %v7237_v16  ;;  %9483 = vrot.lane.b32.xlu1 %v9482_v29, %s9806_s16  ;;  %v7022_v6 = vrot.slane %v7021_v62, 1  ;;  %v7243_v38 = vsel %vm3610_vm1, %v14732_v45, %v7242_v20  ;;  %9272 = vmatpush3.bf16.msra.mxu0 %v9676_v4  ;;  %v9678_v16 = vld [vmem:[%s13898_s5 + $0xe8] sm:$0xff]  }
 0x4f4   : > { %14731 = vst [vmem:[#allocation8_spill] sm:$0xff] %v13245_v24  ;;  %v7239_v56 = vsel %vm3616_vm6, %v13207_v50, %v7238_v14  ;;  %v7244_v3 = vsel %vm3612_vm3, %v13168_v25, %v7243_v38  ;;  %v14734_v17 = vrot.slane %v13074_v22, 1  ;;  %v14735_v13 = vrot.slane %v13049_v26, 2  ;;  %v9680_v38 = vld [vmem:[%s13898_s5 + $0xa8] sm:$0xff]   ;;  %9273 = vmatprep.subr.bf16.mxu0 %v9678_v16 }
 0x4f5   : > { %v7028_v8 = vmax.f32 %v7026_v28, %v7027_v41  ;;  %v9679_v28 = vld [vmem:[%s13898_s5 + $0x28] sm:$0xff]   ;;  %v7245_v41 = vsel %vm3614_vm5, %v13228_v2, %v7244_v3  ;;  %v7111_v20 = vrot.slane %v13059_v9, 2 }
 0x4f6   : > { %v13264_v29 = vmax.f32 %v13074_v22, %v14734_v17  ;;  %v7105_v14 = vmax.f32 %v13049_v26, %v14735_v13  ;;  %v14736_v22 = vrot.slane %v13051_v43, 2  ;;  %v7240_v17 = vsel %vm3618_vm7, %v13230_v53, %v7239_v56  ;;  %9296 = vmatpush3.bf16.msra.mxu1 %v9679_v28 }
 0x4f7   : > { %v7029_v42 = vrot.slane %v7028_v8, 1  ;;  %v7246_v3 = vsel %vm3616_vm6, %v13237_v31, %v7245_v41  ;;  %v7125_v26 = vrot.slane %v13062_v33, 2  ;;  %v13289_v13 = vmax.f32 %v7021_v62, %v7022_v6  ;;  %9274 = vmatpush3.bf16.msra.mxu0 %v9680_v38  ;;  %9297 = vmatprep.subr.bf16.mxu1 %v9681_v49 }
 0x4f8   : > { %v7119_v4 = vmax.f32 %v13051_v43, %v14736_v22  ;;  %v7247_v43 = vsel %vm3618_vm7, %v13245_v24, %v7246_v3  ;;  %v7106_v19 = vrot.slane %v7105_v14, 1  ;;  %v7112_v22 = vmax.f32 %v13059_v9, %v7111_v20  ;;  %v9682_v9 = vld [vmem:[%s13898_s5 + $0xe0] sm:$0xff]  }
 0x4f9   : > { %14737 = vst [vmem:[#allocation52_spill] sm:$0xff] %v13289_v13  ;;  %v13297_v56 = vmax.f32 %v7028_v8, %v7029_v42  ;;  %v7126_v41 = vmax.f32 %v13062_v33, %v7125_v26  ;;  %v14738_v53 = vrot.slane %v13047_v44, 4  ;;  %v14739_v62 = vcombine.high %v13035_v61, %v13035_v61  ;;  %v9683_v8 = vld [vmem:[%s13898_s5 + $0x20] sm:$0xff]   ;;  %9275 = vmatprep.subr.bf16.mxu0 %v9682_v9 }
 0x4fa   : > { %v7241_v33 = vsel %vm14741_vm13, %v13289_v13, %v7240_v17  ;;  %v7113_v28 = vrot.slane %v7112_v22, 1  ;;  %v7120_v20 = vrot.slane %v7119_v4, 1  ;;  %v9684_v61 = vld [vmem:[%s13898_s5 + $0xa0] sm:$0xff]   ;;  %v13320_v38 = vmax.f32 %v7105_v14, %v7106_v19  ;;  %9298 = vmatpush3.bf16.msra.mxu1 %v9683_v8  ;;  %v9685_v13 = vld [vmem:[%s13898_s5 + $0x58] sm:$0xff]   ;;  %vm14771_vm13 = vmmov %vm14723_vm0 }
 0x4fb   : > { %v7131_v16 = vmax.f32 %v13047_v44, %v14738_v53  ;;  %v7136_v6 = vsel %vm14740_vm12, %v14739_v62, -inf  ;;  %v7248_v53 = vsel %vm14742_vm2, %v13297_v56, %v7247_v43  ;;  %v7249_v3 = vsel %vm14743_vm8, %v13002_v36, %v12994_v47  ;;  %9276 = vmatpush3.bf16.msra.mxu0 %v9684_v61  ;;  %v9687_v8 = vld [vmem:[%s13898_s5 + $0x18] sm:$0xff]   ;;  %9299 = vmatprep.subr.bf16.mxu1 %v9685_v13  ;;  %v9689_v61 = vld [vmem:[%s13898_s5 + $0x50] sm:$0xff]   ;;  %vm14768_vm12 = vmmov %vm14722_vm4 }
 0x4fc   : > { %v7137_v44 = vrot.slane %v7136_v6, 4  ;;  %v9487_v17 = vpack.i.bf16 %v7248_v53, %v7241_v33  ;;  %v7127_v26 = vrot.slane %v7126_v41, 1  ;;  %v7250_v49 = vsel %vm3610_vm1, %v13010_v32, %v7249_v3  ;;  %v9690_v53 = vld [vmem:[%s13898_s5 + $0xd0] sm:$0xff]   ;;  %vm14774_vm2 = vmmov %vm14722_vm4 }
 0x4fd   : > { %v7132_v42 = vrot.slane %v7131_v16, 2  ;;  %v13330_v43 = vmax.f32 %v7112_v22, %v7113_v28  ;;  %v7251_v19 = vsel %vm3612_vm3, %v13020_v58, %v7250_v49  ;;  %v7256_v9 = vsel %vm14744_vm11, %v13008_v21, %v12998_v5  ;;  %v9688_v28 = vld [vmem:[%s13898_s5 + $0x98] sm:$0xff]   ;;  %v9691_v13 = vld [vmem:[%s13898_s5 + $0x10] sm:$0xff]   ;;  %vm14775_vm8 = vmmov %vm14723_vm0 }
 0x4fe   : > { %v7138_v62 = vmax.f32 %v7136_v6, %v7137_v44  ;;  %v9686_v6 = vld [vmem:[%s13898_s5 + $0xd8] sm:$0xff]   ;;  %9488 = vrot.lane.b32.xlu0 %v9487_v17, %s9806_s16  ;;  %v7257_v33 = vsel %vm3610_vm1, %v13012_v52, %v7256_v9  ;;  %9300 = vmatpush3.bf16.msra.mxu1 %v9687_v8  ;;  %v13369_v9 = vmax.f32 %v7119_v4, %v7120_v20  ;;  %v9695_v20 = vld [vmem:[%s13898_s5 + $0x8] sm:$0xff]   ;;  %vm14779_vm11 = vmmov %vm14723_vm0 }
 0x4ff   : > { %v7133_v14 = vmax.f32 %v7131_v16, %v7132_v42  ;;  %v7252_v16 = vsel %vm3614_vm5, %v13083_v0, %v7251_v19  ;;  %v7258_v44 = vsel %vm3612_vm3, %v13259_v60, %v7257_v33  ;;  %9277 = vmatprep.subr.bf16.mxu0 %v9686_v6  ;;  %v9693_v19 = vld [vmem:[%s13898_s5 + $0x48] sm:$0xff]   ;;  %v13371_v6 = vmax.f32 %v7126_v41, %v7127_v26 }
 0x500   : > { %v7139_v22 = vrot.slane %v7138_v62, 2  ;;  %v7253_v17 = vsel %vm3616_vm6, %v13320_v38, %v7252_v16  ;;  %v7259_v49 = vsel %vm3614_vm5, %v13264_v29, %v7258_v44  ;;  %14745 = vst [vmem:[#allocation54_spill] sm:$0xff] %v13369_v9  ;;  %9278 = vmatpush3.bf16.msra.mxu0 %v9688_v28  ;;  %9301 = vmatprep.subr.bf16.mxu1 %v9689_v61  ;;  %v9694_v16 = vld [vmem:[%s13898_s5 + $0xc8] sm:$0xff]   ;;  %v9697_v28 = vld [vmem:[%s13898_s5 + $0x40] sm:$0xff]  }
 0x501   : > { %v7134_v42 = vrot.slane %v7133_v14, 1  ;;  %14746 = vst [vmem:[#allocation45_spill] sm:$0xff] %v13371_v6  ;;  %v7260_v8 = vsel %vm3616_vm6, %v13330_v43, %v7259_v49  ;;  %9279 = vmatprep.subr.bf16.mxu0 %v9690_v53  ;;  %v7254_v4 = vsel %vm3618_vm7, %v13369_v9, %v7253_v17  ;;  %v9696_v44 = vld [vmem:[%s13898_s5 + $0x88] sm:$0xff]   ;;  %v9701_v17 = vld [vmem:[%s13898_s5 + $0x1f8] sm:$0xff]  }
 0x502   : > { %v7140_v3 = vmax.f32 %v7138_v62, %v7139_v22  ;;  %v9692_v62 = vld [vmem:[%s13898_s5 + $0x90] sm:$0xff]   ;;  %v7261_v41 = vsel %vm3618_vm7, %v13371_v6, %v7260_v8  ;;  %9302 = vmatpush3.bf16.msra.mxu1 %v9691_v13  ;;  %v9702_v49 = vld [vmem:[%s13898_s5 + $0x178] sm:$0xff]  }
 0x503   : > { %v13388_v26 = vmax.f32 %v7133_v14, %v7134_v42  ;;  %9303 = vmatprep.subr.bf16.mxu1 %v9693_v19  ;;  %v9698_v14 = vld [vmem:[%s13898_s5 + $0xc0] sm:$0xff]   ;;  %v14751_v19 = vld [vmem:[#allocation116_spill] sm:$0xff] }
 0x504   : > { %v7141_v22 = vrot.slane %v7140_v3, 1  ;;  %9280 = vmatpush3.bf16.msra.mxu0 %v9692_v62  ;;  %v9699_v42 = vld [vmem:[%s13898_s5] sm:$0xff]   ;;  %vm7287_vm9 = vcmp.lt.s32.totalorder %v14751_v19, 96 }
 0x505   : > { %14747 = vst [vmem:[#allocation39_spill] sm:$0xff] %v13388_v26  ;;  %v7255_v61 = vsel %vm14749_vm14, %v13388_v26, %v7254_v4  ;;  %9281 = vmatprep.subr.bf16.mxu0 %v9694_v16  ;;  %vm14781_vm14 = vmmov %vm14774_vm2 }
 0x506   : > { %v13390_v33 = vmax.f32 %v7140_v3, %v7141_v22  ;;  %9304 = vmatpush3.bf16.msra.mxu1 %v9695_v20  ;;  %v9700_v3 = vld [vmem:[%s13898_s5 + $0x80] sm:$0xff]  }
 0x507   : > { %9305 = vmatprep.subr.bf16.mxu1 %v9697_v28 }
 0x508   : > { %14748 = vst [vmem:[#allocation111_spill] sm:$0xff] %v13390_v33  ;;  %v7262_v53 = vsel %vm14750_vm15, %v13390_v33, %v7261_v41  ;;  %9282 = vmatpush3.bf16.msra.mxu0 %v9696_v44  ;;  %vm14793_vm15 = vmmov %vm14723_vm0 }
 0x509   : > { %v9492_v13 = vpack.i.bf16 %v7262_v53, %v7255_v61  ;;  %9283 = vmatprep.subr.bf16.mxu0 %v9698_v14 }
 0x50a   : > { %9306 = vmatpush3.bf16.msra.mxu1 %v9699_v42 }
 0x50b   : > { %9493 = vrot.lane.b32.xlu1 %v9492_v13, %s9806_s16  ;;  %9335 = vmatprep.subr.bf16.mxu1 %v9701_v17  ;;  %s8621_s16 = sshll.u32 %s328_s21, 4  ;;  %s13854_s16 = int_to_ptr.vmem [resolvable:$true] %s8621_s16 }
 0x50c   : > { %9284 = vmatpush3.bf16.msra.mxu0 %v9700_v3  ;;  %s9741_s27 = scalar_lea.vmem %s13854_s16, 128  ;;  %p9748_p0 = scmp.lt.s32.totalorder %s13854_s16, %s9746_s29 }
 0x50d   : > { %9313 = vmatprep.subr.bf16.mxu0 %v9702_v49  ;;  %p9742_p11 = scmp.ne.s32.totalorder %s13854_s16, %s9741_s27  ;;  %p9749_p1 = scmp.lt.s32.totalorder %s9747_s14, %s9741_s27 }
 0x50f   : > { %p9743_p12 = pnand %p9742_p11, %p9898_p5  ;;  %p9750_p2 = por %p9749_p1, %p9748_p0 }
 0x511   : > { %p9744_p13 = pneg %p9743_p12 }
 0x513   : > { %p9751_p3 = pnand %p9750_p2, %p9744_p13 }
 0x559   : > { %v9479_v8 = vpop.permute.xlu0 %9478 }
 0x55a   : > { %v9481_v62 = vunpack.i.h.bf16 %v9479_v8  ;;  %v9480_v22 = vunpack.i.l.bf16 %v9479_v8 }
 0x55c   : > { %v7288_v16 = vsel %vm7287_vm9, %v9480_v22, %v9481_v62  ;;  %v13423_v4 = vsel %vm7287_vm9, %v9481_v62, %v9480_v22 }
 0x55d   : > { %v7304_v41 = vrot.slane %v7288_v16, 1  ;;  %v7305_v20 = vrot.slane %v13423_v4, 1  ;;  %v7306_v28 = vrot.slane %v7288_v16, 2  ;;  %v7308_v61 = vrot.slane %v7288_v16, 3 }
 0x55e   : > { %v7309_v53 = vrot.slane %v13423_v4, 3  ;;  %v7310_v14 = vrot.slane %v7288_v16, 4  ;;  %v7311_v13 = vrot.slane %v13423_v4, 4  ;;  %v7312_v42 = vrot.slane %v7288_v16, 5 }
 0x55f   : > { %v7313_v3 = vrot.slane %v13423_v4, 5  ;;  %v7314_v17 = vrot.slane %v7288_v16, 6  ;;  %v7316_v8 = vrot.slane %v7288_v16, 7  ;;  %v7424_v22 = vmax.f32 %v12720_v63, %v7288_v16 }
 0x560   : > { %v7425_v44 = vmax.f32 %v12723_v54, %v13423_v4  ;;  %v7426_v9 = vmax.f32 %v12727_v30, %v7304_v41  ;;  %v7428_v32 = vmax.f32 %v12725_v11, %v7306_v28  ;;  %v7430_v26 = vmax.f32 %v12741_v7, %v7308_v61  ;;  %v14756_v61 = vld [vmem:[#allocation30_spill] sm:$0xff] }
 0x561   : > { %v7432_v58 = vmax.f32 %v12779_v23, %v7310_v14  ;;  %v7434_v6 = vmax.f32 %v12981_v59, %v7312_v42  ;;  %v7436_v49 = vmax.f32 %v13041_v40, %v7314_v17  ;;  %v7438_v52 = vmax.f32 %v13096_v57, %v7316_v8  ;;  %v14757_v42 = vld [vmem:[#allocation31_spill] sm:$0xff] }
 0x562   : > { %v7488_v62 = vpack.c.bf16 %v7424_v22, %v7424_v22  ;;  %v7490_v24 = vpack.c.bf16 %v7426_v9, %v7426_v9  ;;  %v7492_v63 = vpack.c.bf16 %v7428_v32, %v7428_v32  ;;  %v7494_v16 = vpack.c.bf16 %v7430_v26, %v7430_v26  ;;  %v14755_v26 = vld [vmem:[#allocation24_spill] sm:$0xff] }
 0x563   : > { %v7496_v45 = vpack.c.bf16 %v7432_v58, %v7432_v58  ;;  %v7498_v33 = vpack.c.bf16 %v7434_v6, %v7434_v6  ;;  %v7500_v30 = vpack.c.bf16 %v7436_v49, %v7436_v49  ;;  %v7502_v41 = vpack.c.bf16 %v7438_v52, %v7438_v52 }
 0x564   : > { %v13442_v11 = vunpack.c.l.b16 %v7488_v62  ;;  %v13444_v7 = vunpack.c.l.b16 %v7490_v24  ;;  %v13448_v59 = vunpack.c.l.b16 %v7492_v63  ;;  %v13450_v40 = vunpack.c.l.b16 %v7494_v16 }
 0x565   : > { %v9484_v54 = vpop.permute.xlu1 %9483  ;;  %v13446_v23 = vunpack.c.l.b16 %v7496_v45  ;;  %v13452_v57 = vunpack.c.l.b16 %v7498_v33  ;;  %v13454_v9 = vunpack.c.l.b16 %v7500_v30  ;;  %v13456_v32 = vunpack.c.l.b16 %v7502_v41  ;;  %v14758_v33 = vld [vmem:[#allocation22_spill] sm:$0xff] }
 0x566   : > { %14752 = vst [vmem:[#allocation37_spill] sm:$0xff] %v13448_v59  ;;  %14753 = vst [vmem:[#allocation41_spill] sm:$0xff] %v13450_v40  ;;  %v9486_v58 = vunpack.i.h.bf16 %v9484_v54  ;;  %v9485_v52 = vunpack.i.l.bf16 %v9484_v54  ;;  %v7433_v28 = vmax.f32 %v14755_v26, %v7311_v13  ;;  %v7489_v24 = vpack.c.bf16 %v7425_v44, %v7425_v44 }
 0x567   : > { %14754 = vst [vmem:[#allocation42_spill] sm:$0xff] %v13454_v9  ;;  %v13462_v14 = vmax.f32 %v14756_v61, %v7305_v20  ;;  %v13465_v17 = vmax.f32 %v14757_v42, %v7313_v3  ;;  %v13468_v49 = vmax.f32 %v14758_v33, %v7309_v53  ;;  %v14761_v61 = vld [vmem:[#allocation88_spill] sm:$0xff] }
 0x568   : > { %v13472_v8 = vsel %vm7287_vm9, %v9485_v52, %v9486_v58  ;;  %v13476_v62 = vsel %vm7287_vm9, %v9486_v58, %v9485_v52  ;;  %v7497_v44 = vpack.c.bf16 %v7433_v28, %v7433_v28  ;;  %v7834_v13 = vunpack.c.l.b16 %v7489_v24  ;;  %v14759_v52 = vld [vmem:[#allocation32_spill] sm:$0xff]  ;;  %v14760_v28 = vld [vmem:[#allocation34_spill] sm:$0xff] }
 0x569   : > { %v7318_v22 = vrot.slane %v13472_v8, 1  ;;  %v7320_v3 = vrot.slane %v13472_v8, 2  ;;  %v7322_v53 = vrot.slane %v13472_v8, 3  ;;  %v7324_v54 = vrot.slane %v13472_v8, 4 }
 0x56a   : > { %v7326_v30 = vrot.slane %v13472_v8, 5  ;;  %v7440_v26 = vmax.f32 %v14759_v52, %v13472_v8  ;;  %v7325_v52 = vrot.slane %v13476_v62, 4 }
 0x56b   : > { %v7442_v24 = vmax.f32 %v14760_v28, %v7318_v22  ;;  %v13492_v42 = vmax.f32 %v14761_v61, %v7320_v3  ;;  %v13495_v33 = vmax.f32 %v14706_v48, %v7322_v53  ;;  %v7448_v63 = vmax.f32 %v12888_v55, %v7324_v54 }
 0x56c   : > { %v7450_v16 = vmax.f32 %v13132_v51, %v7326_v30  ;;  %v7504_v6 = vpack.c.bf16 %v7440_v26, %v7440_v26  ;;  %v7441_v22 = vmax.f32 %v14702_v10, %v13476_v62 }
 0x56d   : > { %14762 = vst [vmem:[#allocation43_spill] sm:$0xff] %v13492_v42  ;;  %v7506_v41 = vpack.c.bf16 %v7442_v24, %v7442_v24  ;;  %v7512_v59 = vpack.c.bf16 %v7448_v63, %v7448_v63  ;;  %v7836_v24 = vunpack.c.l.b16 %v7497_v44  ;;  %v14764_v42 = vld [vmem:[#allocation35_spill] sm:$0xff] }
 0x56e   : > { %v7514_v9 = vpack.c.bf16 %v7450_v16, %v7450_v16  ;;  %v13504_v48 = vunpack.c.l.b16 %v7504_v6  ;;  %v7505_v28 = vpack.c.bf16 %v7441_v22, %v7441_v22 }
 0x56f   : > { %v13502_v3 = vunpack.c.l.b16 %v7506_v41  ;;  %v13516_v63 = vunpack.c.l.b16 %v7512_v59  ;;  %v7863_v41 = vrot.slane %v7836_v24, 7 }
 0x570   : > { %v9489_v45 = vpop.permute.xlu0 %9488 }
 0x571   : > { %v9491_v20 = vunpack.i.h.bf16 %v9489_v45  ;;  %v9490_v58 = vunpack.i.l.bf16 %v9489_v45  ;;  %v13514_v45 = vunpack.c.l.b16 %v7514_v9  ;;  %v7864_v10 = vsel %vm14722_vm4, %v7863_v41, %v7834_v13  ;;  %vm14802_vm4 = vmmov %vm14723_vm0 }
 0x573   : > { %v13508_v55 = vsel %vm7287_vm9, %v9490_v58, %v9491_v20  ;;  %v13512_v51 = vsel %vm7287_vm9, %v9491_v20, %v9490_v58  ;;  %v7449_v58 = vmax.f32 %v13113_v12, %v7325_v52 }
 0x574   : > { %v7332_v53 = vrot.slane %v13508_v55, 1  ;;  %v7456_v9 = vmax.f32 %v14720_v39, %v13508_v55  ;;  %v7339_v20 = vrot.slane %v13512_v51, 4  ;;  %v7457_v26 = vmax.f32 %v14728_v15, %v13512_v51 }
 0x575   : > { %v7327_v39 = vrot.slane %v13476_v62, 5  ;;  %v7513_v16 = vpack.c.bf16 %v7449_v58, %v7449_v58  ;;  %v7333_v52 = vrot.slane %v13512_v51, 1  ;;  %v7341_v15 = vrot.slane %v13512_v51, 5 }
 0x576   : > { %v13528_v59 = vmax.f32 %v14721_v34, %v7332_v53  ;;  %v7520_v61 = vpack.c.bf16 %v7456_v9, %v7456_v9  ;;  %v7465_v54 = vmax.f32 %v13228_v2, %v7339_v20  ;;  %v7521_v34 = vpack.c.bf16 %v7457_v26, %v7457_v26 }
 0x577   : > { %v7838_v53 = vunpack.c.l.b16 %v7505_v28  ;;  %v7840_v22 = vunpack.c.l.b16 %v7513_v16 }
 0x578   : > { %v13538_v6 = vunpack.c.l.b16 %v7520_v61  ;;  %v7529_v12 = vpack.c.bf16 %v7465_v54, %v7465_v54  ;;  %v7842_v9 = vunpack.c.l.b16 %v7521_v34  ;;  %v14763_v54 = vrot.slane %v13476_v62, 1 }
 0x579   : > { %v7865_v30 = vrot.slane %v7838_v53, 6  ;;  %v7867_v24 = vrot.slane %v7840_v22, 5  ;;  %v7451_v34 = vmax.f32 %v13134_v18, %v7327_v39  ;;  %v7459_v22 = vmax.f32 %v14729_v37, %v7333_v52 }
 0x57a   : > { %v7855_v2 = vrot.slane %v13538_v6, 4  ;;  %v7844_v26 = vunpack.c.l.b16 %v7529_v12  ;;  %v7869_v61 = vrot.slane %v7842_v9, 4  ;;  %v7443_v40 = vmax.f32 %v14764_v42, %v14763_v54 }
 0x57b   : > { %v7866_v28 = vsel %vm3610_vm1, %v7865_v30, %v7864_v10  ;;  %v7515_v52 = vpack.c.bf16 %v7451_v34, %v7451_v34 }
 0x57c   : > { %v7871_v41 = vrot.slane %v7844_v26, 3  ;;  %v7868_v42 = vsel %vm3612_vm3, %v7867_v24, %v7866_v28  ;;  %v7491_v26 = vpack.c.bf16 %v13462_v14, %v13462_v14  ;;  %v7499_v28 = vpack.c.bf16 %v13465_v17, %v13465_v17 }
 0x57d   : > { %v9494_v44 = vpop.permute.xlu1 %9493  ;;  %v7870_v12 = vsel %vm3614_vm5, %v7869_v61, %v7868_v42  ;;  %v7507_v37 = vpack.c.bf16 %v7443_v40, %v7443_v40 }
 0x57e   : > { %v9496_v20 = vunpack.i.h.bf16 %v9494_v44  ;;  %v9495_v58 = vunpack.i.l.bf16 %v9494_v44  ;;  %v7872_v39 = vsel %vm3616_vm6, %v7871_v41, %v7870_v12 }
 0x57f   : > { %v7638_v42 = vunpack.c.l.b16 %v7507_v37  ;;  %v14766_v37 = vrot.slane %v13508_v55, 4 }
 0x580   : > { %v13550_v16 = vsel %vm7287_vm9, %v9495_v58, %v9496_v20  ;;  %v13554_v13 = vsel %vm7287_vm9, %v9496_v20, %v9495_v58  ;;  %v7467_v20 = vmax.f32 %v13237_v31, %v7341_v15  ;;  %v7634_v15 = vunpack.c.l.b16 %v7491_v26  ;;  %vm14794_vm9 = vmmov %vm14774_vm2 }
 0x581   : > { %v7346_v53 = vrot.slane %v13550_v16, 1  ;;  %v7353_v10 = vrot.slane %v13554_v13, 4  ;;  %v7473_v30 = vmax.f32 %v12998_v5, %v13554_v13  ;;  %v7347_v44 = vrot.slane %v13554_v13, 1 }
 0x582   : > { %v7355_v19 = vrot.slane %v13554_v13, 5  ;;  %v7531_v54 = vpack.c.bf16 %v7467_v20, %v7467_v20  ;;  %v7665_v40 = vrot.slane %v7638_v42, 6 }
 0x583   : > { %v7481_v9 = vmax.f32 %v13264_v29, %v7353_v10  ;;  %v7537_v18 = vpack.c.bf16 %v7473_v30, %v7473_v30  ;;  %v7475_v58 = vmax.f32 %v13008_v21, %v7347_v44  ;;  %v7523_v29 = vpack.c.bf16 %v7459_v22, %v7459_v22 }
 0x584   : > { %v7483_v5 = vmax.f32 %v13330_v43, %v7355_v19  ;;  %v7636_v21 = vunpack.c.l.b16 %v7499_v28  ;;  %v7640_v43 = vunpack.c.l.b16 %v7515_v52  ;;  %v7644_v44 = vunpack.c.l.b16 %v7531_v54 }
 0x585   : > { %v7545_v24 = vpack.c.bf16 %v7481_v9, %v7481_v9  ;;  %v7846_v61 = vunpack.c.l.b16 %v7537_v18  ;;  %v7539_v10 = vpack.c.bf16 %v7475_v58, %v7475_v58  ;;  %v7642_v12 = vunpack.c.l.b16 %v7523_v29 }
 0x586   : > { %v7547_v41 = vpack.c.bf16 %v7483_v5, %v7483_v5  ;;  %v7663_v18 = vrot.slane %v7636_v21, 7  ;;  %v7667_v34 = vrot.slane %v7640_v43, 5  ;;  %v7671_v58 = vrot.slane %v7644_v44, 3 }
 0x587   : > { %v7848_v30 = vunpack.c.l.b16 %v7545_v24  ;;  %v7873_v31 = vrot.slane %v7846_v61, 2  ;;  %v7646_v17 = vunpack.c.l.b16 %v7539_v10  ;;  %v7669_v22 = vrot.slane %v7642_v12, 4 }
 0x588   : > { %v7648_v9 = vunpack.c.l.b16 %v7547_v41  ;;  %v7664_v28 = vsel %vm14765_vm10, %v7663_v18, %v7634_v15  ;;  %v7352_v61 = vrot.slane %v13550_v16, 4  ;;  %v7472_v29 = vmax.f32 %v12994_v47, %v13550_v16  ;;  %vm14813_vm10 = vmmov %vm14802_vm4 }
 0x589   : > { %v7874_v14 = vsel %vm3618_vm7, %v7873_v31, %v7872_v39  ;;  %v7875_v19 = vrot.slane %v7848_v30, 1  ;;  %v7673_v5 = vrot.slane %v7646_v17, 2  ;;  %v7464_v39 = vmax.f32 %v12992_v35, %v14766_v37 }
 0x58a   : > { %v7675_v24 = vrot.slane %v7648_v9, 1  ;;  %v7666_v52 = vsel %vm3610_vm1, %v7665_v40, %v7664_v28  ;;  %v14767_v54 = vrot.slane %v13446_v23, 7  ;;  %v7853_v41 = vrot.slane %v13516_v63, 5 }
 0x58b   : > { %v7876_v20 = vsel %vm14723_vm0, %v7875_v19, %v7874_v14  ;;  %v7668_v30 = vsel %vm3612_vm3, %v7667_v34, %v7666_v52  ;;  %v7480_v31 = vmax.f32 %v13083_v0, %v7352_v61  ;;  %v7528_v15 = vpack.c.bf16 %v7464_v39, %v7464_v39  ;;  %v9703_v39 = vld [vmem:[%s13898_s5 + $0x1b8] sm:$0xff]   ;;  %vm14804_vm0 = vmmov %vm14774_vm2 }
 0x58c   : > { %v7878_v26 = vpack.c.b16 %v7876_v20, %v7876_v20  ;;  %v7850_v10 = vsel %vm14768_vm12, %v14767_v54, %v13442_v11  ;;  %v14769_v35 = vrot.slane %v13504_v48, 6  ;;  %v7670_v42 = vsel %vm3614_vm5, %v7669_v22, %v7668_v30  ;;  %vm14816_vm12 = vmmov %vm14804_vm0 }
 0x58d   : > { %v7536_v47 = vpack.c.bf16 %v7472_v29, %v7472_v29  ;;  %v7354_v23 = vrot.slane %v13550_v16, 5  ;;  %v7672_v11 = vsel %vm3616_vm6, %v7671_v58, %v7670_v42  ;;  %v7544_v63 = vpack.c.bf16 %v7480_v31, %v7480_v31 }
 0x58e   : > { %8009 = vmatprep.mubr.bf16.mxu1 %v7878_v26  ;;  %v7852_v21 = vsel %vm3610_vm1, %v14769_v35, %v7850_v10  ;;  %v7843_v12 = vunpack.c.l.b16 %v7528_v15  ;;  %v7674_v44 = vsel %vm3618_vm7, %v7673_v5, %v7672_v11  ;;  %v14770_v14 = vrot.slane %v13508_v55, 5 }
 0x58f   : > { %v7854_v43 = vsel %vm3612_vm3, %v7853_v41, %v7852_v21  ;;  %v7845_v48 = vunpack.c.l.b16 %v7536_v47  ;;  %v7474_v17 = vmax.f32 %v13002_v36, %v7346_v53  ;;  %v7676_v9 = vsel %vm14771_vm13, %v7675_v24, %v7674_v44  ;;  %v9707_v44 = vld [vmem:[%s13898_s5 + $0x1b0] sm:$0xff]   ;;  %vm14817_vm13 = vmmov %vm14802_vm4 }
 0x590   : > { %v7856_v0 = vsel %vm3614_vm5, %v7855_v2, %v7854_v43  ;;  %v7466_v19 = vmax.f32 %v13207_v50, %v14770_v14  ;;  %v7847_v18 = vunpack.c.l.b16 %v7544_v63  ;;  %v7857_v40 = vrot.slane %v7843_v12, 3 }
 0x591   : > { %v7482_v34 = vmax.f32 %v13320_v38, %v7354_v23  ;;  %v7678_v6 = vpack.c.b16 %v7676_v9, %v7676_v9  ;;  %v7859_v22 = vrot.slane %v7845_v48, 2  ;;  %v7538_v20 = vpack.c.bf16 %v7474_v17, %v7474_v17  ;;  %v14780_v9 = vld [vmem:[#allocation111_spill] sm:$0xff] }
 0x592   : > { %v7530_v2 = vpack.c.bf16 %v7466_v19, %v7466_v19  ;;  %v7858_v58 = vsel %vm3616_vm6, %v7857_v40, %v7856_v0  ;;  %v7861_v5 = vrot.slane %v7847_v18, 1  ;;  %v14772_v50 = vpack.c.bf16 %v13528_v59, %v13528_v59 }
 0x593   : > { %v7546_v26 = vpack.c.bf16 %v7482_v34, %v7482_v34  ;;  %7809 = vmatprep.mubr.bf16.mxu0 %v7678_v6  ;;  %v7860_v36 = vsel %vm3618_vm7, %v7859_v22, %v7858_v58  ;;  %v7645_v24 = vunpack.c.l.b16 %v7538_v20  ;;  %v14773_v38 = vrot.slane %v13452_v57, 7  ;;  %v9706_v22 = vld [vmem:[%s13898_s5 + $0x170] sm:$0xff]  }
 0x594   : > { %v7641_v28 = vunpack.c.l.b16 %v14772_v50  ;;  %v7643_v53 = vunpack.c.l.b16 %v7530_v2  ;;  %v7862_v37 = vsel %vm14775_vm8, %v7861_v5, %v7860_v36  ;;  %v14776_v59 = vrot.slane %v13502_v3, 6 }
 0x595   : > { %v7650_v61 = vsel %vm14774_vm2, %v14773_v38, %v13444_v7  ;;  %v7647_v52 = vunpack.c.l.b16 %v7546_v26  ;;  %v7653_v54 = vrot.slane %v13514_v45, 5  ;;  %v7877_v10 = vpack.c.b16 %v7862_v37, %v7862_v37  ;;  %v9705_v7 = vld [vmem:[%s13898_s5 + $0x1f0] sm:$0xff]   ;;  %v9711_v26 = vld [vmem:[%s13898_s5 + $0x1a8] sm:$0xff]  }
 0x596   : > { %v7652_v29 = vsel %vm3610_vm1, %v14776_v59, %v7650_v61  ;;  %v7655_v41 = vrot.slane %v7641_v28, 4  ;;  %v7657_v30 = vrot.slane %v7643_v53, 3  ;;  %v7659_v31 = vrot.slane %v7645_v24, 2  ;;  %v9713_v53 = vld [vmem:[%s13898_s5 + $0x1e0] sm:$0xff]  }
 0x597   : > { %v7654_v57 = vsel %vm3612_vm3, %v7653_v54, %v7652_v29  ;;  %v7661_v15 = vrot.slane %v7647_v52, 1  ;;  %v7331_v35 = vrot.slane %v13476_v62, 7  ;;  %v7337_v21 = vrot.slane %v13512_v51, 3  ;;  %8010 = vmatmul.mubr.bf16.vlgmr.msra.gmra.mxu1 %v7877_v10  ;;  %v9710_v10 = vld [vmem:[%s13898_s5 + $0x168] sm:$0xff]  }
 0x598   : > { %v7656_v3 = vsel %vm3614_vm5, %v7655_v41, %v7654_v57  ;;  %v7345_v45 = vrot.slane %v13512_v51, 7  ;;  %v7351_v42 = vrot.slane %v13554_v13, 3  ;;  %v7359_v47 = vrot.slane %v13554_v13, 7  ;;  %9336 = vmatpush3.bf16.msra.mxu1 %v9703_v39  ;;  %v9708_v39 = vld [vmem:[%s13898_s5 + $0x130] sm:$0xff]   ;;  %v9715_v57 = vld [vmem:[%s13898_s5 + $0x1a0] sm:$0xff]  }
 0x599   : > { %v7658_v43 = vsel %vm3616_vm6, %v7657_v30, %v7656_v3  ;;  %v14777_v23 = vrot.slane %v13423_v4, 7  ;;  %v14778_v63 = vrot.slane %v13476_v62, 3  ;;  %v7455_v0 = vmax.f32 %v13203_v46, %v7331_v35  ;;  %9337 = vmatprep.subr.bf16.mxu1 %v9705_v7  ;;  %v9704_v46 = vld [vmem:[%s13898_s5 + $0x138] sm:$0xff]  }
 0x59a   : > { %v7660_v48 = vsel %vm3618_vm7, %v7659_v31, %v7658_v43  ;;  %v7463_v14 = vmax.f32 %v13168_v25, %v7337_v21  ;;  %v7471_v19 = vmax.f32 %v13297_v56, %v7345_v45  ;;  %v7479_v17 = vmax.f32 %v13259_v60, %v7351_v42  ;;  %v9717_v45 = vld [vmem:[%s13898_s5 + $0x1d8] sm:$0xff]   ;;  %v14783_v43 = vld [vmem:[#allocation29_spill] sm:$0xff] }
 0x59b   : > { %v7439_v11 = vmax.f32 %v13130_v27, %v14777_v23  ;;  %v7447_v12 = vmax.f32 %v13081_v1, %v14778_v63  ;;  %v9709_v27 = vld [vmem:[%s13898_s5 + $0x1e8] sm:$0xff]   ;;  %v7662_v1 = vsel %vm14779_vm11, %v7661_v15, %v7660_v48  ;;  %v7487_v18 = vmax.f32 %v14780_v9, %v7359_v47  ;;  %v14785_v63 = vld [vmem:[#allocation87_spill] sm:$0xff]  ;;  %v14791_v9 = vld [vmem:[#allocation25_spill] sm:$0xff] }
 0x59c   : > { %v7495_v25 = vpack.c.bf16 %v13468_v49, %v13468_v49  ;;  %v7677_v56 = vpack.c.b16 %v7662_v1, %v7662_v1  ;;  %v7519_v60 = vpack.c.bf16 %v7455_v0, %v7455_v0  ;;  %v7527_v6 = vpack.c.bf16 %v7463_v14, %v7463_v14  ;;  %9338 = vmatpush3.bf16.msra.mxu1 %v9707_v44  ;;  %v14787_v0 = vld [vmem:[#allocation27_spill] sm:$0xff]  ;;  %v14788_v14 = vld [vmem:[#allocation17_spill] sm:$0xff]  ;;  %v14790_v1 = vld [vmem:[#allocation8_spill] sm:$0xff] }
 0x59d   : > { %v7503_v40 = vpack.c.bf16 %v7439_v11, %v7439_v11  ;;  %v7511_v34 = vpack.c.bf16 %v7447_v12, %v7447_v12  ;;  %v7535_v2 = vpack.c.bf16 %v7471_v19, %v7471_v19  ;;  %v7543_v20 = vpack.c.bf16 %v7479_v17, %v7479_v17  ;;  %9339 = vmatprep.subr.bf16.mxu1 %v9709_v27  ;;  %v14789_v17 = vld [vmem:[#allocation21_spill] sm:$0xff] }
 0x59e   : > { %v7551_v58 = vpack.c.bf16 %v7487_v18, %v7487_v18  ;;  %v8301_v5 = vunpack.c.l.b16 %v7495_v25  ;;  %7810 = vmatmul.mubr.bf16.vlgmr.msra.gmra.mxu0 %v7677_v56  ;;  %v8307_v28 = vunpack.c.l.b16 %v7519_v60  ;;  %v8309_v36 = vunpack.c.l.b16 %v7527_v6  ;;  %v14792_v25 = vld [vmem:[#allocation45_spill] sm:$0xff] }
 0x59f   : > { %v8303_v49 = vunpack.c.l.b16 %v7503_v40  ;;  %v8305_v50 = vunpack.c.l.b16 %v7511_v34  ;;  %9314 = vmatpush3.bf16.msra.mxu0 %v9704_v46  ;;  %v8311_v24 = vunpack.c.l.b16 %v7535_v2  ;;  %v8313_v38 = vunpack.c.l.b16 %v7543_v20  ;;  %v9719_v34 = vld [vmem:[%s13898_s5 + $0x198] sm:$0xff]   ;;  %v9721_v20 = vld [vmem:[%s13898_s5 + $0x1d0] sm:$0xff]  }
 0x5a0   : > { %v8315_v61 = vunpack.c.l.b16 %v7551_v58  ;;  %v7329_v37 = vrot.slane %v13476_v62, 6  ;;  %v8334_v29 = vrot.slane %v8307_v28, 5  ;;  %v8336_v54 = vrot.slane %v8309_v36, 4  ;;  %9315 = vmatprep.subr.bf16.mxu0 %v9706_v22  ;;  %9340 = vmatpush3.bf16.msra.mxu1 %v9711_v26 }
 0x5a1   : > { %v8330_v52 = vrot.slane %v8303_v49, 7  ;;  %v8332_v59 = vrot.slane %v8305_v50, 6  ;;  %v8338_v41 = vrot.slane %v8311_v24, 3  ;;  %v8340_v30 = vrot.slane %v8313_v38, 2  ;;  %9341 = vmatprep.subr.bf16.mxu1 %v9713_v53  ;;  %v9716_v50 = vld [vmem:[%s13898_s5 + $0x120] sm:$0xff]   ;;  %v9718_v38 = vld [vmem:[%s13898_s5 + $0x158] sm:$0xff]  }
 0x5a2   : > { %v8342_v31 = vrot.slane %v8315_v61, 1  ;;  %v7335_v7 = vrot.slane %v13512_v51, 2  ;;  %v7343_v35 = vrot.slane %v13512_v51, 6  ;;  %v7349_v21 = vrot.slane %v13554_v13, 2 }
 0x5a3   : > { %v8331_v15 = vsel %vm14781_vm14, %v8330_v52, %v8301_v5  ;;  %v7357_v3 = vrot.slane %v13554_v13, 6  ;;  %v14782_v47 = vrot.slane %v13423_v4, 2  ;;  %v14784_v11 = vrot.slane %v13423_v4, 6  ;;  %9316 = vmatpush3.bf16.msra.mxu0 %v9708_v39  ;;  %v9712_v13 = vld [vmem:[%s13898_s5 + $0x128] sm:$0xff]   ;;  %v9714_v4 = vld [vmem:[%s13898_s5 + $0x160] sm:$0xff]  }
 0x5a4   : > { %v8333_v42 = vsel %vm3610_vm1, %v8332_v59, %v8331_v15  ;;  %v14786_v51 = vrot.slane %v13476_v62, 2  ;;  %v7453_v19 = vmax.f32 %v14788_v14, %v7329_v37  ;;  %v7461_v27 = vmax.f32 %v14789_v17, %v7335_v7  ;;  %9317 = vmatprep.subr.bf16.mxu0 %v9710_v10  ;;  %9342 = vmatpush3.bf16.msra.mxu1 %v9715_v57  ;;  %v9723_v59 = vld [vmem:[%s13898_s5 + $0x190] sm:$0xff]   ;;  %v9720_v15 = vld [vmem:[%s13898_s5 + $0x118] sm:$0xff]  }
 0x5a5   : > { %v7429_v23 = vmax.f32 %v14783_v43, %v14782_v47  ;;  %v7437_v12 = vmax.f32 %v14785_v63, %v14784_v11  ;;  %v8335_v48 = vsel %vm3612_vm3, %v8334_v29, %v8333_v42  ;;  %v7469_v46 = vmax.f32 %v14790_v1, %v7343_v35  ;;  %9343 = vmatprep.subr.bf16.mxu1 %v9717_v45  ;;  %v9722_v47 = vld [vmem:[%s13898_s5 + $0x150] sm:$0xff]   ;;  %v14799_v17 = vld [vmem:[#allocation52_spill] sm:$0xff] }
 0x5a6   : > { %v7445_v44 = vmax.f32 %v14787_v0, %v14786_v51  ;;  %v8337_v62 = vsel %vm3614_vm5, %v8336_v54, %v8335_v48  ;;  %v7477_v18 = vmax.f32 %v14791_v9, %v7349_v21  ;;  %v7485_v40 = vmax.f32 %v14792_v25, %v7357_v3  ;;  %v14796_v51 = vld [vmem:[#allocation99_spill] sm:$0xff] }
 0x5a7   : > { %v7493_v56 = vpack.c.bf16 %v7429_v23, %v7429_v23  ;;  %v8339_v60 = vsel %vm3616_vm6, %v8338_v41, %v8337_v62  ;;  %v7501_v6 = vpack.c.bf16 %v7437_v12, %v7437_v12  ;;  %v7517_v2 = vpack.c.bf16 %v7453_v19, %v7453_v19  ;;  %9318 = vmatpush3.bf16.msra.mxu0 %v9712_v13  ;;  %v9727_v23 = vld [vmem:[%s13898_s5 + $0x188] sm:$0xff]   ;;  %v9729_v13 = vld [vmem:[%s13898_s5 + $0x1c0] sm:$0xff]   ;;  %v14798_v14 = vld [vmem:[#allocation23_spill] sm:$0xff] }
 0x5a8   : > { %v7509_v22 = vpack.c.bf16 %v7445_v44, %v7445_v44  ;;  %v8341_v58 = vsel %vm3618_vm7, %v8340_v30, %v8339_v60  ;;  %v7525_v5 = vpack.c.bf16 %v7461_v27, %v7461_v27  ;;  %v7533_v26 = vpack.c.bf16 %v7469_v46, %v7469_v46  ;;  %9319 = vmatprep.subr.bf16.mxu0 %v9714_v4  ;;  %v9725_v30 = vld [vmem:[%s13898_s5 + $0x1c8] sm:$0xff]   ;;  %v9724_v4 = vld [vmem:[%s13898_s5 + $0x110] sm:$0xff]  }
 0x5a9   : > { %v7541_v49 = vpack.c.bf16 %v7477_v18, %v7477_v18  ;;  %v8343_v28 = vsel %vm14793_vm15, %v8342_v31, %v8341_v58  ;;  %v7549_v36 = vpack.c.bf16 %v7485_v40, %v7485_v40  ;;  %v8067_v53 = vunpack.c.l.b16 %v7493_v56  ;;  %9344 = vmatpush3.bf16.msra.mxu1 %v9719_v34  ;;  %v14800_v62 = vld [vmem:[#allocation83_spill] sm:$0xff]  ;;  %v9726_v34 = vld [vmem:[%s13898_s5 + $0x148] sm:$0xff]  }
 0x5aa   : > { %v8069_v24 = vunpack.c.l.b16 %v7501_v6  ;;  %v8345_v61 = vpack.c.b16 %v8343_v28, %v8343_v28  ;;  %v8071_v37 = vunpack.c.l.b16 %v7509_v22  ;;  %v8073_v39 = vunpack.c.l.b16 %v7517_v2  ;;  %9345 = vmatprep.subr.bf16.mxu1 %v9721_v20  ;;  %v14801_v18 = vld [vmem:[#allocation39_spill] sm:$0xff]  ;;  %v9731_v2 = vld [vmem:[%s13898_s5 + $0x180] sm:$0xff]  }
 0x5ab   : > { %v8075_v52 = vunpack.c.l.b16 %v7525_v5  ;;  %v8077_v29 = vunpack.c.l.b16 %v7533_v26  ;;  %v8079_v54 = vunpack.c.l.b16 %v7541_v49  ;;  %v8081_v10 = vunpack.c.l.b16 %v7549_v36  ;;  %9320 = vmatpush3.bf16.msra.mxu0 %v9716_v50 }
 0x5ac   : > { %v8096_v41 = vrot.slane %v8069_v24, 7  ;;  %8476 = vmatprep.mubr.bf16.mxu1 %v8345_v61  ;;  %v8098_v31 = vrot.slane %v8071_v37, 6  ;;  %v8100_v7 = vrot.slane %v8073_v39, 5  ;;  %v7344_v35 = vrot.slane %v13508_v55, 7  ;;  %9321 = vmatprep.subr.bf16.mxu0 %v9718_v38  ;;  %v9730_v37 = vld [vmem:[%s13898_s5 + $0x140] sm:$0xff]  }
 0x5ad   : > { %v8102_v57 = vrot.slane %v8075_v52, 4  ;;  %v8104_v3 = vrot.slane %v8077_v29, 3  ;;  %v8106_v45 = vrot.slane %v8079_v54, 2  ;;  %v8108_v42 = vrot.slane %v8081_v10, 1  ;;  %9346 = vmatpush3.bf16.msra.mxu1 %v9723_v59  ;;  %v14803_v39 = vld [vmem:[#allocation41_spill] sm:$0xff] }
 0x5ae   : > { %v8097_v21 = vsel %vm14794_vm9, %v8096_v41, %v8067_v53  ;;  %v7350_v11 = vrot.slane %v13550_v16, 3  ;;  %v7358_v63 = vrot.slane %v13550_v16, 7  ;;  %v14795_v12 = vrot.slane %v13472_v8, 7  ;;  %9347 = vmatprep.subr.bf16.mxu1 %v9725_v30  ;;  %v9728_v53 = vld [vmem:[%s13898_s5 + $0x108] sm:$0xff]  }
 0x5af   : > { %v8099_v43 = vsel %vm3610_vm1, %v8098_v31, %v8097_v21  ;;  %v14797_v48 = vrot.slane %v13508_v55, 3  ;;  %v7470_v27 = vmax.f32 %v14799_v17, %v7344_v35  ;;  %v7510_v1 = vpack.c.bf16 %v13495_v33, %v13495_v33  ;;  %9322 = vmatpush3.bf16.msra.mxu0 %v9720_v15  ;;  %v14806_v35 = vld [vmem:[#allocation93_spill] sm:$0xff] }
 0x5b0   : > { %v7454_v0 = vmax.f32 %v14796_v51, %v14795_v12  ;;  %v8101_v44 = vsel %vm3612_vm3, %v8100_v7, %v8099_v43  ;;  %v7478_v9 = vmax.f32 %v14800_v62, %v7350_v11  ;;  %v7486_v25 = vmax.f32 %v14801_v18, %v7358_v63  ;;  %9323 = vmatprep.subr.bf16.mxu0 %v9722_v47  ;;  %v14808_v47 = vld [vmem:[#allocation19_spill] sm:$0xff]  ;;  %v14811_v12 = vld [vmem:[#allocation82_spill] sm:$0xff] }
 0x5b1   : > { %v7462_v19 = vmax.f32 %v14798_v14, %v14797_v48  ;;  %v8103_v46 = vsel %vm3614_vm5, %v8102_v57, %v8101_v44  ;;  %v7534_v60 = vpack.c.bf16 %v7470_v27, %v7470_v27  ;;  %v8304_v6 = vunpack.c.l.b16 %v7510_v1  ;;  %9348 = vmatpush3.bf16.msra.mxu1 %v9727_v23  ;;  %v14809_v23 = vld [vmem:[#allocation7_spill] sm:$0xff]  ;;  %v14814_v18 = vld [vmem:[#allocation42_spill] sm:$0xff] }
 0x5b2   : > { %v7518_v40 = vpack.c.bf16 %v7454_v0, %v7454_v0  ;;  %v8105_v56 = vsel %vm3616_vm6, %v8104_v3, %v8103_v46  ;;  %v7542_v20 = vpack.c.bf16 %v7478_v9, %v7478_v9  ;;  %v7550_v58 = vpack.c.bf16 %v7486_v25, %v7486_v25  ;;  %9349 = vmatprep.subr.bf16.mxu1 %v9729_v13  ;;  %v9732_v3 = vld [vmem:[%s13898_s5 + $0x100] sm:$0xff]   ;;  %v14810_v63 = vld [vmem:[#allocation43_spill] sm:$0xff]  ;;  %v14812_v0 = vld [vmem:[#allocation54_spill] sm:$0xff] }
 0x5b3   : > { %v7526_v33 = vpack.c.bf16 %v7462_v19, %v7462_v19  ;;  %v8107_v22 = vsel %vm3618_vm7, %v8106_v45, %v8105_v56  ;;  %v8310_v50 = vunpack.c.l.b16 %v7534_v60  ;;  %v8316_v28 = vrot.slane %v13456_v32, 7  ;;  %9324 = vmatpush3.bf16.msra.mxu0 %v9724_v4  ;;  %v14815_v60 = vld [vmem:[#allocation37_spill] sm:$0xff] }
 0x5b4   : > { %v8306_v5 = vunpack.c.l.b16 %v7518_v40  ;;  %v8109_v26 = vsel %vm14802_vm4, %v8108_v42, %v8107_v22  ;;  %v8312_v24 = vunpack.c.l.b16 %v7542_v20  ;;  %v8314_v38 = vunpack.c.l.b16 %v7550_v58  ;;  %9325 = vmatprep.subr.bf16.mxu0 %v9726_v34 }
 0x5b5   : > { %v8308_v49 = vunpack.c.l.b16 %v7526_v33  ;;  %v8111_v36 = vpack.c.b16 %v8109_v26, %v8109_v26  ;;  %v8318_v61 = vrot.slane %v8304_v6, 6  ;;  %v8317_v52 = vsel %vm14804_vm0, %v8316_v28, %v14803_v39  ;;  %9350 = vmatpush3.bf16.msra.mxu1 %v9731_v2  ;;  %v9736_v39 = vld [vmem:[%s13900_s7 + $0x20] sm:$0xff]  }
 0x5b6   : > { %v8320_v59 = vrot.slane %v8306_v5, 5  ;;  %v8324_v32 = vrot.slane %v8310_v50, 3  ;;  %v8326_v10 = vrot.slane %v8312_v24, 2  ;;  %v8328_v41 = vrot.slane %v8314_v38, 1  ;;  %v9733_v24 = vld [vmem:[%s13900_s7 + $0x38] sm:$0xff]  }
 0x5b7   : > { %v8322_v29 = vrot.slane %v8308_v49, 4  ;;  %8242 = vmatprep.mubr.bf16.mxu0 %v8111_v36  ;;  %v8319_v54 = vsel %vm3610_vm1, %v8318_v61, %v8317_v52  ;;  %v7342_v30 = vrot.slane %v13508_v55, 6  ;;  %v7348_v7 = vrot.slane %v13550_v16, 2  ;;  %9326 = vmatpush3.bf16.msra.mxu0 %v9728_v53  ;;  %v9734_v61 = vld [vmem:[%s13900_s7 + $0x30] sm:$0xff]   ;;  %v9737_v52 = vld [vmem:[%s13900_s7 + $0x18] sm:$0xff]  }
 0x5b8   : > { %v8321_v31 = vsel %vm3612_vm3, %v8320_v59, %v8319_v54  ;;  %v7356_v57 = vrot.slane %v13550_v16, 6  ;;  %v14805_v15 = vrot.slane %v13472_v8, 6  ;;  %v14807_v42 = vrot.slane %v13508_v55, 2  ;;  %9327 = vmatprep.subr.bf16.mxu0 %v9730_v37  ;;  %v9735_v37 = vld [vmem:[%s13900_s7 + $0x28] sm:$0xff]   ;;  %v9738_v59 = vld [vmem:[%s13900_s7 + $0x10] sm:$0xff]  }
 0x5b9   : > { %v8323_v45 = vsel %vm3614_vm5, %v8322_v29, %v8321_v31  ;;  %v7468_v11 = vmax.f32 %v14809_v23, %v7342_v30  ;;  %v7508_v16 = vpack.c.bf16 %v14810_v63, %v14810_v63  ;;  %v7476_v51 = vmax.f32 %v14811_v12, %v7348_v7  ;;  %v9739_v29 = vld [vmem:[%s13900_s7 + $0x8] sm:$0xff]  }
 0x5ba   : > { %v7452_v21 = vmax.f32 %v14806_v35, %v14805_v15  ;;  %v7460_v43 = vmax.f32 %v14808_v47, %v14807_v42  ;;  %v8325_v8 = vsel %vm3616_vm6, %v8324_v32, %v8323_v45  ;;  %v7484_v44 = vmax.f32 %v14812_v0, %v7356_v57  ;;  %v9740_v32 = vld [vmem:[%s13900_s7] sm:$0xff]  }
 0x5bb   : > { %v8327_v48 = vsel %vm3618_vm7, %v8326_v10, %v8325_v8  ;;  %v7532_v19 = vpack.c.bf16 %v7468_v11, %v7468_v11  ;;  %v8070_v55 = vunpack.c.l.b16 %v7508_v16  ;;  %v7540_v27 = vpack.c.bf16 %v7476_v51, %v7476_v51  ;;  %9328 = vmatpush3.bf16.msra.mxu0 %v9732_v3  ;;  %v9190_v51 = vld [vmem:[%s13899_s6] ss:$0 sm:$0xff] }
 0x5bc   : > { %v7516_v13 = vpack.c.bf16 %v7452_v21, %v7452_v21  ;;  %v7524_v14 = vpack.c.bf16 %v7460_v43, %v7460_v43  ;;  %v8329_v17 = vsel %vm14813_vm10, %v8328_v41, %v8327_v48  ;;  %v7548_v1 = vpack.c.bf16 %v7484_v44, %v7484_v44 }
 0x5bd   : > { %v8344_v4 = vpack.c.b16 %v8329_v17, %v8329_v17  ;;  %v8076_v9 = vunpack.c.l.b16 %v7532_v19  ;;  %v8082_v25 = vrot.slane %v14814_v18, 7  ;;  %v8078_v40 = vunpack.c.l.b16 %v7540_v27  ;;  %v9191_v19 = vld [vmem:[%s13901_s8] ss:$0 sm:$0xff] }
 0x5be   : > { %v8072_v46 = vunpack.c.l.b16 %v7516_v13  ;;  %v8074_v62 = vunpack.c.l.b16 %v7524_v14  ;;  %v8080_v56 = vunpack.c.l.b16 %v7548_v1  ;;  %v8084_v34 = vrot.slane %v8070_v55, 6 }
 0x5bf   : > { %8477 = vmatmul.mubr.bf16.vlgmr.msra.gmra.mxu1 %v8344_v4  ;;  %v8083_v6 = vsel %vm14816_vm12, %v8082_v25, %v14815_v60  ;;  %v8090_v2 = vrot.slane %v8076_v9, 3  ;;  %v8092_v58 = vrot.slane %v8078_v40, 2  ;;  %v9807_v38 = vmov 0.0  }
 0x5c0   : > { %v8086_v33 = vrot.slane %v8072_v46, 5  ;;  %v8088_v22 = vrot.slane %v8074_v62, 4  ;;  %v8085_v20 = vsel %vm3610_vm1, %v8084_v34, %v8083_v6  ;;  %v8094_v26 = vrot.slane %v8080_v56, 1  ;;  %9366 = vmatprep.subr.bf16.mxu0 %v9807_v38 }
 0x5c1   : > { %vm9808_vm1 = vmmov 0  }
 0x5c2   : > { %v8087_v5 = vsel %vm3612_vm3, %v8086_v33, %v8085_v20 }
 0x5c3   : > { %v8089_v49 = vsel %vm3614_vm5, %v8088_v22, %v8087_v5 }
 0x5c4   : > { %v8091_v50 = vsel %vm3616_vm6, %v8090_v2, %v8089_v49 }
 0x5c5   : > { %v8093_v28 = vsel %vm3618_vm7, %v8092_v58, %v8091_v50 }
 0x5c6   : > { %v8095_v36 = vsel %vm14817_vm13, %v8094_v26, %v8093_v28 }
 0x5c7   : > { %v8110_v53 = vpack.c.b16 %v8095_v36, %v8095_v36 }
 0x5c9   : > { %8243 = vmatmul.mubr.bf16.vlgmr.msra.gmra.mxu0 %v8110_v53 }
 0x5ca   : > { %9367 = vmatpush3.bf16.msra.mxu0 %v9733_v24  ;;  %9382 = vmatprep.mubr.msk.bf16.mxu0 %vm9808_vm1, %v9807_v38 }
 0x5cb   : > { %9368 = vmatprep.subr.bf16.mxu0 %v9807_v38 }
 0x5ce   : > { %9369 = vmatpush3.bf16.msra.mxu0 %v9734_v61 }
 0x5cf   : > { %9370 = vmatprep.subr.bf16.mxu0 %v9807_v38 }
 0x5d2   : > { %9371 = vmatpush3.bf16.msra.mxu0 %v9735_v37 }
 0x5d3   : > { %9372 = vmatprep.subr.bf16.mxu0 %v9807_v38 }
 0x5d6   : > { %9373 = vmatpush3.bf16.msra.mxu0 %v9736_v39 }
 0x5d7   : > { %9374 = vmatprep.subr.bf16.mxu0 %v9807_v38 }
 0x5da   : > { %9375 = vmatpush3.bf16.msra.mxu0 %v9737_v52 }
 0x5db   : > { %9376 = vmatprep.subr.bf16.mxu0 %v9807_v38 }
 0x5de   : > { %9377 = vmatpush3.bf16.msra.mxu0 %v9738_v59 }
 0x5df   : > { %9378 = vmatprep.subr.bf16.mxu0 %v9807_v38 }
 0x5e2   : > { %9379 = vmatpush3.bf16.msra.mxu0 %v9739_v29 }
 0x5e3   : > { %9380 = vmatprep.subr.bf16.mxu0 %v9807_v38 }
 0x5e6   : > { %9381 = vmatpush3.bf16.msra.mxu0 %v9740_v32 }
 0x657   : > { %v9307_v54 = vpop.f32.mrf.mxu1 }
 0x659   : > { %v9308_v10 = vpop.f32.mrf.mxu1 }
 0x65a   : > { %v9309_v42 = vadd.f32 %v9308_v10, %v9307_v54 }
 0x65b   : > { %v9310_v41 = vpop.f32.mrf.mxu1 }
 0x65d   : > { %v9311_v31 = vpop.f32.mrf.mxu1 }
 0x65e   : > { %v9285_v30 = vpop.f32.mrf.mxu0 }
 0x660   : > { %v9286_v7 = vpop.f32.mrf.mxu0 }
 0x661   : > { %v9287_v47 = vadd.f32 %v9286_v7, %v9285_v30 }
 0x662   : > { %v9288_v57 = vpop.f32.mrf.mxu0 }
 0x663   : > { %v8012_v11 = vadd.f32 %v9309_v42, %v9287_v47 }
 0x664   : > { %v9289_v15 = vpop.f32.mrf.mxu0 }
 0x67f   : > { %v9351_v35 = vpop.f32.mrf.mxu1 }
 0x681   : > { %v9352_v21 = vpop.f32.mrf.mxu1 }
 0x682   : > { %v9353_v8 = vadd.f32 %v9352_v21, %v9351_v35 }
 0x683   : > { %v9354_v3 = vpop.f32.mrf.mxu1 }
 0x685   : > { %v9355_v45 = vpop.f32.mrf.mxu1 }
 0x689   : > { %v9329_v43 = vpop.f32.mrf.mxu0 }
 0x68b   : > { %v9330_v23 = vpop.f32.mrf.mxu0 }
 0x68c   : > { %v9331_v63 = vadd.f32 %v9330_v23, %v9329_v43 }
 0x68d   : > { %v9332_v16 = vpop.f32.mrf.mxu0 }
 0x68e   : > { %v8250_v12 = vadd.f32 %v9331_v63, %v8012_v11 }
 0x68f   : > { %v9333_v0 = vpop.f32.mrf.mxu0 }
 0x690   : > { %v8484_v44 = vadd.f32 %v9353_v8, %v8250_v12 }
 0x692   : > { %v8492_v13 = vadd.f32 %v9190_v51, %v8484_v44 }
 0x694   : > { %v8493_v48 = vmax.f32 %v8492_v13, 0.0 }
 0x696   : > { %v8494_v14 = vpack.c.bf16 %v8493_v48, %v8493_v48 }
 0x698   : > { %9383 = vmatmul.mubr.bf16.vlgmr.msra.gmra.mxu0 %v8494_v14 }
 0x758   : > { %v8600_v55 = vpop.f32.mrf.mxu0 }
 0x759   : > { %v8601_v17 = vadd.f32 %v9191_v19, %v8600_v55 }
 0x75a   : > { %v9384_v27 = vpop.f32.mrf.mxu0 }
 0x75b   : > { %8606 = vst [vmem:[%s328_s21] sm:$0xff] %v8601_v17 }
 0x75c   : > { %v8603_v1 = vpop.f32.mrf.mxu0 }
 0x75d   : > { %9754 = shalt.err (!%p9751_p3)
}
 0x75e   : > { %s9755_s23 = scalar_lea.hbm %s13852_s25, 128  ;;  %s9759_s21 = scalar_lea.hbm %s13902_s9, 256 }
 0x75f   : > { %p9756_p4 = scmp.ne.s32.totalorder %s13852_s25, %s9755_s23  ;;  %p9760_p9 = scmp.lt.s32.totalorder %s13852_s25, %s13902_s9 }
 0x760   : > { %p9761_p10 = scmp.lt.s32.totalorder %s9759_s21, %s9755_s23 }
 0x761   : > { %p9757_p7 = pnand %p9756_p4, %p9898_p5 }
 0x762   : > { %p9762_p11 = por %p9761_p10, %p9760_p9 }
 0x763   : > { %p9758_p8 = pneg %p9757_p7 }
 0x765   : > { %p9763_p12 = pnand %p9762_p11, %p9758_p8 }
 0x767   : > { %9766 = shalt.err (!%p9763_p12)
}
 0x768   : > { %9392 = dma.vmem_to_hbm [thread:$0]  (%p9898_p5), %s13854_s16, 128, %s13852_s25, %s8608_s26   ;;  %v9385_v46 = vpop.f32.mrf.mxu0 }
 0x769 PF: > { %p9398_p13 = scmp.ge.s32.totalorder %s9801_s12, 2  ;;  %s8633_s27 = sand.u32 1, %s9789_s30  }
 0x76a   : > { %s8634_s13 = scalar_lea.sflag [#allocation5], %s8633_s27 }
 0x76b   : > { %p9395_p0 = pnand %p9398_p13, %p9902_p6 }
 0x76d   : > { %p9396_p1 = pneg %p9395_p0 }
 0x76f   : > { %9784 = dma.done.wait (%p9396_p1), %s8634_s13, 128  }
 0x770   : > { %9786 = vsyncadd (%p9396_p1), %s8634_s13, 4294967168  ;;  %p19_p2 = scmp.ge.s32.totalorder %s9885_s15, 4   ;;  %s14818_s30 = smov %s9793_s10 }
 0x771   : > { %s14819_s10 = smov %s9797_s11  ;;  %s14820_s11 = smov %s9896_s18 }
 0x772   : > { %s14821_s12 = smov %s9885_s15  ;;  %21 = sbr.rel (!%p19_p2) target bundleno = 3 (0x3), region = 98 }
 0x777   :  { %8639 = vsyncpa [#allocation5], 1 }
 0x778   :  { %8641 = vsyncpa [#allocation5 + $0x1], 1 }

</bundles_post_ra>
